<compile_context>
chip_gen: v6e
topology: v6e:2x2x1
jax: 0.10.0
libtpu: 0.0.40
codegen_flags: <defaults>
</compile_context>

<pallas_src>
import jax
import jax.numpy as jnp
from jax.experimental import pallas as pl
from jax.experimental.pallas import tpu as pltpu

INPUT_SIZE = 1000
PADDED_INPUT = 1024          # layer-0 contraction dim padded to 128 multiple
HIDDEN = 128
NUM_LAYERS = 4
NUM_CLASSES = 11
HEAD_PAD = 128               # classifier padded to a full lane width
SEQ_LEN = 8


def _vmem():
    return pl.BlockSpec(memory_space=pltpu.MemorySpace.VMEM)


# ------------------------------ fused kernel ---------------------------------
def fused_lstm_kernel(x_ref,
                      wih0, whh0, b0,
                      w1, b1, w2, b2, w3, b3,
                      wout_ref, bout_ref,
                      out_ref,
                      xpad_ref, gx_ref):
    """Gate column order is [i, f, o, g] (permuted offline from torch [i,f,g,o]).

    x_ref:    (T, 1000) f32
    wih0:     (1024, 512) bf16   whh0: (128, 512) bf16   b0: (1, 512) f32
    w1..w3:   (256, 512) bf16  (= concat[W_ih^T, W_hh^T])  b1..b3: (1, 512) f32
    wout_ref: (128, 128) f32 (cols >= 11 are zero)
    bout_ref: (1, 128) f32 (-1e30 in pad lanes)
    out_ref:  (1, 128) f32 softmax (pad lanes are exactly 0)
    xpad_ref: (T, 1024) f32 scratch      gx_ref: (T, 512) f32 scratch
    """
    T = x_ref.shape[0]
    H = HIDDEN

    # ---- fold x pad (1000 -> 1024) + bf16 cast into the kernel --------------
    xpad_ref[...] = jnp.zeros_like(xpad_ref)
    xpad_ref[:, pl.ds(0, INPUT_SIZE)] = x_ref[...]

    # ---- hoisted layer-0 input projection (off the serial chain) ------------
    gx_ref[...] = (jnp.dot(xpad_ref[...].astype(jnp.bfloat16), wih0[...],
                           preferred_element_type=jnp.float32) + b0[...])

    w_comb = (None, w1, w2, w3)
    b_comb = (None, b1, b2, b3)

    zero_f32 = jnp.zeros((1, H), jnp.float32)
    zero_bf = jnp.zeros((1, H), jnp.bfloat16)
    h = [zero_f32] * NUM_LAYERS       # h_{t-1} per layer (f32)
    c = [zero_f32] * NUM_LAYERS       # c_{t-1} per layer (f32)
    h_bf = [zero_bf] * NUM_LAYERS     # bf16 shadow copies feeding the matmuls

    def lstm_cell(gates, c_prev):
        sig = jax.nn.sigmoid(gates[:, :3 * H])          # i, f, o in one shot
        i_g = sig[:, 0 * H:1 * H]
        f_g = sig[:, 1 * H:2 * H]
        o_g = sig[:, 2 * H:3 * H]
        g_g = jnp.tanh(gates[:, 3 * H:4 * H])
        c_new = f_g * c_prev + i_g * g_g
        h_new = o_g * jnp.tanh(c_new)
        return h_new, c_new

    # ---- diagonal wavefront: steps with layer + t = u are independent --------
    for u in range(T + NUM_LAYERS - 1):
        new_h, new_c, new_h_bf = list(h), list(c), list(h_bf)
        for layer in range(NUM_LAYERS):
            t = u - layer
            if t < 0 or t >= T:
                continue
            if layer == 0:
                gates = gx_ref[pl.ds(t, 1), :] + jnp.dot(
                    h_bf[0], whh0[...], preferred_element_type=jnp.float32)
            else:
                # single fused dot: [x_t (= h of layer-1 at t), h_{t-1}]
                z = jnp.concatenate([h_bf[layer - 1], h_bf[layer]], axis=1)
                gates = (jnp.dot(z, w_comb[layer][...],
                                 preferred_element_type=jnp.float32)
                         + b_comb[layer][...])
            h_new, c_new = lstm_cell(gates, c[layer])
            new_h[layer] = h_new
            new_c[layer] = c_new
            new_h_bf[layer] = h_new.astype(jnp.bfloat16)
        h, c, h_bf = new_h, new_c, new_h_bf
    # TODO(synk): nn.LSTM dropout=0.5 between layers is train-mode only; eval
    # semantics (no dropout) are implemented here.

    # ---- Linear(128 -> 11, lane-padded to 128) + Softmax(dim=1) --------------
    logits = jnp.dot(h[NUM_LAYERS - 1], wout_ref[...],
                     preferred_element_type=jnp.float32) + bout_ref[...]
    m = jnp.max(logits, axis=1, keepdims=True)
    e = jnp.exp(logits - m)               # pad lanes underflow to exactly 0
    out_ref[...] = e / jnp.sum(e, axis=1, keepdims=True)


# --------------------------------- Parameters --------------------------------
def _reorder_gates(w_t):
    """Permute last-axis gate groups from PyTorch [i, f, g, o] to [i, f, o, g]."""
    H = HIDDEN
    return jnp.concatenate(
        [w_t[..., 0:2 * H], w_t[..., 3 * H:4 * H], w_t[..., 2 * H:3 * H]],
        axis=-1)


def init_params(key):
    k = 1.0 / jnp.sqrt(jnp.float32(HIDDEN))
    layers = []
    for layer in range(NUM_LAYERS):
        d_in = INPUT_SIZE if layer == 0 else HIDDEN
        key, k1, k2, k3, k4 = jax.random.split(key, 5)
        w_ih = jax.random.uniform(k1, (4 * HIDDEN, d_in), jnp.float32, -k, k)
        w_hh = jax.random.uniform(k2, (4 * HIDDEN, HIDDEN), jnp.float32, -k, k)
        b_ih = jax.random.uniform(k3, (4 * HIDDEN,), jnp.float32, -k, k)
        b_hh = jax.random.uniform(k4, (4 * HIDDEN,), jnp.float32, -k, k)

        w_ih_t = _reorder_gates(w_ih.T)                       # (d_in, 4H)
        w_hh_t = _reorder_gates(w_hh.T)                       # (H, 4H)
        b = _reorder_gates((b_ih + b_hh).reshape(1, 4 * HIDDEN))
        if layer == 0:
            w_ih_t = jnp.pad(w_ih_t, ((0, PADDED_INPUT - INPUT_SIZE), (0, 0)))
            layers.append({"w_ih": w_ih_t.astype(jnp.bfloat16),
                           "w_hh": w_hh_t.astype(jnp.bfloat16),
                           "b": b})
        else:
            w_cat = jnp.concatenate([w_ih_t, w_hh_t], axis=0)  # (2H, 4H)
            layers.append({"w": w_cat.astype(jnp.bfloat16), "b": b})

    key, k1, k2 = jax.random.split(key, 3)
    w_out = jax.random.uniform(k1, (NUM_CLASSES, HIDDEN), jnp.float32, -k, k)
    b_out = jax.random.uniform(k2, (NUM_CLASSES,), jnp.float32, -k, k)
    w_out_pad = jnp.zeros((HIDDEN, HEAD_PAD), jnp.float32)
    w_out_pad = w_out_pad.at[:, :NUM_CLASSES].set(w_out.T)
    b_out_pad = jnp.full((1, HEAD_PAD), -1e30, jnp.float32)
    b_out_pad = b_out_pad.at[0, :NUM_CLASSES].set(b_out)
    return {"layers": layers, "w_out": w_out_pad, "b_out": b_out_pad}


# ---------------------------------- Forward ----------------------------------
def rnn_forward(x, params):
    # PyTorch: x.view(1, -1, 1000) forces batch=1; the batch axis is squeezed.
    T = x.size // INPUT_SIZE
    x2d = x.reshape(T, INPUT_SIZE).astype(jnp.float32)
    l0, l1, l2, l3 = params["layers"]

    probs_pad = pl.pallas_call(
        fused_lstm_kernel,
        out_shape=jax.ShapeDtypeStruct((1, HEAD_PAD), jnp.float32),
        in_specs=[_vmem()] * 12,
        out_specs=_vmem(),
        scratch_shapes=[pltpu.VMEM((T, PADDED_INPUT), jnp.float32),
                        pltpu.VMEM((T, 4 * HIDDEN), jnp.float32)],
    )(x2d,
      l0["w_ih"], l0["w_hh"], l0["b"],
      l1["w"], l1["b"], l2["w"], l2["b"], l3["w"], l3["b"],
      params["w_out"], params["b_out"])
    return probs_pad[:, :NUM_CLASSES]


if __name__ == "__main__":
    key = jax.random.PRNGKey(0)
    key, pkey, xkey = jax.random.split(key, 3)
    params = init_params(pkey)
    x = jax.random.normal(xkey, (SEQ_LEN, INPUT_SIZE), jnp.float32)

    fwd = jax.jit(rnn_forward)
    out = jax.block_until_ready(fwd(x, params))

    assert out.shape == (1, NUM_CLASSES)
    assert bool(jnp.isfinite(out).all())
    # Softmax rows sum to 1 (pad lanes contribute exactly 0).
    assert bool(jnp.allclose(jnp.sum(out, axis=1), 1.0, atol=1e-5))
    print("KERNEL_OK")
</pallas_src>

<mosaic_0001>
module attributes {stable_mosaic.version = 11 : i64} {
  func.func @fused_lstm_kernel(%arg0: memref<8x1000xf32, #tpu.memory_space<vmem>>, %arg1: memref<1024x512xbf16, #tpu.memory_space<vmem>>, %arg2: memref<128x512xbf16, #tpu.memory_space<vmem>>, %arg3: memref<1x512xf32, #tpu.memory_space<vmem>>, %arg4: memref<256x512xbf16, #tpu.memory_space<vmem>>, %arg5: memref<1x512xf32, #tpu.memory_space<vmem>>, %arg6: memref<256x512xbf16, #tpu.memory_space<vmem>>, %arg7: memref<1x512xf32, #tpu.memory_space<vmem>>, %arg8: memref<256x512xbf16, #tpu.memory_space<vmem>>, %arg9: memref<1x512xf32, #tpu.memory_space<vmem>>, %arg10: memref<128x128xf32, #tpu.memory_space<vmem>>, %arg11: memref<1x128xf32, #tpu.memory_space<vmem>>, %arg12: memref<1x128xf32, #tpu.memory_space<vmem>>, %arg13: memref<8x1024xf32, #tpu.memory_space<vmem>>, %arg14: memref<8x512xf32, #tpu.memory_space<vmem>>) attributes {dimension_semantics = [], scalar_prefetch = 0 : i64, scratch_operands = 2 : i64, tpu.core_type = #tpu.core_type<tc>} {
    %cst = arith.constant 0.000000e+00 : f32
    %0 = vector.broadcast %cst : f32 to vector<8x1024xf32>
    %c0 = arith.constant 0 : index
    %c0_0 = arith.constant 0 : index
    %1 = vector.load %arg13[%c0, %c0_0] : memref<8x1024xf32, #tpu.memory_space<vmem>>, vector<8x1024xf32>
    tpu.vector_store %arg13[%c0, %c0_0], %0 {strides = array<i32>} : memref<8x1024xf32, #tpu.memory_space<vmem>>, vector<8x1024xf32>,
    %c0_1 = arith.constant 0 : index
    %c0_2 = arith.constant 0 : index
    %2 = vector.load %arg0[%c0_1, %c0_2] : memref<8x1000xf32, #tpu.memory_space<vmem>>, vector<8x1000xf32>
    %c0_3 = arith.constant 0 : index
    %c0_4 = arith.constant 0 : index
    %3 = vector.load %arg13[%c0_3, %c0_4] : memref<8x1024xf32, #tpu.memory_space<vmem>>, vector<8x1000xf32>
    tpu.vector_store %arg13[%c0_3, %c0_4], %2 {strides = array<i32>} : memref<8x1024xf32, #tpu.memory_space<vmem>>, vector<8x1000xf32>,
    %c0_5 = arith.constant 0 : index
    %c0_6 = arith.constant 0 : index
    %4 = vector.load %arg13[%c0_5, %c0_6] : memref<8x1024xf32, #tpu.memory_space<vmem>>, vector<8x1024xf32>
    %5 = arith.truncf %4 : vector<8x1024xf32> to vector<8x1024xbf16>
    %c0_7 = arith.constant 0 : index
    %c0_8 = arith.constant 0 : index
    %6 = vector.load %arg1[%c0_7, %c0_8] : memref<1024x512xbf16, #tpu.memory_space<vmem>>, vector<1024x512xbf16>
    %cst_9 = arith.constant dense<0.000000e+00> : vector<8x512xf32>
    %7 = tpu.matmul %5, %6, %cst_9 {dimension_numbers = #tpu.dot_dimension_numbers<[1], [0], [0], [1], [0, 0, 1, 1], [], []>} : vector<8x1024xbf16>, vector<1024x512xbf16>, vector<8x512xf32> -> vector<8x512xf32>
    %c0_10 = arith.constant 0 : index
    %c0_11 = arith.constant 0 : index
    %8 = vector.load %arg3[%c0_10, %c0_11] : memref<1x512xf32, #tpu.memory_space<vmem>>, vector<1x512xf32>
    %9 = vector.broadcast %8 : vector<1x512xf32> to vector<8x512xf32>
    %10 = arith.addf %7, %9 : vector<8x512xf32>
    %c0_12 = arith.constant 0 : index
    %c0_13 = arith.constant 0 : index
    %11 = vector.load %arg14[%c0_12, %c0_13] : memref<8x512xf32, #tpu.memory_space<vmem>>, vector<8x512xf32>
    tpu.vector_store %arg14[%c0_12, %c0_13], %10 {strides = array<i32>} : memref<8x512xf32, #tpu.memory_space<vmem>>, vector<8x512xf32>,
    %cst_14 = arith.constant 0.000000e+00 : f32
    %12 = vector.broadcast %cst_14 : f32 to vector<1x128xf32>
    %cst_15 = arith.constant 0.000000e+00 : bf16
    %13 = vector.broadcast %cst_15 : bf16 to vector<1x128xbf16>
    %c0_16 = arith.constant 0 : index
    %c0_17 = arith.constant 0 : index
    %14 = vector.load %arg14[%c0_16, %c0_17] : memref<8x512xf32, #tpu.memory_space<vmem>>, vector<1x512xf32>
    %c0_18 = arith.constant 0 : index
    %c0_19 = arith.constant 0 : index
    %15 = vector.load %arg2[%c0_18, %c0_19] : memref<128x512xbf16, #tpu.memory_space<vmem>>, vector<128x512xbf16>
    %cst_20 = arith.constant dense<0.000000e+00> : vector<1x512xf32>
    %16 = tpu.matmul %13, %15, %cst_20 {dimension_numbers = #tpu.dot_dimension_numbers<[1], [0], [0], [1], [0, 0, 1, 1], [], []>} : vector<1x128xbf16>, vector<128x512xbf16>, vector<1x512xf32> -> vector<1x512xf32>
    %17 = arith.addf %14, %16 : vector<1x512xf32>
    %18 = vector.extract_strided_slice %17 {offsets = [0, 0], sizes = [1, 384], strides = [1, 1]} : vector<1x512xf32> to vector<1x384xf32>
    %19 = arith.negf %18 : vector<1x384xf32>
    %20 = math.exp %19 : vector<1x384xf32>
    %cst_21 = arith.constant 1.000000e+00 : f32
    %21 = vector.broadcast %cst_21 : f32 to vector<1x384xf32>
    %22 = arith.addf %21, %20 : vector<1x384xf32>
    %23 = arith.divf %21, %22 : vector<1x384xf32>
    %24 = vector.extract_strided_slice %23 {offsets = [0, 0], sizes = [1, 128], strides = [1, 1]} : vector<1x384xf32> to vector<1x128xf32>
    %25 = vector.extract_strided_slice %23 {offsets = [0, 128], sizes = [1, 128], strides = [1, 1]} : vector<1x384xf32> to vector<1x128xf32>
    %26 = vector.extract_strided_slice %23 {offsets = [0, 256], sizes = [1, 128], strides = [1, 1]} : vector<1x384xf32> to vector<1x128xf32>
    %27 = vector.extract_strided_slice %17 {offsets = [0, 384], sizes = [1, 128], strides = [1, 1]} : vector<1x512xf32> to vector<1x128xf32>
    %28 = math.tanh %27 : vector<1x128xf32>
    %29 = arith.mulf %25, %12 : vector<1x128xf32>
    %30 = arith.mulf %24, %28 : vector<1x128xf32>
    %31 = arith.addf %29, %30 : vector<1x128xf32>
    %32 = math.tanh %31 : vector<1x128xf32>
    %33 = arith.mulf %26, %32 : vector<1x128xf32>
    %34 = arith.truncf %33 : vector<1x128xf32> to vector<1x128xbf16>
    %c1 = arith.constant 1 : index
    %c0_22 = arith.constant 0 : index
    %35 = vector.load %arg14[%c1, %c0_22] : memref<8x512xf32, #tpu.memory_space<vmem>>, vector<1x512xf32>
    %c0_23 = arith.constant 0 : index
    %c0_24 = arith.constant 0 : index
    %36 = vector.load %arg2[%c0_23, %c0_24] : memref<128x512xbf16, #tpu.memory_space<vmem>>, vector<128x512xbf16>
    %cst_25 = arith.constant dense<0.000000e+00> : vector<1x512xf32>
    %37 = tpu.matmul %34, %36, %cst_25 {dimension_numbers = #tpu.dot_dimension_numbers<[1], [0], [0], [1], [0, 0, 1, 1], [], []>} : vector<1x128xbf16>, vector<128x512xbf16>, vector<1x512xf32> -> vector<1x512xf32>
    %38 = arith.addf %35, %37 : vector<1x512xf32>
    %39 = vector.extract_strided_slice %38 {offsets = [0, 0], sizes = [1, 384], strides = [1, 1]} : vector<1x512xf32> to vector<1x384xf32>
    %40 = arith.negf %39 : vector<1x384xf32>
    %41 = math.exp %40 : vector<1x384xf32>
    %cst_26 = arith.constant 1.000000e+00 : f32
    %42 = vector.broadcast %cst_26 : f32 to vector<1x384xf32>
    %43 = arith.addf %42, %41 : vector<1x384xf32>
    %44 = arith.divf %42, %43 : vector<1x384xf32>
    %45 = vector.extract_strided_slice %44 {offsets = [0, 0], sizes = [1, 128], strides = [1, 1]} : vector<1x384xf32> to vector<1x128xf32>
    %46 = vector.extract_strided_slice %44 {offsets = [0, 128], sizes = [1, 128], strides = [1, 1]} : vector<1x384xf32> to vector<1x128xf32>
    %47 = vector.extract_strided_slice %44 {offsets = [0, 256], sizes = [1, 128], strides = [1, 1]} : vector<1x384xf32> to vector<1x128xf32>
    %48 = vector.extract_strided_slice %38 {offsets = [0, 384], sizes = [1, 128], strides = [1, 1]} : vector<1x512xf32> to vector<1x128xf32>
    %49 = math.tanh %48 : vector<1x128xf32>
    %50 = arith.mulf %46, %31 : vector<1x128xf32>
    %51 = arith.mulf %45, %49 : vector<1x128xf32>
    %52 = arith.addf %50, %51 : vector<1x128xf32>
    %53 = math.tanh %52 : vector<1x128xf32>
    %54 = arith.mulf %47, %53 : vector<1x128xf32>
    %55 = arith.truncf %54 : vector<1x128xf32> to vector<1x128xbf16>
    %56 = tpu.concatenate %34, %13 in 1 : vector<1x128xbf16>, vector<1x128xbf16> -> vector<1x256xbf16>
    %c0_27 = arith.constant 0 : index
    %c0_28 = arith.constant 0 : index
    %57 = vector.load %arg4[%c0_27, %c0_28] : memref<256x512xbf16, #tpu.memory_space<vmem>>, vector<256x512xbf16>
    %cst_29 = arith.constant dense<0.000000e+00> : vector<1x512xf32>
    %58 = tpu.matmul %56, %57, %cst_29 {dimension_numbers = #tpu.dot_dimension_numbers<[1], [0], [0], [1], [0, 0, 1, 1], [], []>} : vector<1x256xbf16>, vector<256x512xbf16>, vector<1x512xf32> -> vector<1x512xf32>
    %c0_30 = arith.constant 0 : index
    %c0_31 = arith.constant 0 : index
    %59 = vector.load %arg5[%c0_30, %c0_31] : memref<1x512xf32, #tpu.memory_space<vmem>>, vector<1x512xf32>
    %60 = arith.addf %58, %59 : vector<1x512xf32>
    %61 = vector.extract_strided_slice %60 {offsets = [0, 0], sizes = [1, 384], strides = [1, 1]} : vector<1x512xf32> to vector<1x384xf32>
    %62 = arith.negf %61 : vector<1x384xf32>
    %63 = math.exp %62 : vector<1x384xf32>
    %cst_32 = arith.constant 1.000000e+00 : f32
    %64 = vector.broadcast %cst_32 : f32 to vector<1x384xf32>
    %65 = arith.addf %64, %63 : vector<1x384xf32>
    %66 = arith.divf %64, %65 : vector<1x384xf32>
    %67 = vector.extract_strided_slice %66 {offsets = [0, 0], sizes = [1, 128], strides = [1, 1]} : vector<1x384xf32> to vector<1x128xf32>
    %68 = vector.extract_strided_slice %66 {offsets = [0, 128], sizes = [1, 128], strides = [1, 1]} : vector<1x384xf32> to vector<1x128xf32>
    %69 = vector.extract_strided_slice %66 {offsets = [0, 256], sizes = [1, 128], strides = [1, 1]} : vector<1x384xf32> to vector<1x128xf32>
    %70 = vector.extract_strided_slice %60 {offsets = [0, 384], sizes = [1, 128], strides = [1, 1]} : vector<1x512xf32> to vector<1x128xf32>
    %71 = math.tanh %70 : vector<1x128xf32>
    %72 = arith.mulf %68, %12 : vector<1x128xf32>
    %73 = arith.mulf %67, %71 : vector<1x128xf32>
    %74 = arith.addf %72, %73 : vector<1x128xf32>
    %75 = math.tanh %74 : vector<1x128xf32>
    %76 = arith.mulf %69, %75 : vector<1x128xf32>
    %77 = arith.truncf %76 : vector<1x128xf32> to vector<1x128xbf16>
    %c2 = arith.constant 2 : index
    %c0_33 = arith.constant 0 : index
    %78 = vector.load %arg14[%c2, %c0_33] : memref<8x512xf32, #tpu.memory_space<vmem>>, vector<1x512xf32>
    %c0_34 = arith.constant 0 : index
    %c0_35 = arith.constant 0 : index
    %79 = vector.load %arg2[%c0_34, %c0_35] : memref<128x512xbf16, #tpu.memory_space<vmem>>, vector<128x512xbf16>
    %cst_36 = arith.constant dense<0.000000e+00> : vector<1x512xf32>
    %80 = tpu.matmul %55, %79, %cst_36 {dimension_numbers = #tpu.dot_dimension_numbers<[1], [0], [0], [1], [0, 0, 1, 1], [], []>} : vector<1x128xbf16>, vector<128x512xbf16>, vector<1x512xf32> -> vector<1x512xf32>
    %81 = arith.addf %78, %80 : vector<1x512xf32>
    %82 = vector.extract_strided_slice %81 {offsets = [0, 0], sizes = [1, 384], strides = [1, 1]} : vector<1x512xf32> to vector<1x384xf32>
    %83 = arith.negf %82 : vector<1x384xf32>
    %84 = math.exp %83 : vector<1x384xf32>
    %cst_37 = arith.constant 1.000000e+00 : f32
    %85 = vector.broadcast %cst_37 : f32 to vector<1x384xf32>
    %86 = arith.addf %85, %84 : vector<1x384xf32>
    %87 = arith.divf %85, %86 : vector<1x384xf32>
    %88 = vector.extract_strided_slice %87 {offsets = [0, 0], sizes = [1, 128], strides = [1, 1]} : vector<1x384xf32> to vector<1x128xf32>
    %89 = vector.extract_strided_slice %87 {offsets = [0, 128], sizes = [1, 128], strides = [1, 1]} : vector<1x384xf32> to vector<1x128xf32>
    %90 = vector.extract_strided_slice %87 {offsets = [0, 256], sizes = [1, 128], strides = [1, 1]} : vector<1x384xf32> to vector<1x128xf32>
    %91 = vector.extract_strided_slice %81 {offsets = [0, 384], sizes = [1, 128], strides = [1, 1]} : vector<1x512xf32> to vector<1x128xf32>
    %92 = math.tanh %91 : vector<1x128xf32>
    %93 = arith.mulf %89, %52 : vector<1x128xf32>
    %94 = arith.mulf %88, %92 : vector<1x128xf32>
    %95 = arith.addf %93, %94 : vector<1x128xf32>
    %96 = math.tanh %95 : vector<1x128xf32>
    %97 = arith.mulf %90, %96 : vector<1x128xf32>
    %98 = arith.truncf %97 : vector<1x128xf32> to vector<1x128xbf16>
    %99 = tpu.concatenate %55, %77 in 1 : vector<1x128xbf16>, vector<1x128xbf16> -> vector<1x256xbf16>
    %c0_38 = arith.constant 0 : index
    %c0_39 = arith.constant 0 : index
    %100 = vector.load %arg4[%c0_38, %c0_39] : memref<256x512xbf16, #tpu.memory_space<vmem>>, vector<256x512xbf16>
    %cst_40 = arith.constant dense<0.000000e+00> : vector<1x512xf32>
    %101 = tpu.matmul %99, %100, %cst_40 {dimension_numbers = #tpu.dot_dimension_numbers<[1], [0], [0], [1], [0, 0, 1, 1], [], []>} : vector<1x256xbf16>, vector<256x512xbf16>, vector<1x512xf32> -> vector<1x512xf32>
    %c0_41 = arith.constant 0 : index
    %c0_42 = arith.constant 0 : index
    %102 = vector.load %arg5[%c0_41, %c0_42] : memref<1x512xf32, #tpu.memory_space<vmem>>, vector<1x512xf32>
    %103 = arith.addf %101, %102 : vector<1x512xf32>
    %104 = vector.extract_strided_slice %103 {offsets = [0, 0], sizes = [1, 384], strides = [1, 1]} : vector<1x512xf32> to vector<1x384xf32>
    %105 = arith.negf %104 : vector<1x384xf32>
    %106 = math.exp %105 : vector<1x384xf32>
    %cst_43 = arith.constant 1.000000e+00 : f32
    %107 = vector.broadcast %cst_43 : f32 to vector<1x384xf32>
    %108 = arith.addf %107, %106 : vector<1x384xf32>
    %109 = arith.divf %107, %108 : vector<1x384xf32>
    %110 = vector.extract_strided_slice %109 {offsets = [0, 0], sizes = [1, 128], strides = [1, 1]} : vector<1x384xf32> to vector<1x128xf32>
    %111 = vector.extract_strided_slice %109 {offsets = [0, 128], sizes = [1, 128], strides = [1, 1]} : vector<1x384xf32> to vector<1x128xf32>
    %112 = vector.extract_strided_slice %109 {offsets = [0, 256], sizes = [1, 128], strides = [1, 1]} : vector<1x384xf32> to vector<1x128xf32>
    %113 = vector.extract_strided_slice %103 {offsets = [0, 384], sizes = [1, 128], strides = [1, 1]} : vector<1x512xf32> to vector<1x128xf32>
    %114 = math.tanh %113 : vector<1x128xf32>
    %115 = arith.mulf %111, %74 : vector<1x128xf32>
    %116 = arith.mulf %110, %114 : vector<1x128xf32>
    %117 = arith.addf %115, %116 : vector<1x128xf32>
    %118 = math.tanh %117 : vector<1x128xf32>
    %119 = arith.mulf %112, %118 : vector<1x128xf32>
    %120 = arith.truncf %119 : vector<1x128xf32> to vector<1x128xbf16>
    %121 = tpu.concatenate %77, %13 in 1 : vector<1x128xbf16>, vector<1x128xbf16> -> vector<1x256xbf16>
    %c0_44 = arith.constant 0 : index
    %c0_45 = arith.constant 0 : index
    %122 = vector.load %arg6[%c0_44, %c0_45] : memref<256x512xbf16, #tpu.memory_space<vmem>>, vector<256x512xbf16>
    %cst_46 = arith.constant dense<0.000000e+00> : vector<1x512xf32>
    %123 = tpu.matmul %121, %122, %cst_46 {dimension_numbers = #tpu.dot_dimension_numbers<[1], [0], [0], [1], [0, 0, 1, 1], [], []>} : vector<1x256xbf16>, vector<256x512xbf16>, vector<1x512xf32> -> vector<1x512xf32>
    %c0_47 = arith.constant 0 : index
    %c0_48 = arith.constant 0 : index
    %124 = vector.load %arg7[%c0_47, %c0_48] : memref<1x512xf32, #tpu.memory_space<vmem>>, vector<1x512xf32>
    %125 = arith.addf %123, %124 : vector<1x512xf32>
    %126 = vector.extract_strided_slice %125 {offsets = [0, 0], sizes = [1, 384], strides = [1, 1]} : vector<1x512xf32> to vector<1x384xf32>
    %127 = arith.negf %126 : vector<1x384xf32>
    %128 = math.exp %127 : vector<1x384xf32>
    %cst_49 = arith.constant 1.000000e+00 : f32
    %129 = vector.broadcast %cst_49 : f32 to vector<1x384xf32>
    %130 = arith.addf %129, %128 : vector<1x384xf32>
    %131 = arith.divf %129, %130 : vector<1x384xf32>
    %132 = vector.extract_strided_slice %131 {offsets = [0, 0], sizes = [1, 128], strides = [1, 1]} : vector<1x384xf32> to vector<1x128xf32>
    %133 = vector.extract_strided_slice %131 {offsets = [0, 128], sizes = [1, 128], strides = [1, 1]} : vector<1x384xf32> to vector<1x128xf32>
    %134 = vector.extract_strided_slice %131 {offsets = [0, 256], sizes = [1, 128], strides = [1, 1]} : vector<1x384xf32> to vector<1x128xf32>
    %135 = vector.extract_strided_slice %125 {offsets = [0, 384], sizes = [1, 128], strides = [1, 1]} : vector<1x512xf32> to vector<1x128xf32>
    %136 = math.tanh %135 : vector<1x128xf32>
    %137 = arith.mulf %133, %12 : vector<1x128xf32>
    %138 = arith.mulf %132, %136 : vector<1x128xf32>
    %139 = arith.addf %137, %138 : vector<1x128xf32>
    %140 = math.tanh %139 : vector<1x128xf32>
    %141 = arith.mulf %134, %140 : vector<1x128xf32>
    %142 = arith.truncf %141 : vector<1x128xf32> to vector<1x128xbf16>
    %c3 = arith.constant 3 : index
    %c0_50 = arith.constant 0 : index
    %143 = vector.load %arg14[%c3, %c0_50] : memref<8x512xf32, #tpu.memory_space<vmem>>, vector<1x512xf32>
    %c0_51 = arith.constant 0 : index
    %c0_52 = arith.constant 0 : index
    %144 = vector.load %arg2[%c0_51, %c0_52] : memref<128x512xbf16, #tpu.memory_space<vmem>>, vector<128x512xbf16>
    %cst_53 = arith.constant dense<0.000000e+00> : vector<1x512xf32>
    %145 = tpu.matmul %98, %144, %cst_53 {dimension_numbers = #tpu.dot_dimension_numbers<[1], [0], [0], [1], [0, 0, 1, 1], [], []>} : vector<1x128xbf16>, vector<128x512xbf16>, vector<1x512xf32> -> vector<1x512xf32>
    %146 = arith.addf %143, %145 : vector<1x512xf32>
    %147 = vector.extract_strided_slice %146 {offsets = [0, 0], sizes = [1, 384], strides = [1, 1]} : vector<1x512xf32> to vector<1x384xf32>
    %148 = arith.negf %147 : vector<1x384xf32>
    %149 = math.exp %148 : vector<1x384xf32>
    %cst_54 = arith.constant 1.000000e+00 : f32
    %150 = vector.broadcast %cst_54 : f32 to vector<1x384xf32>
    %151 = arith.addf %150, %149 : vector<1x384xf32>
    %152 = arith.divf %150, %151 : vector<1x384xf32>
    %153 = vector.extract_strided_slice %152 {offsets = [0, 0], sizes = [1, 128], strides = [1, 1]} : vector<1x384xf32> to vector<1x128xf32>
    %154 = vector.extract_strided_slice %152 {offsets = [0, 128], sizes = [1, 128], strides = [1, 1]} : vector<1x384xf32> to vector<1x128xf32>
    %155 = vector.extract_strided_slice %152 {offsets = [0, 256], sizes = [1, 128], strides = [1, 1]} : vector<1x384xf32> to vector<1x128xf32>
    %156 = vector.extract_strided_slice %146 {offsets = [0, 384], sizes = [1, 128], strides = [1, 1]} : vector<1x512xf32> to vector<1x128xf32>
    %157 = math.tanh %156 : vector<1x128xf32>
    %158 = arith.mulf %154, %95 : vector<1x128xf32>
    %159 = arith.mulf %153, %157 : vector<1x128xf32>
    %160 = arith.addf %158, %159 : vector<1x128xf32>
    %161 = math.tanh %160 : vector<1x128xf32>
    %162 = arith.mulf %155, %161 : vector<1x128xf32>
    %163 = arith.truncf %162 : vector<1x128xf32> to vector<1x128xbf16>
    %164 = tpu.concatenate %98, %120 in 1 : vector<1x128xbf16>, vector<1x128xbf16> -> vector<1x256xbf16>
    %c0_55 = arith.constant 0 : index
    %c0_56 = arith.constant 0 : index
    %165 = vector.load %arg4[%c0_55, %c0_56] : memref<256x512xbf16, #tpu.memory_space<vmem>>, vector<256x512xbf16>
    %cst_57 = arith.constant dense<0.000000e+00> : vector<1x512xf32>
    %166 = tpu.matmul %164, %165, %cst_57 {dimension_numbers = #tpu.dot_dimension_numbers<[1], [0], [0], [1], [0, 0, 1, 1], [], []>} : vector<1x256xbf16>, vector<256x512xbf16>, vector<1x512xf32> -> vector<1x512xf32>
    %c0_58 = arith.constant 0 : index
    %c0_59 = arith.constant 0 : index
    %167 = vector.load %arg5[%c0_58, %c0_59] : memref<1x512xf32, #tpu.memory_space<vmem>>, vector<1x512xf32>
    %168 = arith.addf %166, %167 : vector<1x512xf32>
    %169 = vector.extract_strided_slice %168 {offsets = [0, 0], sizes = [1, 384], strides = [1, 1]} : vector<1x512xf32> to vector<1x384xf32>
    %170 = arith.negf %169 : vector<1x384xf32>
    %171 = math.exp %170 : vector<1x384xf32>
    %cst_60 = arith.constant 1.000000e+00 : f32
    %172 = vector.broadcast %cst_60 : f32 to vector<1x384xf32>
    %173 = arith.addf %172, %171 : vector<1x384xf32>
    %174 = arith.divf %172, %173 : vector<1x384xf32>
    %175 = vector.extract_strided_slice %174 {offsets = [0, 0], sizes = [1, 128], strides = [1, 1]} : vector<1x384xf32> to vector<1x128xf32>
    %176 = vector.extract_strided_slice %174 {offsets = [0, 128], sizes = [1, 128], strides = [1, 1]} : vector<1x384xf32> to vector<1x128xf32>
    %177 = vector.extract_strided_slice %174 {offsets = [0, 256], sizes = [1, 128], strides = [1, 1]} : vector<1x384xf32> to vector<1x128xf32>
    %178 = vector.extract_strided_slice %168 {offsets = [0, 384], sizes = [1, 128], strides = [1, 1]} : vector<1x512xf32> to vector<1x128xf32>
    %179 = math.tanh %178 : vector<1x128xf32>
    %180 = arith.mulf %176, %117 : vector<1x128xf32>
    %181 = arith.mulf %175, %179 : vector<1x128xf32>
    %182 = arith.addf %180, %181 : vector<1x128xf32>
    %183 = math.tanh %182 : vector<1x128xf32>
    %184 = arith.mulf %177, %183 : vector<1x128xf32>
    %185 = arith.truncf %184 : vector<1x128xf32> to vector<1x128xbf16>
    %186 = tpu.concatenate %120, %142 in 1 : vector<1x128xbf16>, vector<1x128xbf16> -> vector<1x256xbf16>
    %c0_61 = arith.constant 0 : index
    %c0_62 = arith.constant 0 : index
    %187 = vector.load %arg6[%c0_61, %c0_62] : memref<256x512xbf16, #tpu.memory_space<vmem>>, vector<256x512xbf16>
    %cst_63 = arith.constant dense<0.000000e+00> : vector<1x512xf32>
    %188 = tpu.matmul %186, %187, %cst_63 {dimension_numbers = #tpu.dot_dimension_numbers<[1], [0], [0], [1], [0, 0, 1, 1], [], []>} : vector<1x256xbf16>, vector<256x512xbf16>, vector<1x512xf32> -> vector<1x512xf32>
    %c0_64 = arith.constant 0 : index
    %c0_65 = arith.constant 0 : index
    %189 = vector.load %arg7[%c0_64, %c0_65] : memref<1x512xf32, #tpu.memory_space<vmem>>, vector<1x512xf32>
    %190 = arith.addf %188, %189 : vector<1x512xf32>
    %191 = vector.extract_strided_slice %190 {offsets = [0, 0], sizes = [1, 384], strides = [1, 1]} : vector<1x512xf32> to vector<1x384xf32>
    %192 = arith.negf %191 : vector<1x384xf32>
    %193 = math.exp %192 : vector<1x384xf32>
    %cst_66 = arith.constant 1.000000e+00 : f32
    %194 = vector.broadcast %cst_66 : f32 to vector<1x384xf32>
    %195 = arith.addf %194, %193 : vector<1x384xf32>
    %196 = arith.divf %194, %195 : vector<1x384xf32>
    %197 = vector.extract_strided_slice %196 {offsets = [0, 0], sizes = [1, 128], strides = [1, 1]} : vector<1x384xf32> to vector<1x128xf32>
    %198 = vector.extract_strided_slice %196 {offsets = [0, 128], sizes = [1, 128], strides = [1, 1]} : vector<1x384xf32> to vector<1x128xf32>
    %199 = vector.extract_strided_slice %196 {offsets = [0, 256], sizes = [1, 128], strides = [1, 1]} : vector<1x384xf32> to vector<1x128xf32>
    %200 = vector.extract_strided_slice %190 {offsets = [0, 384], sizes = [1, 128], strides = [1, 1]} : vector<1x512xf32> to vector<1x128xf32>
    %201 = math.tanh %200 : vector<1x128xf32>
    %202 = arith.mulf %198, %139 : vector<1x128xf32>
    %203 = arith.mulf %197, %201 : vector<1x128xf32>
    %204 = arith.addf %202, %203 : vector<1x128xf32>
    %205 = math.tanh %204 : vector<1x128xf32>
    %206 = arith.mulf %199, %205 : vector<1x128xf32>
    %207 = arith.truncf %206 : vector<1x128xf32> to vector<1x128xbf16>
    %208 = tpu.concatenate %142, %13 in 1 : vector<1x128xbf16>, vector<1x128xbf16> -> vector<1x256xbf16>
    %c0_67 = arith.constant 0 : index
    %c0_68 = arith.constant 0 : index
    %209 = vector.load %arg8[%c0_67, %c0_68] : memref<256x512xbf16, #tpu.memory_space<vmem>>, vector<256x512xbf16>
    %cst_69 = arith.constant dense<0.000000e+00> : vector<1x512xf32>
    %210 = tpu.matmul %208, %209, %cst_69 {dimension_numbers = #tpu.dot_dimension_numbers<[1], [0], [0], [1], [0, 0, 1, 1], [], []>} : vector<1x256xbf16>, vector<256x512xbf16>, vector<1x512xf32> -> vector<1x512xf32>
    %c0_70 = arith.constant 0 : index
    %c0_71 = arith.constant 0 : index
    %211 = vector.load %arg9[%c0_70, %c0_71] : memref<1x512xf32, #tpu.memory_space<vmem>>, vector<1x512xf32>
    %212 = arith.addf %210, %211 : vector<1x512xf32>
    %213 = vector.extract_strided_slice %212 {offsets = [0, 0], sizes = [1, 384], strides = [1, 1]} : vector<1x512xf32> to vector<1x384xf32>
    %214 = arith.negf %213 : vector<1x384xf32>
    %215 = math.exp %214 : vector<1x384xf32>
    %cst_72 = arith.constant 1.000000e+00 : f32
    %216 = vector.broadcast %cst_72 : f32 to vector<1x384xf32>
    %217 = arith.addf %216, %215 : vector<1x384xf32>
    %218 = arith.divf %216, %217 : vector<1x384xf32>
    %219 = vector.extract_strided_slice %218 {offsets = [0, 0], sizes = [1, 128], strides = [1, 1]} : vector<1x384xf32> to vector<1x128xf32>
    %220 = vector.extract_strided_slice %218 {offsets = [0, 128], sizes = [1, 128], strides = [1, 1]} : vector<1x384xf32> to vector<1x128xf32>
    %221 = vector.extract_strided_slice %218 {offsets = [0, 256], sizes = [1, 128], strides = [1, 1]} : vector<1x384xf32> to vector<1x128xf32>
    %222 = vector.extract_strided_slice %212 {offsets = [0, 384], sizes = [1, 128], strides = [1, 1]} : vector<1x512xf32> to vector<1x128xf32>
    %223 = math.tanh %222 : vector<1x128xf32>
    %224 = arith.mulf %220, %12 : vector<1x128xf32>
    %225 = arith.mulf %219, %223 : vector<1x128xf32>
    %226 = arith.addf %224, %225 : vector<1x128xf32>
    %227 = math.tanh %226 : vector<1x128xf32>
    %228 = arith.mulf %221, %227 : vector<1x128xf32>
    %229 = arith.truncf %228 : vector<1x128xf32> to vector<1x128xbf16>
    %c4 = arith.constant 4 : index
    %c0_73 = arith.constant 0 : index
    %230 = vector.load %arg14[%c4, %c0_73] : memref<8x512xf32, #tpu.memory_space<vmem>>, vector<1x512xf32>
    %c0_74 = arith.constant 0 : index
    %c0_75 = arith.constant 0 : index
    %231 = vector.load %arg2[%c0_74, %c0_75] : memref<128x512xbf16, #tpu.memory_space<vmem>>, vector<128x512xbf16>
    %cst_76 = arith.constant dense<0.000000e+00> : vector<1x512xf32>
    %232 = tpu.matmul %163, %231, %cst_76 {dimension_numbers = #tpu.dot_dimension_numbers<[1], [0], [0], [1], [0, 0, 1, 1], [], []>} : vector<1x128xbf16>, vector<128x512xbf16>, vector<1x512xf32> -> vector<1x512xf32>
    %233 = arith.addf %230, %232 : vector<1x512xf32>
    %234 = vector.extract_strided_slice %233 {offsets = [0, 0], sizes = [1, 384], strides = [1, 1]} : vector<1x512xf32> to vector<1x384xf32>
    %235 = arith.negf %234 : vector<1x384xf32>
    %236 = math.exp %235 : vector<1x384xf32>
    %cst_77 = arith.constant 1.000000e+00 : f32
    %237 = vector.broadcast %cst_77 : f32 to vector<1x384xf32>
    %238 = arith.addf %237, %236 : vector<1x384xf32>
    %239 = arith.divf %237, %238 : vector<1x384xf32>
    %240 = vector.extract_strided_slice %239 {offsets = [0, 0], sizes = [1, 128], strides = [1, 1]} : vector<1x384xf32> to vector<1x128xf32>
    %241 = vector.extract_strided_slice %239 {offsets = [0, 128], sizes = [1, 128], strides = [1, 1]} : vector<1x384xf32> to vector<1x128xf32>
    %242 = vector.extract_strided_slice %239 {offsets = [0, 256], sizes = [1, 128], strides = [1, 1]} : vector<1x384xf32> to vector<1x128xf32>
    %243 = vector.extract_strided_slice %233 {offsets = [0, 384], sizes = [1, 128], strides = [1, 1]} : vector<1x512xf32> to vector<1x128xf32>
    %244 = math.tanh %243 : vector<1x128xf32>
    %245 = arith.mulf %241, %160 : vector<1x128xf32>
    %246 = arith.mulf %240, %244 : vector<1x128xf32>
    %247 = arith.addf %245, %246 : vector<1x128xf32>
    %248 = math.tanh %247 : vector<1x128xf32>
    %249 = arith.mulf %242, %248 : vector<1x128xf32>
    %250 = arith.truncf %249 : vector<1x128xf32> to vector<1x128xbf16>
    %251 = tpu.concatenate %163, %185 in 1 : vector<1x128xbf16>, vector<1x128xbf16> -> vector<1x256xbf16>
    %c0_78 = arith.constant 0 : index
    %c0_79 = arith.constant 0 : index
    %252 = vector.load %arg4[%c0_78, %c0_79] : memref<256x512xbf16, #tpu.memory_space<vmem>>, vector<256x512xbf16>
    %cst_80 = arith.constant dense<0.000000e+00> : vector<1x512xf32>
    %253 = tpu.matmul %251, %252, %cst_80 {dimension_numbers = #tpu.dot_dimension_numbers<[1], [0], [0], [1], [0, 0, 1, 1], [], []>} : vector<1x256xbf16>, vector<256x512xbf16>, vector<1x512xf32> -> vector<1x512xf32>
    %c0_81 = arith.constant 0 : index
    %c0_82 = arith.constant 0 : index
    %254 = vector.load %arg5[%c0_81, %c0_82] : memref<1x512xf32, #tpu.memory_space<vmem>>, vector<1x512xf32>
    %255 = arith.addf %253, %254 : vector<1x512xf32>
    %256 = vector.extract_strided_slice %255 {offsets = [0, 0], sizes = [1, 384], strides = [1, 1]} : vector<1x512xf32> to vector<1x384xf32>
    %257 = arith.negf %256 : vector<1x384xf32>
    %258 = math.exp %257 : vector<1x384xf32>
    %cst_83 = arith.constant 1.000000e+00 : f32
    %259 = vector.broadcast %cst_83 : f32 to vector<1x384xf32>
    %260 = arith.addf %259, %258 : vector<1x384xf32>
    %261 = arith.divf %259, %260 : vector<1x384xf32>
    %262 = vector.extract_strided_slice %261 {offsets = [0, 0], sizes = [1, 128], strides = [1, 1]} : vector<1x384xf32> to vector<1x128xf32>
    %263 = vector.extract_strided_slice %261 {offsets = [0, 128], sizes = [1, 128], strides = [1, 1]} : vector<1x384xf32> to vector<1x128xf32>
    %264 = vector.extract_strided_slice %261 {offsets = [0, 256], sizes = [1, 128], strides = [1, 1]} : vector<1x384xf32> to vector<1x128xf32>
    %265 = vector.extract_strided_slice %255 {offsets = [0, 384], sizes = [1, 128], strides = [1, 1]} : vector<1x512xf32> to vector<1x128xf32>
    %266 = math.tanh %265 : vector<1x128xf32>
    %267 = arith.mulf %263, %182 : vector<1x128xf32>
    %268 = arith.mulf %262, %266 : vector<1x128xf32>
    %269 = arith.addf %267, %268 : vector<1x128xf32>
    %270 = math.tanh %269 : vector<1x128xf32>
    %271 = arith.mulf %264, %270 : vector<1x128xf32>
    %272 = arith.truncf %271 : vector<1x128xf32> to vector<1x128xbf16>
    %273 = tpu.concatenate %185, %207 in 1 : vector<1x128xbf16>, vector<1x128xbf16> -> vector<1x256xbf16>
    %c0_84 = arith.constant 0 : index
    %c0_85 = arith.constant 0 : index
    %274 = vector.load %arg6[%c0_84, %c0_85] : memref<256x512xbf16, #tpu.memory_space<vmem>>, vector<256x512xbf16>
    %cst_86 = arith.constant dense<0.000000e+00> : vector<1x512xf32>
    %275 = tpu.matmul %273, %274, %cst_86 {dimension_numbers = #tpu.dot_dimension_numbers<[1], [0], [0], [1], [0, 0, 1, 1], [], []>} : vector<1x256xbf16>, vector<256x512xbf16>, vector<1x512xf32> -> vector<1x512xf32>
    %c0_87 = arith.constant 0 : index
    %c0_88 = arith.constant 0 : index
    %276 = vector.load %arg7[%c0_87, %c0_88] : memref<1x512xf32, #tpu.memory_space<vmem>>, vector<1x512xf32>
    %277 = arith.addf %275, %276 : vector<1x512xf32>
    %278 = vector.extract_strided_slice %277 {offsets = [0, 0], sizes = [1, 384], strides = [1, 1]} : vector<1x512xf32> to vector<1x384xf32>
    %279 = arith.negf %278 : vector<1x384xf32>
    %280 = math.exp %279 : vector<1x384xf32>
    %cst_89 = arith.constant 1.000000e+00 : f32
    %281 = vector.broadcast %cst_89 : f32 to vector<1x384xf32>
    %282 = arith.addf %281, %280 : vector<1x384xf32>
    %283 = arith.divf %281, %282 : vector<1x384xf32>
    %284 = vector.extract_strided_slice %283 {offsets = [0, 0], sizes = [1, 128], strides = [1, 1]} : vector<1x384xf32> to vector<1x128xf32>
    %285 = vector.extract_strided_slice %283 {offsets = [0, 128], sizes = [1, 128], strides = [1, 1]} : vector<1x384xf32> to vector<1x128xf32>
    %286 = vector.extract_strided_slice %283 {offsets = [0, 256], sizes = [1, 128], strides = [1, 1]} : vector<1x384xf32> to vector<1x128xf32>
    %287 = vector.extract_strided_slice %277 {offsets = [0, 384], sizes = [1, 128], strides = [1, 1]} : vector<1x512xf32> to vector<1x128xf32>
    %288 = math.tanh %287 : vector<1x128xf32>
    %289 = arith.mulf %285, %204 : vector<1x128xf32>
    %290 = arith.mulf %284, %288 : vector<1x128xf32>
    %291 = arith.addf %289, %290 : vector<1x128xf32>
    %292 = math.tanh %291 : vector<1x128xf32>
    %293 = arith.mulf %286, %292 : vector<1x128xf32>
    %294 = arith.truncf %293 : vector<1x128xf32> to vector<1x128xbf16>
    %295 = tpu.concatenate %207, %229 in 1 : vector<1x128xbf16>, vector<1x128xbf16> -> vector<1x256xbf16>
    %c0_90 = arith.constant 0 : index
    %c0_91 = arith.constant 0 : index
    %296 = vector.load %arg8[%c0_90, %c0_91] : memref<256x512xbf16, #tpu.memory_space<vmem>>, vector<256x512xbf16>
    %cst_92 = arith.constant dense<0.000000e+00> : vector<1x512xf32>
    %297 = tpu.matmul %295, %296, %cst_92 {dimension_numbers = #tpu.dot_dimension_numbers<[1], [0], [0], [1], [0, 0, 1, 1], [], []>} : vector<1x256xbf16>, vector<256x512xbf16>, vector<1x512xf32> -> vector<1x512xf32>
    %c0_93 = arith.constant 0 : index
    %c0_94 = arith.constant 0 : index
    %298 = vector.load %arg9[%c0_93, %c0_94] : memref<1x512xf32, #tpu.memory_space<vmem>>, vector<1x512xf32>
    %299 = arith.addf %297, %298 : vector<1x512xf32>
    %300 = vector.extract_strided_slice %299 {offsets = [0, 0], sizes = [1, 384], strides = [1, 1]} : vector<1x512xf32> to vector<1x384xf32>
    %301 = arith.negf %300 : vector<1x384xf32>
    %302 = math.exp %301 : vector<1x384xf32>
    %cst_95 = arith.constant 1.000000e+00 : f32
    %303 = vector.broadcast %cst_95 : f32 to vector<1x384xf32>
    %304 = arith.addf %303, %302 : vector<1x384xf32>
    %305 = arith.divf %303, %304 : vector<1x384xf32>
    %306 = vector.extract_strided_slice %305 {offsets = [0, 0], sizes = [1, 128], strides = [1, 1]} : vector<1x384xf32> to vector<1x128xf32>
    %307 = vector.extract_strided_slice %305 {offsets = [0, 128], sizes = [1, 128], strides = [1, 1]} : vector<1x384xf32> to vector<1x128xf32>
    %308 = vector.extract_strided_slice %305 {offsets = [0, 256], sizes = [1, 128], strides = [1, 1]} : vector<1x384xf32> to vector<1x128xf32>
    %309 = vector.extract_strided_slice %299 {offsets = [0, 384], sizes = [1, 128], strides = [1, 1]} : vector<1x512xf32> to vector<1x128xf32>
    %310 = math.tanh %309 : vector<1x128xf32>
    %311 = arith.mulf %307, %226 : vector<1x128xf32>
    %312 = arith.mulf %306, %310 : vector<1x128xf32>
    %313 = arith.addf %311, %312 : vector<1x128xf32>
    %314 = math.tanh %313 : vector<1x128xf32>
    %315 = arith.mulf %308, %314 : vector<1x128xf32>
    %316 = arith.truncf %315 : vector<1x128xf32> to vector<1x128xbf16>
    %c5 = arith.constant 5 : index
    %c0_96 = arith.constant 0 : index
    %317 = vector.load %arg14[%c5, %c0_96] : memref<8x512xf32, #tpu.memory_space<vmem>>, vector<1x512xf32>
    %c0_97 = arith.constant 0 : index
    %c0_98 = arith.constant 0 : index
    %318 = vector.load %arg2[%c0_97, %c0_98] : memref<128x512xbf16, #tpu.memory_space<vmem>>, vector<128x512xbf16>
    %cst_99 = arith.constant dense<0.000000e+00> : vector<1x512xf32>
    %319 = tpu.matmul %250, %318, %cst_99 {dimension_numbers = #tpu.dot_dimension_numbers<[1], [0], [0], [1], [0, 0, 1, 1], [], []>} : vector<1x128xbf16>, vector<128x512xbf16>, vector<1x512xf32> -> vector<1x512xf32>
    %320 = arith.addf %317, %319 : vector<1x512xf32>
    %321 = vector.extract_strided_slice %320 {offsets = [0, 0], sizes = [1, 384], strides = [1, 1]} : vector<1x512xf32> to vector<1x384xf32>
    %322 = arith.negf %321 : vector<1x384xf32>
    %323 = math.exp %322 : vector<1x384xf32>
    %cst_100 = arith.constant 1.000000e+00 : f32
    %324 = vector.broadcast %cst_100 : f32 to vector<1x384xf32>
    %325 = arith.addf %324, %323 : vector<1x384xf32>
    %326 = arith.divf %324, %325 : vector<1x384xf32>
    %327 = vector.extract_strided_slice %326 {offsets = [0, 0], sizes = [1, 128], strides = [1, 1]} : vector<1x384xf32> to vector<1x128xf32>
    %328 = vector.extract_strided_slice %326 {offsets = [0, 128], sizes = [1, 128], strides = [1, 1]} : vector<1x384xf32> to vector<1x128xf32>
    %329 = vector.extract_strided_slice %326 {offsets = [0, 256], sizes = [1, 128], strides = [1, 1]} : vector<1x384xf32> to vector<1x128xf32>
    %330 = vector.extract_strided_slice %320 {offsets = [0, 384], sizes = [1, 128], strides = [1, 1]} : vector<1x512xf32> to vector<1x128xf32>
    %331 = math.tanh %330 : vector<1x128xf32>
    %332 = arith.mulf %328, %247 : vector<1x128xf32>
    %333 = arith.mulf %327, %331 : vector<1x128xf32>
    %334 = arith.addf %332, %333 : vector<1x128xf32>
    %335 = math.tanh %334 : vector<1x128xf32>
    %336 = arith.mulf %329, %335 : vector<1x128xf32>
    %337 = arith.truncf %336 : vector<1x128xf32> to vector<1x128xbf16>
    %338 = tpu.concatenate %250, %272 in 1 : vector<1x128xbf16>, vector<1x128xbf16> -> vector<1x256xbf16>
    %c0_101 = arith.constant 0 : index
    %c0_102 = arith.constant 0 : index
    %339 = vector.load %arg4[%c0_101, %c0_102] : memref<256x512xbf16, #tpu.memory_space<vmem>>, vector<256x512xbf16>
    %cst_103 = arith.constant dense<0.000000e+00> : vector<1x512xf32>
    %340 = tpu.matmul %338, %339, %cst_103 {dimension_numbers = #tpu.dot_dimension_numbers<[1], [0], [0], [1], [0, 0, 1, 1], [], []>} : vector<1x256xbf16>, vector<256x512xbf16>, vector<1x512xf32> -> vector<1x512xf32>
    %c0_104 = arith.constant 0 : index
    %c0_105 = arith.constant 0 : index
    %341 = vector.load %arg5[%c0_104, %c0_105] : memref<1x512xf32, #tpu.memory_space<vmem>>, vector<1x512xf32>
    %342 = arith.addf %340, %341 : vector<1x512xf32>
    %343 = vector.extract_strided_slice %342 {offsets = [0, 0], sizes = [1, 384], strides = [1, 1]} : vector<1x512xf32> to vector<1x384xf32>
    %344 = arith.negf %343 : vector<1x384xf32>
    %345 = math.exp %344 : vector<1x384xf32>
    %cst_106 = arith.constant 1.000000e+00 : f32
    %346 = vector.broadcast %cst_106 : f32 to vector<1x384xf32>
    %347 = arith.addf %346, %345 : vector<1x384xf32>
    %348 = arith.divf %346, %347 : vector<1x384xf32>
    %349 = vector.extract_strided_slice %348 {offsets = [0, 0], sizes = [1, 128], strides = [1, 1]} : vector<1x384xf32> to vector<1x128xf32>
    %350 = vector.extract_strided_slice %348 {offsets = [0, 128], sizes = [1, 128], strides = [1, 1]} : vector<1x384xf32> to vector<1x128xf32>
    %351 = vector.extract_strided_slice %348 {offsets = [0, 256], sizes = [1, 128], strides = [1, 1]} : vector<1x384xf32> to vector<1x128xf32>
    %352 = vector.extract_strided_slice %342 {offsets = [0, 384], sizes = [1, 128], strides = [1, 1]} : vector<1x512xf32> to vector<1x128xf32>
    %353 = math.tanh %352 : vector<1x128xf32>
    %354 = arith.mulf %350, %269 : vector<1x128xf32>
    %355 = arith.mulf %349, %353 : vector<1x128xf32>
    %356 = arith.addf %354, %355 : vector<1x128xf32>
    %357 = math.tanh %356 : vector<1x128xf32>
    %358 = arith.mulf %351, %357 : vector<1x128xf32>
    %359 = arith.truncf %358 : vector<1x128xf32> to vector<1x128xbf16>
    %360 = tpu.concatenate %272, %294 in 1 : vector<1x128xbf16>, vector<1x128xbf16> -> vector<1x256xbf16>
    %c0_107 = arith.constant 0 : index
    %c0_108 = arith.constant 0 : index
    %361 = vector.load %arg6[%c0_107, %c0_108] : memref<256x512xbf16, #tpu.memory_space<vmem>>, vector<256x512xbf16>
    %cst_109 = arith.constant dense<0.000000e+00> : vector<1x512xf32>
    %362 = tpu.matmul %360, %361, %cst_109 {dimension_numbers = #tpu.dot_dimension_numbers<[1], [0], [0], [1], [0, 0, 1, 1], [], []>} : vector<1x256xbf16>, vector<256x512xbf16>, vector<1x512xf32> -> vector<1x512xf32>
    %c0_110 = arith.constant 0 : index
    %c0_111 = arith.constant 0 : index
    %363 = vector.load %arg7[%c0_110, %c0_111] : memref<1x512xf32, #tpu.memory_space<vmem>>, vector<1x512xf32>
    %364 = arith.addf %362, %363 : vector<1x512xf32>
    %365 = vector.extract_strided_slice %364 {offsets = [0, 0], sizes = [1, 384], strides = [1, 1]} : vector<1x512xf32> to vector<1x384xf32>
    %366 = arith.negf %365 : vector<1x384xf32>
    %367 = math.exp %366 : vector<1x384xf32>
    %cst_112 = arith.constant 1.000000e+00 : f32
    %368 = vector.broadcast %cst_112 : f32 to vector<1x384xf32>
    %369 = arith.addf %368, %367 : vector<1x384xf32>
    %370 = arith.divf %368, %369 : vector<1x384xf32>
    %371 = vector.extract_strided_slice %370 {offsets = [0, 0], sizes = [1, 128], strides = [1, 1]} : vector<1x384xf32> to vector<1x128xf32>
    %372 = vector.extract_strided_slice %370 {offsets = [0, 128], sizes = [1, 128], strides = [1, 1]} : vector<1x384xf32> to vector<1x128xf32>
    %373 = vector.extract_strided_slice %370 {offsets = [0, 256], sizes = [1, 128], strides = [1, 1]} : vector<1x384xf32> to vector<1x128xf32>
    %374 = vector.extract_strided_slice %364 {offsets = [0, 384], sizes = [1, 128], strides = [1, 1]} : vector<1x512xf32> to vector<1x128xf32>
    %375 = math.tanh %374 : vector<1x128xf32>
    %376 = arith.mulf %372, %291 : vector<1x128xf32>
    %377 = arith.mulf %371, %375 : vector<1x128xf32>
    %378 = arith.addf %376, %377 : vector<1x128xf32>
    %379 = math.tanh %378 : vector<1x128xf32>
    %380 = arith.mulf %373, %379 : vector<1x128xf32>
    %381 = arith.truncf %380 : vector<1x128xf32> to vector<1x128xbf16>
    %382 = tpu.concatenate %294, %316 in 1 : vector<1x128xbf16>, vector<1x128xbf16> -> vector<1x256xbf16>
    %c0_113 = arith.constant 0 : index
    %c0_114 = arith.constant 0 : index
    %383 = vector.load %arg8[%c0_113, %c0_114] : memref<256x512xbf16, #tpu.memory_space<vmem>>, vector<256x512xbf16>
    %cst_115 = arith.constant dense<0.000000e+00> : vector<1x512xf32>
    %384 = tpu.matmul %382, %383, %cst_115 {dimension_numbers = #tpu.dot_dimension_numbers<[1], [0], [0], [1], [0, 0, 1, 1], [], []>} : vector<1x256xbf16>, vector<256x512xbf16>, vector<1x512xf32> -> vector<1x512xf32>
    %c0_116 = arith.constant 0 : index
    %c0_117 = arith.constant 0 : index
    %385 = vector.load %arg9[%c0_116, %c0_117] : memref<1x512xf32, #tpu.memory_space<vmem>>, vector<1x512xf32>
    %386 = arith.addf %384, %385 : vector<1x512xf32>
    %387 = vector.extract_strided_slice %386 {offsets = [0, 0], sizes = [1, 384], strides = [1, 1]} : vector<1x512xf32> to vector<1x384xf32>
    %388 = arith.negf %387 : vector<1x384xf32>
    %389 = math.exp %388 : vector<1x384xf32>
    %cst_118 = arith.constant 1.000000e+00 : f32
    %390 = vector.broadcast %cst_118 : f32 to vector<1x384xf32>
    %391 = arith.addf %390, %389 : vector<1x384xf32>
    %392 = arith.divf %390, %391 : vector<1x384xf32>
    %393 = vector.extract_strided_slice %392 {offsets = [0, 0], sizes = [1, 128], strides = [1, 1]} : vector<1x384xf32> to vector<1x128xf32>
    %394 = vector.extract_strided_slice %392 {offsets = [0, 128], sizes = [1, 128], strides = [1, 1]} : vector<1x384xf32> to vector<1x128xf32>
    %395 = vector.extract_strided_slice %392 {offsets = [0, 256], sizes = [1, 128], strides = [1, 1]} : vector<1x384xf32> to vector<1x128xf32>
    %396 = vector.extract_strided_slice %386 {offsets = [0, 384], sizes = [1, 128], strides = [1, 1]} : vector<1x512xf32> to vector<1x128xf32>
    %397 = math.tanh %396 : vector<1x128xf32>
    %398 = arith.mulf %394, %313 : vector<1x128xf32>
    %399 = arith.mulf %393, %397 : vector<1x128xf32>
    %400 = arith.addf %398, %399 : vector<1x128xf32>
    %401 = math.tanh %400 : vector<1x128xf32>
    %402 = arith.mulf %395, %401 : vector<1x128xf32>
    %403 = arith.truncf %402 : vector<1x128xf32> to vector<1x128xbf16>
    %c6 = arith.constant 6 : index
    %c0_119 = arith.constant 0 : index
    %404 = vector.load %arg14[%c6, %c0_119] : memref<8x512xf32, #tpu.memory_space<vmem>>, vector<1x512xf32>
    %c0_120 = arith.constant 0 : index
    %c0_121 = arith.constant 0 : index
    %405 = vector.load %arg2[%c0_120, %c0_121] : memref<128x512xbf16, #tpu.memory_space<vmem>>, vector<128x512xbf16>
    %cst_122 = arith.constant dense<0.000000e+00> : vector<1x512xf32>
    %406 = tpu.matmul %337, %405, %cst_122 {dimension_numbers = #tpu.dot_dimension_numbers<[1], [0], [0], [1], [0, 0, 1, 1], [], []>} : vector<1x128xbf16>, vector<128x512xbf16>, vector<1x512xf32> -> vector<1x512xf32>
    %407 = arith.addf %404, %406 : vector<1x512xf32>
    %408 = vector.extract_strided_slice %407 {offsets = [0, 0], sizes = [1, 384], strides = [1, 1]} : vector<1x512xf32> to vector<1x384xf32>
    %409 = arith.negf %408 : vector<1x384xf32>
    %410 = math.exp %409 : vector<1x384xf32>
    %cst_123 = arith.constant 1.000000e+00 : f32
    %411 = vector.broadcast %cst_123 : f32 to vector<1x384xf32>
    %412 = arith.addf %411, %410 : vector<1x384xf32>
    %413 = arith.divf %411, %412 : vector<1x384xf32>
    %414 = vector.extract_strided_slice %413 {offsets = [0, 0], sizes = [1, 128], strides = [1, 1]} : vector<1x384xf32> to vector<1x128xf32>
    %415 = vector.extract_strided_slice %413 {offsets = [0, 128], sizes = [1, 128], strides = [1, 1]} : vector<1x384xf32> to vector<1x128xf32>
    %416 = vector.extract_strided_slice %413 {offsets = [0, 256], sizes = [1, 128], strides = [1, 1]} : vector<1x384xf32> to vector<1x128xf32>
    %417 = vector.extract_strided_slice %407 {offsets = [0, 384], sizes = [1, 128], strides = [1, 1]} : vector<1x512xf32> to vector<1x128xf32>
    %418 = math.tanh %417 : vector<1x128xf32>
    %419 = arith.mulf %415, %334 : vector<1x128xf32>
    %420 = arith.mulf %414, %418 : vector<1x128xf32>
    %421 = arith.addf %419, %420 : vector<1x128xf32>
    %422 = math.tanh %421 : vector<1x128xf32>
    %423 = arith.mulf %416, %422 : vector<1x128xf32>
    %424 = arith.truncf %423 : vector<1x128xf32> to vector<1x128xbf16>
    %425 = tpu.concatenate %337, %359 in 1 : vector<1x128xbf16>, vector<1x128xbf16> -> vector<1x256xbf16>
    %c0_124 = arith.constant 0 : index
    %c0_125 = arith.constant 0 : index
    %426 = vector.load %arg4[%c0_124, %c0_125] : memref<256x512xbf16, #tpu.memory_space<vmem>>, vector<256x512xbf16>
    %cst_126 = arith.constant dense<0.000000e+00> : vector<1x512xf32>
    %427 = tpu.matmul %425, %426, %cst_126 {dimension_numbers = #tpu.dot_dimension_numbers<[1], [0], [0], [1], [0, 0, 1, 1], [], []>} : vector<1x256xbf16>, vector<256x512xbf16>, vector<1x512xf32> -> vector<1x512xf32>
    %c0_127 = arith.constant 0 : index
    %c0_128 = arith.constant 0 : index
    %428 = vector.load %arg5[%c0_127, %c0_128] : memref<1x512xf32, #tpu.memory_space<vmem>>, vector<1x512xf32>
    %429 = arith.addf %427, %428 : vector<1x512xf32>
    %430 = vector.extract_strided_slice %429 {offsets = [0, 0], sizes = [1, 384], strides = [1, 1]} : vector<1x512xf32> to vector<1x384xf32>
    %431 = arith.negf %430 : vector<1x384xf32>
    %432 = math.exp %431 : vector<1x384xf32>
    %cst_129 = arith.constant 1.000000e+00 : f32
    %433 = vector.broadcast %cst_129 : f32 to vector<1x384xf32>
    %434 = arith.addf %433, %432 : vector<1x384xf32>
    %435 = arith.divf %433, %434 : vector<1x384xf32>
    %436 = vector.extract_strided_slice %435 {offsets = [0, 0], sizes = [1, 128], strides = [1, 1]} : vector<1x384xf32> to vector<1x128xf32>
    %437 = vector.extract_strided_slice %435 {offsets = [0, 128], sizes = [1, 128], strides = [1, 1]} : vector<1x384xf32> to vector<1x128xf32>
    %438 = vector.extract_strided_slice %435 {offsets = [0, 256], sizes = [1, 128], strides = [1, 1]} : vector<1x384xf32> to vector<1x128xf32>
    %439 = vector.extract_strided_slice %429 {offsets = [0, 384], sizes = [1, 128], strides = [1, 1]} : vector<1x512xf32> to vector<1x128xf32>
    %440 = math.tanh %439 : vector<1x128xf32>
    %441 = arith.mulf %437, %356 : vector<1x128xf32>
    %442 = arith.mulf %436, %440 : vector<1x128xf32>
    %443 = arith.addf %441, %442 : vector<1x128xf32>
    %444 = math.tanh %443 : vector<1x128xf32>
    %445 = arith.mulf %438, %444 : vector<1x128xf32>
    %446 = arith.truncf %445 : vector<1x128xf32> to vector<1x128xbf16>
    %447 = tpu.concatenate %359, %381 in 1 : vector<1x128xbf16>, vector<1x128xbf16> -> vector<1x256xbf16>
    %c0_130 = arith.constant 0 : index
    %c0_131 = arith.constant 0 : index
    %448 = vector.load %arg6[%c0_130, %c0_131] : memref<256x512xbf16, #tpu.memory_space<vmem>>, vector<256x512xbf16>
    %cst_132 = arith.constant dense<0.000000e+00> : vector<1x512xf32>
    %449 = tpu.matmul %447, %448, %cst_132 {dimension_numbers = #tpu.dot_dimension_numbers<[1], [0], [0], [1], [0, 0, 1, 1], [], []>} : vector<1x256xbf16>, vector<256x512xbf16>, vector<1x512xf32> -> vector<1x512xf32>
    %c0_133 = arith.constant 0 : index
    %c0_134 = arith.constant 0 : index
    %450 = vector.load %arg7[%c0_133, %c0_134] : memref<1x512xf32, #tpu.memory_space<vmem>>, vector<1x512xf32>
    %451 = arith.addf %449, %450 : vector<1x512xf32>
    %452 = vector.extract_strided_slice %451 {offsets = [0, 0], sizes = [1, 384], strides = [1, 1]} : vector<1x512xf32> to vector<1x384xf32>
    %453 = arith.negf %452 : vector<1x384xf32>
    %454 = math.exp %453 : vector<1x384xf32>
    %cst_135 = arith.constant 1.000000e+00 : f32
    %455 = vector.broadcast %cst_135 : f32 to vector<1x384xf32>
    %456 = arith.addf %455, %454 : vector<1x384xf32>
    %457 = arith.divf %455, %456 : vector<1x384xf32>
    %458 = vector.extract_strided_slice %457 {offsets = [0, 0], sizes = [1, 128], strides = [1, 1]} : vector<1x384xf32> to vector<1x128xf32>
    %459 = vector.extract_strided_slice %457 {offsets = [0, 128], sizes = [1, 128], strides = [1, 1]} : vector<1x384xf32> to vector<1x128xf32>
    %460 = vector.extract_strided_slice %457 {offsets = [0, 256], sizes = [1, 128], strides = [1, 1]} : vector<1x384xf32> to vector<1x128xf32>
    %461 = vector.extract_strided_slice %451 {offsets = [0, 384], sizes = [1, 128], strides = [1, 1]} : vector<1x512xf32> to vector<1x128xf32>
    %462 = math.tanh %461 : vector<1x128xf32>
    %463 = arith.mulf %459, %378 : vector<1x128xf32>
    %464 = arith.mulf %458, %462 : vector<1x128xf32>
    %465 = arith.addf %463, %464 : vector<1x128xf32>
    %466 = math.tanh %465 : vector<1x128xf32>
    %467 = arith.mulf %460, %466 : vector<1x128xf32>
    %468 = arith.truncf %467 : vector<1x128xf32> to vector<1x128xbf16>
    %469 = tpu.concatenate %381, %403 in 1 : vector<1x128xbf16>, vector<1x128xbf16> -> vector<1x256xbf16>
    %c0_136 = arith.constant 0 : index
    %c0_137 = arith.constant 0 : index
    %470 = vector.load %arg8[%c0_136, %c0_137] : memref<256x512xbf16, #tpu.memory_space<vmem>>, vector<256x512xbf16>
    %cst_138 = arith.constant dense<0.000000e+00> : vector<1x512xf32>
    %471 = tpu.matmul %469, %470, %cst_138 {dimension_numbers = #tpu.dot_dimension_numbers<[1], [0], [0], [1], [0, 0, 1, 1], [], []>} : vector<1x256xbf16>, vector<256x512xbf16>, vector<1x512xf32> -> vector<1x512xf32>
    %c0_139 = arith.constant 0 : index
    %c0_140 = arith.constant 0 : index
    %472 = vector.load %arg9[%c0_139, %c0_140] : memref<1x512xf32, #tpu.memory_space<vmem>>, vector<1x512xf32>
    %473 = arith.addf %471, %472 : vector<1x512xf32>
    %474 = vector.extract_strided_slice %473 {offsets = [0, 0], sizes = [1, 384], strides = [1, 1]} : vector<1x512xf32> to vector<1x384xf32>
    %475 = arith.negf %474 : vector<1x384xf32>
    %476 = math.exp %475 : vector<1x384xf32>
    %cst_141 = arith.constant 1.000000e+00 : f32
    %477 = vector.broadcast %cst_141 : f32 to vector<1x384xf32>
    %478 = arith.addf %477, %476 : vector<1x384xf32>
    %479 = arith.divf %477, %478 : vector<1x384xf32>
    %480 = vector.extract_strided_slice %479 {offsets = [0, 0], sizes = [1, 128], strides = [1, 1]} : vector<1x384xf32> to vector<1x128xf32>
    %481 = vector.extract_strided_slice %479 {offsets = [0, 128], sizes = [1, 128], strides = [1, 1]} : vector<1x384xf32> to vector<1x128xf32>
    %482 = vector.extract_strided_slice %479 {offsets = [0, 256], sizes = [1, 128], strides = [1, 1]} : vector<1x384xf32> to vector<1x128xf32>
    %483 = vector.extract_strided_slice %473 {offsets = [0, 384], sizes = [1, 128], strides = [1, 1]} : vector<1x512xf32> to vector<1x128xf32>
    %484 = math.tanh %483 : vector<1x128xf32>
    %485 = arith.mulf %481, %400 : vector<1x128xf32>
    %486 = arith.mulf %480, %484 : vector<1x128xf32>
    %487 = arith.addf %485, %486 : vector<1x128xf32>
    %488 = math.tanh %487 : vector<1x128xf32>
    %489 = arith.mulf %482, %488 : vector<1x128xf32>
    %490 = arith.truncf %489 : vector<1x128xf32> to vector<1x128xbf16>
    %c7 = arith.constant 7 : index
    %c0_142 = arith.constant 0 : index
    %491 = vector.load %arg14[%c7, %c0_142] : memref<8x512xf32, #tpu.memory_space<vmem>>, vector<1x512xf32>
    %c0_143 = arith.constant 0 : index
    %c0_144 = arith.constant 0 : index
    %492 = vector.load %arg2[%c0_143, %c0_144] : memref<128x512xbf16, #tpu.memory_space<vmem>>, vector<128x512xbf16>
    %cst_145 = arith.constant dense<0.000000e+00> : vector<1x512xf32>
    %493 = tpu.matmul %424, %492, %cst_145 {dimension_numbers = #tpu.dot_dimension_numbers<[1], [0], [0], [1], [0, 0, 1, 1], [], []>} : vector<1x128xbf16>, vector<128x512xbf16>, vector<1x512xf32> -> vector<1x512xf32>
    %494 = arith.addf %491, %493 : vector<1x512xf32>
    %495 = vector.extract_strided_slice %494 {offsets = [0, 0], sizes = [1, 384], strides = [1, 1]} : vector<1x512xf32> to vector<1x384xf32>
    %496 = arith.negf %495 : vector<1x384xf32>
    %497 = math.exp %496 : vector<1x384xf32>
    %cst_146 = arith.constant 1.000000e+00 : f32
    %498 = vector.broadcast %cst_146 : f32 to vector<1x384xf32>
    %499 = arith.addf %498, %497 : vector<1x384xf32>
    %500 = arith.divf %498, %499 : vector<1x384xf32>
    %501 = vector.extract_strided_slice %500 {offsets = [0, 0], sizes = [1, 128], strides = [1, 1]} : vector<1x384xf32> to vector<1x128xf32>
    %502 = vector.extract_strided_slice %500 {offsets = [0, 128], sizes = [1, 128], strides = [1, 1]} : vector<1x384xf32> to vector<1x128xf32>
    %503 = vector.extract_strided_slice %500 {offsets = [0, 256], sizes = [1, 128], strides = [1, 1]} : vector<1x384xf32> to vector<1x128xf32>
    %504 = vector.extract_strided_slice %494 {offsets = [0, 384], sizes = [1, 128], strides = [1, 1]} : vector<1x512xf32> to vector<1x128xf32>
    %505 = math.tanh %504 : vector<1x128xf32>
    %506 = arith.mulf %502, %421 : vector<1x128xf32>
    %507 = arith.mulf %501, %505 : vector<1x128xf32>
    %508 = arith.addf %506, %507 : vector<1x128xf32>
    %509 = math.tanh %508 : vector<1x128xf32>
    %510 = arith.mulf %503, %509 : vector<1x128xf32>
    %511 = arith.truncf %510 : vector<1x128xf32> to vector<1x128xbf16>
    %512 = tpu.concatenate %424, %446 in 1 : vector<1x128xbf16>, vector<1x128xbf16> -> vector<1x256xbf16>
    %c0_147 = arith.constant 0 : index
    %c0_148 = arith.constant 0 : index
    %513 = vector.load %arg4[%c0_147, %c0_148] : memref<256x512xbf16, #tpu.memory_space<vmem>>, vector<256x512xbf16>
    %cst_149 = arith.constant dense<0.000000e+00> : vector<1x512xf32>
    %514 = tpu.matmul %512, %513, %cst_149 {dimension_numbers = #tpu.dot_dimension_numbers<[1], [0], [0], [1], [0, 0, 1, 1], [], []>} : vector<1x256xbf16>, vector<256x512xbf16>, vector<1x512xf32> -> vector<1x512xf32>
    %c0_150 = arith.constant 0 : index
    %c0_151 = arith.constant 0 : index
    %515 = vector.load %arg5[%c0_150, %c0_151] : memref<1x512xf32, #tpu.memory_space<vmem>>, vector<1x512xf32>
    %516 = arith.addf %514, %515 : vector<1x512xf32>
    %517 = vector.extract_strided_slice %516 {offsets = [0, 0], sizes = [1, 384], strides = [1, 1]} : vector<1x512xf32> to vector<1x384xf32>
    %518 = arith.negf %517 : vector<1x384xf32>
    %519 = math.exp %518 : vector<1x384xf32>
    %cst_152 = arith.constant 1.000000e+00 : f32
    %520 = vector.broadcast %cst_152 : f32 to vector<1x384xf32>
    %521 = arith.addf %520, %519 : vector<1x384xf32>
    %522 = arith.divf %520, %521 : vector<1x384xf32>
    %523 = vector.extract_strided_slice %522 {offsets = [0, 0], sizes = [1, 128], strides = [1, 1]} : vector<1x384xf32> to vector<1x128xf32>
    %524 = vector.extract_strided_slice %522 {offsets = [0, 128], sizes = [1, 128], strides = [1, 1]} : vector<1x384xf32> to vector<1x128xf32>
    %525 = vector.extract_strided_slice %522 {offsets = [0, 256], sizes = [1, 128], strides = [1, 1]} : vector<1x384xf32> to vector<1x128xf32>
    %526 = vector.extract_strided_slice %516 {offsets = [0, 384], sizes = [1, 128], strides = [1, 1]} : vector<1x512xf32> to vector<1x128xf32>
    %527 = math.tanh %526 : vector<1x128xf32>
    %528 = arith.mulf %524, %443 : vector<1x128xf32>
    %529 = arith.mulf %523, %527 : vector<1x128xf32>
    %530 = arith.addf %528, %529 : vector<1x128xf32>
    %531 = math.tanh %530 : vector<1x128xf32>
    %532 = arith.mulf %525, %531 : vector<1x128xf32>
    %533 = arith.truncf %532 : vector<1x128xf32> to vector<1x128xbf16>
    %534 = tpu.concatenate %446, %468 in 1 : vector<1x128xbf16>, vector<1x128xbf16> -> vector<1x256xbf16>
    %c0_153 = arith.constant 0 : index
    %c0_154 = arith.constant 0 : index
    %535 = vector.load %arg6[%c0_153, %c0_154] : memref<256x512xbf16, #tpu.memory_space<vmem>>, vector<256x512xbf16>
    %cst_155 = arith.constant dense<0.000000e+00> : vector<1x512xf32>
    %536 = tpu.matmul %534, %535, %cst_155 {dimension_numbers = #tpu.dot_dimension_numbers<[1], [0], [0], [1], [0, 0, 1, 1], [], []>} : vector<1x256xbf16>, vector<256x512xbf16>, vector<1x512xf32> -> vector<1x512xf32>
    %c0_156 = arith.constant 0 : index
    %c0_157 = arith.constant 0 : index
    %537 = vector.load %arg7[%c0_156, %c0_157] : memref<1x512xf32, #tpu.memory_space<vmem>>, vector<1x512xf32>
    %538 = arith.addf %536, %537 : vector<1x512xf32>
    %539 = vector.extract_strided_slice %538 {offsets = [0, 0], sizes = [1, 384], strides = [1, 1]} : vector<1x512xf32> to vector<1x384xf32>
    %540 = arith.negf %539 : vector<1x384xf32>
    %541 = math.exp %540 : vector<1x384xf32>
    %cst_158 = arith.constant 1.000000e+00 : f32
    %542 = vector.broadcast %cst_158 : f32 to vector<1x384xf32>
    %543 = arith.addf %542, %541 : vector<1x384xf32>
    %544 = arith.divf %542, %543 : vector<1x384xf32>
    %545 = vector.extract_strided_slice %544 {offsets = [0, 0], sizes = [1, 128], strides = [1, 1]} : vector<1x384xf32> to vector<1x128xf32>
    %546 = vector.extract_strided_slice %544 {offsets = [0, 128], sizes = [1, 128], strides = [1, 1]} : vector<1x384xf32> to vector<1x128xf32>
    %547 = vector.extract_strided_slice %544 {offsets = [0, 256], sizes = [1, 128], strides = [1, 1]} : vector<1x384xf32> to vector<1x128xf32>
    %548 = vector.extract_strided_slice %538 {offsets = [0, 384], sizes = [1, 128], strides = [1, 1]} : vector<1x512xf32> to vector<1x128xf32>
    %549 = math.tanh %548 : vector<1x128xf32>
    %550 = arith.mulf %546, %465 : vector<1x128xf32>
    %551 = arith.mulf %545, %549 : vector<1x128xf32>
    %552 = arith.addf %550, %551 : vector<1x128xf32>
    %553 = math.tanh %552 : vector<1x128xf32>
    %554 = arith.mulf %547, %553 : vector<1x128xf32>
    %555 = arith.truncf %554 : vector<1x128xf32> to vector<1x128xbf16>
    %556 = tpu.concatenate %468, %490 in 1 : vector<1x128xbf16>, vector<1x128xbf16> -> vector<1x256xbf16>
    %c0_159 = arith.constant 0 : index
    %c0_160 = arith.constant 0 : index
    %557 = vector.load %arg8[%c0_159, %c0_160] : memref<256x512xbf16, #tpu.memory_space<vmem>>, vector<256x512xbf16>
    %cst_161 = arith.constant dense<0.000000e+00> : vector<1x512xf32>
    %558 = tpu.matmul %556, %557, %cst_161 {dimension_numbers = #tpu.dot_dimension_numbers<[1], [0], [0], [1], [0, 0, 1, 1], [], []>} : vector<1x256xbf16>, vector<256x512xbf16>, vector<1x512xf32> -> vector<1x512xf32>
    %c0_162 = arith.constant 0 : index
    %c0_163 = arith.constant 0 : index
    %559 = vector.load %arg9[%c0_162, %c0_163] : memref<1x512xf32, #tpu.memory_space<vmem>>, vector<1x512xf32>
    %560 = arith.addf %558, %559 : vector<1x512xf32>
    %561 = vector.extract_strided_slice %560 {offsets = [0, 0], sizes = [1, 384], strides = [1, 1]} : vector<1x512xf32> to vector<1x384xf32>
    %562 = arith.negf %561 : vector<1x384xf32>
    %563 = math.exp %562 : vector<1x384xf32>
    %cst_164 = arith.constant 1.000000e+00 : f32
    %564 = vector.broadcast %cst_164 : f32 to vector<1x384xf32>
    %565 = arith.addf %564, %563 : vector<1x384xf32>
    %566 = arith.divf %564, %565 : vector<1x384xf32>
    %567 = vector.extract_strided_slice %566 {offsets = [0, 0], sizes = [1, 128], strides = [1, 1]} : vector<1x384xf32> to vector<1x128xf32>
    %568 = vector.extract_strided_slice %566 {offsets = [0, 128], sizes = [1, 128], strides = [1, 1]} : vector<1x384xf32> to vector<1x128xf32>
    %569 = vector.extract_strided_slice %566 {offsets = [0, 256], sizes = [1, 128], strides = [1, 1]} : vector<1x384xf32> to vector<1x128xf32>
    %570 = vector.extract_strided_slice %560 {offsets = [0, 384], sizes = [1, 128], strides = [1, 1]} : vector<1x512xf32> to vector<1x128xf32>
    %571 = math.tanh %570 : vector<1x128xf32>
    %572 = arith.mulf %568, %487 : vector<1x128xf32>
    %573 = arith.mulf %567, %571 : vector<1x128xf32>
    %574 = arith.addf %572, %573 : vector<1x128xf32>
    %575 = math.tanh %574 : vector<1x128xf32>
    %576 = arith.mulf %569, %575 : vector<1x128xf32>
    %577 = arith.truncf %576 : vector<1x128xf32> to vector<1x128xbf16>
    %578 = tpu.concatenate %511, %533 in 1 : vector<1x128xbf16>, vector<1x128xbf16> -> vector<1x256xbf16>
    %c0_165 = arith.constant 0 : index
    %c0_166 = arith.constant 0 : index
    %579 = vector.load %arg4[%c0_165, %c0_166] : memref<256x512xbf16, #tpu.memory_space<vmem>>, vector<256x512xbf16>
    %cst_167 = arith.constant dense<0.000000e+00> : vector<1x512xf32>
    %580 = tpu.matmul %578, %579, %cst_167 {dimension_numbers = #tpu.dot_dimension_numbers<[1], [0], [0], [1], [0, 0, 1, 1], [], []>} : vector<1x256xbf16>, vector<256x512xbf16>, vector<1x512xf32> -> vector<1x512xf32>
    %c0_168 = arith.constant 0 : index
    %c0_169 = arith.constant 0 : index
    %581 = vector.load %arg5[%c0_168, %c0_169] : memref<1x512xf32, #tpu.memory_space<vmem>>, vector<1x512xf32>
    %582 = arith.addf %580, %581 : vector<1x512xf32>
    %583 = vector.extract_strided_slice %582 {offsets = [0, 0], sizes = [1, 384], strides = [1, 1]} : vector<1x512xf32> to vector<1x384xf32>
    %584 = arith.negf %583 : vector<1x384xf32>
    %585 = math.exp %584 : vector<1x384xf32>
    %cst_170 = arith.constant 1.000000e+00 : f32
    %586 = vector.broadcast %cst_170 : f32 to vector<1x384xf32>
    %587 = arith.addf %586, %585 : vector<1x384xf32>
    %588 = arith.divf %586, %587 : vector<1x384xf32>
    %589 = vector.extract_strided_slice %588 {offsets = [0, 0], sizes = [1, 128], strides = [1, 1]} : vector<1x384xf32> to vector<1x128xf32>
    %590 = vector.extract_strided_slice %588 {offsets = [0, 128], sizes = [1, 128], strides = [1, 1]} : vector<1x384xf32> to vector<1x128xf32>
    %591 = vector.extract_strided_slice %588 {offsets = [0, 256], sizes = [1, 128], strides = [1, 1]} : vector<1x384xf32> to vector<1x128xf32>
    %592 = vector.extract_strided_slice %582 {offsets = [0, 384], sizes = [1, 128], strides = [1, 1]} : vector<1x512xf32> to vector<1x128xf32>
    %593 = math.tanh %592 : vector<1x128xf32>
    %594 = arith.mulf %590, %530 : vector<1x128xf32>
    %595 = arith.mulf %589, %593 : vector<1x128xf32>
    %596 = arith.addf %594, %595 : vector<1x128xf32>
    %597 = math.tanh %596 : vector<1x128xf32>
    %598 = arith.mulf %591, %597 : vector<1x128xf32>
    %599 = arith.truncf %598 : vector<1x128xf32> to vector<1x128xbf16>
    %600 = tpu.concatenate %533, %555 in 1 : vector<1x128xbf16>, vector<1x128xbf16> -> vector<1x256xbf16>
    %c0_171 = arith.constant 0 : index
    %c0_172 = arith.constant 0 : index
    %601 = vector.load %arg6[%c0_171, %c0_172] : memref<256x512xbf16, #tpu.memory_space<vmem>>, vector<256x512xbf16>
    %cst_173 = arith.constant dense<0.000000e+00> : vector<1x512xf32>
    %602 = tpu.matmul %600, %601, %cst_173 {dimension_numbers = #tpu.dot_dimension_numbers<[1], [0], [0], [1], [0, 0, 1, 1], [], []>} : vector<1x256xbf16>, vector<256x512xbf16>, vector<1x512xf32> -> vector<1x512xf32>
    %c0_174 = arith.constant 0 : index
    %c0_175 = arith.constant 0 : index
    %603 = vector.load %arg7[%c0_174, %c0_175] : memref<1x512xf32, #tpu.memory_space<vmem>>, vector<1x512xf32>
    %604 = arith.addf %602, %603 : vector<1x512xf32>
    %605 = vector.extract_strided_slice %604 {offsets = [0, 0], sizes = [1, 384], strides = [1, 1]} : vector<1x512xf32> to vector<1x384xf32>
    %606 = arith.negf %605 : vector<1x384xf32>
    %607 = math.exp %606 : vector<1x384xf32>
    %cst_176 = arith.constant 1.000000e+00 : f32
    %608 = vector.broadcast %cst_176 : f32 to vector<1x384xf32>
    %609 = arith.addf %608, %607 : vector<1x384xf32>
    %610 = arith.divf %608, %609 : vector<1x384xf32>
    %611 = vector.extract_strided_slice %610 {offsets = [0, 0], sizes = [1, 128], strides = [1, 1]} : vector<1x384xf32> to vector<1x128xf32>
    %612 = vector.extract_strided_slice %610 {offsets = [0, 128], sizes = [1, 128], strides = [1, 1]} : vector<1x384xf32> to vector<1x128xf32>
    %613 = vector.extract_strided_slice %610 {offsets = [0, 256], sizes = [1, 128], strides = [1, 1]} : vector<1x384xf32> to vector<1x128xf32>
    %614 = vector.extract_strided_slice %604 {offsets = [0, 384], sizes = [1, 128], strides = [1, 1]} : vector<1x512xf32> to vector<1x128xf32>
    %615 = math.tanh %614 : vector<1x128xf32>
    %616 = arith.mulf %612, %552 : vector<1x128xf32>
    %617 = arith.mulf %611, %615 : vector<1x128xf32>
    %618 = arith.addf %616, %617 : vector<1x128xf32>
    %619 = math.tanh %618 : vector<1x128xf32>
    %620 = arith.mulf %613, %619 : vector<1x128xf32>
    %621 = arith.truncf %620 : vector<1x128xf32> to vector<1x128xbf16>
    %622 = tpu.concatenate %555, %577 in 1 : vector<1x128xbf16>, vector<1x128xbf16> -> vector<1x256xbf16>
    %c0_177 = arith.constant 0 : index
    %c0_178 = arith.constant 0 : index
    %623 = vector.load %arg8[%c0_177, %c0_178] : memref<256x512xbf16, #tpu.memory_space<vmem>>, vector<256x512xbf16>
    %cst_179 = arith.constant dense<0.000000e+00> : vector<1x512xf32>
    %624 = tpu.matmul %622, %623, %cst_179 {dimension_numbers = #tpu.dot_dimension_numbers<[1], [0], [0], [1], [0, 0, 1, 1], [], []>} : vector<1x256xbf16>, vector<256x512xbf16>, vector<1x512xf32> -> vector<1x512xf32>
    %c0_180 = arith.constant 0 : index
    %c0_181 = arith.constant 0 : index
    %625 = vector.load %arg9[%c0_180, %c0_181] : memref<1x512xf32, #tpu.memory_space<vmem>>, vector<1x512xf32>
    %626 = arith.addf %624, %625 : vector<1x512xf32>
    %627 = vector.extract_strided_slice %626 {offsets = [0, 0], sizes = [1, 384], strides = [1, 1]} : vector<1x512xf32> to vector<1x384xf32>
    %628 = arith.negf %627 : vector<1x384xf32>
    %629 = math.exp %628 : vector<1x384xf32>
    %cst_182 = arith.constant 1.000000e+00 : f32
    %630 = vector.broadcast %cst_182 : f32 to vector<1x384xf32>
    %631 = arith.addf %630, %629 : vector<1x384xf32>
    %632 = arith.divf %630, %631 : vector<1x384xf32>
    %633 = vector.extract_strided_slice %632 {offsets = [0, 0], sizes = [1, 128], strides = [1, 1]} : vector<1x384xf32> to vector<1x128xf32>
    %634 = vector.extract_strided_slice %632 {offsets = [0, 128], sizes = [1, 128], strides = [1, 1]} : vector<1x384xf32> to vector<1x128xf32>
    %635 = vector.extract_strided_slice %632 {offsets = [0, 256], sizes = [1, 128], strides = [1, 1]} : vector<1x384xf32> to vector<1x128xf32>
    %636 = vector.extract_strided_slice %626 {offsets = [0, 384], sizes = [1, 128], strides = [1, 1]} : vector<1x512xf32> to vector<1x128xf32>
    %637 = math.tanh %636 : vector<1x128xf32>
    %638 = arith.mulf %634, %574 : vector<1x128xf32>
    %639 = arith.mulf %633, %637 : vector<1x128xf32>
    %640 = arith.addf %638, %639 : vector<1x128xf32>
    %641 = math.tanh %640 : vector<1x128xf32>
    %642 = arith.mulf %635, %641 : vector<1x128xf32>
    %643 = arith.truncf %642 : vector<1x128xf32> to vector<1x128xbf16>
    %644 = tpu.concatenate %599, %621 in 1 : vector<1x128xbf16>, vector<1x128xbf16> -> vector<1x256xbf16>
    %c0_183 = arith.constant 0 : index
    %c0_184 = arith.constant 0 : index
    %645 = vector.load %arg6[%c0_183, %c0_184] : memref<256x512xbf16, #tpu.memory_space<vmem>>, vector<256x512xbf16>
    %cst_185 = arith.constant dense<0.000000e+00> : vector<1x512xf32>
    %646 = tpu.matmul %644, %645, %cst_185 {dimension_numbers = #tpu.dot_dimension_numbers<[1], [0], [0], [1], [0, 0, 1, 1], [], []>} : vector<1x256xbf16>, vector<256x512xbf16>, vector<1x512xf32> -> vector<1x512xf32>
    %c0_186 = arith.constant 0 : index
    %c0_187 = arith.constant 0 : index
    %647 = vector.load %arg7[%c0_186, %c0_187] : memref<1x512xf32, #tpu.memory_space<vmem>>, vector<1x512xf32>
    %648 = arith.addf %646, %647 : vector<1x512xf32>
    %649 = vector.extract_strided_slice %648 {offsets = [0, 0], sizes = [1, 384], strides = [1, 1]} : vector<1x512xf32> to vector<1x384xf32>
    %650 = arith.negf %649 : vector<1x384xf32>
    %651 = math.exp %650 : vector<1x384xf32>
    %cst_188 = arith.constant 1.000000e+00 : f32
    %652 = vector.broadcast %cst_188 : f32 to vector<1x384xf32>
    %653 = arith.addf %652, %651 : vector<1x384xf32>
    %654 = arith.divf %652, %653 : vector<1x384xf32>
    %655 = vector.extract_strided_slice %654 {offsets = [0, 0], sizes = [1, 128], strides = [1, 1]} : vector<1x384xf32> to vector<1x128xf32>
    %656 = vector.extract_strided_slice %654 {offsets = [0, 128], sizes = [1, 128], strides = [1, 1]} : vector<1x384xf32> to vector<1x128xf32>
    %657 = vector.extract_strided_slice %654 {offsets = [0, 256], sizes = [1, 128], strides = [1, 1]} : vector<1x384xf32> to vector<1x128xf32>
    %658 = vector.extract_strided_slice %648 {offsets = [0, 384], sizes = [1, 128], strides = [1, 1]} : vector<1x512xf32> to vector<1x128xf32>
    %659 = math.tanh %658 : vector<1x128xf32>
    %660 = arith.mulf %656, %618 : vector<1x128xf32>
    %661 = arith.mulf %655, %659 : vector<1x128xf32>
    %662 = arith.addf %660, %661 : vector<1x128xf32>
    %663 = math.tanh %662 : vector<1x128xf32>
    %664 = arith.mulf %657, %663 : vector<1x128xf32>
    %665 = arith.truncf %664 : vector<1x128xf32> to vector<1x128xbf16>
    %666 = tpu.concatenate %621, %643 in 1 : vector<1x128xbf16>, vector<1x128xbf16> -> vector<1x256xbf16>
    %c0_189 = arith.constant 0 : index
    %c0_190 = arith.constant 0 : index
    %667 = vector.load %arg8[%c0_189, %c0_190] : memref<256x512xbf16, #tpu.memory_space<vmem>>, vector<256x512xbf16>
    %cst_191 = arith.constant dense<0.000000e+00> : vector<1x512xf32>
    %668 = tpu.matmul %666, %667, %cst_191 {dimension_numbers = #tpu.dot_dimension_numbers<[1], [0], [0], [1], [0, 0, 1, 1], [], []>} : vector<1x256xbf16>, vector<256x512xbf16>, vector<1x512xf32> -> vector<1x512xf32>
    %c0_192 = arith.constant 0 : index
    %c0_193 = arith.constant 0 : index
    %669 = vector.load %arg9[%c0_192, %c0_193] : memref<1x512xf32, #tpu.memory_space<vmem>>, vector<1x512xf32>
    %670 = arith.addf %668, %669 : vector<1x512xf32>
    %671 = vector.extract_strided_slice %670 {offsets = [0, 0], sizes = [1, 384], strides = [1, 1]} : vector<1x512xf32> to vector<1x384xf32>
    %672 = arith.negf %671 : vector<1x384xf32>
    %673 = math.exp %672 : vector<1x384xf32>
    %cst_194 = arith.constant 1.000000e+00 : f32
    %674 = vector.broadcast %cst_194 : f32 to vector<1x384xf32>
    %675 = arith.addf %674, %673 : vector<1x384xf32>
    %676 = arith.divf %674, %675 : vector<1x384xf32>
    %677 = vector.extract_strided_slice %676 {offsets = [0, 0], sizes = [1, 128], strides = [1, 1]} : vector<1x384xf32> to vector<1x128xf32>
    %678 = vector.extract_strided_slice %676 {offsets = [0, 128], sizes = [1, 128], strides = [1, 1]} : vector<1x384xf32> to vector<1x128xf32>
    %679 = vector.extract_strided_slice %676 {offsets = [0, 256], sizes = [1, 128], strides = [1, 1]} : vector<1x384xf32> to vector<1x128xf32>
    %680 = vector.extract_strided_slice %670 {offsets = [0, 384], sizes = [1, 128], strides = [1, 1]} : vector<1x512xf32> to vector<1x128xf32>
    %681 = math.tanh %680 : vector<1x128xf32>
    %682 = arith.mulf %678, %640 : vector<1x128xf32>
    %683 = arith.mulf %677, %681 : vector<1x128xf32>
    %684 = arith.addf %682, %683 : vector<1x128xf32>
    %685 = math.tanh %684 : vector<1x128xf32>
    %686 = arith.mulf %679, %685 : vector<1x128xf32>
    %687 = arith.truncf %686 : vector<1x128xf32> to vector<1x128xbf16>
    %688 = tpu.concatenate %665, %687 in 1 : vector<1x128xbf16>, vector<1x128xbf16> -> vector<1x256xbf16>
    %c0_195 = arith.constant 0 : index
    %c0_196 = arith.constant 0 : index
    %689 = vector.load %arg8[%c0_195, %c0_196] : memref<256x512xbf16, #tpu.memory_space<vmem>>, vector<256x512xbf16>
    %cst_197 = arith.constant dense<0.000000e+00> : vector<1x512xf32>
    %690 = tpu.matmul %688, %689, %cst_197 {dimension_numbers = #tpu.dot_dimension_numbers<[1], [0], [0], [1], [0, 0, 1, 1], [], []>} : vector<1x256xbf16>, vector<256x512xbf16>, vector<1x512xf32> -> vector<1x512xf32>
    %c0_198 = arith.constant 0 : index
    %c0_199 = arith.constant 0 : index
    %691 = vector.load %arg9[%c0_198, %c0_199] : memref<1x512xf32, #tpu.memory_space<vmem>>, vector<1x512xf32>
    %692 = arith.addf %690, %691 : vector<1x512xf32>
    %693 = vector.extract_strided_slice %692 {offsets = [0, 0], sizes = [1, 384], strides = [1, 1]} : vector<1x512xf32> to vector<1x384xf32>
    %694 = arith.negf %693 : vector<1x384xf32>
    %695 = math.exp %694 : vector<1x384xf32>
    %cst_200 = arith.constant 1.000000e+00 : f32
    %696 = vector.broadcast %cst_200 : f32 to vector<1x384xf32>
    %697 = arith.addf %696, %695 : vector<1x384xf32>
    %698 = arith.divf %696, %697 : vector<1x384xf32>
    %699 = vector.extract_strided_slice %698 {offsets = [0, 0], sizes = [1, 128], strides = [1, 1]} : vector<1x384xf32> to vector<1x128xf32>
    %700 = vector.extract_strided_slice %698 {offsets = [0, 128], sizes = [1, 128], strides = [1, 1]} : vector<1x384xf32> to vector<1x128xf32>
    %701 = vector.extract_strided_slice %698 {offsets = [0, 256], sizes = [1, 128], strides = [1, 1]} : vector<1x384xf32> to vector<1x128xf32>
    %702 = vector.extract_strided_slice %692 {offsets = [0, 384], sizes = [1, 128], strides = [1, 1]} : vector<1x512xf32> to vector<1x128xf32>
    %703 = math.tanh %702 : vector<1x128xf32>
    %704 = arith.mulf %700, %684 : vector<1x128xf32>
    %705 = arith.mulf %699, %703 : vector<1x128xf32>
    %706 = arith.addf %704, %705 : vector<1x128xf32>
    %707 = math.tanh %706 : vector<1x128xf32>
    %708 = arith.mulf %701, %707 : vector<1x128xf32>
    %c0_201 = arith.constant 0 : index
    %c0_202 = arith.constant 0 : index
    %709 = vector.load %arg10[%c0_201, %c0_202] : memref<128x128xf32, #tpu.memory_space<vmem>>, vector<128x128xf32>
    %cst_203 = arith.constant dense<0.000000e+00> : vector<1x128xf32>
    %710 = tpu.matmul %708, %709, %cst_203 {dimension_numbers = #tpu.dot_dimension_numbers<[1], [0], [0], [1], [0, 0, 1, 1], [], []>} : vector<1x128xf32>, vector<128x128xf32>, vector<1x128xf32> -> vector<1x128xf32>
    %c0_204 = arith.constant 0 : index
    %c0_205 = arith.constant 0 : index
    %711 = vector.load %arg11[%c0_204, %c0_205] : memref<1x128xf32, #tpu.memory_space<vmem>>, vector<1x128xf32>
    %712 = arith.addf %710, %711 : vector<1x128xf32>
    %cst_206 = arith.constant dense<0xFF800000> : vector<1xf32>
    %713 = vector.multi_reduction <maximumf>, %712, %cst_206 [1] : vector<1x128xf32> to vector<1xf32>
    %714 = vector.shape_cast %713 : vector<1xf32> to vector<1x1xf32>
    %715 = vector.broadcast %714 : vector<1x1xf32> to vector<1x128xf32>
    %716 = arith.subf %712, %715 : vector<1x128xf32>
    %717 = math.exp %716 : vector<1x128xf32>
    %cst_207 = arith.constant dense<0.000000e+00> : vector<1xf32>
    %718 = vector.multi_reduction <add>, %717, %cst_207 [1] : vector<1x128xf32> to vector<1xf32>
    %719 = vector.shape_cast %718 : vector<1xf32> to vector<1x1xf32>
    %720 = vector.broadcast %719 : vector<1x1xf32> to vector<1x128xf32>
    %721 = arith.divf %717, %720 : vector<1x128xf32>
    %c0_208 = arith.constant 0 : index
    %c0_209 = arith.constant 0 : index
    %722 = vector.load %arg12[%c0_208, %c0_209] : memref<1x128xf32, #tpu.memory_space<vmem>>, vector<1x128xf32>
    tpu.vector_store %arg12[%c0_208, %c0_209], %721 {strides = array<i32>} : memref<1x128xf32, #tpu.memory_space<vmem>>, vector<1x128xf32>,
    return
  }
}

</mosaic_0001>

<bundles_post_ra>
// kernel: rnn_forward.1
= control target key start
LH: loop header
LB: loop body
LE: loop exit
PB: predicated region body
PF: predicated region fallthrough
CT: control target
= control target key end

     0   :  { %17 = vsyncpa [#allocation5], 0  ;;  %s14013_s0 = inlined_call_operand.hbm [shape: f32[8,1000], index: 0, kind: input, shape index: {}]   ;;  %s14014_s1 = inlined_call_operand.hbm [shape: bf16[1024,512], index: 1, kind: input, shape index: {}]   ;;  %s14015_s2 = inlined_call_operand.hbm [shape: bf16[128,512], index: 2, kind: input, shape index: {}]   ;;  %s14016_s3 = inlined_call_operand.hbm [shape: f32[1,512], index: 3, kind: input, shape index: {}]   ;;  %s14017_s4 = inlined_call_operand.hbm [shape: bf16[256,512], index: 4, kind: input, shape index: {}]   ;;  %s14018_s5 = inlined_call_operand.vmem [shape: f32[1,512], index: 5, kind: input, shape index: {}]   ;;  %s14019_s6 = inlined_call_operand.hbm [shape: bf16[256,512], index: 6, kind: input, shape index: {}]   ;;  %s14020_s7 = inlined_call_operand.vmem [shape: f32[1,512], index: 7, kind: input, shape index: {}]   ;;  %s14021_s8 = inlined_call_operand.hbm [shape: bf16[256,512], index: 8, kind: input, shape index: {}]   ;;  %s14022_s9 = inlined_call_operand.vmem [shape: f32[1,512], index: 9, kind: input, shape index: {}]   ;;  %s14023_s10 = inlined_call_operand.hbm [shape: f32[128,128], index: 10, kind: input, shape index: {}]   ;;  %s14024_s11 = inlined_call_operand.hbm [shape: f32[1,128], index: 11, kind: input, shape index: {}]   ;;  %s14025_s12 = inlined_call_operand.hbm [shape: f32[1,128], index: 12, kind: output, shape index: {}]  }
   0x1   :  { %18 = vsyncpa [#allocation8], 0 }
   0x2   :  { %19 = vsyncpa [#allocation11], 0 }
   0x3   :  { %20 = vsyncpa [#allocation14], 0 }
   0x4   :  { %21 = vsyncpa [#allocation17], 0 }
   0x5   :  { %22 = vsyncpa [#allocation6], 0  ;;  %s9951_s21 = smov [#allocation7]  }
   0x6   :  { %s38_s22 = sshll.u32 %s9951_s21, 4  ;;  %s39_s22 = int_to_ptr.vmem [resolvable:$true] %s38_s22 }
   0x7   :  { %s9747_s23 = scalar_lea.vmem %s39_s22, 32768  ;;  %p9752_p1 = scmp.lt.s32.totalorder %s39_s22, %s39_s22 }
   0x8   :  { %p9748_p0 = scmp.ne.s32.totalorder %s39_s22, %s9747_s23  ;;  %p9753_p2 = scmp.lt.s32.totalorder %s9747_s23, %s9747_s23 }
   0xa   :  { %p9754_p3 = por %p9753_p2, %p9752_p1 }
   0xc   :  { %p9755_p4 = pnand %p9754_p3, %p9748_p0 }
   0xe   :  { %9758 = shalt.err (!%p9755_p4)
}
   0xf   :  { %s9952_s24 = smov 256   ;;  %s9953_s25 = smov 16  }
  0x10   :  { %44 = dma.hbm_to_vmem [thread:$0]  %s14014_s1, 32768, %s39_s22, [#allocation8], %s9952_s24, %s9952_s24, %s9953_s25  }
  0x11   :  { %s9954_s28 = smov [#allocation10]   ;;  %s9955_s30 = smov [#allocation13]  }
  0x12   :  { %s63_s29 = sshll.u32 %s9954_s28, 4  ;;  %s86_s13 = sshll.u32 %s9955_s30, 4  ;;  %s64_s29 = int_to_ptr.vmem [resolvable:$true] %s63_s29  ;;  %s87_s13 = int_to_ptr.vmem [resolvable:$true] %s86_s13 }
  0x13   :  { %s9767_s14 = scalar_lea.vmem %s64_s29, 64  ;;  %p9772_p6 = scmp.lt.s32.totalorder %s64_s29, %s64_s29 }
  0x14   :  { %p9768_p5 = scmp.ne.s32.totalorder %s64_s29, %s9767_s14  ;;  %p9773_p7 = scmp.lt.s32.totalorder %s9767_s14, %s9767_s14 }
  0x16   :  { %p9774_p8 = por %p9773_p7, %p9772_p6 }
  0x18   :  { %p9775_p9 = pnand %p9774_p8, %p9768_p5 }
  0x1a   :  { %9778 = shalt.err (!%p9775_p9)
}
  0x1b   :  { %66 = dma.hbm_to_vmem [thread:$0]  %s14016_s3, 64, %s64_s29, [#allocation11]  }
  0x1c   :  { %s9787_s17 = scalar_lea.vmem %s87_s13, 8192  ;;  %p9792_p11 = scmp.lt.s32.totalorder %s87_s13, %s87_s13 }
  0x1d   :  { %p9788_p10 = scmp.ne.s32.totalorder %s87_s13, %s9787_s17  ;;  %p9793_p12 = scmp.lt.s32.totalorder %s9787_s17, %s9787_s17 }
  0x1f   :  { %p9794_p13 = por %p9793_p12, %p9792_p11 }
  0x21   :  { %p9795_p0 = pnand %p9794_p13, %p9788_p10 }
  0x23   :  { %9798 = shalt.err (!%p9795_p0)
}
  0x24   :  { %92 = dma.hbm_to_vmem [thread:$0]  %s14019_s6, 8192, %s87_s13, [#allocation14], %s9952_s24, %s9952_s24, %s9953_s25  }
  0x25   :  { %s9956_s19 = smov [#allocation16]  }
  0x26   :  { %s114_s20 = sshll.u32 %s9956_s19, 4  ;;  %s115_s20 = int_to_ptr.vmem [resolvable:$true] %s114_s20 }
  0x27   :  { %s9807_s21 = scalar_lea.vmem %s115_s20, 2048  ;;  %p9812_p2 = scmp.lt.s32.totalorder %s115_s20, %s115_s20 }
  0x28   :  { %p9808_p1 = scmp.ne.s32.totalorder %s115_s20, %s9807_s21  ;;  %p9813_p3 = scmp.lt.s32.totalorder %s9807_s21, %s9807_s21 }
  0x2a   :  { %p9814_p4 = por %p9813_p3, %p9812_p2 }
  0x2c   :  { %p9815_p5 = pnand %p9814_p4, %p9808_p1 }
  0x2e   :  { %9818 = shalt.err (!%p9815_p5)
}
  0x2f   :  { %s9957_s3 = smov 128   ;;  %s9958_s22 = smov 8  }
  0x30   :  { %120 = dma.hbm_to_vmem [thread:$0]  %s14023_s10, 2048, %s115_s20, [#allocation17], %s9957_s3, %s9957_s3, %s9958_s22  }
  0x31   :  { %s9959_s27 = smov [#allocation4]   ;;  %s9960_s29 = smov [#allocation9]  }
  0x32   :  { %s29_s28 = sshll.u32 %s9959_s27, 4  ;;  %s50_s6 = sshll.u32 %s9960_s29, 4  ;;  %s30_s28 = int_to_ptr.vmem [resolvable:$true] %s29_s28  ;;  %s51_s6 = int_to_ptr.vmem [resolvable:$true] %s50_s6 }
  0x33   :  { %s9827_s30 = scalar_lea.vmem %s30_s28, 1024  ;;  %p9832_p7 = scmp.lt.s32.totalorder %s30_s28, %s30_s28 }
  0x34   :  { %p9828_p6 = scmp.ne.s32.totalorder %s30_s28, %s9827_s30  ;;  %p9833_p8 = scmp.lt.s32.totalorder %s9827_s30, %s9827_s30 }
  0x36   :  { %p9834_p9 = por %p9833_p8, %p9832_p7 }
  0x38   :  { %p9835_p10 = pnand %p9834_p9, %p9828_p6 }
  0x3a   :  { %9838 = shalt.err (!%p9835_p10)
}
  0x3b   :  { %32 = dma.hbm_to_vmem [thread:$0]  %s14013_s0, 1024, %s30_s28, [#allocation5]  }
  0x3c   :  { %s9847_s15 = scalar_lea.vmem %s51_s6, 4096  ;;  %p9852_p12 = scmp.lt.s32.totalorder %s51_s6, %s51_s6 }
  0x3d   :  { %p9848_p11 = scmp.ne.s32.totalorder %s51_s6, %s9847_s15  ;;  %p9853_p13 = scmp.lt.s32.totalorder %s9847_s15, %s9847_s15 }
  0x3f   :  { %p9854_p0 = por %p9853_p13, %p9852_p12 }
  0x41   :  { %p9855_p1 = pnand %p9854_p0, %p9848_p11 }
  0x43   :  { %9858 = shalt.err (!%p9855_p1)
}
  0x44   :  { %56 = dma.hbm_to_vmem [thread:$0]  %s14015_s2, 4096, %s51_s6, [#allocation8], %s9952_s24, %s9952_s24, %s9953_s25  }
  0x45   :  { %s9961_s17 = smov [#allocation12]   ;;  %s9962_s18 = smov [#allocation15]  }
  0x46   :  { %s72_s1 = sshll.u32 %s9961_s17, 4  ;;  %s100_s19 = sshll.u32 %s9962_s18, 4  ;;  %s73_s1 = int_to_ptr.vmem [resolvable:$true] %s72_s1  ;;  %s101_s19 = int_to_ptr.vmem [resolvable:$true] %s100_s19 }
  0x47   :  { %s9867_s0 = scalar_lea.vmem %s73_s1, 8192  ;;  %p9872_p3 = scmp.lt.s32.totalorder %s73_s1, %s73_s1 }
  0x48   :  { %p9868_p2 = scmp.ne.s32.totalorder %s73_s1, %s9867_s0  ;;  %p9873_p4 = scmp.lt.s32.totalorder %s9867_s0, %s9867_s0 }
  0x4a   :  { %p9874_p5 = por %p9873_p4, %p9872_p3 }
  0x4c   :  { %p9875_p6 = pnand %p9874_p5, %p9868_p2 }
  0x4e   :  { %9878 = shalt.err (!%p9875_p6)
}
  0x4f   :  { %78 = dma.hbm_to_vmem [thread:$0]  %s14017_s4, 8192, %s73_s1, [#allocation11], %s9952_s24, %s9952_s24, %s9953_s25  }
  0x50   :  { %s9887_s2 = scalar_lea.vmem %s101_s19, 8192  ;;  %p9892_p8 = scmp.lt.s32.totalorder %s101_s19, %s101_s19 }
  0x51   :  { %p9888_p7 = scmp.ne.s32.totalorder %s101_s19, %s9887_s2  ;;  %p9893_p9 = scmp.lt.s32.totalorder %s9887_s2, %s9887_s2 }
  0x53   :  { %p9894_p10 = por %p9893_p9, %p9892_p8 }
  0x55   :  { %p9895_p11 = pnand %p9894_p10, %p9888_p7 }
  0x57   :  { %9898 = shalt.err (!%p9895_p11)
}
  0x58   :  { %106 = dma.hbm_to_vmem [thread:$0]  %s14021_s8, 8192, %s101_s19, [#allocation14], %s9952_s24, %s9952_s24, %s9953_s25  }
  0x59   :  { %s9963_s23 = smov [#allocation18]  }
  0x5a   :  { %s127_s26 = sshll.u32 %s9963_s23, 4  ;;  %s128_s26 = int_to_ptr.vmem [resolvable:$true] %s127_s26 }
  0x5b   :  { %s9907_s27 = scalar_lea.vmem %s128_s26, 16  ;;  %s9911_s4 = scalar_lea.vmem %s128_s26, 32 }
  0x5c   :  { %p9908_p12 = scmp.ne.s32.totalorder %s128_s26, %s9907_s27  ;;  %p9912_p13 = scmp.lt.s32.totalorder %s128_s26, %s128_s26 }
  0x5d   :  { %p9913_p0 = scmp.lt.s32.totalorder %s9911_s4, %s9907_s27 }
  0x5f   :  { %p9914_p1 = por %p9913_p0, %p9912_p13 }
  0x61   :  { %p9915_p2 = pnand %p9914_p1, %p9908_p12 }
  0x63   :  { %9918 = shalt.err (!%p9915_p2)
}
  0x64   :  { %130 = dma.hbm_to_vmem [thread:$0]  %s14024_s11, 16, %s128_s26, [#allocation17]  }
  0x65   :  { %9939 = dma.done.wait [#allocation5], 1024  }
  0x66   :  { %9940 = vsyncadd [#allocation5], 4294966272 }
  0x67   :  { %9941 = dma.done.wait [#allocation8], 36864  }
  0x68   :  { %9942 = vsyncadd [#allocation8], 4294930432 }
  0x69   :  { %9943 = dma.done.wait [#allocation11], 8256  }
  0x6a   :  { %9944 = vsyncadd [#allocation11], 4294959040 }
  0x6b   :  { %9945 = dma.done.wait [#allocation14], 16384  }
  0x6c   :  { %9946 = vsyncadd [#allocation14], 4294950912 }
  0x6d   :  { %9947 = dma.done.wait [#allocation17], 2064  }
  0x6e   :  { %9948 = vsyncadd [#allocation17], 4294965232  ;;  %v14026_v0 = vmov 0.0   ;;  %v7895_v1 = vld [vmem:[#allocation7 + $0xe4] ss:$16 sps:$4 sm:$0xff]   ;;  %v168_v49 = vld [vmem:[#allocation4 + $0x8] sm:$0xff] }
  0x6f   :  { %166 = vst [vmem:[#allocation2 + $0x38] sm:$0xff] %v14026_v0  ;;  %v7897_v2 = vld [vmem:[#allocation7 + $0x2e4] ss:$16 sps:$4 sm:$0xff]   ;;  %1758 = vmatprep.subr.bf16.mxu0 %v7895_v1  ;;  %v7899_v3 = vld [vmem:[#allocation7 + $0xe0] ss:$16 sps:$4 sm:$0xff]   ;;  %v10077_v50 = vpack.c.bf16 %v168_v49, %v168_v49  ;;  %v170_v51 = vld [vmem:[#allocation4 + $0x18] sm:$0xff] }
  0x70   :  { %v7900_v4 = vld [vmem:[#allocation7 + $0x2e0] ss:$16 sps:$4 sm:$0xff]   ;;  %1799 = vmatprep.subr.bf16.mxu1 %v7897_v2  ;;  %v7901_v5 = vld [vmem:[#allocation7 + $0xc4] ss:$16 sps:$4 sm:$0xff]   ;;  %1759 = vmatpush1.bf16.msra.mxu0 %v7899_v3  ;;  %v10079_v55 = vpack.c.bf16 %v170_v51, %v170_v51  ;;  %vm182_vm0 = vcmask 850944   ;;  %vm9967_vm1 = vmmov 0  }
  0x71   :  { %1800 = vmatpush1.bf16.msra.mxu1 %v7900_v4  ;;  %v7903_v6 = vld [vmem:[#allocation7 + $0x2c4] ss:$16 sps:$4 sm:$0xff]   ;;  %v7905_v7 = vld [vmem:[#allocation7 + $0xc0] ss:$16 sps:$4 sm:$0xff]   ;;  %1760 = vmatprep.subr.bf16.mxu0 %v7901_v5  ;;  %v9966_v0 = vmov 1966171168  }
  0x72   :  { %v7906_v8 = vld [vmem:[#allocation7 + $0x2c0] ss:$16 sps:$4 sm:$0xff]   ;;  %1801 = vmatprep.subr.bf16.mxu1 %v7903_v6  ;;  %v7907_v9 = vld [vmem:[#allocation7 + $0xa4] ss:$16 sps:$4 sm:$0xff]   ;;  %1790 = vmatprep.mubr.bf16.mxu0 %v10077_v50  ;;  %vm7233_vm2 = vcmask 1040384  }
  0x73   :  { %v7909_v10 = vld [vmem:[#allocation7 + $0x2a4] ss:$16 sps:$4 sm:$0xff]   ;;  %v7911_v11 = vld [vmem:[#allocation7 + $0xa0] ss:$16 sps:$4 sm:$0xff]   ;;  %1831 = vmatprep.mubr.bf16.mxu1 %v10079_v55 }
  0x74   :  { %v7912_v12 = vld [vmem:[#allocation7 + $0x2a0] ss:$16 sps:$4 sm:$0xff]   ;;  %1761 = vmatpush1.bf16.msra.mxu0 %v7905_v7  ;;  %v7913_v13 = vld [vmem:[#allocation7 + $0x84] ss:$16 sps:$4 sm:$0xff]  }
  0x75   :  { %1802 = vmatpush1.bf16.msra.mxu1 %v7906_v8  ;;  %1762 = vmatprep.subr.bf16.mxu0 %v7907_v9  ;;  %v7915_v14 = vld [vmem:[#allocation7 + $0x284] ss:$16 sps:$4 sm:$0xff]   ;;  %v7917_v15 = vld [vmem:[#allocation7 + $0x80] ss:$16 sps:$4 sm:$0xff]  }
  0x76   :  { %1803 = vmatprep.subr.bf16.mxu1 %v7909_v10  ;;  %v7918_v16 = vld [vmem:[#allocation7 + $0x280] ss:$16 sps:$4 sm:$0xff]   ;;  %v7919_v17 = vld [vmem:[#allocation7 + $0x64] ss:$16 sps:$4 sm:$0xff]  }
  0x77   :  { %v7921_v18 = vld [vmem:[#allocation7 + $0x264] ss:$16 sps:$4 sm:$0xff]   ;;  %v7923_v19 = vld [vmem:[#allocation7 + $0x60] ss:$16 sps:$4 sm:$0xff]  }
  0x78   :  { %1763 = vmatpush1.bf16.msra.mxu0 %v7911_v11  ;;  %v7924_v20 = vld [vmem:[#allocation7 + $0x260] ss:$16 sps:$4 sm:$0xff]   ;;  %v7925_v21 = vld [vmem:[#allocation7 + $0x44] ss:$16 sps:$4 sm:$0xff]  }
  0x79   :  { %1804 = vmatpush1.bf16.msra.mxu1 %v7912_v12  ;;  %1764 = vmatprep.subr.bf16.mxu0 %v7913_v13  ;;  %v7927_v22 = vld [vmem:[#allocation7 + $0x244] ss:$16 sps:$4 sm:$0xff]   ;;  %v7929_v23 = vld [vmem:[#allocation7 + $0x40] ss:$16 sps:$4 sm:$0xff]  }
  0x7a   :  { %1805 = vmatprep.subr.bf16.mxu1 %v7915_v14  ;;  %v7930_v24 = vld [vmem:[#allocation7 + $0x240] ss:$16 sps:$4 sm:$0xff]   ;;  %v7931_v25 = vld [vmem:[#allocation7 + $0x24] ss:$16 sps:$4 sm:$0xff]  }
  0x7b   :  { %v7933_v26 = vld [vmem:[#allocation7 + $0x224] ss:$16 sps:$4 sm:$0xff]   ;;  %v7935_v27 = vld [vmem:[#allocation7 + $0x20] ss:$16 sps:$4 sm:$0xff]  }
  0x7c   :  { %1765 = vmatpush1.bf16.msra.mxu0 %v7917_v15  ;;  %v7936_v28 = vld [vmem:[#allocation7 + $0x220] ss:$16 sps:$4 sm:$0xff]   ;;  %v7937_v29 = vld [vmem:[#allocation7 + $0x4] ss:$16 sps:$4 sm:$0xff]  }
  0x7d   :  { %1806 = vmatpush1.bf16.msra.mxu1 %v7918_v16  ;;  %1766 = vmatprep.subr.bf16.mxu0 %v7919_v17  ;;  %v7939_v30 = vld [vmem:[#allocation7 + $0x204] ss:$16 sps:$4 sm:$0xff]   ;;  %v7941_v31 = vld [vmem:[#allocation7] ss:$16 sps:$4 sm:$0xff]  }
  0x7e   :  { %1807 = vmatprep.subr.bf16.mxu1 %v7921_v18  ;;  %v7942_v32 = vld [vmem:[#allocation7 + $0x200] ss:$16 sps:$4 sm:$0xff]   ;;  %v7943_v33 = vld [vmem:[#allocation7 + $0x1e4] ss:$16 sps:$4 sm:$0xff]  }
  0x7f   :  { %v7945_v34 = vld [vmem:[#allocation7 + $0x3e4] ss:$16 sps:$4 sm:$0xff]   ;;  %v7947_v35 = vld [vmem:[#allocation7 + $0x1e0] ss:$16 sps:$4 sm:$0xff]  }
  0x80   :  { %1767 = vmatpush1.bf16.msra.mxu0 %v7923_v19  ;;  %v7948_v36 = vld [vmem:[#allocation7 + $0x3e0] ss:$16 sps:$4 sm:$0xff]   ;;  %v7949_v37 = vld [vmem:[#allocation7 + $0x1c4] ss:$16 sps:$4 sm:$0xff]  }
  0x81   :  { %1808 = vmatpush1.bf16.msra.mxu1 %v7924_v20  ;;  %1768 = vmatprep.subr.bf16.mxu0 %v7925_v21  ;;  %v7951_v38 = vld [vmem:[#allocation7 + $0x3c4] ss:$16 sps:$4 sm:$0xff]   ;;  %v7953_v39 = vld [vmem:[#allocation7 + $0x1c0] ss:$16 sps:$4 sm:$0xff]  }
  0x82   :  { %1809 = vmatprep.subr.bf16.mxu1 %v7927_v22  ;;  %v7954_v40 = vld [vmem:[#allocation7 + $0x3c0] ss:$16 sps:$4 sm:$0xff]   ;;  %v7955_v41 = vld [vmem:[#allocation7 + $0x1a4] ss:$16 sps:$4 sm:$0xff]  }
  0x83   :  { %v7957_v42 = vld [vmem:[#allocation7 + $0x3a4] ss:$16 sps:$4 sm:$0xff]   ;;  %v7959_v43 = vld [vmem:[#allocation7 + $0x1a0] ss:$16 sps:$4 sm:$0xff]  }
  0x84   :  { %1769 = vmatpush1.bf16.msra.mxu0 %v7929_v23  ;;  %v7960_v44 = vld [vmem:[#allocation7 + $0x3a0] ss:$16 sps:$4 sm:$0xff]   ;;  %v7961_v45 = vld [vmem:[#allocation7 + $0x184] ss:$16 sps:$4 sm:$0xff]  }
  0x85   :  { %1810 = vmatpush1.bf16.msra.mxu1 %v7930_v24  ;;  %1770 = vmatprep.subr.bf16.mxu0 %v7931_v25  ;;  %v7963_v46 = vld [vmem:[#allocation7 + $0x384] ss:$16 sps:$4 sm:$0xff]   ;;  %v7965_v47 = vld [vmem:[#allocation7 + $0x180] ss:$16 sps:$4 sm:$0xff]  }
  0x86   :  { %1811 = vmatprep.subr.bf16.mxu1 %v7933_v26  ;;  %v7966_v48 = vld [vmem:[#allocation7 + $0x380] ss:$16 sps:$4 sm:$0xff]   ;;  %v7967_v54 = vld [vmem:[#allocation7 + $0x164] ss:$16 sps:$4 sm:$0xff]  }
  0x87   :  { %v167_v52 = vld [vmem:[#allocation4] sm:$0xff]  ;;  %v169_v53 = vld [vmem:[#allocation4 + $0x10] sm:$0xff] }
  0x88   :  { %1771 = vmatpush1.bf16.msra.mxu0 %v7935_v27  ;;  %v7969_v56 = vld [vmem:[#allocation7 + $0x364] ss:$16 sps:$4 sm:$0xff]   ;;  %v7971_v57 = vld [vmem:[#allocation7 + $0x160] ss:$16 sps:$4 sm:$0xff]   ;;  %v10083_v10 = vpack.c.bf16 %v167_v52, %v167_v52  ;;  %v10085_v11 = vpack.c.bf16 %v169_v53, %v169_v53 }
  0x89   :  { %1812 = vmatpush1.bf16.msra.mxu1 %v7936_v28  ;;  %1772 = vmatprep.subr.bf16.mxu0 %v7937_v29  ;;  %v7972_v58 = vld [vmem:[#allocation7 + $0x360] ss:$16 sps:$4 sm:$0xff]   ;;  %v7973_v59 = vld [vmem:[#allocation7 + $0x144] ss:$16 sps:$4 sm:$0xff]  }
  0x8a   :  { %1813 = vmatprep.subr.bf16.mxu1 %v7939_v30  ;;  %v7975_v60 = vld [vmem:[#allocation7 + $0x344] ss:$16 sps:$4 sm:$0xff]   ;;  %v7977_v61 = vld [vmem:[#allocation7 + $0x140] ss:$16 sps:$4 sm:$0xff]  }
  0x8b   :  { %v7978_v62 = vld [vmem:[#allocation7 + $0x340] ss:$16 sps:$4 sm:$0xff]   ;;  %v7979_v63 = vld [vmem:[#allocation7 + $0x124] ss:$16 sps:$4 sm:$0xff]  }
  0x8c   :  { %1773 = vmatpush1.bf16.msra.mxu0 %v7941_v31  ;;  %v7981_v1 = vld [vmem:[#allocation7 + $0x324] ss:$16 sps:$4 sm:$0xff]   ;;  %v7983_v2 = vld [vmem:[#allocation7 + $0x120] ss:$16 sps:$4 sm:$0xff]  }
  0x8d   :  { %1814 = vmatpush1.bf16.msra.mxu1 %v7942_v32  ;;  %1774 = vmatprep.subr.bf16.mxu0 %v7943_v33  ;;  %v7984_v3 = vld [vmem:[#allocation7 + $0x320] ss:$16 sps:$4 sm:$0xff]   ;;  %v7985_v4 = vld [vmem:[#allocation7 + $0x104] ss:$16 sps:$4 sm:$0xff]  }
  0x8e   :  { %1815 = vmatprep.subr.bf16.mxu1 %v7945_v34  ;;  %v7987_v5 = vld [vmem:[#allocation7 + $0x304] ss:$16 sps:$4 sm:$0xff]   ;;  %v7989_v6 = vld [vmem:[#allocation7 + $0x100] ss:$16 sps:$4 sm:$0xff]  }
  0x8f   :  { %v7990_v7 = vld [vmem:[#allocation7 + $0x300] ss:$16 sps:$4 sm:$0xff]   ;;  %v7993_v8 = vld [vmem:[#allocation7 + $0x4e4] ss:$16 sps:$4 sm:$0xff]  }
  0x90   :  { %1775 = vmatpush2.bf16.msra.mxu0 %v7947_v35  ;;  %v7996_v9 = vld [vmem:[#allocation7 + $0x6e4] ss:$16 sps:$4 sm:$0xff]   ;;  %v7991_v12 = vld [vmem:[#allocation7 + $0x4e0] ss:$16 sps:$4 sm:$0xff]  }
  0x91   :  { %1816 = vmatpush2.bf16.msra.mxu1 %v7948_v36  ;;  %1776 = vmatprep.subr.bf16.mxu0 %v7949_v37  ;;  %v7994_v13 = vld [vmem:[#allocation7 + $0x6e0] ss:$16 sps:$4 sm:$0xff]   ;;  %v7999_v14 = vld [vmem:[#allocation7 + $0x4c4] ss:$16 sps:$4 sm:$0xff]  }
  0x92   :  { %1817 = vmatprep.subr.bf16.mxu1 %v7951_v38  ;;  %v8002_v15 = vld [vmem:[#allocation7 + $0x6c4] ss:$16 sps:$4 sm:$0xff]   ;;  %v7997_v16 = vld [vmem:[#allocation7 + $0x4c0] ss:$16 sps:$4 sm:$0xff]   ;;  %v172_v38 = vld [vmem:[#allocation4 + $0x28] sm:$0xff] }
  0x93   :  { %v8000_v17 = vld [vmem:[#allocation7 + $0x6c0] ss:$16 sps:$4 sm:$0xff]   ;;  %v8005_v18 = vld [vmem:[#allocation7 + $0x4a4] ss:$16 sps:$4 sm:$0xff]  }
  0x94   :  { %1777 = vmatpush2.bf16.msra.mxu0 %v7953_v39  ;;  %v8008_v19 = vld [vmem:[#allocation7 + $0x6a4] ss:$16 sps:$4 sm:$0xff]   ;;  %v8003_v20 = vld [vmem:[#allocation7 + $0x4a0] ss:$16 sps:$4 sm:$0xff]   ;;  %v10089_v39 = vpack.c.bf16 %v172_v38, %v172_v38  ;;  %v8105_v38 = vld [vmem:[#allocation7 + $0x88] ss:$16 sps:$4 sm:$0xff]  }
  0x95   :  { %1818 = vmatpush2.bf16.msra.mxu1 %v7954_v40  ;;  %1778 = vmatprep.subr.bf16.mxu0 %v7955_v41  ;;  %v8006_v21 = vld [vmem:[#allocation7 + $0x6a0] ss:$16 sps:$4 sm:$0xff]   ;;  %v8011_v22 = vld [vmem:[#allocation7 + $0x484] ss:$16 sps:$4 sm:$0xff]   ;;  %v174_v40 = vld [vmem:[#allocation4 + $0x38] sm:$0xff] }
  0x96   :  { %1819 = vmatprep.subr.bf16.mxu1 %v7957_v42  ;;  %v8014_v23 = vld [vmem:[#allocation7 + $0x684] ss:$16 sps:$4 sm:$0xff]   ;;  %v8009_v24 = vld [vmem:[#allocation7 + $0x480] ss:$16 sps:$4 sm:$0xff]   ;;  %183 = vst.msk [vmem:[#allocation2 + $0x38] sm:$0xff] %vm182_vm0, %v174_v40 }
  0x97   :  { %v8012_v25 = vld [vmem:[#allocation7 + $0x680] ss:$16 sps:$4 sm:$0xff]   ;;  %v8017_v26 = vld [vmem:[#allocation7 + $0x464] ss:$16 sps:$4 sm:$0xff]   ;;  %v8108_v40 = vld [vmem:[#allocation7 + $0x288] ss:$16 sps:$4 sm:$0xff]  }
  0x98   :  { %1779 = vmatpush2.bf16.msra.mxu0 %v7959_v43  ;;  %v8020_v27 = vld [vmem:[#allocation7 + $0x664] ss:$16 sps:$4 sm:$0xff]   ;;  %v8015_v28 = vld [vmem:[#allocation7 + $0x460] ss:$16 sps:$4 sm:$0xff]  }
  0x99   :  { %1820 = vmatpush2.bf16.msra.mxu1 %v7960_v44  ;;  %1780 = vmatprep.subr.bf16.mxu0 %v7961_v45  ;;  %v8018_v29 = vld [vmem:[#allocation7 + $0x660] ss:$16 sps:$4 sm:$0xff]   ;;  %v8023_v30 = vld [vmem:[#allocation7 + $0x444] ss:$16 sps:$4 sm:$0xff]  }
  0x9a   :  { %1821 = vmatprep.subr.bf16.mxu1 %v7963_v46  ;;  %v8026_v31 = vld [vmem:[#allocation7 + $0x644] ss:$16 sps:$4 sm:$0xff]   ;;  %v8021_v32 = vld [vmem:[#allocation7 + $0x440] ss:$16 sps:$4 sm:$0xff]  }
  0x9b   :  { %v8024_v33 = vld [vmem:[#allocation7 + $0x640] ss:$16 sps:$4 sm:$0xff]   ;;  %v8029_v34 = vld [vmem:[#allocation7 + $0x424] ss:$16 sps:$4 sm:$0xff]  }
  0x9c   :  { %1781 = vmatpush2.bf16.msra.mxu0 %v7965_v47  ;;  %v8032_v35 = vld [vmem:[#allocation7 + $0x624] ss:$16 sps:$4 sm:$0xff]   ;;  %v8027_v36 = vld [vmem:[#allocation7 + $0x420] ss:$16 sps:$4 sm:$0xff]  }
  0x9d   :  { %1822 = vmatpush2.bf16.msra.mxu1 %v7966_v48  ;;  %1782 = vmatprep.subr.bf16.mxu0 %v7967_v54  ;;  %v8030_v37 = vld [vmem:[#allocation7 + $0x620] ss:$16 sps:$4 sm:$0xff]   ;;  %v8035_v43 = vld [vmem:[#allocation7 + $0x404] ss:$16 sps:$4 sm:$0xff]   ;;  %v191_v51 = vld [vmem:[#allocation2 + $0x38] sm:$0xff] }
  0x9e   :  { %1823 = vmatprep.subr.bf16.mxu1 %v7969_v56  ;;  %v10091_v41 = vld [vmem:[#allocation4 + $0x20] sm:$0xff]  ;;  %v10093_v42 = vld [vmem:[#allocation4 + $0x30] sm:$0xff]  ;;  %v10096_v53 = vpack.c.bf16 %v191_v51, %v191_v51  ;;  %v8126_v51 = vld [vmem:[#allocation7 + $0x228] ss:$16 sps:$4 sm:$0xff]  }
  0x9f   :  { %v8038_v44 = vld [vmem:[#allocation7 + $0x604] ss:$16 sps:$4 sm:$0xff]   ;;  %v8033_v45 = vld [vmem:[#allocation7 + $0x400] ss:$16 sps:$4 sm:$0xff]  }
  0xa0   :  { %1783 = vmatpush2.bf16.msra.mxu0 %v7971_v57  ;;  %v8036_v46 = vld [vmem:[#allocation7 + $0x600] ss:$16 sps:$4 sm:$0xff]   ;;  %v8041_v47 = vld [vmem:[#allocation7 + $0x5e4] ss:$16 sps:$4 sm:$0xff]  }
  0xa1   :  { %1824 = vmatpush2.bf16.msra.mxu1 %v7972_v58  ;;  %1784 = vmatprep.subr.bf16.mxu0 %v7973_v59  ;;  %v8044_v48 = vld [vmem:[#allocation7 + $0x7e4] ss:$16 sps:$4 sm:$0xff]   ;;  %v8039_v49 = vld [vmem:[#allocation7 + $0x5e0] ss:$16 sps:$4 sm:$0xff]  }
  0xa2   :  { %1825 = vmatprep.subr.bf16.mxu1 %v7975_v60  ;;  %v8042_v52 = vld [vmem:[#allocation7 + $0x7e0] ss:$16 sps:$4 sm:$0xff]   ;;  %v8047_v54 = vld [vmem:[#allocation7 + $0x5c4] ss:$16 sps:$4 sm:$0xff]  }
  0xa3   :  { %v8050_v56 = vld [vmem:[#allocation7 + $0x7c4] ss:$16 sps:$4 sm:$0xff]   ;;  %v8045_v57 = vld [vmem:[#allocation7 + $0x5c0] ss:$16 sps:$4 sm:$0xff]  }
  0xa4   :  { %1785 = vmatpush2.bf16.msra.mxu0 %v7977_v61  ;;  %v8048_v58 = vld [vmem:[#allocation7 + $0x7c0] ss:$16 sps:$4 sm:$0xff]   ;;  %v8053_v59 = vld [vmem:[#allocation7 + $0x5a4] ss:$16 sps:$4 sm:$0xff]  }
  0xa5   :  { %1826 = vmatpush2.bf16.msra.mxu1 %v7978_v62  ;;  %1786 = vmatprep.subr.bf16.mxu0 %v7979_v63  ;;  %v8056_v60 = vld [vmem:[#allocation7 + $0x7a4] ss:$16 sps:$4 sm:$0xff]   ;;  %v8051_v61 = vld [vmem:[#allocation7 + $0x5a0] ss:$16 sps:$4 sm:$0xff]  }
  0xa6   :  { %1827 = vmatprep.subr.bf16.mxu1 %v7981_v1  ;;  %v8054_v62 = vld [vmem:[#allocation7 + $0x7a0] ss:$16 sps:$4 sm:$0xff]   ;;  %v8059_v63 = vld [vmem:[#allocation7 + $0x584] ss:$16 sps:$4 sm:$0xff]  }
  0xa7   :  { %v8062_v1 = vld [vmem:[#allocation7 + $0x784] ss:$16 sps:$4 sm:$0xff]  }
  0xa8   :  { %1787 = vmatpush2.bf16.msra.mxu0 %v7983_v2  ;;  %v8057_v2 = vld [vmem:[#allocation7 + $0x580] ss:$16 sps:$4 sm:$0xff]  }
  0xa9   :  { %1828 = vmatpush2.bf16.msra.mxu1 %v7984_v3  ;;  %1788 = vmatprep.subr.bf16.mxu0 %v7985_v4  ;;  %v8060_v3 = vld [vmem:[#allocation7 + $0x780] ss:$16 sps:$4 sm:$0xff]   ;;  %v8065_v4 = vld [vmem:[#allocation7 + $0x564] ss:$16 sps:$4 sm:$0xff]  }
  0xaa   :  { %1829 = vmatprep.subr.bf16.mxu1 %v7987_v5  ;;  %v8068_v5 = vld [vmem:[#allocation7 + $0x764] ss:$16 sps:$4 sm:$0xff]  }
  0xac   :  { %1789 = vmatpush2.bf16.msra.mxu0 %v7989_v6  ;;  %v8063_v6 = vld [vmem:[#allocation7 + $0x560] ss:$16 sps:$4 sm:$0xff]  }
  0xad   :  { %1830 = vmatpush2.bf16.msra.mxu1 %v7990_v7  ;;  %1840 = vmatprep.subr.bf16.mxu0 %v7993_v8  ;;  %v8066_v7 = vld [vmem:[#allocation7 + $0x760] ss:$16 sps:$4 sm:$0xff]   ;;  %v8071_v8 = vld [vmem:[#allocation7 + $0x544] ss:$16 sps:$4 sm:$0xff]  }
  0xae   :  { %1881 = vmatprep.subr.bf16.mxu1 %v7996_v9  ;;  %v8074_v9 = vld [vmem:[#allocation7 + $0x744] ss:$16 sps:$4 sm:$0xff]  }
  0xaf   :  { %1791 = vmatmul.mubr.bf16.vlgmr.msra.gmra.mxu0 %v10083_v10 }
  0xb0   :  { %1832 = vmatmul.mubr.bf16.vlgmr.msra.gmra.mxu1 %v10085_v11  ;;  %1841 = vmatpush1.bf16.msra.mxu0 %v7991_v12  ;;  %v8069_v12 = vld [vmem:[#allocation7 + $0x540] ss:$16 sps:$4 sm:$0xff]  }
  0xb1   :  { %1882 = vmatpush1.bf16.msra.mxu1 %v7994_v13  ;;  %1842 = vmatprep.subr.bf16.mxu0 %v7999_v14  ;;  %v8072_v13 = vld [vmem:[#allocation7 + $0x740] ss:$16 sps:$4 sm:$0xff]   ;;  %v8077_v14 = vld [vmem:[#allocation7 + $0x524] ss:$16 sps:$4 sm:$0xff]  }
  0xb2   :  { %1883 = vmatprep.subr.bf16.mxu1 %v8002_v15  ;;  %1872 = vmatprep.mubr.bf16.mxu0 %v10089_v39  ;;  %v8080_v15 = vld [vmem:[#allocation7 + $0x724] ss:$16 sps:$4 sm:$0xff]  }
  0xb3   :  { %1913 = vmatprep.mubr.bf16.mxu1 %v10096_v53 }
  0xb4   :  { %1843 = vmatpush1.bf16.msra.mxu0 %v7997_v16  ;;  %v8075_v16 = vld [vmem:[#allocation7 + $0x520] ss:$16 sps:$4 sm:$0xff]  }
  0xb5   :  { %1884 = vmatpush1.bf16.msra.mxu1 %v8000_v17  ;;  %1844 = vmatprep.subr.bf16.mxu0 %v8005_v18  ;;  %v8078_v17 = vld [vmem:[#allocation7 + $0x720] ss:$16 sps:$4 sm:$0xff]   ;;  %v8083_v18 = vld [vmem:[#allocation7 + $0x504] ss:$16 sps:$4 sm:$0xff]  }
  0xb6   :  { %1885 = vmatprep.subr.bf16.mxu1 %v8008_v19  ;;  %v8086_v19 = vld [vmem:[#allocation7 + $0x704] ss:$16 sps:$4 sm:$0xff]  }
  0xb8   :  { %1845 = vmatpush1.bf16.msra.mxu0 %v8003_v20  ;;  %v8081_v20 = vld [vmem:[#allocation7 + $0x500] ss:$16 sps:$4 sm:$0xff]  }
  0xb9   :  { %1886 = vmatpush1.bf16.msra.mxu1 %v8006_v21  ;;  %1846 = vmatprep.subr.bf16.mxu0 %v8011_v22  ;;  %v8084_v21 = vld [vmem:[#allocation7 + $0x700] ss:$16 sps:$4 sm:$0xff]   ;;  %v8089_v22 = vld [vmem:[#allocation7 + $0xec] ss:$16 sps:$4 sm:$0xff]  }
  0xba   :  { %1887 = vmatprep.subr.bf16.mxu1 %v8014_v23  ;;  %v8092_v23 = vld [vmem:[#allocation7 + $0x2ec] ss:$16 sps:$4 sm:$0xff]  }
  0xbc   :  { %1847 = vmatpush1.bf16.msra.mxu0 %v8009_v24  ;;  %v10101_v24 = vpack.c.bf16 %v10091_v41, %v10091_v41  ;;  %v8113_v41 = vld [vmem:[#allocation7 + $0x6c] ss:$16 sps:$4 sm:$0xff]  }
  0xbd   :  { %1888 = vmatpush1.bf16.msra.mxu1 %v8012_v25  ;;  %1848 = vmatprep.subr.bf16.mxu0 %v8017_v26  ;;  %v10105_v25 = vpack.c.bf16 %v10093_v42, %v10093_v42  ;;  %v8087_v26 = vld [vmem:[#allocation7 + $0xe8] ss:$16 sps:$4 sm:$0xff]   ;;  %v8116_v42 = vld [vmem:[#allocation7 + $0x26c] ss:$16 sps:$4 sm:$0xff]  }
  0xbe   :  { %1889 = vmatprep.subr.bf16.mxu1 %v8020_v27  ;;  %v8090_v27 = vld [vmem:[#allocation7 + $0x2e8] ss:$16 sps:$4 sm:$0xff]  }
  0xc0   :  { %1849 = vmatpush1.bf16.msra.mxu0 %v8015_v28  ;;  %v8095_v28 = vld [vmem:[#allocation7 + $0xcc] ss:$16 sps:$4 sm:$0xff]  }
  0xc1   :  { %1890 = vmatpush1.bf16.msra.mxu1 %v8018_v29  ;;  %1850 = vmatprep.subr.bf16.mxu0 %v8023_v30  ;;  %v8098_v29 = vld [vmem:[#allocation7 + $0x2cc] ss:$16 sps:$4 sm:$0xff]   ;;  %v8093_v30 = vld [vmem:[#allocation7 + $0xc8] ss:$16 sps:$4 sm:$0xff]  }
  0xc2   :  { %1891 = vmatprep.subr.bf16.mxu1 %v8026_v31  ;;  %v8096_v31 = vld [vmem:[#allocation7 + $0x2c8] ss:$16 sps:$4 sm:$0xff]  }
  0xc4   :  { %1851 = vmatpush1.bf16.msra.mxu0 %v8021_v32  ;;  %v8101_v32 = vld [vmem:[#allocation7 + $0xac] ss:$16 sps:$4 sm:$0xff]  }
  0xc5   :  { %1892 = vmatpush1.bf16.msra.mxu1 %v8024_v33  ;;  %1852 = vmatprep.subr.bf16.mxu0 %v8029_v34  ;;  %v8104_v33 = vld [vmem:[#allocation7 + $0x2ac] ss:$16 sps:$4 sm:$0xff]   ;;  %v8099_v34 = vld [vmem:[#allocation7 + $0xa8] ss:$16 sps:$4 sm:$0xff]  }
  0xc6   :  { %1893 = vmatprep.subr.bf16.mxu1 %v8032_v35  ;;  %v8102_v35 = vld [vmem:[#allocation7 + $0x2a8] ss:$16 sps:$4 sm:$0xff]  }
  0xc8   :  { %1853 = vmatpush1.bf16.msra.mxu0 %v8027_v36  ;;  %v8107_v36 = vld [vmem:[#allocation7 + $0x8c] ss:$16 sps:$4 sm:$0xff]  }
  0xc9   :  { %1894 = vmatpush1.bf16.msra.mxu1 %v8030_v37  ;;  %1854 = vmatprep.subr.bf16.mxu0 %v8035_v43  ;;  %v8110_v37 = vld [vmem:[#allocation7 + $0x28c] ss:$16 sps:$4 sm:$0xff]   ;;  %v8111_v43 = vld [vmem:[#allocation7 + $0x68] ss:$16 sps:$4 sm:$0xff]  }
  0xca   :  { %1895 = vmatprep.subr.bf16.mxu1 %v8038_v44  ;;  %v8122_v44 = vld [vmem:[#allocation7 + $0x24c] ss:$16 sps:$4 sm:$0xff]  }
  0xcc   :  { %1855 = vmatpush1.bf16.msra.mxu0 %v8033_v45  ;;  %v8117_v45 = vld [vmem:[#allocation7 + $0x48] ss:$16 sps:$4 sm:$0xff]  }
  0xcd   :  { %1896 = vmatpush1.bf16.msra.mxu1 %v8036_v46  ;;  %1856 = vmatprep.subr.bf16.mxu0 %v8041_v47  ;;  %v8120_v46 = vld [vmem:[#allocation7 + $0x248] ss:$16 sps:$4 sm:$0xff]   ;;  %v8125_v47 = vld [vmem:[#allocation7 + $0x2c] ss:$16 sps:$4 sm:$0xff]  }
  0xce   :  { %1897 = vmatprep.subr.bf16.mxu1 %v8044_v48  ;;  %v8128_v48 = vld [vmem:[#allocation7 + $0x22c] ss:$16 sps:$4 sm:$0xff]  }
  0xd0   :  { %1857 = vmatpush2.bf16.msra.mxu0 %v8039_v49  ;;  %v8123_v49 = vld [vmem:[#allocation7 + $0x28] ss:$16 sps:$4 sm:$0xff]  }
  0xd1   :  { %1898 = vmatpush2.bf16.msra.mxu1 %v8042_v52  ;;  %1858 = vmatprep.subr.bf16.mxu0 %v8047_v54  ;;  %v8131_v52 = vld [vmem:[#allocation7 + $0xc] ss:$16 sps:$4 sm:$0xff]  }
  0xd2   :  { %1899 = vmatprep.subr.bf16.mxu1 %v8050_v56  ;;  %v8134_v54 = vld [vmem:[#allocation7 + $0x20c] ss:$16 sps:$4 sm:$0xff]   ;;  %v8129_v56 = vld [vmem:[#allocation7 + $0x8] ss:$16 sps:$4 sm:$0xff]  }
  0xd4   :  { %1859 = vmatpush2.bf16.msra.mxu0 %v8045_v57  ;;  %v8132_v57 = vld [vmem:[#allocation7 + $0x208] ss:$16 sps:$4 sm:$0xff]  }
  0xd5   :  { %1900 = vmatpush2.bf16.msra.mxu1 %v8048_v58  ;;  %1860 = vmatprep.subr.bf16.mxu0 %v8053_v59  ;;  %v8137_v58 = vld [vmem:[#allocation7 + $0x1ec] ss:$16 sps:$4 sm:$0xff]  }
  0xd6   :  { %1901 = vmatprep.subr.bf16.mxu1 %v8056_v60  ;;  %v8140_v59 = vld [vmem:[#allocation7 + $0x3ec] ss:$16 sps:$4 sm:$0xff]   ;;  %v8135_v60 = vld [vmem:[#allocation7 + $0x1e8] ss:$16 sps:$4 sm:$0xff]  }
  0xd8   :  { %1861 = vmatpush2.bf16.msra.mxu0 %v8051_v61  ;;  %v8138_v61 = vld [vmem:[#allocation7 + $0x3e8] ss:$16 sps:$4 sm:$0xff]  }
  0xd9   :  { %1902 = vmatpush2.bf16.msra.mxu1 %v8054_v62  ;;  %1862 = vmatprep.subr.bf16.mxu0 %v8059_v63  ;;  %v8143_v62 = vld [vmem:[#allocation7 + $0x1cc] ss:$16 sps:$4 sm:$0xff]  }
  0xda   :  { %1903 = vmatprep.subr.bf16.mxu1 %v8062_v1  ;;  %v8146_v63 = vld [vmem:[#allocation7 + $0x3cc] ss:$16 sps:$4 sm:$0xff]   ;;  %v8141_v1 = vld [vmem:[#allocation7 + $0x1c8] ss:$16 sps:$4 sm:$0xff]  }
  0xdc   :  { %1863 = vmatpush2.bf16.msra.mxu0 %v8057_v2  ;;  %v8144_v2 = vld [vmem:[#allocation7 + $0x3c8] ss:$16 sps:$4 sm:$0xff]  }
  0xdd   :  { %1904 = vmatpush2.bf16.msra.mxu1 %v8060_v3  ;;  %1864 = vmatprep.subr.bf16.mxu0 %v8065_v4  ;;  %v8149_v3 = vld [vmem:[#allocation7 + $0x1ac] ss:$16 sps:$4 sm:$0xff]  }
  0xde   :  { %1905 = vmatprep.subr.bf16.mxu1 %v8068_v5  ;;  %v8152_v4 = vld [vmem:[#allocation7 + $0x3ac] ss:$16 sps:$4 sm:$0xff]   ;;  %v8147_v5 = vld [vmem:[#allocation7 + $0x1a8] ss:$16 sps:$4 sm:$0xff]  }
  0xe0   :  { %1865 = vmatpush2.bf16.msra.mxu0 %v8063_v6  ;;  %v8150_v6 = vld [vmem:[#allocation7 + $0x3a8] ss:$16 sps:$4 sm:$0xff]  }
  0xe1   :  { %1906 = vmatpush2.bf16.msra.mxu1 %v8066_v7  ;;  %1866 = vmatprep.subr.bf16.mxu0 %v8071_v8  ;;  %v8155_v7 = vld [vmem:[#allocation7 + $0x18c] ss:$16 sps:$4 sm:$0xff]  }
  0xe2   :  { %1907 = vmatprep.subr.bf16.mxu1 %v8074_v9  ;;  %v8158_v8 = vld [vmem:[#allocation7 + $0x38c] ss:$16 sps:$4 sm:$0xff]   ;;  %v8153_v9 = vld [vmem:[#allocation7 + $0x188] ss:$16 sps:$4 sm:$0xff]  }
  0xe4   :  { %1867 = vmatpush2.bf16.msra.mxu0 %v8069_v12  ;;  %v8156_v12 = vld [vmem:[#allocation7 + $0x388] ss:$16 sps:$4 sm:$0xff]  }
  0xe5   :  { %1908 = vmatpush2.bf16.msra.mxu1 %v8072_v13  ;;  %1868 = vmatprep.subr.bf16.mxu0 %v8077_v14  ;;  %v8161_v13 = vld [vmem:[#allocation7 + $0x16c] ss:$16 sps:$4 sm:$0xff]  }
  0xe6   :  { %1909 = vmatprep.subr.bf16.mxu1 %v8080_v15  ;;  %v8164_v14 = vld [vmem:[#allocation7 + $0x36c] ss:$16 sps:$4 sm:$0xff]   ;;  %v8159_v15 = vld [vmem:[#allocation7 + $0x168] ss:$16 sps:$4 sm:$0xff]  }
  0xe8   :  { %1869 = vmatpush2.bf16.msra.mxu0 %v8075_v16  ;;  %v8162_v16 = vld [vmem:[#allocation7 + $0x368] ss:$16 sps:$4 sm:$0xff]  }
  0xe9   :  { %1910 = vmatpush2.bf16.msra.mxu1 %v8078_v17  ;;  %1870 = vmatprep.subr.bf16.mxu0 %v8083_v18  ;;  %v8167_v17 = vld [vmem:[#allocation7 + $0x14c] ss:$16 sps:$4 sm:$0xff]  }
  0xea   :  { %1911 = vmatprep.subr.bf16.mxu1 %v8086_v19  ;;  %v8170_v18 = vld [vmem:[#allocation7 + $0x34c] ss:$16 sps:$4 sm:$0xff]   ;;  %v8165_v19 = vld [vmem:[#allocation7 + $0x148] ss:$16 sps:$4 sm:$0xff]  }
  0xec   :  { %1871 = vmatpush2.bf16.msra.mxu0 %v8081_v20  ;;  %v8168_v20 = vld [vmem:[#allocation7 + $0x348] ss:$16 sps:$4 sm:$0xff]  }
  0xed   :  { %1912 = vmatpush2.bf16.msra.mxu1 %v8084_v21  ;;  %1922 = vmatprep.subr.bf16.mxu0 %v8089_v22  ;;  %v8173_v21 = vld [vmem:[#allocation7 + $0x12c] ss:$16 sps:$4 sm:$0xff]  }
  0xee   :  { %1963 = vmatprep.subr.bf16.mxu1 %v8092_v23  ;;  %v8176_v22 = vld [vmem:[#allocation7 + $0x32c] ss:$16 sps:$4 sm:$0xff]   ;;  %v8171_v23 = vld [vmem:[#allocation7 + $0x128] ss:$16 sps:$4 sm:$0xff]  }
  0xef   :  { %1873 = vmatmul.mubr.bf16.vlgmr.msra.gmra.mxu0 %v10101_v24 }
  0xf0   :  { %1914 = vmatmul.mubr.bf16.vlgmr.msra.gmra.mxu1 %v10105_v25  ;;  %1923 = vmatpush1.bf16.msra.mxu0 %v8087_v26  ;;  %v8174_v26 = vld [vmem:[#allocation7 + $0x328] ss:$16 sps:$4 sm:$0xff]  }
  0xf1   :  { %1964 = vmatpush1.bf16.msra.mxu1 %v8090_v27  ;;  %1924 = vmatprep.subr.bf16.mxu0 %v8095_v28  ;;  %v8179_v27 = vld [vmem:[#allocation7 + $0x10c] ss:$16 sps:$4 sm:$0xff]  }
  0xf2   :  { %1965 = vmatprep.subr.bf16.mxu1 %v8098_v29  ;;  %1954 = vmatprep.mubr.bf16.mxu0 %v10077_v50  ;;  %v8114_v50 = vld [vmem:[#allocation7 + $0x268] ss:$16 sps:$4 sm:$0xff]   ;;  %v8182_v28 = vld [vmem:[#allocation7 + $0x30c] ss:$16 sps:$4 sm:$0xff]  }
  0xf3   :  { %1995 = vmatprep.mubr.bf16.mxu1 %v10079_v55  ;;  %v8119_v55 = vld [vmem:[#allocation7 + $0x4c] ss:$16 sps:$4 sm:$0xff]   ;;  %v8177_v29 = vld [vmem:[#allocation7 + $0x108] ss:$16 sps:$4 sm:$0xff]  }
  0xf4   :  { %1925 = vmatpush1.bf16.msra.mxu0 %v8093_v30  ;;  %v8180_v30 = vld [vmem:[#allocation7 + $0x308] ss:$16 sps:$4 sm:$0xff]  }
  0xf5   :  { %1966 = vmatpush1.bf16.msra.mxu1 %v8096_v31  ;;  %1926 = vmatprep.subr.bf16.mxu0 %v8101_v32  ;;  %v8185_v31 = vld [vmem:[#allocation7 + $0x4ec] ss:$16 sps:$4 sm:$0xff]  }
  0xf6   :  { %1967 = vmatprep.subr.bf16.mxu1 %v8104_v33  ;;  %v8188_v32 = vld [vmem:[#allocation7 + $0x6ec] ss:$16 sps:$4 sm:$0xff]   ;;  %v8183_v33 = vld [vmem:[#allocation7 + $0x4e8] ss:$16 sps:$4 sm:$0xff]  }
  0xf8   :  { %1927 = vmatpush1.bf16.msra.mxu0 %v8099_v34  ;;  %v8186_v34 = vld [vmem:[#allocation7 + $0x6e8] ss:$16 sps:$4 sm:$0xff]  }
  0xf9   :  { %1968 = vmatpush1.bf16.msra.mxu1 %v8102_v35  ;;  %1928 = vmatprep.subr.bf16.mxu0 %v8107_v36  ;;  %v8191_v35 = vld [vmem:[#allocation7 + $0x4cc] ss:$16 sps:$4 sm:$0xff]  }
  0xfa   :  { %1969 = vmatprep.subr.bf16.mxu1 %v8110_v37  ;;  %v8194_v36 = vld [vmem:[#allocation7 + $0x6cc] ss:$16 sps:$4 sm:$0xff]   ;;  %v8189_v37 = vld [vmem:[#allocation7 + $0x4c8] ss:$16 sps:$4 sm:$0xff]  }
  0xfc   :  { %1929 = vmatpush1.bf16.msra.mxu0 %v8105_v38  ;;  %v8192_v38 = vld [vmem:[#allocation7 + $0x6c8] ss:$16 sps:$4 sm:$0xff]  }
  0xfd   :  { %1970 = vmatpush1.bf16.msra.mxu1 %v8108_v40  ;;  %1930 = vmatprep.subr.bf16.mxu0 %v8113_v41  ;;  %v8197_v40 = vld [vmem:[#allocation7 + $0x4ac] ss:$16 sps:$4 sm:$0xff]  }
  0xfe   :  { %1971 = vmatprep.subr.bf16.mxu1 %v8116_v42  ;;  %v8200_v41 = vld [vmem:[#allocation7 + $0x6ac] ss:$16 sps:$4 sm:$0xff]   ;;  %v8195_v42 = vld [vmem:[#allocation7 + $0x4a8] ss:$16 sps:$4 sm:$0xff]  }
 0x100   :  { %1931 = vmatpush1.bf16.msra.mxu0 %v8111_v43  ;;  %v8198_v43 = vld [vmem:[#allocation7 + $0x6a8] ss:$16 sps:$4 sm:$0xff]  }
 0x101   :  { %1972 = vmatpush1.bf16.msra.mxu1 %v8114_v50  ;;  %1932 = vmatprep.subr.bf16.mxu0 %v8119_v55  ;;  %v8203_v50 = vld [vmem:[#allocation7 + $0x48c] ss:$16 sps:$4 sm:$0xff]  }
 0x102   :  { %1973 = vmatprep.subr.bf16.mxu1 %v8122_v44  ;;  %v8206_v55 = vld [vmem:[#allocation7 + $0x68c] ss:$16 sps:$4 sm:$0xff]  }
 0x103   :  { %v8209_v44 = vld [vmem:[#allocation7 + $0x46c] ss:$16 sps:$4 sm:$0xff]  }
 0x104   :  { %1933 = vmatpush1.bf16.msra.mxu0 %v8117_v45  ;;  %v8212_v45 = vld [vmem:[#allocation7 + $0x66c] ss:$16 sps:$4 sm:$0xff]  }
 0x105   :  { %1974 = vmatpush1.bf16.msra.mxu1 %v8120_v46  ;;  %1934 = vmatprep.subr.bf16.mxu0 %v8125_v47  ;;  %v8207_v46 = vld [vmem:[#allocation7 + $0x468] ss:$16 sps:$4 sm:$0xff]  }
 0x106   :  { %1975 = vmatprep.subr.bf16.mxu1 %v8128_v48  ;;  %v8210_v47 = vld [vmem:[#allocation7 + $0x668] ss:$16 sps:$4 sm:$0xff]   ;;  %v8215_v48 = vld [vmem:[#allocation7 + $0x44c] ss:$16 sps:$4 sm:$0xff]  }
 0x108   :  { %1935 = vmatpush1.bf16.msra.mxu0 %v8123_v49  ;;  %v8216_v49 = vld [vmem:[#allocation7 + $0x648] ss:$16 sps:$4 sm:$0xff]  }
 0x109   :  { %1976 = vmatpush1.bf16.msra.mxu1 %v8126_v51  ;;  %1936 = vmatprep.subr.bf16.mxu0 %v8131_v52  ;;  %v8221_v51 = vld [vmem:[#allocation7 + $0x42c] ss:$16 sps:$4 sm:$0xff]  }
 0x10a   :  { %1977 = vmatprep.subr.bf16.mxu1 %v8134_v54  ;;  %v8224_v52 = vld [vmem:[#allocation7 + $0x62c] ss:$16 sps:$4 sm:$0xff]   ;;  %v8219_v54 = vld [vmem:[#allocation7 + $0x428] ss:$16 sps:$4 sm:$0xff]  }
 0x10c   :  { %1937 = vmatpush1.bf16.msra.mxu0 %v8129_v56  ;;  %v8222_v56 = vld [vmem:[#allocation7 + $0x628] ss:$16 sps:$4 sm:$0xff]  }
 0x10d   :  { %1978 = vmatpush1.bf16.msra.mxu1 %v8132_v57  ;;  %1938 = vmatprep.subr.bf16.mxu0 %v8137_v58  ;;  %v8227_v57 = vld [vmem:[#allocation7 + $0x40c] ss:$16 sps:$4 sm:$0xff]  }
 0x10e   :  { %1979 = vmatprep.subr.bf16.mxu1 %v8140_v59  ;;  %v8230_v58 = vld [vmem:[#allocation7 + $0x60c] ss:$16 sps:$4 sm:$0xff]   ;;  %v8225_v59 = vld [vmem:[#allocation7 + $0x408] ss:$16 sps:$4 sm:$0xff]  }
 0x110   :  { %1939 = vmatpush2.bf16.msra.mxu0 %v8135_v60  ;;  %v8228_v60 = vld [vmem:[#allocation7 + $0x608] ss:$16 sps:$4 sm:$0xff]  }
 0x111   :  { %1980 = vmatpush2.bf16.msra.mxu1 %v8138_v61  ;;  %1940 = vmatprep.subr.bf16.mxu0 %v8143_v62  ;;  %v8233_v61 = vld [vmem:[#allocation7 + $0x5ec] ss:$16 sps:$4 sm:$0xff]  }
 0x112   :  { %1981 = vmatprep.subr.bf16.mxu1 %v8146_v63  ;;  %v8236_v62 = vld [vmem:[#allocation7 + $0x7ec] ss:$16 sps:$4 sm:$0xff]   ;;  %v8231_v63 = vld [vmem:[#allocation7 + $0x5e8] ss:$16 sps:$4 sm:$0xff]  }
 0x114   :  { %1941 = vmatpush2.bf16.msra.mxu0 %v8141_v1  ;;  %v8234_v1 = vld [vmem:[#allocation7 + $0x7e8] ss:$16 sps:$4 sm:$0xff]  }
 0x115   :  { %1982 = vmatpush2.bf16.msra.mxu1 %v8144_v2  ;;  %1942 = vmatprep.subr.bf16.mxu0 %v8149_v3  ;;  %v8239_v2 = vld [vmem:[#allocation7 + $0x5cc] ss:$16 sps:$4 sm:$0xff]  }
 0x116   :  { %1983 = vmatprep.subr.bf16.mxu1 %v8152_v4  ;;  %v8242_v3 = vld [vmem:[#allocation7 + $0x7cc] ss:$16 sps:$4 sm:$0xff]   ;;  %v8237_v4 = vld [vmem:[#allocation7 + $0x5c8] ss:$16 sps:$4 sm:$0xff]  }
 0x118   :  { %1943 = vmatpush2.bf16.msra.mxu0 %v8147_v5  ;;  %v8240_v5 = vld [vmem:[#allocation7 + $0x7c8] ss:$16 sps:$4 sm:$0xff]  }
 0x119   :  { %1984 = vmatpush2.bf16.msra.mxu1 %v8150_v6  ;;  %1944 = vmatprep.subr.bf16.mxu0 %v8155_v7  ;;  %v8245_v6 = vld [vmem:[#allocation7 + $0x5ac] ss:$16 sps:$4 sm:$0xff]  }
 0x11a   :  { %1985 = vmatprep.subr.bf16.mxu1 %v8158_v8  ;;  %v8248_v7 = vld [vmem:[#allocation7 + $0x7ac] ss:$16 sps:$4 sm:$0xff]   ;;  %v8243_v8 = vld [vmem:[#allocation7 + $0x5a8] ss:$16 sps:$4 sm:$0xff]  }
 0x11c   :  { %1945 = vmatpush2.bf16.msra.mxu0 %v8153_v9  ;;  %v8246_v9 = vld [vmem:[#allocation7 + $0x7a8] ss:$16 sps:$4 sm:$0xff]  }
 0x11d   :  { %1986 = vmatpush2.bf16.msra.mxu1 %v8156_v12  ;;  %1946 = vmatprep.subr.bf16.mxu0 %v8161_v13  ;;  %v8251_v12 = vld [vmem:[#allocation7 + $0x58c] ss:$16 sps:$4 sm:$0xff]  }
 0x11e   :  { %1987 = vmatprep.subr.bf16.mxu1 %v8164_v14  ;;  %v8254_v13 = vld [vmem:[#allocation7 + $0x78c] ss:$16 sps:$4 sm:$0xff]   ;;  %v8249_v14 = vld [vmem:[#allocation7 + $0x588] ss:$16 sps:$4 sm:$0xff]  }
 0x120   :  { %1947 = vmatpush2.bf16.msra.mxu0 %v8159_v15  ;;  %v8252_v15 = vld [vmem:[#allocation7 + $0x788] ss:$16 sps:$4 sm:$0xff]  }
 0x121   :  { %1988 = vmatpush2.bf16.msra.mxu1 %v8162_v16  ;;  %1948 = vmatprep.subr.bf16.mxu0 %v8167_v17  ;;  %v8257_v16 = vld [vmem:[#allocation7 + $0x56c] ss:$16 sps:$4 sm:$0xff]  }
 0x122   :  { %1989 = vmatprep.subr.bf16.mxu1 %v8170_v18  ;;  %v8260_v17 = vld [vmem:[#allocation7 + $0x76c] ss:$16 sps:$4 sm:$0xff]   ;;  %v8255_v18 = vld [vmem:[#allocation7 + $0x568] ss:$16 sps:$4 sm:$0xff]  }
 0x124   :  { %1949 = vmatpush2.bf16.msra.mxu0 %v8165_v19  ;;  %v8258_v19 = vld [vmem:[#allocation7 + $0x768] ss:$16 sps:$4 sm:$0xff]  }
 0x125   :  { %1990 = vmatpush2.bf16.msra.mxu1 %v8168_v20  ;;  %1950 = vmatprep.subr.bf16.mxu0 %v8173_v21  ;;  %v8263_v20 = vld [vmem:[#allocation7 + $0x54c] ss:$16 sps:$4 sm:$0xff]  }
 0x126   :  { %1991 = vmatprep.subr.bf16.mxu1 %v8176_v22  ;;  %v8266_v21 = vld [vmem:[#allocation7 + $0x74c] ss:$16 sps:$4 sm:$0xff]   ;;  %v8261_v22 = vld [vmem:[#allocation7 + $0x548] ss:$16 sps:$4 sm:$0xff]  }
 0x128   :  { %1951 = vmatpush2.bf16.msra.mxu0 %v8171_v23  ;;  %v8264_v23 = vld [vmem:[#allocation7 + $0x748] ss:$16 sps:$4 sm:$0xff]  }
 0x129   :  { %1992 = vmatpush2.bf16.msra.mxu1 %v8174_v26  ;;  %1952 = vmatprep.subr.bf16.mxu0 %v8179_v27  ;;  %v8269_v26 = vld [vmem:[#allocation7 + $0x52c] ss:$16 sps:$4 sm:$0xff]  }
 0x12a   :  { %1993 = vmatprep.subr.bf16.mxu1 %v8182_v28  ;;  %v8272_v27 = vld [vmem:[#allocation7 + $0x72c] ss:$16 sps:$4 sm:$0xff]   ;;  %v8267_v28 = vld [vmem:[#allocation7 + $0x528] ss:$16 sps:$4 sm:$0xff]  }
 0x12c   :  { %1953 = vmatpush2.bf16.msra.mxu0 %v8177_v29  ;;  %v8270_v29 = vld [vmem:[#allocation7 + $0x728] ss:$16 sps:$4 sm:$0xff]  }
 0x12d   :  { %1994 = vmatpush2.bf16.msra.mxu1 %v8180_v30  ;;  %2004 = vmatprep.subr.bf16.mxu0 %v8185_v31  ;;  %v8275_v30 = vld [vmem:[#allocation7 + $0x50c] ss:$16 sps:$4 sm:$0xff]  }
 0x12e   :  { %2045 = vmatprep.subr.bf16.mxu1 %v8188_v32  ;;  %v8278_v31 = vld [vmem:[#allocation7 + $0x70c] ss:$16 sps:$4 sm:$0xff]   ;;  %v8273_v32 = vld [vmem:[#allocation7 + $0x508] ss:$16 sps:$4 sm:$0xff]  }
 0x12f   :  { %1955 = vmatmul.mubr.bf16.vlgmr.msra.gmra.mxu0 %v10083_v10  ;;  %v8201_v10 = vld [vmem:[#allocation7 + $0x488] ss:$16 sps:$4 sm:$0xff]  }
 0x130   :  { %1996 = vmatmul.mubr.bf16.vlgmr.msra.gmra.mxu1 %v10085_v11  ;;  %2005 = vmatpush1.bf16.msra.mxu0 %v8183_v33  ;;  %v8204_v11 = vld [vmem:[#allocation7 + $0x688] ss:$16 sps:$4 sm:$0xff]  }
 0x131   :  { %2046 = vmatpush1.bf16.msra.mxu1 %v8186_v34  ;;  %2006 = vmatprep.subr.bf16.mxu0 %v8191_v35  ;;  %v8276_v33 = vld [vmem:[#allocation7 + $0x708] ss:$16 sps:$4 sm:$0xff]   ;;  %v10115_v34 = vld [vmem:[#allocation9 + $0xe4] ss:$16 sps:$4 sm:$0xff]   ;;  %v10117_v35 = vld [vmem:[#allocation9 + $0xec] ss:$16 sps:$4 sm:$0xff]  }
 0x132   :  { %2047 = vmatprep.subr.bf16.mxu1 %v8194_v36  ;;  %2036 = vmatprep.mubr.bf16.mxu0 %v10089_v39  ;;  %v8218_v39 = vld [vmem:[#allocation7 + $0x64c] ss:$16 sps:$4 sm:$0xff]   ;;  %v10119_v36 = vld [vmem:[#allocation9 + $0xe0] ss:$16 sps:$4 sm:$0xff]  }
 0x133   :  { %2077 = vmatprep.mubr.bf16.mxu1 %v10096_v53  ;;  %v8213_v53 = vld [vmem:[#allocation7 + $0x448] ss:$16 sps:$4 sm:$0xff]  }
 0x134   :  { %2007 = vmatpush1.bf16.msra.mxu0 %v8189_v37  ;;  %v10121_v37 = vld [vmem:[#allocation9 + $0xe8] ss:$16 sps:$4 sm:$0xff]  }
 0x135   :  { %2048 = vmatpush1.bf16.msra.mxu1 %v8192_v38  ;;  %2008 = vmatprep.subr.bf16.mxu0 %v8197_v40  ;;  %v10123_v38 = vld [vmem:[#allocation9 + $0xc4] ss:$16 sps:$4 sm:$0xff]   ;;  %v10125_v40 = vld [vmem:[#allocation9 + $0xcc] ss:$16 sps:$4 sm:$0xff]  }
 0x136   :  { %2049 = vmatprep.subr.bf16.mxu1 %v8200_v41 }
 0x138   :  { %2009 = vmatpush1.bf16.msra.mxu0 %v8195_v42 }
 0x139   :  { %2050 = vmatpush1.bf16.msra.mxu1 %v8198_v43  ;;  %2010 = vmatprep.subr.bf16.mxu0 %v8203_v50  ;;  %v10137_v43 = vld [vmem:[#allocation9 + $0xc0] ss:$16 sps:$4 sm:$0xff]   ;;  %v10139_v50 = vld [vmem:[#allocation9 + $0xc8] ss:$16 sps:$4 sm:$0xff]  }
 0x13a   :  { %2051 = vmatprep.subr.bf16.mxu1 %v8206_v55 }
 0x13c   :  { %2011 = vmatpush1.bf16.msra.mxu0 %v8201_v10 }
 0x13d   :  { %2052 = vmatpush1.bf16.msra.mxu1 %v8204_v11  ;;  %2012 = vmatprep.subr.bf16.mxu0 %v8209_v44  ;;  %v10147_v11 = vld [vmem:[#allocation9 + $0xa4] ss:$16 sps:$4 sm:$0xff]  }
 0x13e   :  { %2053 = vmatprep.subr.bf16.mxu1 %v8212_v45 }
 0x140   :  { %2013 = vmatpush1.bf16.msra.mxu0 %v8207_v46  ;;  %v10155_v46 = vld [vmem:[#allocation9 + $0xa0] ss:$16 sps:$4 sm:$0xff]  }
 0x141   :  { %2054 = vmatpush1.bf16.msra.mxu1 %v8210_v47  ;;  %2014 = vmatprep.subr.bf16.mxu0 %v8215_v48  ;;  %v10157_v47 = vld [vmem:[#allocation9 + $0xa8] ss:$16 sps:$4 sm:$0xff]  }
 0x142   :  { %2055 = vmatprep.subr.bf16.mxu1 %v8218_v39 }
 0x144   :  { %2015 = vmatpush1.bf16.msra.mxu0 %v8213_v53  ;;  %v10161_v53 = vld [vmem:[#allocation9 + $0x84] ss:$16 sps:$4 sm:$0xff]  }
 0x145   :  { %2056 = vmatpush1.bf16.msra.mxu1 %v8216_v49  ;;  %2016 = vmatprep.subr.bf16.mxu0 %v8221_v51  ;;  %v10163_v49 = vld [vmem:[#allocation9 + $0x8c] ss:$16 sps:$4 sm:$0xff]   ;;  %v10167_v51 = vld [vmem:[#allocation9 + $0x80] ss:$16 sps:$4 sm:$0xff]  }
 0x146   :  { %2057 = vmatprep.subr.bf16.mxu1 %v8224_v52  ;;  %v10169_v52 = vld [vmem:[#allocation9 + $0x88] ss:$16 sps:$4 sm:$0xff]  }
 0x148   :  { %2017 = vmatpush1.bf16.msra.mxu0 %v8219_v54  ;;  %v10173_v54 = vld [vmem:[#allocation9 + $0x64] ss:$16 sps:$4 sm:$0xff]  }
 0x149   :  { %2058 = vmatpush1.bf16.msra.mxu1 %v8222_v56  ;;  %2018 = vmatprep.subr.bf16.mxu0 %v8227_v57  ;;  %v10175_v56 = vld [vmem:[#allocation9 + $0x6c] ss:$16 sps:$4 sm:$0xff]   ;;  %v10179_v57 = vld [vmem:[#allocation9 + $0x60] ss:$16 sps:$4 sm:$0xff]  }
 0x14a   :  { %2059 = vmatprep.subr.bf16.mxu1 %v8230_v58  ;;  %v10181_v58 = vld [vmem:[#allocation9 + $0x68] ss:$16 sps:$4 sm:$0xff]  }
 0x14c   :  { %2019 = vmatpush1.bf16.msra.mxu0 %v8225_v59  ;;  %v10185_v59 = vld [vmem:[#allocation9 + $0x44] ss:$16 sps:$4 sm:$0xff]  }
 0x14d   :  { %2060 = vmatpush1.bf16.msra.mxu1 %v8228_v60  ;;  %2020 = vmatprep.subr.bf16.mxu0 %v8233_v61  ;;  %v10187_v60 = vld [vmem:[#allocation9 + $0x4c] ss:$16 sps:$4 sm:$0xff]   ;;  %v10191_v61 = vld [vmem:[#allocation9 + $0x40] ss:$16 sps:$4 sm:$0xff]  }
 0x14e   :  { %2061 = vmatprep.subr.bf16.mxu1 %v8236_v62  ;;  %v10193_v62 = vld [vmem:[#allocation9 + $0x48] ss:$16 sps:$4 sm:$0xff]  }
 0x150   :  { %2021 = vmatpush2.bf16.msra.mxu0 %v8231_v63  ;;  %v10197_v63 = vld [vmem:[#allocation9 + $0x24] ss:$16 sps:$4 sm:$0xff]  }
 0x151   :  { %2062 = vmatpush2.bf16.msra.mxu1 %v8234_v1  ;;  %2022 = vmatprep.subr.bf16.mxu0 %v8239_v2  ;;  %v10199_v1 = vld [vmem:[#allocation9 + $0x2c] ss:$16 sps:$4 sm:$0xff]   ;;  %v10203_v2 = vld [vmem:[#allocation9 + $0x20] ss:$16 sps:$4 sm:$0xff]  }
 0x152   :  { %2063 = vmatprep.subr.bf16.mxu1 %v8242_v3  ;;  %v10205_v3 = vld [vmem:[#allocation9 + $0x28] ss:$16 sps:$4 sm:$0xff]  }
 0x154   :  { %2023 = vmatpush2.bf16.msra.mxu0 %v8237_v4  ;;  %v10209_v4 = vld [vmem:[#allocation9 + $0x4] ss:$16 sps:$4 sm:$0xff]  }
 0x155   :  { %2064 = vmatpush2.bf16.msra.mxu1 %v8240_v5  ;;  %2024 = vmatprep.subr.bf16.mxu0 %v8245_v6  ;;  %v10211_v5 = vld [vmem:[#allocation9 + $0xc] ss:$16 sps:$4 sm:$0xff]   ;;  %v10215_v6 = vld [vmem:[#allocation9] ss:$16 sps:$4 sm:$0xff]  }
 0x156   :  { %2065 = vmatprep.subr.bf16.mxu1 %v8248_v7  ;;  %v10217_v7 = vld [vmem:[#allocation9 + $0x8] ss:$16 sps:$4 sm:$0xff]  }
 0x158   :  { %2025 = vmatpush2.bf16.msra.mxu0 %v8243_v8  ;;  %v458_v8 = vlaneseq }
 0x159   :  { %2066 = vmatpush2.bf16.msra.mxu1 %v8246_v9  ;;  %2026 = vmatprep.subr.bf16.mxu0 %v8251_v12 }
 0x15a   :  { %2067 = vmatprep.subr.bf16.mxu1 %v8254_v13  ;;  %v10245_v9 = vshrl.u32 %v458_v8, 7  ;;  %v456_v13 = vld [vmem:[#allocation10] sm:$0xf] }
 0x15c   :  { %2027 = vmatpush2.bf16.msra.mxu0 %v8249_v14  ;;  %v10252_v12 = vsub.s32 0, %v10245_v9  ;;  %v10255_v14 = vsub.s32 1, %v10245_v9 }
 0x15d   :  { %2068 = vmatpush2.bf16.msra.mxu1 %v8252_v15  ;;  %2028 = vmatprep.subr.bf16.mxu0 %v8257_v16 }
 0x15e   :  { %2069 = vmatprep.subr.bf16.mxu1 %v8260_v17  ;;  %v461_v15 = vrot.slane %v456_v13, %v10252_v12  ;;  %v465_v16 = vrot.slane %v456_v13, %v10255_v14 }
 0x160   :  { %2029 = vmatpush2.bf16.msra.mxu0 %v8255_v18 }
 0x161   :  { %2070 = vmatpush2.bf16.msra.mxu1 %v8258_v19  ;;  %2030 = vmatprep.subr.bf16.mxu0 %v8263_v20 }
 0x162   :  { %2071 = vmatprep.subr.bf16.mxu1 %v8266_v21 }
 0x164   :  { %2031 = vmatpush2.bf16.msra.mxu0 %v8261_v22 }
 0x165   :  { %2072 = vmatpush2.bf16.msra.mxu1 %v8264_v23  ;;  %2032 = vmatprep.subr.bf16.mxu0 %v8269_v26 }
 0x166   :  { %2073 = vmatprep.subr.bf16.mxu1 %v8272_v27 }
 0x168   :  { %2033 = vmatpush2.bf16.msra.mxu0 %v8267_v28 }
 0x169   :  { %2074 = vmatpush2.bf16.msra.mxu1 %v8270_v29  ;;  %2034 = vmatprep.subr.bf16.mxu0 %v8275_v30 }
 0x16a   :  { %2075 = vmatprep.subr.bf16.mxu1 %v8278_v31 }
 0x16c   :  { %2035 = vmatpush2.bf16.msra.mxu0 %v8273_v32 }
 0x16d   :  { %2076 = vmatpush2.bf16.msra.mxu1 %v8276_v33  ;;  %2283 = vmatprep.subr.bf16.mxu0 %v10115_v34 }
 0x16e   :  { %2324 = vmatprep.subr.bf16.mxu1 %v10117_v35 }
 0x16f   :  { %v10129_v41 = vpop.f32.mrf.mxu0  ;;  %2037 = vmatmul.mubr.bf16.vlgmr.msra.gmra.mxu0 %v10101_v24  ;;  %v10149_v24 = vld [vmem:[#allocation9 + $0xac] ss:$16 sps:$4 sm:$0xff]  }
 0x170   :  { %v10131_v42 = vpop.f32.mrf.mxu1  ;;  %2078 = vmatmul.mubr.bf16.vlgmr.msra.gmra.mxu1 %v10105_v25  ;;  %2284 = vmatpush1.bf16.msra.mxu0 %v10119_v36  ;;  %v14028_v25 = vmov 0   ;;  %v1793_v17 = vadd.f32 %v10129_v41, %v461_v15  ;;  %v10273_v15 = vld [vmem:[#allocation12 + $0xe4] ss:$16 sps:$4 sm:$0xff]  }
 0x171   :  { %2325 = vmatpush1.bf16.msra.mxu1 %v10121_v37  ;;  %v10141_v55 = vpop.f32.mrf.mxu0  ;;  %2285 = vmatprep.subr.bf16.mxu0 %v10123_v38 }
 0x172   :  { %v10143_v10 = vpop.f32.mrf.mxu1  ;;  %2326 = vmatprep.subr.bf16.mxu1 %v10125_v40  ;;  %2315 = vmatprep.mubr.bf16.mxu0 %v14028_v25  ;;  %v1795_v18 = vadd.f32 %v10141_v55, %v465_v16  ;;  %v1834_v19 = vadd.f32 %v10131_v42, %v1793_v17  ;;  %v10275_v16 = vld [vmem:[#allocation12 + $0xec] ss:$16 sps:$4 sm:$0xff]   ;;  %v10280_v17 = vsub.s32 2, %v10245_v9 }
 0x173   :  { %2356 = vmatprep.mubr.bf16.mxu1 %v14028_v25  ;;  %v1796_v44 = vpop.f32.mrf.mxu0 }
 0x174   :  { %v1837_v45 = vpop.f32.mrf.mxu1  ;;  %2286 = vmatpush1.bf16.msra.mxu0 %v10137_v43  ;;  %v1836_v22 = vadd.f32 %v10143_v10, %v1795_v18  ;;  %v10283_v18 = vsub.s32 3, %v10245_v9 }
 0x175   :  { %2327 = vmatpush1.bf16.msra.mxu1 %v10139_v50  ;;  %v1797_v48 = vpop.f32.mrf.mxu0  ;;  %2287 = vmatprep.subr.bf16.mxu0 %v10147_v11 }
 0x176   :  { %v1838_v39 = vpop.f32.mrf.mxu1  ;;  %2328 = vmatprep.subr.bf16.mxu1 %v10149_v24  ;;  %14609 = vst [vmem:[#allocation26_spill] sm:$0xff] %v10283_v18 }
 0x178   :  { %2288 = vmatpush1.bf16.msra.mxu0 %v10155_v46 }
 0x179   :  { %2329 = vmatpush1.bf16.msra.mxu1 %v10157_v47  ;;  %2289 = vmatprep.subr.bf16.mxu0 %v10161_v53 }
 0x17a   :  { %2330 = vmatprep.subr.bf16.mxu1 %v10163_v49 }
 0x17c   :  { %2290 = vmatpush1.bf16.msra.mxu0 %v10167_v51 }
 0x17d   :  { %2331 = vmatpush1.bf16.msra.mxu1 %v10169_v52  ;;  %2291 = vmatprep.subr.bf16.mxu0 %v10173_v54 }
 0x17e   :  { %2332 = vmatprep.subr.bf16.mxu1 %v10175_v56 }
 0x180   :  { %2292 = vmatpush1.bf16.msra.mxu0 %v10179_v57 }
 0x181   :  { %2333 = vmatpush1.bf16.msra.mxu1 %v10181_v58  ;;  %2293 = vmatprep.subr.bf16.mxu0 %v10185_v59 }
 0x182   :  { %2334 = vmatprep.subr.bf16.mxu1 %v10187_v60 }
 0x184   :  { %2294 = vmatpush1.bf16.msra.mxu0 %v10191_v61 }
 0x185   :  { %2335 = vmatpush1.bf16.msra.mxu1 %v10193_v62  ;;  %2295 = vmatprep.subr.bf16.mxu0 %v10197_v63 }
 0x186   :  { %2336 = vmatprep.subr.bf16.mxu1 %v10199_v1 }
 0x188   :  { %2296 = vmatpush1.bf16.msra.mxu0 %v10203_v2 }
 0x189   :  { %2337 = vmatpush1.bf16.msra.mxu1 %v10205_v3  ;;  %2297 = vmatprep.subr.bf16.mxu0 %v10209_v4 }
 0x18a   :  { %2338 = vmatprep.subr.bf16.mxu1 %v10211_v5 }
 0x18c   :  { %2298 = vmatpush1.bf16.msra.mxu0 %v10215_v6 }
 0x18d   :  { %2339 = vmatpush1.bf16.msra.mxu1 %v10217_v7  ;;  %2418 = vmatprep.subr.bf16.mxu0 %v10115_v34 }
 0x18e   :  { %2459 = vmatprep.subr.bf16.mxu1 %v10117_v35 }
 0x18f   :  { %2316 = vmatmul.mubr.bf16.vlgmr.msra.gmra.mxu0 %v14028_v25 }
 0x190   :  { %2357 = vmatmul.mubr.bf16.vlgmr.msra.gmra.mxu1 %v14028_v25  ;;  %2419 = vmatpush1.bf16.msra.mxu0 %v10119_v36 }
 0x191   :  { %2460 = vmatpush1.bf16.msra.mxu1 %v10121_v37  ;;  %2420 = vmatprep.subr.bf16.mxu0 %v10123_v38 }
 0x192   :  { %2461 = vmatprep.subr.bf16.mxu1 %v10125_v40  ;;  %2450 = vmatprep.mubr.bf16.mxu0 %v14028_v25 }
 0x193   :  { %2491 = vmatprep.mubr.bf16.mxu1 %v14028_v25 }
 0x194   :  { %2421 = vmatpush1.bf16.msra.mxu0 %v10137_v43 }
 0x195   :  { %2462 = vmatpush1.bf16.msra.mxu1 %v10139_v50  ;;  %2422 = vmatprep.subr.bf16.mxu0 %v10147_v11 }
 0x196   :  { %2463 = vmatprep.subr.bf16.mxu1 %v10149_v24 }
 0x198   :  { %2423 = vmatpush1.bf16.msra.mxu0 %v10155_v46 }
 0x199   :  { %2464 = vmatpush1.bf16.msra.mxu1 %v10157_v47  ;;  %2424 = vmatprep.subr.bf16.mxu0 %v10161_v53 }
 0x19a   :  { %2465 = vmatprep.subr.bf16.mxu1 %v10163_v49 }
 0x19c   :  { %2425 = vmatpush1.bf16.msra.mxu0 %v10167_v51 }
 0x19d   :  { %2466 = vmatpush1.bf16.msra.mxu1 %v10169_v52  ;;  %2426 = vmatprep.subr.bf16.mxu0 %v10173_v54 }
 0x19e   :  { %2467 = vmatprep.subr.bf16.mxu1 %v10175_v56 }
 0x1a0   :  { %2427 = vmatpush1.bf16.msra.mxu0 %v10179_v57 }
 0x1a1   :  { %2468 = vmatpush1.bf16.msra.mxu1 %v10181_v58  ;;  %2428 = vmatprep.subr.bf16.mxu0 %v10185_v59 }
 0x1a2   :  { %2469 = vmatprep.subr.bf16.mxu1 %v10187_v60 }
 0x1a4   :  { %2429 = vmatpush1.bf16.msra.mxu0 %v10191_v61 }
 0x1a5   :  { %2470 = vmatpush1.bf16.msra.mxu1 %v10193_v62  ;;  %2430 = vmatprep.subr.bf16.mxu0 %v10197_v63 }
 0x1a6   :  { %2471 = vmatprep.subr.bf16.mxu1 %v10199_v1 }
 0x1a8   :  { %2431 = vmatpush1.bf16.msra.mxu0 %v10203_v2 }
 0x1a9   :  { %2472 = vmatpush1.bf16.msra.mxu1 %v10205_v3  ;;  %2432 = vmatprep.subr.bf16.mxu0 %v10209_v4 }
 0x1aa   :  { %2473 = vmatprep.subr.bf16.mxu1 %v10211_v5 }
 0x1ac   :  { %2433 = vmatpush1.bf16.msra.mxu0 %v10215_v6 }
 0x1ad   :  { %2474 = vmatpush1.bf16.msra.mxu1 %v10217_v7  ;;  %2957 = vmatprep.subr.bf16.mxu0 %v10273_v15 }
 0x1ae   :  { %2998 = vmatprep.subr.bf16.mxu1 %v10275_v16 }
 0x1af   :  { %v1874_v20 = vpop.f32.mrf.mxu0 }
 0x1b0   :  { %v1915_v21 = vpop.f32.mrf.mxu1  ;;  %v1875_v23 = vadd.f32 %v1874_v20, %v1834_v19  ;;  %v469_v19 = vrot.slane %v456_v13, %v10280_v17  ;;  %v473_v20 = vrot.slane %v456_v13, %v10283_v18  ;;  %v2372_v13 = vunpack.c.l.s4 %v9966_v0 }
 0x1b1   :  { %v1876_v26 = vpop.f32.mrf.mxu0 }
 0x1b2   :  { %v1917_v27 = vpop.f32.mrf.mxu1  ;;  %v1916_v28 = vadd.f32 %v1915_v21, %v1875_v23  ;;  %v1877_v29 = vadd.f32 %v1876_v26, %v1836_v22 }
 0x1b3   :  { %v1878_v30 = vpop.f32.mrf.mxu0 }
 0x1b4   :  { %v1919_v31 = vpop.f32.mrf.mxu1  ;;  %2086 = vst [vmem:[#allocation3] sm:$0xff] %v1916_v28  ;;  %v1918_v32 = vadd.f32 %v1917_v27, %v1877_v29 }
 0x1b5   :  { %v1879_v33 = vpop.f32.mrf.mxu0 }
 0x1b6   :  { %v1920_v41 = vpop.f32.mrf.mxu1  ;;  %2087 = vst [vmem:[#allocation3 + $0x8] sm:$0xff] %v1918_v32 }
 0x1ef   :  { %v1956_v55 = vpop.f32.mrf.mxu0 }
 0x1f0   :  { %v1997_v44 = vpop.f32.mrf.mxu1  ;;  %v1957_v21 = vadd.f32 %v1956_v55, %v469_v19  ;;  %v2373_v55 = vunpack.c.0.s8 %v2372_v13 }
 0x1f1   :  { %v1958_v45 = vpop.f32.mrf.mxu0 }
 0x1f2   :  { %v1999_v42 = vpop.f32.mrf.mxu1  ;;  %v1959_v22 = vadd.f32 %v1958_v45, %v473_v20  ;;  %v1998_v23 = vadd.f32 %v1997_v44, %v1957_v21  ;;  %v10288_v19 = vsub.s32 %v2373_v55, %v10245_v9 }
 0x1f3   :  { %v1960_v48 = vpop.f32.mrf.mxu0 }
 0x1f4   :  { %v2001_v39 = vpop.f32.mrf.mxu1  ;;  %v2000_v28 = vadd.f32 %v1999_v42, %v1959_v22  ;;  %14610 = vst [vmem:[#allocation27_spill] sm:$0xff] %v10288_v19 }
 0x1f5   :  { %v1961_v8 = vpop.f32.mrf.mxu0 }
 0x1f6   :  { %v2002_v10 = vpop.f32.mrf.mxu1 }
 0x22f   :  { %v2038_v26 = vpop.f32.mrf.mxu0 }
 0x230   :  { %v2079_v27 = vpop.f32.mrf.mxu1  ;;  %v2039_v29 = vadd.f32 %v2038_v26, %v1998_v23 }
 0x231   :  { %v2040_v30 = vpop.f32.mrf.mxu0 }
 0x232   :  { %v2081_v31 = vpop.f32.mrf.mxu1  ;;  %v2080_v32 = vadd.f32 %v2079_v27, %v2039_v29  ;;  %v2041_v33 = vadd.f32 %v2040_v30, %v2000_v28 }
 0x233   :  { %v2042_v41 = vpop.f32.mrf.mxu0 }
 0x234   :  { %v2083_v48 = vpop.f32.mrf.mxu1  ;;  %2088 = vst [vmem:[#allocation3 + $0x10] sm:$0xff] %v2080_v32  ;;  %v2082_v39 = vadd.f32 %v2081_v31, %v2041_v33 }
 0x235   :  { %v2043_v8 = vpop.f32.mrf.mxu0 }
 0x236   :  { %v2084_v10 = vpop.f32.mrf.mxu1  ;;  %2089 = vst [vmem:[#allocation3 + $0x18] sm:$0xff] %v2082_v39 }
 0x23d   :  { %v2090_v32 = vld [vmem:[#allocation3] ss:$8 sm:$0xf] }
 0x24f   :  { %v2317_v45 = vpop.f32.mrf.mxu0 }
 0x250   :  { %v2358_v44 = vpop.f32.mrf.mxu1 }
 0x251   :  { %v2319_v42 = vpop.f32.mrf.mxu0 }
 0x252   :  { %v2360_v20 = vpop.f32.mrf.mxu1  ;;  %v2369_v21 = vcombine.low %v2317_v45, %v2319_v42 }
 0x253   :  { %v2370_v22 = vcombine.low %v2358_v44, %v2360_v20  ;;  %v2321_v23 = vpop.f32.mrf.mxu0 }
 0x254   :  { %v2362_v26 = vpop.f32.mrf.mxu1  ;;  %v2377_v27 = vrot.slane %v2369_v21, %v10288_v19  ;;  %v10298_v23 = vld [vmem:[#allocation12 + $0xe8] ss:$16 sps:$4 sm:$0xff]  }
 0x255   :  { %v2384_v28 = vrot.slane %v2370_v22, %v10288_v19  ;;  %v2322_v29 = vpop.f32.mrf.mxu0  ;;  %v10296_v22 = vld [vmem:[#allocation12 + $0xe0] ss:$16 sps:$4 sm:$0xff]  }
 0x256   :  { %v2363_v30 = vpop.f32.mrf.mxu1  ;;  %v10310_v29 = vld [vmem:[#allocation12 + $0xc0] ss:$16 sps:$4 sm:$0xff]  }
 0x257   :  { %v2385_v31 = vcombine.low %v2377_v27, %v2384_v28  ;;  %v10302_v27 = vld [vmem:[#allocation12 + $0xc4] ss:$16 sps:$4 sm:$0xff]   ;;  %v10304_v28 = vld [vmem:[#allocation12 + $0xcc] ss:$16 sps:$4 sm:$0xff]   ;;  %v10312_v30 = vld [vmem:[#allocation12 + $0xc8] ss:$16 sps:$4 sm:$0xff]  }
 0x259   :  { %v2392_v0 = vrot.slane %v2385_v31, %v10288_v19  ;;  %v10316_v31 = vld [vmem:[#allocation12 + $0xa4] ss:$16 sps:$4 sm:$0xff]  }
 0x25b   :  { %v2394_v33 = vadd.f32 %v2392_v0, %v2090_v32  ;;  %v10318_v0 = vld [vmem:[#allocation12 + $0xac] ss:$16 sps:$4 sm:$0xff]   ;;  %v10324_v32 = vld [vmem:[#allocation12 + $0xa0] ss:$16 sps:$4 sm:$0xff]  }
 0x25d   :  { %v7553_v41 = vmul.f32 -1.442695, %v2394_v33  ;;  %v2402_v39 = vrot.slane %v2394_v33, 3  ;;  %v10326_v33 = vld [vmem:[#allocation12 + $0xa8] ss:$16 sps:$4 sm:$0xff]  }
 0x25f   :  { %8615 = vpow2.f32 %v7553_v41  ;;  %v10330_v41 = vld [vmem:[#allocation12 + $0x84] ss:$16 sps:$4 sm:$0xff]  }
 0x26c   :  { %v8616_v9 = vpop.eup %8615 }
 0x26d   :  { %v2398_v48 = vadd.f32 1.0, %v8616_v9  ;;  %v10332_v9 = vld [vmem:[#allocation12 + $0x8c] ss:$16 sps:$4 sm:$0xff]  }
 0x26f   :  { %8617 = vrcp.f32 %v2398_v48  ;;  %v10336_v48 = vld [vmem:[#allocation12 + $0x80] ss:$16 sps:$4 sm:$0xff]  }
 0x270   :  { %8619 = vtanh.f32 %v2402_v39  ;;  %v10338_v39 = vld [vmem:[#allocation12 + $0x88] ss:$16 sps:$4 sm:$0xff]  }
 0x27c   :  { %v8618_v8 = vpop.eup %8617 }
 0x27d   :  { %v2406_v10 = vrot.slane %v8618_v8, 1  ;;  %v8620_v13 = vpop.eup %8619  ;;  %v2412_v42 = vrot.slane %v8618_v8, 2 }
 0x27e   :  { %v2409_v55 = vmul.f32 %v8620_v13, %v8618_v8  ;;  %v10342_v8 = vld [vmem:[#allocation12 + $0x64] ss:$16 sps:$4 sm:$0xff]   ;;  %v10348_v13 = vld [vmem:[#allocation12 + $0x60] ss:$16 sps:$4 sm:$0xff]  }
 0x27f   :  { %v2408_v45 = vmul.f32 0.0, %v2406_v10  ;;  %14611 = vst [vmem:[#allocation28_spill] sm:$0xff] %v10342_v8  ;;  %v10344_v10 = vld [vmem:[#allocation12 + $0x6c] ss:$16 sps:$4 sm:$0xff]   ;;  %14613 = vst [vmem:[#allocation30_spill] sm:$0xff] %v10348_v13 }
 0x280   :  { %14612 = vst [vmem:[#allocation29_spill] sm:$0xff] %v10344_v10 }
 0x281   :  { %v10293_v44 = vadd.f32 %v2409_v55, %v2408_v45  ;;  %v10350_v55 = vld [vmem:[#allocation12 + $0x68] ss:$16 sps:$4 sm:$0xff]   ;;  %v10354_v45 = vld [vmem:[#allocation12 + $0x44] ss:$16 sps:$4 sm:$0xff]  }
 0x282   :  { %14614 = vst [vmem:[#allocation31_spill] sm:$0xff] %v10350_v55  ;;  %14615 = vst [vmem:[#allocation32_spill] sm:$0xff] %v10354_v45 }
 0x283   :  { %8621 = vtanh.f32 %v10293_v44 }
 0x290   :  { %v8622_v20 = vpop.eup %8621 }
 0x291   :  { %v2414_v21 = vmul.f32 %v8622_v20, %v2412_v42  ;;  %v10356_v42 = vld [vmem:[#allocation12 + $0x4c] ss:$16 sps:$4 sm:$0xff]   ;;  %v10360_v20 = vld [vmem:[#allocation12 + $0x40] ss:$16 sps:$4 sm:$0xff]  }
 0x292   :  { %14616 = vst [vmem:[#allocation33_spill] sm:$0xff] %v10356_v42  ;;  %14617 = vst [vmem:[#allocation34_spill] sm:$0xff] %v10360_v20 }
 0x293   :  { %v10300_v26 = vpack.c.bf16 %v2414_v21, %v2414_v21  ;;  %v10362_v21 = vld [vmem:[#allocation12 + $0x48] ss:$16 sps:$4 sm:$0xff]  }
 0x294   :  { %14618 = vst [vmem:[#allocation35_spill] sm:$0xff] %v10362_v21 }
 0x295   :  { %2451 = vmatmul.mubr.bf16.vlgmr.msra.gmra.mxu0 %v10300_v26  ;;  %2492 = vmatmul.mubr.bf16.vlgmr.msra.gmra.mxu1 %v10300_v26 }
 0x296   :  { %2958 = vmatpush1.bf16.msra.mxu0 %v10296_v22  ;;  %2999 = vmatpush1.bf16.msra.mxu1 %v10298_v23 }
 0x297   :  { %2959 = vmatprep.subr.bf16.mxu0 %v10302_v27  ;;  %3000 = vmatprep.subr.bf16.mxu1 %v10304_v28 }
 0x298   :  { %2989 = vmatprep.mubr.bf16.mxu0 %v14028_v25  ;;  %3030 = vmatprep.mubr.bf16.mxu1 %v14028_v25  ;;  %v10366_v25 = vld [vmem:[#allocation12 + $0x24] ss:$16 sps:$4 sm:$0xff]  }
 0x299   :  { %14619 = vst [vmem:[#allocation36_spill] sm:$0xff] %v10366_v25 }
 0x29a   :  { %2960 = vmatpush1.bf16.msra.mxu0 %v10310_v29  ;;  %3001 = vmatpush1.bf16.msra.mxu1 %v10312_v30 }
 0x29b   :  { %2961 = vmatprep.subr.bf16.mxu0 %v10316_v31  ;;  %3002 = vmatprep.subr.bf16.mxu1 %v10318_v0 }
 0x29e   :  { %2962 = vmatpush1.bf16.msra.mxu0 %v10324_v32  ;;  %3003 = vmatpush1.bf16.msra.mxu1 %v10326_v33 }
 0x29f   :  { %2963 = vmatprep.subr.bf16.mxu0 %v10330_v41  ;;  %3004 = vmatprep.subr.bf16.mxu1 %v10332_v9 }
 0x2a2   :  { %2964 = vmatpush1.bf16.msra.mxu0 %v10336_v48  ;;  %3005 = vmatpush1.bf16.msra.mxu1 %v10338_v39 }
 0x2a3   :  { %2965 = vmatprep.subr.bf16.mxu0 %v10342_v8  ;;  %3006 = vmatprep.subr.bf16.mxu1 %v10344_v10  ;;  %v10368_v8 = vld [vmem:[#allocation12 + $0x2c] ss:$16 sps:$4 sm:$0xff]   ;;  %v10372_v10 = vld [vmem:[#allocation12 + $0x20] ss:$16 sps:$4 sm:$0xff]  }
 0x2a4   :  { %14620 = vst [vmem:[#allocation37_spill] sm:$0xff] %v10368_v8  ;;  %14621 = vst [vmem:[#allocation38_spill] sm:$0xff] %v10372_v10 }
 0x2a6   :  { %2966 = vmatpush1.bf16.msra.mxu0 %v10348_v13  ;;  %3007 = vmatpush1.bf16.msra.mxu1 %v10350_v55  ;;  %v10374_v13 = vld [vmem:[#allocation12 + $0x28] ss:$16 sps:$4 sm:$0xff]   ;;  %v10378_v55 = vld [vmem:[#allocation12 + $0x4] ss:$16 sps:$4 sm:$0xff]  }
 0x2a7   :  { %2967 = vmatprep.subr.bf16.mxu0 %v10354_v45  ;;  %3008 = vmatprep.subr.bf16.mxu1 %v10356_v42  ;;  %14622 = vst [vmem:[#allocation39_spill] sm:$0xff] %v10374_v13  ;;  %14623 = vst [vmem:[#allocation40_spill] sm:$0xff] %v10378_v55  ;;  %v10380_v45 = vld [vmem:[#allocation12 + $0xc] ss:$16 sps:$4 sm:$0xff]   ;;  %v10384_v42 = vld [vmem:[#allocation12] ss:$16 sps:$4 sm:$0xff]  }
 0x2a8   :  { %14624 = vst [vmem:[#allocation41_spill] sm:$0xff] %v10380_v45  ;;  %14625 = vst [vmem:[#allocation42_spill] sm:$0xff] %v10384_v42 }
 0x2aa   :  { %2968 = vmatpush1.bf16.msra.mxu0 %v10360_v20  ;;  %3009 = vmatpush1.bf16.msra.mxu1 %v10362_v21  ;;  %v10386_v20 = vld [vmem:[#allocation12 + $0x8] ss:$16 sps:$4 sm:$0xff]   ;;  %v10390_v21 = vld [vmem:[#allocation12 + $0x1e4] ss:$16 sps:$4 sm:$0xff]  }
 0x2ab   :  { %2969 = vmatprep.subr.bf16.mxu0 %v10366_v25  ;;  %3010 = vmatprep.subr.bf16.mxu1 %v10368_v8  ;;  %14626 = vst [vmem:[#allocation43_spill] sm:$0xff] %v10386_v20  ;;  %14627 = vst [vmem:[#allocation44_spill] sm:$0xff] %v10390_v21  ;;  %v10392_v25 = vld [vmem:[#allocation12 + $0x1ec] ss:$16 sps:$4 sm:$0xff]   ;;  %v10396_v8 = vld [vmem:[#allocation12 + $0x1e0] ss:$16 sps:$4 sm:$0xff]  }
 0x2ac   :  { %14628 = vst [vmem:[#allocation45_spill] sm:$0xff] %v10392_v25  ;;  %14629 = vst [vmem:[#allocation46_spill] sm:$0xff] %v10396_v8 }
 0x2ae   :  { %2970 = vmatpush1.bf16.msra.mxu0 %v10372_v10  ;;  %3011 = vmatpush1.bf16.msra.mxu1 %v10374_v13  ;;  %v10398_v10 = vld [vmem:[#allocation12 + $0x1e8] ss:$16 sps:$4 sm:$0xff]   ;;  %v10402_v13 = vld [vmem:[#allocation12 + $0x1c4] ss:$16 sps:$4 sm:$0xff]  }
 0x2af   :  { %2971 = vmatprep.subr.bf16.mxu0 %v10378_v55  ;;  %3012 = vmatprep.subr.bf16.mxu1 %v10380_v45  ;;  %14630 = vst [vmem:[#allocation47_spill] sm:$0xff] %v10398_v10  ;;  %14631 = vst [vmem:[#allocation48_spill] sm:$0xff] %v10402_v13  ;;  %v10404_v55 = vld [vmem:[#allocation12 + $0x1cc] ss:$16 sps:$4 sm:$0xff]   ;;  %v10408_v45 = vld [vmem:[#allocation12 + $0x1c0] ss:$16 sps:$4 sm:$0xff]  }
 0x2b0   :  { %14632 = vst [vmem:[#allocation49_spill] sm:$0xff] %v10404_v55  ;;  %14633 = vst [vmem:[#allocation50_spill] sm:$0xff] %v10408_v45 }
 0x2b2   :  { %2972 = vmatpush1.bf16.msra.mxu0 %v10384_v42  ;;  %3013 = vmatpush1.bf16.msra.mxu1 %v10386_v20  ;;  %v10410_v42 = vld [vmem:[#allocation12 + $0x1c8] ss:$16 sps:$4 sm:$0xff]   ;;  %v10414_v20 = vld [vmem:[#allocation12 + $0x1a4] ss:$16 sps:$4 sm:$0xff]  }
 0x2b3   :  { %2973 = vmatprep.subr.bf16.mxu0 %v10390_v21  ;;  %3014 = vmatprep.subr.bf16.mxu1 %v10392_v25  ;;  %14634 = vst [vmem:[#allocation51_spill] sm:$0xff] %v10410_v42  ;;  %14635 = vst [vmem:[#allocation52_spill] sm:$0xff] %v10414_v20  ;;  %v10416_v21 = vld [vmem:[#allocation12 + $0x1ac] ss:$16 sps:$4 sm:$0xff]   ;;  %v10420_v25 = vld [vmem:[#allocation12 + $0x1a0] ss:$16 sps:$4 sm:$0xff]  }
 0x2b4   :  { %14636 = vst [vmem:[#allocation53_spill] sm:$0xff] %v10416_v21  ;;  %14637 = vst [vmem:[#allocation54_spill] sm:$0xff] %v10420_v25 }
 0x2b6   :  { %2974 = vmatpush2.bf16.msra.mxu0 %v10396_v8  ;;  %3015 = vmatpush2.bf16.msra.mxu1 %v10398_v10  ;;  %v10422_v8 = vld [vmem:[#allocation12 + $0x1a8] ss:$16 sps:$4 sm:$0xff]   ;;  %v10426_v10 = vld [vmem:[#allocation12 + $0x184] ss:$16 sps:$4 sm:$0xff]  }
 0x2b7   :  { %2975 = vmatprep.subr.bf16.mxu0 %v10402_v13  ;;  %3016 = vmatprep.subr.bf16.mxu1 %v10404_v55  ;;  %14638 = vst [vmem:[#allocation55_spill] sm:$0xff] %v10422_v8  ;;  %14639 = vst [vmem:[#allocation56_spill] sm:$0xff] %v10426_v10  ;;  %v10428_v13 = vld [vmem:[#allocation12 + $0x18c] ss:$16 sps:$4 sm:$0xff]   ;;  %v10432_v55 = vld [vmem:[#allocation12 + $0x180] ss:$16 sps:$4 sm:$0xff]  }
 0x2b8   :  { %14640 = vst [vmem:[#allocation57_spill] sm:$0xff] %v10428_v13  ;;  %14641 = vst [vmem:[#allocation58_spill] sm:$0xff] %v10432_v55 }
 0x2ba   :  { %2976 = vmatpush2.bf16.msra.mxu0 %v10408_v45  ;;  %3017 = vmatpush2.bf16.msra.mxu1 %v10410_v42  ;;  %v10434_v45 = vld [vmem:[#allocation12 + $0x188] ss:$16 sps:$4 sm:$0xff]   ;;  %v10438_v42 = vld [vmem:[#allocation12 + $0x164] ss:$16 sps:$4 sm:$0xff]  }
 0x2bb   :  { %2977 = vmatprep.subr.bf16.mxu0 %v10414_v20  ;;  %3018 = vmatprep.subr.bf16.mxu1 %v10416_v21  ;;  %14642 = vst [vmem:[#allocation59_spill] sm:$0xff] %v10434_v45  ;;  %14643 = vst [vmem:[#allocation60_spill] sm:$0xff] %v10438_v42  ;;  %v10440_v20 = vld [vmem:[#allocation12 + $0x16c] ss:$16 sps:$4 sm:$0xff]   ;;  %v10444_v21 = vld [vmem:[#allocation12 + $0x160] ss:$16 sps:$4 sm:$0xff]  }
 0x2bc   :  { %14644 = vst [vmem:[#allocation61_spill] sm:$0xff] %v10440_v20  ;;  %14645 = vst [vmem:[#allocation62_spill] sm:$0xff] %v10444_v21 }
 0x2be   :  { %2978 = vmatpush2.bf16.msra.mxu0 %v10420_v25  ;;  %3019 = vmatpush2.bf16.msra.mxu1 %v10422_v8  ;;  %v10446_v25 = vld [vmem:[#allocation12 + $0x168] ss:$16 sps:$4 sm:$0xff]   ;;  %v10450_v8 = vld [vmem:[#allocation12 + $0x144] ss:$16 sps:$4 sm:$0xff]  }
 0x2bf   :  { %2979 = vmatprep.subr.bf16.mxu0 %v10426_v10  ;;  %3020 = vmatprep.subr.bf16.mxu1 %v10428_v13  ;;  %14646 = vst [vmem:[#allocation63_spill] sm:$0xff] %v10446_v25  ;;  %14647 = vst [vmem:[#allocation64_spill] sm:$0xff] %v10450_v8  ;;  %v10452_v10 = vld [vmem:[#allocation12 + $0x14c] ss:$16 sps:$4 sm:$0xff]   ;;  %v10456_v13 = vld [vmem:[#allocation12 + $0x140] ss:$16 sps:$4 sm:$0xff]  }
 0x2c0   :  { %14648 = vst [vmem:[#allocation65_spill] sm:$0xff] %v10452_v10  ;;  %14649 = vst [vmem:[#allocation66_spill] sm:$0xff] %v10456_v13 }
 0x2c2   :  { %2980 = vmatpush2.bf16.msra.mxu0 %v10432_v55  ;;  %3021 = vmatpush2.bf16.msra.mxu1 %v10434_v45  ;;  %v10458_v55 = vld [vmem:[#allocation12 + $0x148] ss:$16 sps:$4 sm:$0xff]   ;;  %v10462_v45 = vld [vmem:[#allocation12 + $0x124] ss:$16 sps:$4 sm:$0xff]  }
 0x2c3   :  { %2981 = vmatprep.subr.bf16.mxu0 %v10438_v42  ;;  %3022 = vmatprep.subr.bf16.mxu1 %v10440_v20  ;;  %v10464_v42 = vld [vmem:[#allocation12 + $0x12c] ss:$16 sps:$4 sm:$0xff]   ;;  %v10468_v20 = vld [vmem:[#allocation12 + $0x120] ss:$16 sps:$4 sm:$0xff]  }
 0x2c6   :  { %2982 = vmatpush2.bf16.msra.mxu0 %v10444_v21  ;;  %3023 = vmatpush2.bf16.msra.mxu1 %v10446_v25  ;;  %v10470_v21 = vld [vmem:[#allocation12 + $0x128] ss:$16 sps:$4 sm:$0xff]   ;;  %v10474_v25 = vld [vmem:[#allocation12 + $0x104] ss:$16 sps:$4 sm:$0xff]  }
 0x2c7   :  { %2983 = vmatprep.subr.bf16.mxu0 %v10450_v8  ;;  %3024 = vmatprep.subr.bf16.mxu1 %v10452_v10  ;;  %v10476_v8 = vld [vmem:[#allocation12 + $0x10c] ss:$16 sps:$4 sm:$0xff]   ;;  %v10480_v10 = vld [vmem:[#allocation12 + $0x100] ss:$16 sps:$4 sm:$0xff]  }
 0x2c8   :  { %14650 = vst [vmem:[#allocation67_spill] sm:$0xff] %v10476_v8 }
 0x2ca   :  { %2984 = vmatpush2.bf16.msra.mxu0 %v10456_v13  ;;  %3025 = vmatpush2.bf16.msra.mxu1 %v10458_v55  ;;  %v10482_v13 = vld [vmem:[#allocation12 + $0x108] ss:$16 sps:$4 sm:$0xff]  }
 0x2cb   :  { %2985 = vmatprep.subr.bf16.mxu0 %v10462_v45  ;;  %3026 = vmatprep.subr.bf16.mxu1 %v10464_v42 }
 0x2ce   :  { %2986 = vmatpush2.bf16.msra.mxu0 %v10468_v20  ;;  %3027 = vmatpush2.bf16.msra.mxu1 %v10470_v21 }
 0x2cf   :  { %2987 = vmatprep.subr.bf16.mxu0 %v10474_v25  ;;  %3028 = vmatprep.subr.bf16.mxu1 %v10476_v8  ;;  %v14651_v8 = vmov 0  }
 0x2d2   :  { %2988 = vmatpush2.bf16.msra.mxu0 %v10480_v10  ;;  %3029 = vmatpush2.bf16.msra.mxu1 %v10482_v13 }
 0x2d3   :  { %3066 = vmatprep.subr.bf16.mxu0 %v10115_v34  ;;  %3107 = vmatprep.subr.bf16.mxu1 %v10117_v35 }
 0x2d5   :  { %2990 = vmatmul.mubr.bf16.vlgmr.msra.gmra.mxu0 %v10300_v26  ;;  %3031 = vmatmul.mubr.bf16.vlgmr.msra.gmra.mxu1 %v10300_v26 }
 0x2d6   :  { %3067 = vmatpush1.bf16.msra.mxu0 %v10119_v36  ;;  %3108 = vmatpush1.bf16.msra.mxu1 %v10121_v37 }
 0x2d7   :  { %3068 = vmatprep.subr.bf16.mxu0 %v10123_v38  ;;  %3109 = vmatprep.subr.bf16.mxu1 %v10125_v40 }
 0x2d8   :  { %3098 = vmatprep.mubr.bf16.mxu0 %v14651_v8  ;;  %3139 = vmatprep.mubr.bf16.mxu1 %v14651_v8 }
 0x2da   :  { %3069 = vmatpush1.bf16.msra.mxu0 %v10137_v43  ;;  %3110 = vmatpush1.bf16.msra.mxu1 %v10139_v50 }
 0x2db   :  { %3070 = vmatprep.subr.bf16.mxu0 %v10147_v11  ;;  %3111 = vmatprep.subr.bf16.mxu1 %v10149_v24 }
 0x2de   :  { %3071 = vmatpush1.bf16.msra.mxu0 %v10155_v46  ;;  %3112 = vmatpush1.bf16.msra.mxu1 %v10157_v47 }
 0x2df   :  { %3072 = vmatprep.subr.bf16.mxu0 %v10161_v53  ;;  %3113 = vmatprep.subr.bf16.mxu1 %v10163_v49 }
 0x2e2   :  { %3073 = vmatpush1.bf16.msra.mxu0 %v10167_v51  ;;  %3114 = vmatpush1.bf16.msra.mxu1 %v10169_v52  ;;  %v2417_v51 = vld [vmem:[#allocation3 + $0x1] ss:$8 sm:$0xf] }
 0x2e3   :  { %3074 = vmatprep.subr.bf16.mxu0 %v10173_v54  ;;  %3115 = vmatprep.subr.bf16.mxu1 %v10175_v56 }
 0x2e6   :  { %3075 = vmatpush1.bf16.msra.mxu0 %v10179_v57  ;;  %3116 = vmatpush1.bf16.msra.mxu1 %v10181_v58 }
 0x2e7   :  { %3076 = vmatprep.subr.bf16.mxu0 %v10185_v59  ;;  %3117 = vmatprep.subr.bf16.mxu1 %v10187_v60 }
 0x2ea   :  { %3077 = vmatpush1.bf16.msra.mxu0 %v10191_v61  ;;  %3118 = vmatpush1.bf16.msra.mxu1 %v10193_v62 }
 0x2eb   :  { %3078 = vmatprep.subr.bf16.mxu0 %v10197_v63  ;;  %3119 = vmatprep.subr.bf16.mxu1 %v10199_v1 }
 0x2ee   :  { %3079 = vmatpush1.bf16.msra.mxu0 %v10203_v2  ;;  %3120 = vmatpush1.bf16.msra.mxu1 %v10205_v3  ;;  %v2615_v2 = vld [vmem:[%s14018_s5] sm:$0xf] }
 0x2ef   :  { %3080 = vmatprep.subr.bf16.mxu0 %v10209_v4  ;;  %3121 = vmatprep.subr.bf16.mxu1 %v10211_v5  ;;  %v10537_v3 = vrot.slane %v2615_v2, %v10252_v12  ;;  %v10540_v4 = vrot.slane %v2615_v2, %v10255_v14 }
 0x2f1   :  { %14652 = vst [vmem:[#allocation68_spill] sm:$0xff] %v10537_v3  ;;  %14653 = vst [vmem:[#allocation69_spill] sm:$0xff] %v10540_v4 }
 0x2f2   :  { %3081 = vmatpush1.bf16.msra.mxu0 %v10215_v6  ;;  %3122 = vmatpush1.bf16.msra.mxu1 %v10217_v7 }
 0x2f3   :  { %3199 = vmatprep.subr.bf16.mxu0 %v10273_v15  ;;  %3240 = vmatprep.subr.bf16.mxu1 %v10275_v16 }
 0x355   :  { %v2452_v34 = vpop.f32.mrf.mxu0  ;;  %v2493_v35 = vpop.f32.mrf.mxu1 }
 0x357   :  { %v2454_v36 = vpop.f32.mrf.mxu0  ;;  %v2495_v37 = vpop.f32.mrf.mxu1 }
 0x358   :  { %v2504_v38 = vcombine.low %v2452_v34, %v2454_v36  ;;  %v2505_v40 = vcombine.low %v2493_v35, %v2495_v37 }
 0x359   :  { %v2456_v43 = vpop.f32.mrf.mxu0  ;;  %v2497_v50 = vpop.f32.mrf.mxu1 }
 0x35a   :  { %v2512_v11 = vrot.slane %v2504_v38, %v10288_v19  ;;  %v2519_v24 = vrot.slane %v2505_v40, %v10288_v19 }
 0x35b   :  { %v2457_v46 = vpop.f32.mrf.mxu0  ;;  %v2498_v47 = vpop.f32.mrf.mxu1 }
 0x35c   :  { %v2520_v53 = vcombine.low %v2512_v11, %v2519_v24  ;;  %v10551_v24 = vrot.slane %v2615_v2, %v10280_v17  ;;  %v14661_v47 = vld [vmem:[#allocation33_spill] sm:$0xff] }
 0x35e   :  { %v2527_v49 = vrot.slane %v2520_v53, %v10288_v19  ;;  %14654 = vst [vmem:[#allocation70_spill] sm:$0xff] %v10551_v24  ;;  %v14664_v53 = vld [vmem:[#allocation36_spill] sm:$0xff] }
 0x360   :  { %v2529_v52 = vadd.f32 %v2527_v49, %v2417_v51  ;;  %v14665_v49 = vld [vmem:[#allocation37_spill] sm:$0xff]  ;;  %v14666_v51 = vld [vmem:[#allocation38_spill] sm:$0xff] }
 0x362   :  { %v7554_v54 = vmul.f32 -1.442695, %v2529_v52  ;;  %v2537_v58 = vrot.slane %v2529_v52, 3  ;;  %v14667_v52 = vld [vmem:[#allocation39_spill] sm:$0xff] }
 0x364   :  { %8623 = vpow2.f32 %v7554_v54  ;;  %v14668_v54 = vld [vmem:[#allocation40_spill] sm:$0xff] }
 0x371   :  { %v8624_v56 = vpop.eup %8623 }
 0x372   :  { %v2533_v57 = vadd.f32 1.0, %v8624_v56  ;;  %v14669_v56 = vld [vmem:[#allocation41_spill] sm:$0xff] }
 0x374   :  { %8625 = vrcp.f32 %v2533_v57 }
 0x375   :  { %8627 = vtanh.f32 %v2537_v58 }
 0x381   :  { %v8626_v59 = vpop.eup %8625 }
 0x382   :  { %v2541_v60 = vrot.slane %v8626_v59, 1  ;;  %v8628_v61 = vpop.eup %8627  ;;  %v2547_v5 = vrot.slane %v8626_v59, 2 }
 0x383   :  { %v2544_v62 = vmul.f32 %v8628_v61, %v8626_v59  ;;  %v14671_v61 = vld [vmem:[#allocation43_spill] sm:$0xff] }
 0x384   :  { %v2543_v63 = vmul.f32 %v2541_v60, %v10293_v44  ;;  %v14670_v60 = vld [vmem:[#allocation42_spill] sm:$0xff] }
 0x386   :  { %v10530_v1 = vadd.f32 %v2544_v62, %v2543_v63 }
 0x388   :  { %8629 = vtanh.f32 %v10530_v1 }
 0x395   :  { %v8630_v6 = vpop.eup %8629  ;;  %v2991_v7 = vpop.f32.mrf.mxu0 }
 0x396   :  { %v3032_v15 = vpop.f32.mrf.mxu1  ;;  %v2992_v16 = vadd.f32 %v2991_v7, %v10537_v3  ;;  %v2549_v44 = vmul.f32 %v8630_v6, %v2547_v5  ;;  %v14673_v5 = vld [vmem:[#allocation45_spill] sm:$0xff] }
 0x397   :  { %v2993_v26 = vpop.f32.mrf.mxu0  ;;  %v3033_v46 = vadd.f32 %v3032_v15, %v10551_v24 }
 0x398   :  { %v3034_v34 = vpop.f32.mrf.mxu1  ;;  %v7619_v35 = vmul.f32 -1.442695, %v2992_v16  ;;  %v2994_v36 = vadd.f32 %v2993_v26, %v10540_v4  ;;  %v10544_v40 = vpack.c.bf16 %v2549_v44, %v2549_v44  ;;  %v14674_v16 = vld [vmem:[#allocation46_spill] sm:$0xff]  ;;  %v14675_v44 = vld [vmem:[#allocation47_spill] sm:$0xff]  ;;  %v14676_v26 = vld [vmem:[#allocation48_spill] sm:$0xff] }
 0x399   :  { %v2995_v37 = vpop.f32.mrf.mxu0 }
 0x39a   :  { %v3036_v38 = vpop.f32.mrf.mxu1  ;;  %8631 = vpow2.f32 %v7619_v35  ;;  %v7620_v43 = vmul.f32 -1.442695, %v2994_v36  ;;  %3099 = vmatmul.mubr.bf16.vlgmr.msra.gmra.mxu0 %v10544_v40  ;;  %3140 = vmatmul.mubr.bf16.vlgmr.msra.gmra.mxu1 %v10544_v40  ;;  %v14678_v35 = vld [vmem:[#allocation50_spill] sm:$0xff]  ;;  %v14679_v36 = vld [vmem:[#allocation51_spill] sm:$0xff]  ;;  %v14680_v37 = vld [vmem:[#allocation52_spill] sm:$0xff] }
 0x39b   :  { %v2996_v50 = vpop.f32.mrf.mxu0  ;;  %3200 = vmatpush1.bf16.msra.mxu0 %v10296_v22  ;;  %3241 = vmatpush1.bf16.msra.mxu1 %v10298_v23  ;;  %v10561_v22 = vrot.slane %v2615_v2, %v10283_v18  ;;  %v7621_v23 = vmul.f32 -1.442695, %v3033_v46  ;;  %v14672_v2 = vld [vmem:[#allocation44_spill] sm:$0xff]  ;;  %v14681_v38 = vld [vmem:[#allocation53_spill] sm:$0xff] }
 0x39c   :  { %v3037_v11 = vpop.f32.mrf.mxu1  ;;  %8633 = vpow2.f32 %v7620_v43  ;;  %3201 = vmatprep.subr.bf16.mxu0 %v10302_v27  ;;  %3242 = vmatprep.subr.bf16.mxu1 %v10304_v28  ;;  %v14682_v43 = vld [vmem:[#allocation54_spill] sm:$0xff]  ;;  %v14683_v50 = vld [vmem:[#allocation55_spill] sm:$0xff]  ;;  %v14685_v46 = vld [vmem:[#allocation57_spill] sm:$0xff] }
 0x39d   :  { %14655 = vst [vmem:[#allocation71_spill] sm:$0xff] %v10561_v22  ;;  %v3035_v28 = vadd.f32 %v3034_v34, %v10561_v22  ;;  %8635 = vpow2.f32 %v7621_v23  ;;  %v14677_v34 = vld [vmem:[#allocation49_spill] sm:$0xff]  ;;  %v14684_v11 = vld [vmem:[#allocation56_spill] sm:$0xff]  ;;  %v14686_v23 = vld [vmem:[#allocation58_spill] sm:$0xff] }
 0x39f   :  { %3202 = vmatpush1.bf16.msra.mxu0 %v10310_v29  ;;  %3243 = vmatpush1.bf16.msra.mxu1 %v10312_v30 }
 0x3a0   :  { %3203 = vmatprep.subr.bf16.mxu0 %v10316_v31  ;;  %3244 = vmatprep.subr.bf16.mxu1 %v10318_v0  ;;  %v14656_v31 = vld [vmem:[#allocation28_spill] sm:$0xff]  ;;  %v14657_v0 = vld [vmem:[#allocation29_spill] sm:$0xff] }
 0x3a3   :  { %3204 = vmatpush1.bf16.msra.mxu0 %v10324_v32  ;;  %3245 = vmatpush1.bf16.msra.mxu1 %v10326_v33  ;;  %v14658_v33 = vld [vmem:[#allocation30_spill] sm:$0xff] }
 0x3a4   :  { %3205 = vmatprep.subr.bf16.mxu0 %v10330_v41  ;;  %3246 = vmatprep.subr.bf16.mxu1 %v10332_v9  ;;  %v14659_v41 = vld [vmem:[#allocation31_spill] sm:$0xff]  ;;  %v14660_v9 = vld [vmem:[#allocation32_spill] sm:$0xff] }
 0x3a7   :  { %v8632_v27 = vpop.eup %8631  ;;  %3206 = vmatpush1.bf16.msra.mxu0 %v10336_v48  ;;  %3247 = vmatpush1.bf16.msra.mxu1 %v10338_v39  ;;  %v14662_v48 = vld [vmem:[#allocation34_spill] sm:$0xff]  ;;  %v14663_v39 = vld [vmem:[#allocation35_spill] sm:$0xff] }
 0x3a8   :  { %v3048_v29 = vadd.f32 1.0, %v8632_v27  ;;  %3207 = vmatprep.subr.bf16.mxu0 %v14656_v31  ;;  %3248 = vmatprep.subr.bf16.mxu1 %v14657_v0  ;;  %v14687_v27 = vld [vmem:[#allocation59_spill] sm:$0xff]  ;;  %v14690_v0 = vld [vmem:[#allocation62_spill] sm:$0xff] }
 0x3a9   :  { %v8634_v30 = vpop.eup %8633 }
 0x3aa   :  { %8637 = vrcp.f32 %v3048_v29  ;;  %v3049_v32 = vadd.f32 1.0, %v8634_v30  ;;  %v8636_v57 = vpop.eup %8635  ;;  %v14689_v29 = vld [vmem:[#allocation61_spill] sm:$0xff] }
 0x3ab   :  { %8639 = vtanh.f32 %v3035_v28  ;;  %3208 = vmatpush1.bf16.msra.mxu0 %v14658_v33  ;;  %3249 = vmatpush1.bf16.msra.mxu1 %v14659_v41  ;;  %v3050_v63 = vadd.f32 1.0, %v8636_v57  ;;  %v14688_v28 = vld [vmem:[#allocation60_spill] sm:$0xff]  ;;  %v10643_v57 = vld [vmem:[#allocation13 + $0xc0] ss:$16 sps:$4 sm:$0xff]  }
 0x3ac   :  { %8641 = vrcp.f32 %v3049_v32  ;;  %3209 = vmatprep.subr.bf16.mxu0 %v14660_v9  ;;  %3250 = vmatprep.subr.bf16.mxu1 %v14661_v47  ;;  %v14691_v32 = vld [vmem:[#allocation63_spill] sm:$0xff]  ;;  %v14692_v41 = vld [vmem:[#allocation64_spill] sm:$0xff]  ;;  %v14693_v9 = vld [vmem:[#allocation65_spill] sm:$0xff] }
 0x3ad   :  { %8643 = vrcp.f32 %v3050_v63  ;;  %v10665_v63 = vld [vmem:[#allocation13 + $0x8c] ss:$16 sps:$4 sm:$0xff]  }
 0x3ae   :  { %14699 = vst [vmem:[#allocation31_spill] sm:$0xff] %v10665_v63 }
 0x3af   :  { %3210 = vmatpush1.bf16.msra.mxu0 %v14662_v48  ;;  %3251 = vmatpush1.bf16.msra.mxu1 %v14663_v39  ;;  %v14694_v48 = vld [vmem:[#allocation66_spill] sm:$0xff]  ;;  %v14695_v39 = vld [vmem:[#allocation67_spill] sm:$0xff] }
 0x3b0   :  { %3211 = vmatprep.subr.bf16.mxu0 %v14664_v53  ;;  %3252 = vmatprep.subr.bf16.mxu1 %v14665_v49  ;;  %v10623_v53 = vld [vmem:[#allocation13 + $0xe4] ss:$16 sps:$4 sm:$0xff]   ;;  %v10625_v49 = vld [vmem:[#allocation13 + $0xec] ss:$16 sps:$4 sm:$0xff]  }
 0x3b3   :  { %3212 = vmatpush1.bf16.msra.mxu0 %v14666_v51  ;;  %3253 = vmatpush1.bf16.msra.mxu1 %v14667_v52  ;;  %v10629_v51 = vld [vmem:[#allocation13 + $0xe0] ss:$16 sps:$4 sm:$0xff]   ;;  %v10631_v52 = vld [vmem:[#allocation13 + $0xe8] ss:$16 sps:$4 sm:$0xff]  }
 0x3b4   :  { %3213 = vmatprep.subr.bf16.mxu0 %v14668_v54  ;;  %3254 = vmatprep.subr.bf16.mxu1 %v14669_v56  ;;  %v10635_v54 = vld [vmem:[#allocation13 + $0xc4] ss:$16 sps:$4 sm:$0xff]   ;;  %v10637_v56 = vld [vmem:[#allocation13 + $0xcc] ss:$16 sps:$4 sm:$0xff]  }
 0x3b7   :  { %v8638_v58 = vpop.eup %8637  ;;  %3214 = vmatpush1.bf16.msra.mxu0 %v14670_v60  ;;  %3255 = vmatpush1.bf16.msra.mxu1 %v14671_v61  ;;  %v10651_v60 = vld [vmem:[#allocation13 + $0xac] ss:$16 sps:$4 sm:$0xff]   ;;  %v10659_v61 = vld [vmem:[#allocation13 + $0xa8] ss:$16 sps:$4 sm:$0xff]  }
 0x3b8   :  { %v8640_v59 = vpop.eup %8639  ;;  %3215 = vmatprep.subr.bf16.mxu0 %v14672_v2  ;;  %3256 = vmatprep.subr.bf16.mxu1 %v14673_v5  ;;  %14697 = vst [vmem:[#allocation29_spill] sm:$0xff] %v10659_v61  ;;  %v10669_v2 = vld [vmem:[#allocation13 + $0x80] ss:$16 sps:$4 sm:$0xff]   ;;  %v10671_v5 = vld [vmem:[#allocation13 + $0x88] ss:$16 sps:$4 sm:$0xff]  }
 0x3b9   :  { %v8642_v62 = vpop.eup %8641  ;;  %v3059_v7 = vmul.f32 %v8640_v59, %v8638_v58  ;;  %v10645_v58 = vld [vmem:[#allocation13 + $0xc8] ss:$16 sps:$4 sm:$0xff]   ;;  %v10649_v59 = vld [vmem:[#allocation13 + $0xa4] ss:$16 sps:$4 sm:$0xff]   ;;  %14700 = vst [vmem:[#allocation32_spill] sm:$0xff] %v10669_v2  ;;  %14701 = vst [vmem:[#allocation33_spill] sm:$0xff] %v10671_v5 }
 0x3ba   :  { %v3058_v6 = vmul.f32 0.0, %v8642_v62  ;;  %v8644_v30 = vpop.eup %8643  ;;  %v10663_v62 = vld [vmem:[#allocation13 + $0x84] ss:$16 sps:$4 sm:$0xff]  }
 0x3bb   :  { %3216 = vmatpush2.bf16.msra.mxu0 %v14674_v16  ;;  %3257 = vmatpush2.bf16.msra.mxu1 %v14675_v44  ;;  %14698 = vst [vmem:[#allocation30_spill] sm:$0xff] %v10663_v62  ;;  %v10681_v16 = vld [vmem:[#allocation13 + $0x60] ss:$16 sps:$4 sm:$0xff]   ;;  %v10683_v44 = vld [vmem:[#allocation13 + $0x68] ss:$16 sps:$4 sm:$0xff]  }
 0x3bc   :  { %v10588_v15 = vadd.f32 %v3059_v7, %v3058_v6  ;;  %3217 = vmatprep.subr.bf16.mxu0 %v14676_v26  ;;  %3258 = vmatprep.subr.bf16.mxu1 %v14677_v34  ;;  %v10675_v6 = vld [vmem:[#allocation13 + $0x64] ss:$16 sps:$4 sm:$0xff]   ;;  %v10677_v7 = vld [vmem:[#allocation13 + $0x6c] ss:$16 sps:$4 sm:$0xff]   ;;  %14704 = vst [vmem:[#allocation36_spill] sm:$0xff] %v10681_v16  ;;  %14705 = vst [vmem:[#allocation37_spill] sm:$0xff] %v10683_v44 }
 0x3bd   :  { %14702 = vst [vmem:[#allocation34_spill] sm:$0xff] %v10675_v6  ;;  %14703 = vst [vmem:[#allocation35_spill] sm:$0xff] %v10677_v7  ;;  %v10687_v26 = vld [vmem:[#allocation13 + $0x44] ss:$16 sps:$4 sm:$0xff]   ;;  %v10689_v34 = vld [vmem:[#allocation13 + $0x4c] ss:$16 sps:$4 sm:$0xff]  }
 0x3be   :  { %8645 = vtanh.f32 %v10588_v15  ;;  %14706 = vst [vmem:[#allocation38_spill] sm:$0xff] %v10687_v26  ;;  %14707 = vst [vmem:[#allocation39_spill] sm:$0xff] %v10689_v34 }
 0x3bf   :  { %3218 = vmatpush2.bf16.msra.mxu0 %v14678_v35  ;;  %3259 = vmatpush2.bf16.msra.mxu1 %v14679_v36  ;;  %v10693_v35 = vld [vmem:[#allocation13 + $0x40] ss:$16 sps:$4 sm:$0xff]   ;;  %v10695_v36 = vld [vmem:[#allocation13 + $0x48] ss:$16 sps:$4 sm:$0xff]  }
 0x3c0   :  { %3219 = vmatprep.subr.bf16.mxu0 %v14680_v37  ;;  %3260 = vmatprep.subr.bf16.mxu1 %v14681_v38  ;;  %14708 = vst [vmem:[#allocation40_spill] sm:$0xff] %v10693_v35  ;;  %14709 = vst [vmem:[#allocation41_spill] sm:$0xff] %v10695_v36 }
 0x3c3   :  { %3220 = vmatpush2.bf16.msra.mxu0 %v14682_v43  ;;  %3261 = vmatpush2.bf16.msra.mxu1 %v14683_v50 }
 0x3c4   :  { %3221 = vmatprep.subr.bf16.mxu0 %v14684_v11  ;;  %3262 = vmatprep.subr.bf16.mxu1 %v14685_v46 }
 0x3c7   :  { %3222 = vmatpush2.bf16.msra.mxu0 %v14686_v23  ;;  %3263 = vmatpush2.bf16.msra.mxu1 %v14687_v27 }
 0x3c8   :  { %3223 = vmatprep.subr.bf16.mxu0 %v14688_v28  ;;  %3264 = vmatprep.subr.bf16.mxu1 %v14689_v29 }
 0x3cb   :  { %v8646_v31 = vpop.eup %8645  ;;  %3224 = vmatpush2.bf16.msra.mxu0 %v14690_v0  ;;  %3265 = vmatpush2.bf16.msra.mxu1 %v14691_v32 }
 0x3cc   :  { %v3062_v33 = vmul.f32 %v8646_v31, %v8644_v30  ;;  %3225 = vmatprep.subr.bf16.mxu0 %v14692_v41  ;;  %3266 = vmatprep.subr.bf16.mxu1 %v14693_v9  ;;  %v10699_v30 = vld [vmem:[#allocation13 + $0x24] ss:$16 sps:$4 sm:$0xff]   ;;  %v10701_v31 = vld [vmem:[#allocation13 + $0x2c] ss:$16 sps:$4 sm:$0xff]  }
 0x3cd   :  { %14710 = vst [vmem:[#allocation42_spill] sm:$0xff] %v10699_v30  ;;  %14711 = vst [vmem:[#allocation43_spill] sm:$0xff] %v10701_v31 }
 0x3ce   :  { %v10611_v47 = vpack.c.bf16 %v3062_v33, %v3062_v33  ;;  %v10705_v33 = vld [vmem:[#allocation13 + $0x20] ss:$16 sps:$4 sm:$0xff]  }
 0x3cf   :  { %3226 = vmatpush2.bf16.msra.mxu0 %v14694_v48  ;;  %3267 = vmatpush2.bf16.msra.mxu1 %v10458_v55  ;;  %14712 = vst [vmem:[#allocation44_spill] sm:$0xff] %v10705_v33 }
 0x3d0   :  { %3231 = vmatprep.mubr.bf16.mxu0 %v10611_v47  ;;  %3272 = vmatprep.mubr.bf16.mxu1 %v10611_v47 }
 0x3d1   :  { %3227 = vmatprep.subr.bf16.mxu0 %v10462_v45  ;;  %3268 = vmatprep.subr.bf16.mxu1 %v10464_v42 }
 0x3d3   :  { %3228 = vmatpush2.bf16.msra.mxu0 %v10468_v20  ;;  %3269 = vmatpush2.bf16.msra.mxu1 %v10470_v21 }
 0x3d4   :  { %3229 = vmatprep.subr.bf16.mxu0 %v10474_v25  ;;  %3270 = vmatprep.subr.bf16.mxu1 %v14695_v39 }
 0x3d7   :  { %3230 = vmatpush2.bf16.msra.mxu0 %v10480_v10  ;;  %3271 = vmatpush2.bf16.msra.mxu1 %v10482_v13 }
 0x3d8   :  { %3712 = vmatprep.subr.bf16.mxu0 %v10623_v53  ;;  %3753 = vmatprep.subr.bf16.mxu1 %v10625_v49 }
 0x3da   :  { %3232 = vmatmul.mubr.bf16.vlgmr.msra.gmra.mxu0 %v10544_v40  ;;  %3273 = vmatmul.mubr.bf16.vlgmr.msra.gmra.mxu1 %v10544_v40  ;;  %v10657_v40 = vld [vmem:[#allocation13 + $0xa0] ss:$16 sps:$4 sm:$0xff]  }
 0x3db   :  { %3713 = vmatpush1.bf16.msra.mxu0 %v10629_v51  ;;  %3754 = vmatpush1.bf16.msra.mxu1 %v10631_v52  ;;  %14696 = vst [vmem:[#allocation28_spill] sm:$0xff] %v10657_v40 }
 0x3dc   :  { %3714 = vmatprep.subr.bf16.mxu0 %v10635_v54  ;;  %3755 = vmatprep.subr.bf16.mxu1 %v10637_v56 }
 0x3dd   :  { %3744 = vmatprep.mubr.bf16.mxu0 %v14651_v8  ;;  %3785 = vmatprep.mubr.bf16.mxu1 %v14651_v8 }
 0x3df   :  { %3715 = vmatpush1.bf16.msra.mxu0 %v10643_v57  ;;  %3756 = vmatpush1.bf16.msra.mxu1 %v10645_v58 }
 0x3e0   :  { %3716 = vmatprep.subr.bf16.mxu0 %v10649_v59  ;;  %3757 = vmatprep.subr.bf16.mxu1 %v10651_v60 }
 0x3e3   :  { %3717 = vmatpush1.bf16.msra.mxu0 %v10657_v40  ;;  %3758 = vmatpush1.bf16.msra.mxu1 %v10659_v61 }
 0x3e4   :  { %3718 = vmatprep.subr.bf16.mxu0 %v10663_v62  ;;  %3759 = vmatprep.subr.bf16.mxu1 %v10665_v63  ;;  %v3065_v63 = vld [vmem:[#allocation3 + $0x2] ss:$8 sm:$0xf] }
 0x3e7   :  { %3719 = vmatpush1.bf16.msra.mxu0 %v10669_v2  ;;  %3760 = vmatpush1.bf16.msra.mxu1 %v10671_v5 }
 0x3e8   :  { %3720 = vmatprep.subr.bf16.mxu0 %v10675_v6  ;;  %3761 = vmatprep.subr.bf16.mxu1 %v10677_v7 }
 0x3eb   :  { %3721 = vmatpush1.bf16.msra.mxu0 %v10681_v16  ;;  %3762 = vmatpush1.bf16.msra.mxu1 %v10683_v44  ;;  %v10707_v16 = vld [vmem:[#allocation13 + $0x28] ss:$16 sps:$4 sm:$0xff]   ;;  %v10711_v44 = vld [vmem:[#allocation13 + $0x4] ss:$16 sps:$4 sm:$0xff]  }
 0x3ec   :  { %3722 = vmatprep.subr.bf16.mxu0 %v10687_v26  ;;  %3763 = vmatprep.subr.bf16.mxu1 %v10689_v34  ;;  %14713 = vst [vmem:[#allocation45_spill] sm:$0xff] %v10707_v16  ;;  %14714 = vst [vmem:[#allocation46_spill] sm:$0xff] %v10711_v44  ;;  %v10713_v26 = vld [vmem:[#allocation13 + $0xc] ss:$16 sps:$4 sm:$0xff]   ;;  %v10717_v34 = vld [vmem:[#allocation13] ss:$16 sps:$4 sm:$0xff]  }
 0x3ed   :  { %14715 = vst [vmem:[#allocation47_spill] sm:$0xff] %v10713_v26  ;;  %14716 = vst [vmem:[#allocation48_spill] sm:$0xff] %v10717_v34 }
 0x3ef   :  { %3723 = vmatpush1.bf16.msra.mxu0 %v10693_v35  ;;  %3764 = vmatpush1.bf16.msra.mxu1 %v10695_v36  ;;  %v10719_v35 = vld [vmem:[#allocation13 + $0x8] ss:$16 sps:$4 sm:$0xff]   ;;  %v10723_v36 = vld [vmem:[#allocation13 + $0x1e4] ss:$16 sps:$4 sm:$0xff]  }
 0x3f0   :  { %3724 = vmatprep.subr.bf16.mxu0 %v10699_v30  ;;  %3765 = vmatprep.subr.bf16.mxu1 %v10701_v31  ;;  %14717 = vst [vmem:[#allocation49_spill] sm:$0xff] %v10719_v35  ;;  %14718 = vst [vmem:[#allocation50_spill] sm:$0xff] %v10723_v36  ;;  %v10725_v30 = vld [vmem:[#allocation13 + $0x1ec] ss:$16 sps:$4 sm:$0xff]   ;;  %v10729_v31 = vld [vmem:[#allocation13 + $0x1e0] ss:$16 sps:$4 sm:$0xff]  }
 0x3f1   :  { %14719 = vst [vmem:[#allocation51_spill] sm:$0xff] %v10725_v30  ;;  %14720 = vst [vmem:[#allocation52_spill] sm:$0xff] %v10729_v31 }
 0x3f3   :  { %3725 = vmatpush1.bf16.msra.mxu0 %v10705_v33  ;;  %3766 = vmatpush1.bf16.msra.mxu1 %v10707_v16  ;;  %v10731_v33 = vld [vmem:[#allocation13 + $0x1e8] ss:$16 sps:$4 sm:$0xff]   ;;  %v10735_v16 = vld [vmem:[#allocation13 + $0x1c4] ss:$16 sps:$4 sm:$0xff]  }
 0x3f4   :  { %3726 = vmatprep.subr.bf16.mxu0 %v10711_v44  ;;  %3767 = vmatprep.subr.bf16.mxu1 %v10713_v26  ;;  %14721 = vst [vmem:[#allocation53_spill] sm:$0xff] %v10731_v33  ;;  %14722 = vst [vmem:[#allocation54_spill] sm:$0xff] %v10735_v16  ;;  %v10737_v44 = vld [vmem:[#allocation13 + $0x1cc] ss:$16 sps:$4 sm:$0xff]   ;;  %v10741_v26 = vld [vmem:[#allocation13 + $0x1c0] ss:$16 sps:$4 sm:$0xff]  }
 0x3f5   :  { %14723 = vst [vmem:[#allocation55_spill] sm:$0xff] %v10737_v44  ;;  %14724 = vst [vmem:[#allocation56_spill] sm:$0xff] %v10741_v26 }
 0x3f7   :  { %3727 = vmatpush1.bf16.msra.mxu0 %v10717_v34  ;;  %3768 = vmatpush1.bf16.msra.mxu1 %v10719_v35  ;;  %v10743_v34 = vld [vmem:[#allocation13 + $0x1c8] ss:$16 sps:$4 sm:$0xff]   ;;  %v10747_v35 = vld [vmem:[#allocation13 + $0x1a4] ss:$16 sps:$4 sm:$0xff]  }
 0x3f8   :  { %3728 = vmatprep.subr.bf16.mxu0 %v10723_v36  ;;  %3769 = vmatprep.subr.bf16.mxu1 %v10725_v30  ;;  %14725 = vst [vmem:[#allocation57_spill] sm:$0xff] %v10743_v34  ;;  %14726 = vst [vmem:[#allocation58_spill] sm:$0xff] %v10747_v35  ;;  %v10749_v36 = vld [vmem:[#allocation13 + $0x1ac] ss:$16 sps:$4 sm:$0xff]   ;;  %v10753_v30 = vld [vmem:[#allocation13 + $0x1a0] ss:$16 sps:$4 sm:$0xff]  }
 0x3f9   :  { %14727 = vst [vmem:[#allocation59_spill] sm:$0xff] %v10749_v36  ;;  %14728 = vst [vmem:[#allocation60_spill] sm:$0xff] %v10753_v30 }
 0x3fb   :  { %3729 = vmatpush2.bf16.msra.mxu0 %v10729_v31  ;;  %3770 = vmatpush2.bf16.msra.mxu1 %v10731_v33  ;;  %v10755_v31 = vld [vmem:[#allocation13 + $0x1a8] ss:$16 sps:$4 sm:$0xff]   ;;  %v10759_v33 = vld [vmem:[#allocation13 + $0x184] ss:$16 sps:$4 sm:$0xff]  }
 0x3fc   :  { %3730 = vmatprep.subr.bf16.mxu0 %v10735_v16  ;;  %3771 = vmatprep.subr.bf16.mxu1 %v10737_v44  ;;  %14729 = vst [vmem:[#allocation61_spill] sm:$0xff] %v10755_v31  ;;  %14730 = vst [vmem:[#allocation62_spill] sm:$0xff] %v10759_v33  ;;  %v10761_v16 = vld [vmem:[#allocation13 + $0x18c] ss:$16 sps:$4 sm:$0xff]   ;;  %v10765_v44 = vld [vmem:[#allocation13 + $0x180] ss:$16 sps:$4 sm:$0xff]  }
 0x3fd   :  { %14731 = vst [vmem:[#allocation63_spill] sm:$0xff] %v10761_v16  ;;  %14732 = vst [vmem:[#allocation64_spill] sm:$0xff] %v10765_v44 }
 0x3ff   :  { %3731 = vmatpush2.bf16.msra.mxu0 %v10741_v26  ;;  %3772 = vmatpush2.bf16.msra.mxu1 %v10743_v34  ;;  %v10767_v26 = vld [vmem:[#allocation13 + $0x188] ss:$16 sps:$4 sm:$0xff]   ;;  %v10771_v34 = vld [vmem:[#allocation13 + $0x164] ss:$16 sps:$4 sm:$0xff]  }
 0x400   :  { %3732 = vmatprep.subr.bf16.mxu0 %v10747_v35  ;;  %3773 = vmatprep.subr.bf16.mxu1 %v10749_v36  ;;  %14733 = vst [vmem:[#allocation65_spill] sm:$0xff] %v10767_v26  ;;  %14734 = vst [vmem:[#allocation66_spill] sm:$0xff] %v10771_v34  ;;  %v10773_v35 = vld [vmem:[#allocation13 + $0x16c] ss:$16 sps:$4 sm:$0xff]   ;;  %v10777_v36 = vld [vmem:[#allocation13 + $0x160] ss:$16 sps:$4 sm:$0xff]  }
 0x401   :  { %14735 = vst [vmem:[#allocation67_spill] sm:$0xff] %v10773_v35  ;;  %14736 = vst [vmem:[#allocation72_spill] sm:$0xff] %v10777_v36 }
 0x403   :  { %3733 = vmatpush2.bf16.msra.mxu0 %v10753_v30  ;;  %3774 = vmatpush2.bf16.msra.mxu1 %v10755_v31  ;;  %v10779_v30 = vld [vmem:[#allocation13 + $0x168] ss:$16 sps:$4 sm:$0xff]   ;;  %v10783_v31 = vld [vmem:[#allocation13 + $0x144] ss:$16 sps:$4 sm:$0xff]  }
 0x404   :  { %3734 = vmatprep.subr.bf16.mxu0 %v10759_v33  ;;  %3775 = vmatprep.subr.bf16.mxu1 %v10761_v16  ;;  %14737 = vst [vmem:[#allocation73_spill] sm:$0xff] %v10779_v30  ;;  %14738 = vst [vmem:[#allocation74_spill] sm:$0xff] %v10783_v31  ;;  %v10785_v33 = vld [vmem:[#allocation13 + $0x14c] ss:$16 sps:$4 sm:$0xff]   ;;  %v10789_v16 = vld [vmem:[#allocation13 + $0x140] ss:$16 sps:$4 sm:$0xff]  }
 0x405   :  { %14739 = vst [vmem:[#allocation75_spill] sm:$0xff] %v10785_v33  ;;  %14740 = vst [vmem:[#allocation76_spill] sm:$0xff] %v10789_v16 }
 0x407   :  { %3735 = vmatpush2.bf16.msra.mxu0 %v10765_v44  ;;  %3776 = vmatpush2.bf16.msra.mxu1 %v10767_v26  ;;  %v10791_v44 = vld [vmem:[#allocation13 + $0x148] ss:$16 sps:$4 sm:$0xff]   ;;  %v10795_v26 = vld [vmem:[#allocation13 + $0x124] ss:$16 sps:$4 sm:$0xff]  }
 0x408   :  { %3736 = vmatprep.subr.bf16.mxu0 %v10771_v34  ;;  %3777 = vmatprep.subr.bf16.mxu1 %v10773_v35  ;;  %14741 = vst [vmem:[#allocation77_spill] sm:$0xff] %v10791_v44  ;;  %14742 = vst [vmem:[#allocation78_spill] sm:$0xff] %v10795_v26  ;;  %v10797_v34 = vld [vmem:[#allocation13 + $0x12c] ss:$16 sps:$4 sm:$0xff]   ;;  %v10801_v35 = vld [vmem:[#allocation13 + $0x120] ss:$16 sps:$4 sm:$0xff]  }
 0x409   :  { %14743 = vst [vmem:[#allocation79_spill] sm:$0xff] %v10797_v34  ;;  %14744 = vst [vmem:[#allocation80_spill] sm:$0xff] %v10801_v35 }
 0x40b   :  { %3737 = vmatpush2.bf16.msra.mxu0 %v10777_v36  ;;  %3778 = vmatpush2.bf16.msra.mxu1 %v10779_v30  ;;  %v10803_v36 = vld [vmem:[#allocation13 + $0x128] ss:$16 sps:$4 sm:$0xff]   ;;  %v10807_v30 = vld [vmem:[#allocation13 + $0x104] ss:$16 sps:$4 sm:$0xff]  }
 0x40c   :  { %3738 = vmatprep.subr.bf16.mxu0 %v10783_v31  ;;  %3779 = vmatprep.subr.bf16.mxu1 %v10785_v33  ;;  %14745 = vst [vmem:[#allocation81_spill] sm:$0xff] %v10803_v36  ;;  %14746 = vst [vmem:[#allocation82_spill] sm:$0xff] %v10807_v30  ;;  %v10809_v31 = vld [vmem:[#allocation13 + $0x10c] ss:$16 sps:$4 sm:$0xff]   ;;  %v10813_v33 = vld [vmem:[#allocation13 + $0x100] ss:$16 sps:$4 sm:$0xff]  }
 0x40d   :  { %14747 = vst [vmem:[#allocation83_spill] sm:$0xff] %v10809_v31  ;;  %14748 = vst [vmem:[#allocation84_spill] sm:$0xff] %v10813_v33 }
 0x40f   :  { %3739 = vmatpush2.bf16.msra.mxu0 %v10789_v16  ;;  %3780 = vmatpush2.bf16.msra.mxu1 %v10791_v44  ;;  %v10815_v16 = vld [vmem:[#allocation13 + $0x108] ss:$16 sps:$4 sm:$0xff]  }
 0x410   :  { %3740 = vmatprep.subr.bf16.mxu0 %v10795_v26  ;;  %3781 = vmatprep.subr.bf16.mxu1 %v10797_v34  ;;  %14749 = vst [vmem:[#allocation85_spill] sm:$0xff] %v10815_v16  ;;  %v10821_v34 = vld [vmem:[#allocation9 + $0xe4] ss:$16 sps:$4 sm:$0xff]   ;;  %v10824_v26 = vld [vmem:[#allocation9 + $0xec] ss:$16 sps:$4 sm:$0xff]  }
 0x411   :  { %14750 = vst [vmem:[#allocation86_spill] sm:$0xff] %v10821_v34  ;;  %14751 = vst [vmem:[#allocation87_spill] sm:$0xff] %v10824_v26 }
 0x413   :  { %3741 = vmatpush2.bf16.msra.mxu0 %v10801_v35  ;;  %3782 = vmatpush2.bf16.msra.mxu1 %v10803_v36  ;;  %v10829_v36 = vld [vmem:[#allocation9 + $0xe0] ss:$16 sps:$4 sm:$0xff]  }
 0x414   :  { %3742 = vmatprep.subr.bf16.mxu0 %v10807_v30  ;;  %3783 = vmatprep.subr.bf16.mxu1 %v10809_v31  ;;  %14752 = vst [vmem:[#allocation88_spill] sm:$0xff] %v10829_v36  ;;  %v10832_v31 = vld [vmem:[#allocation9 + $0xe8] ss:$16 sps:$4 sm:$0xff]  }
 0x415   :  { %14753 = vst [vmem:[#allocation89_spill] sm:$0xff] %v10832_v31 }
 0x417   :  { %3743 = vmatpush2.bf16.msra.mxu0 %v10813_v33  ;;  %3784 = vmatpush2.bf16.msra.mxu1 %v10815_v16  ;;  %v10835_v16 = vld [vmem:[#allocation9 + $0xc4] ss:$16 sps:$4 sm:$0xff]  }
 0x418   :  { %3821 = vmatprep.subr.bf16.mxu0 %v10821_v34  ;;  %3862 = vmatprep.subr.bf16.mxu1 %v10824_v26  ;;  %14754 = vst [vmem:[#allocation90_spill] sm:$0xff] %v10835_v16  ;;  %v10838_v34 = vld [vmem:[#allocation9 + $0xcc] ss:$16 sps:$4 sm:$0xff]   ;;  %v10858_v26 = vld [vmem:[#allocation9 + $0xa8] ss:$16 sps:$4 sm:$0xff]  }
 0x419   :  { %14755 = vst [vmem:[#allocation91_spill] sm:$0xff] %v10838_v34  ;;  %14761 = vst [vmem:[#allocation97_spill] sm:$0xff] %v10858_v26 }
 0x41a   :  { %3745 = vmatmul.mubr.bf16.vlgmr.msra.gmra.mxu0 %v10611_v47  ;;  %3786 = vmatmul.mubr.bf16.vlgmr.msra.gmra.mxu1 %v10611_v47  ;;  %v10843_v47 = vld [vmem:[#allocation9 + $0xc0] ss:$16 sps:$4 sm:$0xff]  }
 0x41b   :  { %3822 = vmatpush1.bf16.msra.mxu0 %v10829_v36  ;;  %3863 = vmatpush1.bf16.msra.mxu1 %v10832_v31  ;;  %14756 = vst [vmem:[#allocation92_spill] sm:$0xff] %v10843_v47  ;;  %v10846_v36 = vld [vmem:[#allocation9 + $0xc8] ss:$16 sps:$4 sm:$0xff]   ;;  %v10849_v31 = vld [vmem:[#allocation9 + $0xa4] ss:$16 sps:$4 sm:$0xff]  }
 0x41c   :  { %3823 = vmatprep.subr.bf16.mxu0 %v10835_v16  ;;  %3864 = vmatprep.subr.bf16.mxu1 %v10838_v34  ;;  %14757 = vst [vmem:[#allocation93_spill] sm:$0xff] %v10846_v36  ;;  %14758 = vst [vmem:[#allocation94_spill] sm:$0xff] %v10849_v31  ;;  %v10852_v16 = vld [vmem:[#allocation9 + $0xac] ss:$16 sps:$4 sm:$0xff]   ;;  %v10855_v34 = vld [vmem:[#allocation9 + $0xa0] ss:$16 sps:$4 sm:$0xff]  }
 0x41d   :  { %3853 = vmatprep.mubr.bf16.mxu0 %v14651_v8  ;;  %3894 = vmatprep.mubr.bf16.mxu1 %v14651_v8  ;;  %14759 = vst [vmem:[#allocation95_spill] sm:$0xff] %v10852_v16  ;;  %14760 = vst [vmem:[#allocation96_spill] sm:$0xff] %v10855_v34 }
 0x41f   :  { %3824 = vmatpush1.bf16.msra.mxu0 %v10843_v47  ;;  %3865 = vmatpush1.bf16.msra.mxu1 %v10846_v36  ;;  %v10861_v47 = vld [vmem:[#allocation9 + $0x84] ss:$16 sps:$4 sm:$0xff]   ;;  %v10864_v36 = vld [vmem:[#allocation9 + $0x8c] ss:$16 sps:$4 sm:$0xff]  }
 0x420   :  { %3825 = vmatprep.subr.bf16.mxu0 %v10849_v31  ;;  %3866 = vmatprep.subr.bf16.mxu1 %v10852_v16  ;;  %14762 = vst [vmem:[#allocation98_spill] sm:$0xff] %v10861_v47  ;;  %14763 = vst [vmem:[#allocation99_spill] sm:$0xff] %v10864_v36  ;;  %v10867_v31 = vld [vmem:[#allocation9 + $0x80] ss:$16 sps:$4 sm:$0xff]   ;;  %v10870_v16 = vld [vmem:[#allocation9 + $0x88] ss:$16 sps:$4 sm:$0xff]  }
 0x421   :  { %14764 = vst [vmem:[#allocation100_spill] sm:$0xff] %v10867_v31  ;;  %14765 = vst [vmem:[#allocation101_spill] sm:$0xff] %v10870_v16 }
 0x423   :  { %3826 = vmatpush1.bf16.msra.mxu0 %v10855_v34  ;;  %3867 = vmatpush1.bf16.msra.mxu1 %v10858_v26  ;;  %v10873_v34 = vld [vmem:[#allocation9 + $0x64] ss:$16 sps:$4 sm:$0xff]   ;;  %v10876_v26 = vld [vmem:[#allocation9 + $0x6c] ss:$16 sps:$4 sm:$0xff]  }
 0x424   :  { %3827 = vmatprep.subr.bf16.mxu0 %v10861_v47  ;;  %3868 = vmatprep.subr.bf16.mxu1 %v10864_v36  ;;  %14766 = vst [vmem:[#allocation102_spill] sm:$0xff] %v10873_v34  ;;  %14767 = vst [vmem:[#allocation103_spill] sm:$0xff] %v10876_v26  ;;  %v10879_v47 = vld [vmem:[#allocation9 + $0x60] ss:$16 sps:$4 sm:$0xff]   ;;  %v10882_v36 = vld [vmem:[#allocation9 + $0x68] ss:$16 sps:$4 sm:$0xff]  }
 0x425   :  { %14768 = vst [vmem:[#allocation104_spill] sm:$0xff] %v10879_v47  ;;  %14769 = vst [vmem:[#allocation105_spill] sm:$0xff] %v10882_v36 }
 0x427   :  { %3828 = vmatpush1.bf16.msra.mxu0 %v10867_v31  ;;  %3869 = vmatpush1.bf16.msra.mxu1 %v10870_v16  ;;  %v10885_v31 = vld [vmem:[#allocation9 + $0x44] ss:$16 sps:$4 sm:$0xff]   ;;  %v10888_v16 = vld [vmem:[#allocation9 + $0x4c] ss:$16 sps:$4 sm:$0xff]  }
 0x428   :  { %3829 = vmatprep.subr.bf16.mxu0 %v10873_v34  ;;  %3870 = vmatprep.subr.bf16.mxu1 %v10876_v26  ;;  %14770 = vst [vmem:[#allocation106_spill] sm:$0xff] %v10885_v31  ;;  %14771 = vst [vmem:[#allocation107_spill] sm:$0xff] %v10888_v16  ;;  %v10891_v34 = vld [vmem:[#allocation9 + $0x40] ss:$16 sps:$4 sm:$0xff]   ;;  %v10894_v26 = vld [vmem:[#allocation9 + $0x48] ss:$16 sps:$4 sm:$0xff]  }
 0x429   :  { %14772 = vst [vmem:[#allocation108_spill] sm:$0xff] %v10891_v34  ;;  %14773 = vst [vmem:[#allocation109_spill] sm:$0xff] %v10894_v26 }
 0x42b   :  { %3830 = vmatpush1.bf16.msra.mxu0 %v10879_v47  ;;  %3871 = vmatpush1.bf16.msra.mxu1 %v10882_v36  ;;  %v10897_v47 = vld [vmem:[#allocation9 + $0x24] ss:$16 sps:$4 sm:$0xff]   ;;  %v10900_v36 = vld [vmem:[#allocation9 + $0x2c] ss:$16 sps:$4 sm:$0xff]  }
 0x42c   :  { %3831 = vmatprep.subr.bf16.mxu0 %v10885_v31  ;;  %3872 = vmatprep.subr.bf16.mxu1 %v10888_v16  ;;  %14774 = vst [vmem:[#allocation110_spill] sm:$0xff] %v10897_v47  ;;  %14775 = vst [vmem:[#allocation111_spill] sm:$0xff] %v10900_v36  ;;  %v10903_v31 = vld [vmem:[#allocation9 + $0x20] ss:$16 sps:$4 sm:$0xff]   ;;  %v10906_v16 = vld [vmem:[#allocation9 + $0x28] ss:$16 sps:$4 sm:$0xff]  }
 0x42d   :  { %14776 = vst [vmem:[#allocation112_spill] sm:$0xff] %v10903_v31  ;;  %14777 = vst [vmem:[#allocation113_spill] sm:$0xff] %v10906_v16 }
 0x42f   :  { %3832 = vmatpush1.bf16.msra.mxu0 %v10891_v34  ;;  %3873 = vmatpush1.bf16.msra.mxu1 %v10894_v26  ;;  %v10909_v34 = vld [vmem:[#allocation9 + $0x4] ss:$16 sps:$4 sm:$0xff]   ;;  %v10912_v26 = vld [vmem:[#allocation9 + $0xc] ss:$16 sps:$4 sm:$0xff]  }
 0x430   :  { %3833 = vmatprep.subr.bf16.mxu0 %v10897_v47  ;;  %3874 = vmatprep.subr.bf16.mxu1 %v10900_v36  ;;  %14778 = vst [vmem:[#allocation114_spill] sm:$0xff] %v10909_v34  ;;  %14779 = vst [vmem:[#allocation115_spill] sm:$0xff] %v10912_v26  ;;  %v10915_v47 = vld [vmem:[#allocation9] ss:$16 sps:$4 sm:$0xff]   ;;  %v10918_v36 = vld [vmem:[#allocation9 + $0x8] ss:$16 sps:$4 sm:$0xff]  }
 0x431   :  { %14780 = vst [vmem:[#allocation116_spill] sm:$0xff] %v10915_v47  ;;  %14781 = vst [vmem:[#allocation117_spill] sm:$0xff] %v10918_v36 }
 0x433   :  { %3834 = vmatpush1.bf16.msra.mxu0 %v10903_v31  ;;  %3875 = vmatpush1.bf16.msra.mxu1 %v10906_v16  ;;  %v10921_v31 = vld [vmem:[#allocation12 + $0xe4] ss:$16 sps:$4 sm:$0xff]   ;;  %v10924_v16 = vld [vmem:[#allocation12 + $0xec] ss:$16 sps:$4 sm:$0xff]  }
 0x434   :  { %3835 = vmatprep.subr.bf16.mxu0 %v10909_v34  ;;  %3876 = vmatprep.subr.bf16.mxu1 %v10912_v26  ;;  %14782 = vst [vmem:[#allocation118_spill] sm:$0xff] %v10921_v31  ;;  %14783 = vst [vmem:[#allocation119_spill] sm:$0xff] %v10924_v16 }
 0x437   :  { %3836 = vmatpush1.bf16.msra.mxu0 %v10915_v47  ;;  %3877 = vmatpush1.bf16.msra.mxu1 %v10918_v36 }
 0x438   :  { %3954 = vmatprep.subr.bf16.mxu0 %v10921_v31  ;;  %3995 = vmatprep.subr.bf16.mxu1 %v10924_v16 }
 0x45a   :  { %v3100_v34 = vpop.f32.mrf.mxu0  ;;  %v3141_v8 = vpop.f32.mrf.mxu1 }
 0x45c   :  { %v3102_v33 = vpop.f32.mrf.mxu0  ;;  %v3143_v26 = vpop.f32.mrf.mxu1 }
 0x45d   :  { %v3152_v30 = vcombine.low %v3100_v34, %v3102_v33  ;;  %v3153_v35 = vcombine.low %v3141_v8, %v3143_v26 }
 0x45e   :  { %v3104_v44 = vpop.f32.mrf.mxu0  ;;  %v3145_v47 = vpop.f32.mrf.mxu1 }
 0x45f   :  { %v3160_v7 = vrot.slane %v3152_v30, %v10288_v19  ;;  %v3167_v36 = vrot.slane %v3153_v35, %v10288_v19 }
 0x460   :  { %v3105_v6 = vpop.f32.mrf.mxu0  ;;  %v3146_v5 = vpop.f32.mrf.mxu1 }
 0x461   :  { %v3168_v2 = vcombine.low %v3160_v7, %v3167_v36 }
 0x463   :  { %v3175_v31 = vrot.slane %v3168_v2, %v10288_v19 }
 0x465   :  { %v3177_v62 = vadd.f32 %v3175_v31, %v3065_v63 }
 0x467   :  { %v7622_v16 = vmul.f32 -1.442695, %v3177_v62  ;;  %v3185_v18 = vrot.slane %v3177_v62, 3 }
 0x469   :  { %8647 = vpow2.f32 %v7622_v16 }
 0x476   :  { %v8648_v61 = vpop.eup %8647 }
 0x477   :  { %v3181_v40 = vadd.f32 1.0, %v8648_v61 }
 0x479   :  { %8649 = vrcp.f32 %v3181_v40 }
 0x47a   :  { %8651 = vtanh.f32 %v3185_v18 }
 0x486   :  { %v8650_v8 = vpop.eup %8649 }
 0x487   :  { %v3189_v44 = vrot.slane %v8650_v8, 1  ;;  %v8652_v26 = vpop.eup %8651  ;;  %v3195_v2 = vrot.slane %v8650_v8, 2 }
 0x488   :  { %v3192_v34 = vmul.f32 %v8652_v26, %v8650_v8  ;;  %v10940_v8 = vld [vmem:[#allocation12 + $0xe0] ss:$16 sps:$4 sm:$0xff]   ;;  %v10943_v26 = vld [vmem:[#allocation12 + $0xe8] ss:$16 sps:$4 sm:$0xff]  }
 0x489   :  { %v3191_v35 = vmul.f32 %v3189_v44, %v10530_v1 }
 0x48b   :  { %v10931_v6 = vadd.f32 %v3192_v34, %v3191_v35  ;;  %v10946_v34 = vld [vmem:[#allocation12 + $0xc4] ss:$16 sps:$4 sm:$0xff]   ;;  %v10949_v35 = vld [vmem:[#allocation12 + $0xcc] ss:$16 sps:$4 sm:$0xff]  }
 0x48d   :  { %8653 = vtanh.f32 %v10931_v6 }
 0x49a   :  { %v8654_v5 = vpop.eup %8653  ;;  %v3233_v63 = vpop.f32.mrf.mxu0 }
 0x49b   :  { %v3274_v7 = vpop.f32.mrf.mxu1  ;;  %v3234_v16 = vadd.f32 %v3233_v63, %v10537_v3  ;;  %v3197_v61 = vmul.f32 %v8654_v5, %v3195_v2  ;;  %v10952_v2 = vld [vmem:[#allocation12 + $0xc0] ss:$16 sps:$4 sm:$0xff]   ;;  %v10955_v5 = vld [vmem:[#allocation12 + $0xc8] ss:$16 sps:$4 sm:$0xff]  }
 0x49c   :  { %v3235_v62 = vpop.f32.mrf.mxu0  ;;  %v3275_v63 = vadd.f32 %v3274_v7, %v10551_v24  ;;  %v10974_v7 = vld [vmem:[#allocation12 + $0x8c] ss:$16 sps:$4 sm:$0xff]  }
 0x49d   :  { %v3276_v40 = vpop.f32.mrf.mxu1  ;;  %v7623_v18 = vmul.f32 -1.442695, %v3234_v16  ;;  %v3236_v36 = vadd.f32 %v3235_v62, %v10540_v4  ;;  %v10936_v33 = vpack.c.bf16 %v3197_v61, %v3197_v61  ;;  %v10959_v16 = vld [vmem:[#allocation12 + $0xa4] ss:$16 sps:$4 sm:$0xff]   ;;  %v10962_v61 = vld [vmem:[#allocation12 + $0xac] ss:$16 sps:$4 sm:$0xff]  }
 0x49e   :  { %v3237_v30 = vpop.f32.mrf.mxu0  ;;  %v10965_v62 = vld [vmem:[#allocation12 + $0xa0] ss:$16 sps:$4 sm:$0xff]   ;;  %14787 = vst [vmem:[#allocation123_spill] sm:$0xff] %v10974_v7 }
 0x49f   :  { %v3278_v31 = vpop.f32.mrf.mxu1  ;;  %8655 = vpow2.f32 %v7623_v18  ;;  %v7624_v1 = vmul.f32 -1.442695, %v3236_v36  ;;  %3854 = vmatmul.mubr.bf16.vlgmr.msra.gmra.mxu0 %v10936_v33  ;;  %3895 = vmatmul.mubr.bf16.vlgmr.msra.gmra.mxu1 %v10936_v33  ;;  %14784 = vst [vmem:[#allocation120_spill] sm:$0xff] %v10965_v62  ;;  %v10968_v18 = vld [vmem:[#allocation12 + $0xa8] ss:$16 sps:$4 sm:$0xff]  }
 0x4a0   :  { %v3238_v47 = vpop.f32.mrf.mxu0  ;;  %3955 = vmatpush1.bf16.msra.mxu0 %v10940_v8  ;;  %3996 = vmatpush1.bf16.msra.mxu1 %v10943_v26  ;;  %14785 = vst [vmem:[#allocation121_spill] sm:$0xff] %v10968_v18  ;;  %v7625_v36 = vmul.f32 -1.442695, %v3275_v63  ;;  %v10971_v30 = vld [vmem:[#allocation12 + $0x84] ss:$16 sps:$4 sm:$0xff]  }
 0x4a1   :  { %v3279_v44 = vpop.f32.mrf.mxu1  ;;  %8657 = vpow2.f32 %v7624_v1  ;;  %3956 = vmatprep.subr.bf16.mxu0 %v10946_v34  ;;  %3997 = vmatprep.subr.bf16.mxu1 %v10949_v35  ;;  %14786 = vst [vmem:[#allocation122_spill] sm:$0xff] %v10971_v30  ;;  %v3277_v1 = vadd.f32 %v3276_v40, %v10561_v22 }
 0x4a2   :  { %v10978_v44 = vld [vmem:[#allocation12 + $0x80] ss:$16 sps:$4 sm:$0xff]   ;;  %8659 = vpow2.f32 %v7625_v36  ;;  %v10996_v36 = vld [vmem:[#allocation12 + $0x44] ss:$16 sps:$4 sm:$0xff]  }
 0x4a3   :  { %14788 = vst [vmem:[#allocation124_spill] sm:$0xff] %v10978_v44  ;;  %14794 = vst [vmem:[#allocation130_spill] sm:$0xff] %v10996_v36 }
 0x4a4   :  { %3957 = vmatpush1.bf16.msra.mxu0 %v10952_v2  ;;  %3998 = vmatpush1.bf16.msra.mxu1 %v10955_v5 }
 0x4a5   :  { %3958 = vmatprep.subr.bf16.mxu0 %v10959_v16  ;;  %3999 = vmatprep.subr.bf16.mxu1 %v10962_v61 }
 0x4a8   :  { %3959 = vmatpush1.bf16.msra.mxu0 %v10965_v62  ;;  %4000 = vmatpush1.bf16.msra.mxu1 %v10968_v18  ;;  %v10981_v62 = vld [vmem:[#allocation12 + $0x88] ss:$16 sps:$4 sm:$0xff]   ;;  %v10984_v18 = vld [vmem:[#allocation12 + $0x64] ss:$16 sps:$4 sm:$0xff]  }
 0x4a9   :  { %3960 = vmatprep.subr.bf16.mxu0 %v10971_v30  ;;  %4001 = vmatprep.subr.bf16.mxu1 %v10974_v7  ;;  %14789 = vst [vmem:[#allocation125_spill] sm:$0xff] %v10981_v62  ;;  %14790 = vst [vmem:[#allocation126_spill] sm:$0xff] %v10984_v18  ;;  %v10987_v30 = vld [vmem:[#allocation12 + $0x6c] ss:$16 sps:$4 sm:$0xff]  }
 0x4aa   :  { %14791 = vst [vmem:[#allocation127_spill] sm:$0xff] %v10987_v30 }
 0x4ac   :  { %v8656_v31 = vpop.eup %8655  ;;  %3961 = vmatpush1.bf16.msra.mxu0 %v10978_v44  ;;  %4002 = vmatpush1.bf16.msra.mxu1 %v10981_v62  ;;  %v10993_v44 = vld [vmem:[#allocation12 + $0x68] ss:$16 sps:$4 sm:$0xff]   ;;  %v11032_v62 = vld [vmem:[#allocation12 + $0x1e4] ss:$16 sps:$4 sm:$0xff]  }
 0x4ad   :  { %v3290_v47 = vadd.f32 1.0, %v8656_v31  ;;  %3962 = vmatprep.subr.bf16.mxu0 %v10984_v18  ;;  %4003 = vmatprep.subr.bf16.mxu1 %v10987_v30  ;;  %v10990_v31 = vld [vmem:[#allocation12 + $0x60] ss:$16 sps:$4 sm:$0xff]   ;;  %14793 = vst [vmem:[#allocation129_spill] sm:$0xff] %v10993_v44  ;;  %v10999_v18 = vld [vmem:[#allocation12 + $0x4c] ss:$16 sps:$4 sm:$0xff]  }
 0x4ae   :  { %v8658_v63 = vpop.eup %8657  ;;  %14792 = vst [vmem:[#allocation128_spill] sm:$0xff] %v10990_v31  ;;  %14795 = vst [vmem:[#allocation131_spill] sm:$0xff] %v10999_v18 }
 0x4af   :  { %8661 = vrcp.f32 %v3290_v47  ;;  %v3291_v40 = vadd.f32 1.0, %v8658_v63  ;;  %v11002_v47 = vld [vmem:[#allocation12 + $0x40] ss:$16 sps:$4 sm:$0xff]   ;;  %v11008_v63 = vld [vmem:[#allocation12 + $0x24] ss:$16 sps:$4 sm:$0xff]   ;;  %14806 = vst [vmem:[#allocation142_spill] sm:$0xff] %v11032_v62 }
 0x4b0   :  { %8663 = vtanh.f32 %v3277_v1  ;;  %3963 = vmatpush1.bf16.msra.mxu0 %v10990_v31  ;;  %4004 = vmatpush1.bf16.msra.mxu1 %v10993_v44  ;;  %14796 = vst [vmem:[#allocation132_spill] sm:$0xff] %v11002_v47  ;;  %v11005_v1 = vld [vmem:[#allocation12 + $0x48] ss:$16 sps:$4 sm:$0xff]   ;;  %14798 = vst [vmem:[#allocation134_spill] sm:$0xff] %v11008_v63 }
 0x4b1   :  { %8665 = vrcp.f32 %v3291_v40  ;;  %3964 = vmatprep.subr.bf16.mxu0 %v10996_v36  ;;  %4005 = vmatprep.subr.bf16.mxu1 %v10999_v18  ;;  %14797 = vst [vmem:[#allocation133_spill] sm:$0xff] %v11005_v1  ;;  %v11011_v40 = vld [vmem:[#allocation12 + $0x2c] ss:$16 sps:$4 sm:$0xff]   ;;  %v11014_v36 = vld [vmem:[#allocation12 + $0x20] ss:$16 sps:$4 sm:$0xff]  }
 0x4b2   :  { %14799 = vst [vmem:[#allocation135_spill] sm:$0xff] %v11011_v40  ;;  %14800 = vst [vmem:[#allocation136_spill] sm:$0xff] %v11014_v36  ;;  %v11017_v18 = vld [vmem:[#allocation12 + $0x28] ss:$16 sps:$4 sm:$0xff]  }
 0x4b3   :  { %14801 = vst [vmem:[#allocation137_spill] sm:$0xff] %v11017_v18 }
 0x4b4   :  { %3965 = vmatpush1.bf16.msra.mxu0 %v11002_v47  ;;  %4006 = vmatpush1.bf16.msra.mxu1 %v11005_v1  ;;  %v11020_v47 = vld [vmem:[#allocation12 + $0x4] ss:$16 sps:$4 sm:$0xff]   ;;  %v11023_v1 = vld [vmem:[#allocation12 + $0xc] ss:$16 sps:$4 sm:$0xff]  }
 0x4b5   :  { %3966 = vmatprep.subr.bf16.mxu0 %v11008_v63  ;;  %4007 = vmatprep.subr.bf16.mxu1 %v11011_v40  ;;  %14802 = vst [vmem:[#allocation138_spill] sm:$0xff] %v11020_v47  ;;  %14803 = vst [vmem:[#allocation139_spill] sm:$0xff] %v11023_v1  ;;  %v8660_v63 = vpop.eup %8659  ;;  %v11026_v40 = vld [vmem:[#allocation12] ss:$16 sps:$4 sm:$0xff]  }
 0x4b6   :  { %14804 = vst [vmem:[#allocation140_spill] sm:$0xff] %v11026_v40  ;;  %v3292_v30 = vadd.f32 1.0, %v8660_v63  ;;  %v11047_v63 = vld [vmem:[#allocation12 + $0x1c4] ss:$16 sps:$4 sm:$0xff]  }
 0x4b8   :  { %3967 = vmatpush1.bf16.msra.mxu0 %v11014_v36  ;;  %4008 = vmatpush1.bf16.msra.mxu1 %v11017_v18  ;;  %v11029_v36 = vld [vmem:[#allocation12 + $0x8] ss:$16 sps:$4 sm:$0xff]   ;;  %8667 = vrcp.f32 %v3292_v30 }
 0x4b9   :  { %3968 = vmatprep.subr.bf16.mxu0 %v11020_v47  ;;  %4009 = vmatprep.subr.bf16.mxu1 %v11023_v1  ;;  %14805 = vst [vmem:[#allocation141_spill] sm:$0xff] %v11029_v36  ;;  %v11035_v47 = vld [vmem:[#allocation12 + $0x1ec] ss:$16 sps:$4 sm:$0xff]  }
 0x4bc   :  { %v8662_v44 = vpop.eup %8661  ;;  %3969 = vmatpush1.bf16.msra.mxu0 %v11026_v40  ;;  %4010 = vmatpush1.bf16.msra.mxu1 %v11029_v36  ;;  %v11041_v40 = vld [vmem:[#allocation12 + $0x1e0] ss:$16 sps:$4 sm:$0xff]   ;;  %v11044_v36 = vld [vmem:[#allocation12 + $0x1e8] ss:$16 sps:$4 sm:$0xff]  }
 0x4bd   :  { %v8664_v31 = vpop.eup %8663  ;;  %3970 = vmatprep.subr.bf16.mxu0 %v11032_v62  ;;  %4011 = vmatprep.subr.bf16.mxu1 %v11035_v47  ;;  %v11050_v62 = vld [vmem:[#allocation12 + $0x1cc] ss:$16 sps:$4 sm:$0xff]  }
 0x4be   :  { %v8666_v18 = vpop.eup %8665  ;;  %v3301_v22 = vmul.f32 %v8664_v31, %v8662_v44  ;;  %v14820_v44 = vld [vmem:[#allocation36_spill] sm:$0xff]  ;;  %v14821_v31 = vld [vmem:[#allocation37_spill] sm:$0xff] }
 0x4bf   :  { %v3300_v1 = vmul.f32 %v8666_v18, %v10588_v15  ;;  %v11057_v15 = vld [vmem:[#allocation12 + $0x1c8] ss:$16 sps:$4 sm:$0xff]  }
 0x4c0   :  { %3971 = vmatpush2.bf16.msra.mxu0 %v11041_v40  ;;  %4012 = vmatpush2.bf16.msra.mxu1 %v11044_v36 }
 0x4c1   :  { %v11039_v7 = vadd.f32 %v3301_v22, %v3300_v1  ;;  %3972 = vmatprep.subr.bf16.mxu0 %v11047_v63  ;;  %4013 = vmatprep.subr.bf16.mxu1 %v11050_v62  ;;  %v11054_v22 = vld [vmem:[#allocation12 + $0x1c0] ss:$16 sps:$4 sm:$0xff]   ;;  %v14822_v1 = vld [vmem:[#allocation38_spill] sm:$0xff] }
 0x4c3   :  { %8669 = vtanh.f32 %v11039_v7 }
 0x4c4   :  { %3973 = vmatpush2.bf16.msra.mxu0 %v11054_v22  ;;  %4014 = vmatpush2.bf16.msra.mxu1 %v11057_v15 }
 0x4c5   :  { %3974 = vmatprep.subr.bf16.mxu0 %v14680_v37  ;;  %4015 = vmatprep.subr.bf16.mxu1 %v14681_v38  ;;  %v8668_v18 = vpop.eup %8667 }
 0x4c8   :  { %3975 = vmatpush2.bf16.msra.mxu0 %v14682_v43  ;;  %4016 = vmatpush2.bf16.msra.mxu1 %v14683_v50  ;;  %v3370_v50 = vld [vmem:[%s14020_s7] sm:$0xf] }
 0x4c9   :  { %3976 = vmatprep.subr.bf16.mxu0 %v14684_v11  ;;  %4017 = vmatprep.subr.bf16.mxu1 %v14685_v46  ;;  %v11084_v11 = vrot.slane %v3370_v50, %v10252_v12  ;;  %v11089_v46 = vrot.slane %v3370_v50, %v10255_v14 }
 0x4cb   :  { %14807 = vst [vmem:[#allocation143_spill] sm:$0xff] %v11084_v11  ;;  %14808 = vst [vmem:[#allocation144_spill] sm:$0xff] %v11089_v46 }
 0x4cc   :  { %3977 = vmatpush2.bf16.msra.mxu0 %v14686_v23  ;;  %4018 = vmatpush2.bf16.msra.mxu1 %v14687_v27 }
 0x4cd   :  { %3978 = vmatprep.subr.bf16.mxu0 %v14688_v28  ;;  %4019 = vmatprep.subr.bf16.mxu1 %v14689_v29 }
 0x4d0   :  { %v8670_v37 = vpop.eup %8669  ;;  %3979 = vmatpush2.bf16.msra.mxu0 %v14690_v0  ;;  %4020 = vmatpush2.bf16.msra.mxu1 %v14691_v32 }
 0x4d1   :  { %v3304_v38 = vmul.f32 %v8670_v37, %v8668_v18  ;;  %3980 = vmatprep.subr.bf16.mxu0 %v14692_v41  ;;  %4021 = vmatprep.subr.bf16.mxu1 %v14693_v9  ;;  %v14810_v41 = vld [vmem:[#allocation26_spill] sm:$0xff]  ;;  %v14823_v18 = vld [vmem:[#allocation39_spill] sm:$0xff]  ;;  %v14824_v37 = vld [vmem:[#allocation40_spill] sm:$0xff] }
 0x4d2   :  { %v11116_v9 = vrot.slane %v3370_v50, %v14810_v41 }
 0x4d3   :  { %v11074_v43 = vpack.c.bf16 %v3304_v38, %v3304_v38  ;;  %v14825_v38 = vld [vmem:[#allocation41_spill] sm:$0xff] }
 0x4d4   :  { %3981 = vmatpush2.bf16.msra.mxu0 %v14694_v48  ;;  %4022 = vmatpush2.bf16.msra.mxu1 %v10458_v55  ;;  %14811 = vst [vmem:[#allocation26_spill] sm:$0xff] %v11116_v9  ;;  %v14812_v48 = vld [vmem:[#allocation28_spill] sm:$0xff] }
 0x4d5   :  { %3986 = vmatprep.mubr.bf16.mxu0 %v11074_v43  ;;  %4027 = vmatprep.mubr.bf16.mxu1 %v11074_v43 }
 0x4d6   :  { %3982 = vmatprep.subr.bf16.mxu0 %v10462_v45  ;;  %4023 = vmatprep.subr.bf16.mxu1 %v10464_v42 }
 0x4d8   :  { %3983 = vmatpush2.bf16.msra.mxu0 %v10468_v20  ;;  %4024 = vmatpush2.bf16.msra.mxu1 %v10470_v21 }
 0x4d9   :  { %3984 = vmatprep.subr.bf16.mxu0 %v10474_v25  ;;  %4025 = vmatprep.subr.bf16.mxu1 %v14695_v39  ;;  %v14813_v39 = vld [vmem:[#allocation29_spill] sm:$0xff] }
 0x4da   :  { %v3746_v23 = vpop.f32.mrf.mxu0  ;;  %v3787_v55 = vpop.f32.mrf.mxu1 }
 0x4db   :  { %v3747_v27 = vadd.f32 %v3746_v23, %v11084_v11  ;;  %v14827_v23 = vld [vmem:[#allocation43_spill] sm:$0xff] }
 0x4dc   :  { %v3748_v28 = vpop.f32.mrf.mxu0  ;;  %v3789_v29 = vpop.f32.mrf.mxu1  ;;  %3985 = vmatpush2.bf16.msra.mxu0 %v10480_v10  ;;  %4026 = vmatpush2.bf16.msra.mxu1 %v10482_v13  ;;  %v11106_v10 = vrot.slane %v3370_v50, %v10280_v17  ;;  %v14826_v50 = vld [vmem:[#allocation42_spill] sm:$0xff] }
 0x4dd   :  { %v7690_v45 = vmul.f32 -1.442695, %v3747_v27  ;;  %v3749_v42 = vadd.f32 %v3748_v28, %v11089_v46  ;;  %4061 = vmatprep.subr.bf16.mxu0 %v10623_v53  ;;  %4102 = vmatprep.subr.bf16.mxu1 %v10625_v49  ;;  %v14814_v49 = vld [vmem:[#allocation30_spill] sm:$0xff]  ;;  %v14829_v27 = vld [vmem:[#allocation45_spill] sm:$0xff] }
 0x4de   :  { %v3750_v20 = vpop.f32.mrf.mxu0  ;;  %v3791_v0 = vpop.f32.mrf.mxu1  ;;  %14809 = vst [vmem:[#allocation145_spill] sm:$0xff] %v11106_v10  ;;  %v3788_v13 = vadd.f32 %v3787_v55, %v11106_v10  ;;  %v14828_v55 = vld [vmem:[#allocation44_spill] sm:$0xff]  ;;  %v14830_v28 = vld [vmem:[#allocation46_spill] sm:$0xff] }
 0x4df   :  { %8671 = vpow2.f32 %v7690_v45  ;;  %v7691_v25 = vmul.f32 -1.442695, %v3749_v42  ;;  %3987 = vmatmul.mubr.bf16.vlgmr.msra.gmra.mxu0 %v10936_v33  ;;  %4028 = vmatmul.mubr.bf16.vlgmr.msra.gmra.mxu1 %v10936_v33  ;;  %v14819_v33 = vld [vmem:[#allocation35_spill] sm:$0xff]  ;;  %v14832_v0 = vld [vmem:[#allocation48_spill] sm:$0xff] }
 0x4e0   :  { %v3751_v21 = vpop.f32.mrf.mxu0  ;;  %v3792_v32 = vpop.f32.mrf.mxu1  ;;  %4062 = vmatpush1.bf16.msra.mxu0 %v10629_v51  ;;  %4103 = vmatpush1.bf16.msra.mxu1 %v10631_v52  ;;  %v7692_v53 = vmul.f32 -1.442695, %v3788_v13  ;;  %v14815_v51 = vld [vmem:[#allocation31_spill] sm:$0xff]  ;;  %v14834_v13 = vld [vmem:[#allocation50_spill] sm:$0xff] }
 0x4e1   :  { %8673 = vpow2.f32 %v7691_v25  ;;  %4063 = vmatprep.subr.bf16.mxu0 %v10635_v54  ;;  %4104 = vmatprep.subr.bf16.mxu1 %v10637_v56  ;;  %v3790_v54 = vadd.f32 %v3789_v29, %v11116_v9  ;;  %v14831_v29 = vld [vmem:[#allocation47_spill] sm:$0xff]  ;;  %v14833_v25 = vld [vmem:[#allocation49_spill] sm:$0xff] }
 0x4e2   :  { %8675 = vpow2.f32 %v7692_v53 }
 0x4e4   :  { %4064 = vmatpush1.bf16.msra.mxu0 %v10643_v57  ;;  %4105 = vmatpush1.bf16.msra.mxu1 %v10645_v58  ;;  %v14816_v57 = vld [vmem:[#allocation32_spill] sm:$0xff]  ;;  %v14817_v58 = vld [vmem:[#allocation33_spill] sm:$0xff] }
 0x4e5   :  { %4065 = vmatprep.subr.bf16.mxu0 %v10649_v59  ;;  %4106 = vmatprep.subr.bf16.mxu1 %v10651_v60  ;;  %v14818_v60 = vld [vmem:[#allocation34_spill] sm:$0xff] }
 0x4e8   :  { %4066 = vmatpush1.bf16.msra.mxu0 %v14812_v48  ;;  %4107 = vmatpush1.bf16.msra.mxu1 %v14813_v39  ;;  %v14835_v48 = vld [vmem:[#allocation51_spill] sm:$0xff] }
 0x4e9   :  { %4067 = vmatprep.subr.bf16.mxu0 %v14814_v49  ;;  %4108 = vmatprep.subr.bf16.mxu1 %v14815_v51  ;;  %v14836_v51 = vld [vmem:[#allocation52_spill] sm:$0xff] }
 0x4ec   :  { %v8672_v52 = vpop.eup %8671  ;;  %4068 = vmatpush1.bf16.msra.mxu0 %v14816_v57  ;;  %4109 = vmatpush1.bf16.msra.mxu1 %v14817_v58  ;;  %v14840_v57 = vld [vmem:[#allocation56_spill] sm:$0xff]  ;;  %v14841_v58 = vld [vmem:[#allocation57_spill] sm:$0xff] }
 0x4ed   :  { %v3803_v56 = vadd.f32 1.0, %v8672_v52  ;;  %4069 = vmatprep.subr.bf16.mxu0 %v14818_v60  ;;  %4110 = vmatprep.subr.bf16.mxu1 %v14819_v33  ;;  %v14837_v52 = vld [vmem:[#allocation53_spill] sm:$0xff]  ;;  %v14843_v60 = vld [vmem:[#allocation59_spill] sm:$0xff]  ;;  %v14844_v33 = vld [vmem:[#allocation60_spill] sm:$0xff] }
 0x4ee   :  { %v8674_v59 = vpop.eup %8673 }
 0x4ef   :  { %8677 = vrcp.f32 %v3803_v56  ;;  %v3804_v30 = vadd.f32 1.0, %v8674_v59  ;;  %v8676_v45 = vpop.eup %8675  ;;  %v14839_v56 = vld [vmem:[#allocation55_spill] sm:$0xff]  ;;  %v14842_v59 = vld [vmem:[#allocation58_spill] sm:$0xff] }
 0x4f0   :  { %8679 = vtanh.f32 %v3790_v54  ;;  %4070 = vmatpush1.bf16.msra.mxu0 %v14820_v44  ;;  %4111 = vmatpush1.bf16.msra.mxu1 %v14821_v31  ;;  %v3805_v32 = vadd.f32 1.0, %v8676_v45  ;;  %v14838_v54 = vld [vmem:[#allocation54_spill] sm:$0xff]  ;;  %v14847_v31 = vld [vmem:[#allocation63_spill] sm:$0xff] }
 0x4f1   :  { %8681 = vrcp.f32 %v3804_v30  ;;  %4071 = vmatprep.subr.bf16.mxu0 %v14822_v1  ;;  %4112 = vmatprep.subr.bf16.mxu1 %v14823_v18  ;;  %v14845_v30 = vld [vmem:[#allocation61_spill] sm:$0xff]  ;;  %v14846_v44 = vld [vmem:[#allocation62_spill] sm:$0xff]  ;;  %v14848_v1 = vld [vmem:[#allocation64_spill] sm:$0xff] }
 0x4f2   :  { %8683 = vrcp.f32 %v3805_v32  ;;  %v14849_v18 = vld [vmem:[#allocation65_spill] sm:$0xff]  ;;  %v14855_v45 = vld [vmem:[#allocation75_spill] sm:$0xff]  ;;  %v14860_v32 = vld [vmem:[#allocation80_spill] sm:$0xff] }
 0x4f4   :  { %4072 = vmatpush1.bf16.msra.mxu0 %v14824_v37  ;;  %4113 = vmatpush1.bf16.msra.mxu1 %v14825_v38  ;;  %v14850_v37 = vld [vmem:[#allocation66_spill] sm:$0xff]  ;;  %v14851_v38 = vld [vmem:[#allocation67_spill] sm:$0xff] }
 0x4f5   :  { %4073 = vmatprep.subr.bf16.mxu0 %v14826_v50  ;;  %4114 = vmatprep.subr.bf16.mxu1 %v14827_v23 }
 0x4f8   :  { %4074 = vmatpush1.bf16.msra.mxu0 %v14828_v55  ;;  %4115 = vmatpush1.bf16.msra.mxu1 %v14829_v27  ;;  %v14852_v55 = vld [vmem:[#allocation72_spill] sm:$0xff]  ;;  %v14853_v27 = vld [vmem:[#allocation73_spill] sm:$0xff] }
 0x4f9   :  { %4075 = vmatprep.subr.bf16.mxu0 %v14830_v28  ;;  %4116 = vmatprep.subr.bf16.mxu1 %v14831_v29  ;;  %v14854_v29 = vld [vmem:[#allocation74_spill] sm:$0xff] }
 0x4fc   :  { %v8678_v42 = vpop.eup %8677  ;;  %4076 = vmatpush1.bf16.msra.mxu0 %v14832_v0  ;;  %4117 = vmatpush1.bf16.msra.mxu1 %v14833_v25  ;;  %v14857_v0 = vld [vmem:[#allocation77_spill] sm:$0xff]  ;;  %v14858_v25 = vld [vmem:[#allocation78_spill] sm:$0xff] }
 0x4fd   :  { %v8680_v20 = vpop.eup %8679  ;;  %4077 = vmatprep.subr.bf16.mxu0 %v14834_v13  ;;  %4118 = vmatprep.subr.bf16.mxu1 %v14835_v48  ;;  %v14861_v13 = vld [vmem:[#allocation81_spill] sm:$0xff]  ;;  %v14862_v48 = vld [vmem:[#allocation82_spill] sm:$0xff] }
 0x4fe   :  { %v8682_v21 = vpop.eup %8681  ;;  %v3814_v53 = vmul.f32 %v8680_v20, %v8678_v42  ;;  %v14856_v20 = vld [vmem:[#allocation76_spill] sm:$0xff] }
 0x4ff   :  { %v3813_v39 = vmul.f32 0.0, %v8682_v21  ;;  %v8684_v50 = vpop.eup %8683  ;;  %v14859_v21 = vld [vmem:[#allocation79_spill] sm:$0xff] }
 0x500   :  { %4078 = vmatpush2.bf16.msra.mxu0 %v14836_v51  ;;  %4119 = vmatpush2.bf16.msra.mxu1 %v14837_v52  ;;  %v11180_v51 = vld [vmem:[#allocation15 + $0xec] ss:$16 sps:$4 sm:$0xff]   ;;  %v14864_v52 = vld [vmem:[#allocation84_spill] sm:$0xff] }
 0x501   :  { %v11143_v49 = vadd.f32 %v3814_v53, %v3813_v39  ;;  %4079 = vmatprep.subr.bf16.mxu0 %v14838_v54  ;;  %4120 = vmatprep.subr.bf16.mxu1 %v14839_v56  ;;  %v14863_v39 = vld [vmem:[#allocation83_spill] sm:$0xff]  ;;  %v11178_v53 = vld [vmem:[#allocation15 + $0xe4] ss:$16 sps:$4 sm:$0xff]   ;;  %v14865_v54 = vld [vmem:[#allocation85_spill] sm:$0xff] }
 0x502   :  { %v11184_v56 = vld [vmem:[#allocation15 + $0xe0] ss:$16 sps:$4 sm:$0xff]  }
 0x503   :  { %8685 = vtanh.f32 %v11143_v49 }
 0x504   :  { %4080 = vmatpush2.bf16.msra.mxu0 %v14840_v57  ;;  %4121 = vmatpush2.bf16.msra.mxu1 %v14841_v58  ;;  %v11186_v57 = vld [vmem:[#allocation15 + $0xe8] ss:$16 sps:$4 sm:$0xff]   ;;  %v11190_v58 = vld [vmem:[#allocation15 + $0xc4] ss:$16 sps:$4 sm:$0xff]  }
 0x505   :  { %4081 = vmatprep.subr.bf16.mxu0 %v14842_v59  ;;  %4122 = vmatprep.subr.bf16.mxu1 %v14843_v60  ;;  %v11192_v59 = vld [vmem:[#allocation15 + $0xcc] ss:$16 sps:$4 sm:$0xff]   ;;  %v11198_v60 = vld [vmem:[#allocation15 + $0xc0] ss:$16 sps:$4 sm:$0xff]  }
 0x508   :  { %4082 = vmatpush2.bf16.msra.mxu0 %v14844_v33  ;;  %4123 = vmatpush2.bf16.msra.mxu1 %v14845_v30  ;;  %v11200_v33 = vld [vmem:[#allocation15 + $0xc8] ss:$16 sps:$4 sm:$0xff]   ;;  %v11204_v30 = vld [vmem:[#allocation15 + $0xa4] ss:$16 sps:$4 sm:$0xff]  }
 0x509   :  { %4083 = vmatprep.subr.bf16.mxu0 %v14846_v44  ;;  %4124 = vmatprep.subr.bf16.mxu1 %v14847_v31  ;;  %v11206_v44 = vld [vmem:[#allocation15 + $0xac] ss:$16 sps:$4 sm:$0xff]   ;;  %v14866_v31 = vmov 0  }
 0x50c   :  { %4084 = vmatpush2.bf16.msra.mxu0 %v14848_v1  ;;  %4125 = vmatpush2.bf16.msra.mxu1 %v14849_v18  ;;  %v11214_v1 = vld [vmem:[#allocation15 + $0xa8] ss:$16 sps:$4 sm:$0xff]   ;;  %v11218_v18 = vld [vmem:[#allocation15 + $0x84] ss:$16 sps:$4 sm:$0xff]  }
 0x50d   :  { %4085 = vmatprep.subr.bf16.mxu0 %v14850_v37  ;;  %4126 = vmatprep.subr.bf16.mxu1 %v14851_v38  ;;  %v11220_v37 = vld [vmem:[#allocation15 + $0x8c] ss:$16 sps:$4 sm:$0xff]   ;;  %v11224_v38 = vld [vmem:[#allocation15 + $0x80] ss:$16 sps:$4 sm:$0xff]  }
 0x510   :  { %v8686_v23 = vpop.eup %8685  ;;  %4086 = vmatpush2.bf16.msra.mxu0 %v14852_v55  ;;  %4127 = vmatpush2.bf16.msra.mxu1 %v14853_v27  ;;  %v11232_v55 = vld [vmem:[#allocation15 + $0x6c] ss:$16 sps:$4 sm:$0xff]   ;;  %v11236_v27 = vld [vmem:[#allocation15 + $0x60] ss:$16 sps:$4 sm:$0xff]  }
 0x511   :  { %v3817_v28 = vmul.f32 %v8686_v23, %v8684_v50  ;;  %4087 = vmatprep.subr.bf16.mxu0 %v14854_v29  ;;  %4128 = vmatprep.subr.bf16.mxu1 %v14855_v45  ;;  %v11226_v50 = vld [vmem:[#allocation15 + $0x88] ss:$16 sps:$4 sm:$0xff]   ;;  %v11230_v23 = vld [vmem:[#allocation15 + $0x64] ss:$16 sps:$4 sm:$0xff]   ;;  %14867 = vst [vmem:[#allocation28_spill] sm:$0xff] %v11232_v55  ;;  %14868 = vst [vmem:[#allocation29_spill] sm:$0xff] %v11236_v27 }
 0x512   :  { %v11242_v29 = vld [vmem:[#allocation15 + $0x44] ss:$16 sps:$4 sm:$0xff]   ;;  %v11244_v45 = vld [vmem:[#allocation15 + $0x4c] ss:$16 sps:$4 sm:$0xff]  }
 0x513   :  { %v11166_v42 = vpack.c.bf16 %v3817_v28, %v3817_v28  ;;  %v11238_v28 = vld [vmem:[#allocation15 + $0x68] ss:$16 sps:$4 sm:$0xff]   ;;  %14870 = vst [vmem:[#allocation31_spill] sm:$0xff] %v11242_v29  ;;  %14871 = vst [vmem:[#allocation32_spill] sm:$0xff] %v11244_v45 }
 0x514   :  { %4088 = vmatpush2.bf16.msra.mxu0 %v14856_v20  ;;  %4129 = vmatpush2.bf16.msra.mxu1 %v14857_v0  ;;  %14869 = vst [vmem:[#allocation30_spill] sm:$0xff] %v11238_v28  ;;  %v11248_v20 = vld [vmem:[#allocation15 + $0x40] ss:$16 sps:$4 sm:$0xff]   ;;  %v11250_v0 = vld [vmem:[#allocation15 + $0x48] ss:$16 sps:$4 sm:$0xff]  }
 0x515   :  { %4093 = vmatprep.mubr.bf16.mxu0 %v11166_v42  ;;  %4134 = vmatprep.mubr.bf16.mxu1 %v11166_v42  ;;  %14872 = vst [vmem:[#allocation33_spill] sm:$0xff] %v11248_v20  ;;  %14873 = vst [vmem:[#allocation34_spill] sm:$0xff] %v11250_v0 }
 0x516   :  { %4089 = vmatprep.subr.bf16.mxu0 %v14858_v25  ;;  %4130 = vmatprep.subr.bf16.mxu1 %v14859_v21  ;;  %v11254_v25 = vld [vmem:[#allocation15 + $0x24] ss:$16 sps:$4 sm:$0xff]   ;;  %v11256_v21 = vld [vmem:[#allocation15 + $0x2c] ss:$16 sps:$4 sm:$0xff]  }
 0x517   :  { %14874 = vst [vmem:[#allocation35_spill] sm:$0xff] %v11254_v25  ;;  %14875 = vst [vmem:[#allocation36_spill] sm:$0xff] %v11256_v21 }
 0x518   :  { %4090 = vmatpush2.bf16.msra.mxu0 %v14860_v32  ;;  %4131 = vmatpush2.bf16.msra.mxu1 %v14861_v13  ;;  %v11260_v32 = vld [vmem:[#allocation15 + $0x20] ss:$16 sps:$4 sm:$0xff]   ;;  %v11262_v13 = vld [vmem:[#allocation15 + $0x28] ss:$16 sps:$4 sm:$0xff]  }
 0x519   :  { %4091 = vmatprep.subr.bf16.mxu0 %v14862_v48  ;;  %4132 = vmatprep.subr.bf16.mxu1 %v14863_v39  ;;  %14876 = vst [vmem:[#allocation37_spill] sm:$0xff] %v11260_v32  ;;  %14877 = vst [vmem:[#allocation38_spill] sm:$0xff] %v11262_v13  ;;  %v11266_v48 = vld [vmem:[#allocation15 + $0x4] ss:$16 sps:$4 sm:$0xff]   ;;  %v11268_v39 = vld [vmem:[#allocation15 + $0xc] ss:$16 sps:$4 sm:$0xff]  }
 0x51a   :  { %14878 = vst [vmem:[#allocation39_spill] sm:$0xff] %v11266_v48  ;;  %14879 = vst [vmem:[#allocation40_spill] sm:$0xff] %v11268_v39 }
 0x51c   :  { %4092 = vmatpush2.bf16.msra.mxu0 %v14864_v52  ;;  %4133 = vmatpush2.bf16.msra.mxu1 %v14865_v54  ;;  %v11272_v52 = vld [vmem:[#allocation15] ss:$16 sps:$4 sm:$0xff]   ;;  %v11274_v54 = vld [vmem:[#allocation15 + $0x8] ss:$16 sps:$4 sm:$0xff]  }
 0x51d   :  { %4574 = vmatprep.subr.bf16.mxu0 %v11178_v53  ;;  %4615 = vmatprep.subr.bf16.mxu1 %v11180_v51  ;;  %14880 = vst [vmem:[#allocation41_spill] sm:$0xff] %v11272_v52  ;;  %14881 = vst [vmem:[#allocation42_spill] sm:$0xff] %v11274_v54 }
 0x51f   :  { %4094 = vmatmul.mubr.bf16.vlgmr.msra.gmra.mxu0 %v11074_v43  ;;  %4135 = vmatmul.mubr.bf16.vlgmr.msra.gmra.mxu1 %v11074_v43  ;;  %v11212_v43 = vld [vmem:[#allocation15 + $0xa0] ss:$16 sps:$4 sm:$0xff]  }
 0x520   :  { %4575 = vmatpush1.bf16.msra.mxu0 %v11184_v56  ;;  %4616 = vmatpush1.bf16.msra.mxu1 %v11186_v57 }
 0x521   :  { %4576 = vmatprep.subr.bf16.mxu0 %v11190_v58  ;;  %4617 = vmatprep.subr.bf16.mxu1 %v11192_v59 }
 0x522   :  { %4606 = vmatprep.mubr.bf16.mxu0 %v14866_v31  ;;  %4647 = vmatprep.mubr.bf16.mxu1 %v14866_v31 }
 0x524   :  { %4577 = vmatpush1.bf16.msra.mxu0 %v11198_v60  ;;  %4618 = vmatpush1.bf16.msra.mxu1 %v11200_v33 }
 0x525   :  { %4578 = vmatprep.subr.bf16.mxu0 %v11204_v30  ;;  %4619 = vmatprep.subr.bf16.mxu1 %v11206_v44 }
 0x528   :  { %4579 = vmatpush1.bf16.msra.mxu0 %v11212_v43  ;;  %4620 = vmatpush1.bf16.msra.mxu1 %v11214_v1 }
 0x529   :  { %4580 = vmatprep.subr.bf16.mxu0 %v11218_v18  ;;  %4621 = vmatprep.subr.bf16.mxu1 %v11220_v37 }
 0x52c   :  { %4581 = vmatpush1.bf16.msra.mxu0 %v11224_v38  ;;  %4622 = vmatpush1.bf16.msra.mxu1 %v11226_v50 }
 0x52d   :  { %4582 = vmatprep.subr.bf16.mxu0 %v11230_v23  ;;  %4623 = vmatprep.subr.bf16.mxu1 %v11232_v55  ;;  %v14922_v55 = vld [vmem:[#allocation94_spill] sm:$0xff] }
 0x530   :  { %4583 = vmatpush1.bf16.msra.mxu0 %v11236_v27  ;;  %4624 = vmatpush1.bf16.msra.mxu1 %v11238_v28  ;;  %v14920_v28 = vld [vmem:[#allocation92_spill] sm:$0xff] }
 0x531   :  { %4584 = vmatprep.subr.bf16.mxu0 %v11242_v29  ;;  %4625 = vmatprep.subr.bf16.mxu1 %v11244_v45  ;;  %v14918_v45 = vld [vmem:[#allocation90_spill] sm:$0xff] }
 0x534   :  { %4585 = vmatpush1.bf16.msra.mxu0 %v11248_v20  ;;  %4626 = vmatpush1.bf16.msra.mxu1 %v11250_v0  ;;  %v11278_v0 = vld [vmem:[#allocation15 + $0x1e4] ss:$16 sps:$4 sm:$0xff]   ;;  %v14917_v20 = vld [vmem:[#allocation89_spill] sm:$0xff] }
 0x535   :  { %4586 = vmatprep.subr.bf16.mxu0 %v11254_v25  ;;  %4627 = vmatprep.subr.bf16.mxu1 %v11256_v21  ;;  %14882 = vst [vmem:[#allocation43_spill] sm:$0xff] %v11278_v0  ;;  %v11280_v25 = vld [vmem:[#allocation15 + $0x1ec] ss:$16 sps:$4 sm:$0xff]   ;;  %v11284_v21 = vld [vmem:[#allocation15 + $0x1e0] ss:$16 sps:$4 sm:$0xff]  }
 0x536   :  { %14883 = vst [vmem:[#allocation44_spill] sm:$0xff] %v11280_v25  ;;  %14884 = vst [vmem:[#allocation45_spill] sm:$0xff] %v11284_v21 }
 0x538   :  { %4587 = vmatpush1.bf16.msra.mxu0 %v11260_v32  ;;  %4628 = vmatpush1.bf16.msra.mxu1 %v11262_v13  ;;  %v11286_v32 = vld [vmem:[#allocation15 + $0x1e8] ss:$16 sps:$4 sm:$0xff]   ;;  %v11290_v13 = vld [vmem:[#allocation15 + $0x1c4] ss:$16 sps:$4 sm:$0xff]  }
 0x539   :  { %4588 = vmatprep.subr.bf16.mxu0 %v11266_v48  ;;  %4629 = vmatprep.subr.bf16.mxu1 %v11268_v39  ;;  %14885 = vst [vmem:[#allocation46_spill] sm:$0xff] %v11286_v32  ;;  %14886 = vst [vmem:[#allocation47_spill] sm:$0xff] %v11290_v13  ;;  %v11292_v48 = vld [vmem:[#allocation15 + $0x1cc] ss:$16 sps:$4 sm:$0xff]   ;;  %v11296_v39 = vld [vmem:[#allocation15 + $0x1c0] ss:$16 sps:$4 sm:$0xff]  }
 0x53a   :  { %14887 = vst [vmem:[#allocation48_spill] sm:$0xff] %v11292_v48  ;;  %14888 = vst [vmem:[#allocation49_spill] sm:$0xff] %v11296_v39 }
 0x53c   :  { %4589 = vmatpush1.bf16.msra.mxu0 %v11272_v52  ;;  %4630 = vmatpush1.bf16.msra.mxu1 %v11274_v54  ;;  %v11298_v52 = vld [vmem:[#allocation15 + $0x1c8] ss:$16 sps:$4 sm:$0xff]   ;;  %v11302_v54 = vld [vmem:[#allocation15 + $0x1a4] ss:$16 sps:$4 sm:$0xff]  }
 0x53d   :  { %4590 = vmatprep.subr.bf16.mxu0 %v11278_v0  ;;  %4631 = vmatprep.subr.bf16.mxu1 %v11280_v25  ;;  %14889 = vst [vmem:[#allocation50_spill] sm:$0xff] %v11298_v52  ;;  %14890 = vst [vmem:[#allocation51_spill] sm:$0xff] %v11302_v54  ;;  %v11304_v0 = vld [vmem:[#allocation15 + $0x1ac] ss:$16 sps:$4 sm:$0xff]   ;;  %v11308_v25 = vld [vmem:[#allocation15 + $0x1a0] ss:$16 sps:$4 sm:$0xff]  }
 0x53e   :  { %14891 = vst [vmem:[#allocation52_spill] sm:$0xff] %v11304_v0  ;;  %14892 = vst [vmem:[#allocation53_spill] sm:$0xff] %v11308_v25 }
 0x540   :  { %4591 = vmatpush2.bf16.msra.mxu0 %v11284_v21  ;;  %4632 = vmatpush2.bf16.msra.mxu1 %v11286_v32  ;;  %v11310_v21 = vld [vmem:[#allocation15 + $0x1a8] ss:$16 sps:$4 sm:$0xff]   ;;  %v11314_v32 = vld [vmem:[#allocation15 + $0x184] ss:$16 sps:$4 sm:$0xff]  }
 0x541   :  { %4592 = vmatprep.subr.bf16.mxu0 %v11290_v13  ;;  %4633 = vmatprep.subr.bf16.mxu1 %v11292_v48  ;;  %14893 = vst [vmem:[#allocation54_spill] sm:$0xff] %v11310_v21  ;;  %14894 = vst [vmem:[#allocation55_spill] sm:$0xff] %v11314_v32  ;;  %v11316_v13 = vld [vmem:[#allocation15 + $0x18c] ss:$16 sps:$4 sm:$0xff]   ;;  %v11320_v48 = vld [vmem:[#allocation15 + $0x180] ss:$16 sps:$4 sm:$0xff]  }
 0x542   :  { %14895 = vst [vmem:[#allocation56_spill] sm:$0xff] %v11316_v13  ;;  %14896 = vst [vmem:[#allocation57_spill] sm:$0xff] %v11320_v48 }
 0x544   :  { %4593 = vmatpush2.bf16.msra.mxu0 %v11296_v39  ;;  %4634 = vmatpush2.bf16.msra.mxu1 %v11298_v52  ;;  %v11322_v39 = vld [vmem:[#allocation15 + $0x188] ss:$16 sps:$4 sm:$0xff]   ;;  %v11326_v52 = vld [vmem:[#allocation15 + $0x164] ss:$16 sps:$4 sm:$0xff]  }
 0x545   :  { %4594 = vmatprep.subr.bf16.mxu0 %v11302_v54  ;;  %4635 = vmatprep.subr.bf16.mxu1 %v11304_v0  ;;  %14897 = vst [vmem:[#allocation58_spill] sm:$0xff] %v11322_v39  ;;  %14898 = vst [vmem:[#allocation59_spill] sm:$0xff] %v11326_v52  ;;  %v11328_v54 = vld [vmem:[#allocation15 + $0x16c] ss:$16 sps:$4 sm:$0xff]   ;;  %v11332_v0 = vld [vmem:[#allocation15 + $0x160] ss:$16 sps:$4 sm:$0xff]  }
 0x546   :  { %14899 = vst [vmem:[#allocation60_spill] sm:$0xff] %v11328_v54  ;;  %14900 = vst [vmem:[#allocation61_spill] sm:$0xff] %v11332_v0 }
 0x548   :  { %4595 = vmatpush2.bf16.msra.mxu0 %v11308_v25  ;;  %4636 = vmatpush2.bf16.msra.mxu1 %v11310_v21  ;;  %v11334_v25 = vld [vmem:[#allocation15 + $0x168] ss:$16 sps:$4 sm:$0xff]   ;;  %v11338_v21 = vld [vmem:[#allocation15 + $0x144] ss:$16 sps:$4 sm:$0xff]  }
 0x549   :  { %4596 = vmatprep.subr.bf16.mxu0 %v11314_v32  ;;  %4637 = vmatprep.subr.bf16.mxu1 %v11316_v13  ;;  %14901 = vst [vmem:[#allocation62_spill] sm:$0xff] %v11334_v25  ;;  %14902 = vst [vmem:[#allocation63_spill] sm:$0xff] %v11338_v21  ;;  %v11340_v32 = vld [vmem:[#allocation15 + $0x14c] ss:$16 sps:$4 sm:$0xff]   ;;  %v11344_v13 = vld [vmem:[#allocation15 + $0x140] ss:$16 sps:$4 sm:$0xff]  }
 0x54a   :  { %14903 = vst [vmem:[#allocation64_spill] sm:$0xff] %v11340_v32  ;;  %14904 = vst [vmem:[#allocation65_spill] sm:$0xff] %v11344_v13 }
 0x54c   :  { %4597 = vmatpush2.bf16.msra.mxu0 %v11320_v48  ;;  %4638 = vmatpush2.bf16.msra.mxu1 %v11322_v39  ;;  %v11346_v48 = vld [vmem:[#allocation15 + $0x148] ss:$16 sps:$4 sm:$0xff]   ;;  %v11350_v39 = vld [vmem:[#allocation15 + $0x124] ss:$16 sps:$4 sm:$0xff]  }
 0x54d   :  { %4598 = vmatprep.subr.bf16.mxu0 %v11326_v52  ;;  %4639 = vmatprep.subr.bf16.mxu1 %v11328_v54  ;;  %14905 = vst [vmem:[#allocation66_spill] sm:$0xff] %v11346_v48  ;;  %14906 = vst [vmem:[#allocation67_spill] sm:$0xff] %v11350_v39  ;;  %v11352_v52 = vld [vmem:[#allocation15 + $0x12c] ss:$16 sps:$4 sm:$0xff]   ;;  %v11356_v54 = vld [vmem:[#allocation15 + $0x120] ss:$16 sps:$4 sm:$0xff]  }
 0x54e   :  { %14907 = vst [vmem:[#allocation72_spill] sm:$0xff] %v11352_v52  ;;  %14908 = vst [vmem:[#allocation73_spill] sm:$0xff] %v11356_v54 }
 0x550   :  { %4599 = vmatpush2.bf16.msra.mxu0 %v11332_v0  ;;  %4640 = vmatpush2.bf16.msra.mxu1 %v11334_v25  ;;  %v11358_v0 = vld [vmem:[#allocation15 + $0x128] ss:$16 sps:$4 sm:$0xff]   ;;  %v11362_v25 = vld [vmem:[#allocation15 + $0x104] ss:$16 sps:$4 sm:$0xff]  }
 0x551   :  { %4600 = vmatprep.subr.bf16.mxu0 %v11338_v21  ;;  %4641 = vmatprep.subr.bf16.mxu1 %v11340_v32  ;;  %14909 = vst [vmem:[#allocation74_spill] sm:$0xff] %v11358_v0  ;;  %14910 = vst [vmem:[#allocation75_spill] sm:$0xff] %v11362_v25  ;;  %v11364_v21 = vld [vmem:[#allocation15 + $0x10c] ss:$16 sps:$4 sm:$0xff]   ;;  %v11368_v32 = vld [vmem:[#allocation15 + $0x100] ss:$16 sps:$4 sm:$0xff]  }
 0x552   :  { %14911 = vst [vmem:[#allocation76_spill] sm:$0xff] %v11364_v21  ;;  %14912 = vst [vmem:[#allocation77_spill] sm:$0xff] %v11368_v32 }
 0x554   :  { %4601 = vmatpush2.bf16.msra.mxu0 %v11344_v13  ;;  %4642 = vmatpush2.bf16.msra.mxu1 %v11346_v48  ;;  %v11370_v13 = vld [vmem:[#allocation15 + $0x108] ss:$16 sps:$4 sm:$0xff]  }
 0x555   :  { %4602 = vmatprep.subr.bf16.mxu0 %v11350_v39  ;;  %4643 = vmatprep.subr.bf16.mxu1 %v11352_v52  ;;  %14913 = vst [vmem:[#allocation78_spill] sm:$0xff] %v11370_v13  ;;  %v14914_v52 = vld [vmem:[#allocation86_spill] sm:$0xff]  ;;  %v14915_v39 = vld [vmem:[#allocation87_spill] sm:$0xff]  ;;  %v14916_v48 = vld [vmem:[#allocation88_spill] sm:$0xff] }
 0x558   :  { %4603 = vmatpush2.bf16.msra.mxu0 %v11356_v54  ;;  %4644 = vmatpush2.bf16.msra.mxu1 %v11358_v0 }
 0x559   :  { %4604 = vmatprep.subr.bf16.mxu0 %v11362_v25  ;;  %4645 = vmatprep.subr.bf16.mxu1 %v11364_v21 }
 0x55c   :  { %4605 = vmatpush2.bf16.msra.mxu0 %v11368_v32  ;;  %4646 = vmatpush2.bf16.msra.mxu1 %v11370_v13  ;;  %v14919_v32 = vld [vmem:[#allocation91_spill] sm:$0xff] }
 0x55d   :  { %4683 = vmatprep.subr.bf16.mxu0 %v14914_v52  ;;  %4724 = vmatprep.subr.bf16.mxu1 %v14915_v39 }
 0x55f   :  { %4607 = vmatmul.mubr.bf16.vlgmr.msra.gmra.mxu0 %v11166_v42  ;;  %4648 = vmatmul.mubr.bf16.vlgmr.msra.gmra.mxu1 %v11166_v42  ;;  %v3855_v0 = vpop.f32.mrf.mxu0  ;;  %v3896_v54 = vpop.f32.mrf.mxu1 }
 0x560   :  { %4684 = vmatpush1.bf16.msra.mxu0 %v14916_v48  ;;  %4725 = vmatpush1.bf16.msra.mxu1 %v14917_v20  ;;  %v14921_v20 = vld [vmem:[#allocation93_spill] sm:$0xff] }
 0x561   :  { %v3857_v25 = vpop.f32.mrf.mxu0  ;;  %v3898_v21 = vpop.f32.mrf.mxu1  ;;  %4685 = vmatprep.subr.bf16.mxu0 %v14918_v45  ;;  %4726 = vmatprep.subr.bf16.mxu1 %v14919_v32  ;;  %v14924_v32 = vld [vmem:[#allocation96_spill] sm:$0xff] }
 0x562   :  { %v3907_v13 = vcombine.low %v3855_v0, %v3857_v25  ;;  %v3908_v52 = vcombine.low %v3896_v54, %v3898_v21  ;;  %4715 = vmatprep.mubr.bf16.mxu0 %v14866_v31  ;;  %4756 = vmatprep.mubr.bf16.mxu1 %v14866_v31  ;;  %v14923_v0 = vld [vmem:[#allocation95_spill] sm:$0xff]  ;;  %v14925_v54 = vld [vmem:[#allocation97_spill] sm:$0xff] }
 0x563   :  { %v3859_v39 = vpop.f32.mrf.mxu0  ;;  %v3900_v42 = vpop.f32.mrf.mxu1 }
 0x564   :  { %v3915_v29 = vrot.slane %v3907_v13, %v10288_v19  ;;  %v3922_v48 = vrot.slane %v3908_v52, %v10288_v19  ;;  %4686 = vmatpush1.bf16.msra.mxu0 %v14920_v28  ;;  %4727 = vmatpush1.bf16.msra.mxu1 %v14921_v20  ;;  %v3820_v13 = vld [vmem:[#allocation3 + $0x3] ss:$8 sm:$0xf] }
 0x565   :  { %v3860_v27 = vpop.f32.mrf.mxu0  ;;  %v3901_v45 = vpop.f32.mrf.mxu1  ;;  %4687 = vmatprep.subr.bf16.mxu0 %v14922_v55  ;;  %4728 = vmatprep.subr.bf16.mxu1 %v14923_v0  ;;  %v14926_v39 = vld [vmem:[#allocation98_spill] sm:$0xff]  ;;  %v14927_v52 = vld [vmem:[#allocation99_spill] sm:$0xff]  ;;  %v14929_v20 = vld [vmem:[#allocation101_spill] sm:$0xff] }
 0x566   :  { %v3923_v25 = vcombine.low %v3915_v29, %v3922_v48  ;;  %v14928_v27 = vld [vmem:[#allocation100_spill] sm:$0xff]  ;;  %v14930_v55 = vld [vmem:[#allocation102_spill] sm:$0xff]  ;;  %v14931_v29 = vld [vmem:[#allocation103_spill] sm:$0xff] }
 0x567   :  { %v14932_v48 = vld [vmem:[#allocation104_spill] sm:$0xff]  ;;  %v14933_v45 = vld [vmem:[#allocation105_spill] sm:$0xff]  ;;  %v14934_v0 = vld [vmem:[#allocation106_spill] sm:$0xff] }
 0x568   :  { %v3930_v21 = vrot.slane %v3923_v25, %v10288_v19  ;;  %4688 = vmatpush1.bf16.msra.mxu0 %v14924_v32  ;;  %4729 = vmatpush1.bf16.msra.mxu1 %v14925_v54  ;;  %v14935_v25 = vld [vmem:[#allocation107_spill] sm:$0xff]  ;;  %v14936_v32 = vld [vmem:[#allocation108_spill] sm:$0xff]  ;;  %v14938_v54 = vld [vmem:[#allocation110_spill] sm:$0xff] }
 0x569   :  { %4689 = vmatprep.subr.bf16.mxu0 %v14926_v39  ;;  %4730 = vmatprep.subr.bf16.mxu1 %v14927_v52  ;;  %v14940_v39 = vld [vmem:[#allocation112_spill] sm:$0xff]  ;;  %v14941_v52 = vld [vmem:[#allocation113_spill] sm:$0xff] }
 0x56a   :  { %v3932_v28 = vadd.f32 %v3930_v21, %v3820_v13  ;;  %v14937_v21 = vld [vmem:[#allocation109_spill] sm:$0xff]  ;;  %v14939_v13 = vld [vmem:[#allocation111_spill] sm:$0xff] }
 0x56c   :  { %v7693_v42 = vmul.f32 -1.442695, %v3932_v28  ;;  %4690 = vmatpush1.bf16.msra.mxu0 %v14928_v27  ;;  %4731 = vmatpush1.bf16.msra.mxu1 %v14929_v20  ;;  %v14943_v27 = vld [vmem:[#allocation115_spill] sm:$0xff] }
 0x56d   :  { %4691 = vmatprep.subr.bf16.mxu0 %v14930_v55  ;;  %4732 = vmatprep.subr.bf16.mxu1 %v14931_v29  ;;  %v3940_v29 = vrot.slane %v3932_v28, 3 }
 0x56e   :  { %8687 = vpow2.f32 %v7693_v42  ;;  %v14942_v42 = vld [vmem:[#allocation114_spill] sm:$0xff] }
 0x570   :  { %4692 = vmatpush1.bf16.msra.mxu0 %v14932_v48  ;;  %4733 = vmatpush1.bf16.msra.mxu1 %v14933_v45  ;;  %v14944_v48 = vld [vmem:[#allocation116_spill] sm:$0xff]  ;;  %v14945_v45 = vld [vmem:[#allocation117_spill] sm:$0xff] }
 0x571   :  { %4693 = vmatprep.subr.bf16.mxu0 %v14934_v0  ;;  %4734 = vmatprep.subr.bf16.mxu1 %v14935_v25  ;;  %v14946_v0 = vld [vmem:[#allocation118_spill] sm:$0xff]  ;;  %v14947_v25 = vld [vmem:[#allocation119_spill] sm:$0xff] }
 0x574   :  { %4694 = vmatpush1.bf16.msra.mxu0 %v14936_v32  ;;  %4735 = vmatpush1.bf16.msra.mxu1 %v14937_v21 }
 0x575   :  { %4695 = vmatprep.subr.bf16.mxu0 %v14938_v54  ;;  %4736 = vmatprep.subr.bf16.mxu1 %v14939_v13 }
 0x578   :  { %4696 = vmatpush1.bf16.msra.mxu0 %v14940_v39  ;;  %4737 = vmatpush1.bf16.msra.mxu1 %v14941_v52 }
 0x579   :  { %4697 = vmatprep.subr.bf16.mxu0 %v14942_v42  ;;  %4738 = vmatprep.subr.bf16.mxu1 %v14943_v27 }
 0x57b   :  { %v8688_v20 = vpop.eup %8687 }
 0x57c   :  { %v3936_v55 = vadd.f32 1.0, %v8688_v20  ;;  %4698 = vmatpush1.bf16.msra.mxu0 %v14944_v48  ;;  %4739 = vmatpush1.bf16.msra.mxu1 %v14945_v45 }
 0x57d   :  { %4816 = vmatprep.subr.bf16.mxu0 %v14946_v0  ;;  %4857 = vmatprep.subr.bf16.mxu1 %v14947_v25 }
 0x57e   :  { %8689 = vrcp.f32 %v3936_v55 }
 0x57f   :  { %8691 = vtanh.f32 %v3940_v29 }
 0x58b   :  { %v8690_v32 = vpop.eup %8689 }
 0x58c   :  { %v3944_v21 = vrot.slane %v8690_v32, 1  ;;  %v8692_v54 = vpop.eup %8691  ;;  %v3950_v28 = vrot.slane %v8690_v32, 2 }
 0x58d   :  { %v3947_v13 = vmul.f32 %v8692_v54, %v8690_v32  ;;  %v14948_v32 = vld [vmem:[#allocation120_spill] sm:$0xff] }
 0x58e   :  { %v3946_v39 = vmul.f32 %v3944_v21, %v10931_v6 }
 0x590   :  { %v11418_v52 = vadd.f32 %v3947_v13, %v3946_v39  ;;  %v14949_v39 = vld [vmem:[#allocation121_spill] sm:$0xff] }
 0x592   :  { %8693 = vtanh.f32 %v11418_v52 }
 0x59f   :  { %v8694_v42 = vpop.eup %8693  ;;  %v3988_v27 = vpop.f32.mrf.mxu0 }
 0x5a0   :  { %v4029_v20 = vpop.f32.mrf.mxu1  ;;  %v3989_v48 = vadd.f32 %v3988_v27, %v10537_v3  ;;  %v3952_v45 = vmul.f32 %v8694_v42, %v3950_v28  ;;  %v14952_v28 = vld [vmem:[#allocation71_spill] sm:$0xff]  ;;  %v14954_v27 = vld [vmem:[#allocation125_spill] sm:$0xff] }
 0x5a1   :  { %v3990_v0 = vpop.f32.mrf.mxu0 }
 0x5a2   :  { %v4031_v55 = vpop.f32.mrf.mxu1  ;;  %v7694_v29 = vmul.f32 -1.442695, %v3989_v48  ;;  %v3991_v25 = vadd.f32 %v3990_v0, %v10540_v4  ;;  %v11423_v31 = vpack.c.bf16 %v3952_v45, %v3952_v45  ;;  %v14957_v45 = vld [vmem:[#allocation128_spill] sm:$0xff]  ;;  %v14958_v0 = vld [vmem:[#allocation129_spill] sm:$0xff] }
 0x5a3   :  { %v3992_v19 = vpop.f32.mrf.mxu0 }
 0x5a4   :  { %v4033_v54 = vpop.f32.mrf.mxu1  ;;  %8695 = vpow2.f32 %v7694_v29  ;;  %v7695_v6 = vmul.f32 -1.442695, %v3991_v25  ;;  %4716 = vmatmul.mubr.bf16.vlgmr.msra.gmra.mxu0 %v11423_v31  ;;  %4757 = vmatmul.mubr.bf16.vlgmr.msra.gmra.mxu1 %v11423_v31  ;;  %v4030_v19 = vadd.f32 %v4029_v20, %v10551_v24  ;;  %v14956_v20 = vld [vmem:[#allocation127_spill] sm:$0xff]  ;;  %v14961_v25 = vld [vmem:[#allocation132_spill] sm:$0xff] }
 0x5a5   :  { %v3993_v21 = vpop.f32.mrf.mxu0  ;;  %4817 = vmatpush1.bf16.msra.mxu0 %v10940_v8  ;;  %4858 = vmatpush1.bf16.msra.mxu1 %v10943_v26  ;;  %v14950_v26 = vld [vmem:[#allocation122_spill] sm:$0xff]  ;;  %v14960_v29 = vld [vmem:[#allocation131_spill] sm:$0xff]  ;;  %v14962_v54 = vld [vmem:[#allocation133_spill] sm:$0xff] }
 0x5a6   :  { %v4034_v13 = vpop.f32.mrf.mxu1  ;;  %8697 = vpow2.f32 %v7695_v6  ;;  %4818 = vmatprep.subr.bf16.mxu0 %v10946_v34  ;;  %4859 = vmatprep.subr.bf16.mxu1 %v10949_v35  ;;  %v7696_v8 = vmul.f32 -1.442695, %v4030_v19  ;;  %v14951_v34 = vld [vmem:[#allocation123_spill] sm:$0xff]  ;;  %v14963_v6 = vld [vmem:[#allocation134_spill] sm:$0xff]  ;;  %v14966_v19 = vld [vmem:[#allocation137_spill] sm:$0xff] }
 0x5a7   :  { %v14964_v21 = vld [vmem:[#allocation135_spill] sm:$0xff]  ;;  %v14965_v13 = vld [vmem:[#allocation136_spill] sm:$0xff] }
 0x5a8   :  { %8699 = vpow2.f32 %v7696_v8 }
 0x5a9   :  { %4819 = vmatpush1.bf16.msra.mxu0 %v10952_v2  ;;  %4860 = vmatpush1.bf16.msra.mxu1 %v10955_v5  ;;  %v4032_v2 = vadd.f32 %v4031_v55, %v14952_v28  ;;  %v14953_v5 = vld [vmem:[#allocation124_spill] sm:$0xff]  ;;  %v14959_v55 = vld [vmem:[#allocation130_spill] sm:$0xff] }
 0x5aa   :  { %4820 = vmatprep.subr.bf16.mxu0 %v10959_v16  ;;  %4861 = vmatprep.subr.bf16.mxu1 %v10962_v61  ;;  %v14955_v61 = vld [vmem:[#allocation126_spill] sm:$0xff] }
 0x5ad   :  { %4821 = vmatpush1.bf16.msra.mxu0 %v14948_v32  ;;  %4862 = vmatpush1.bf16.msra.mxu1 %v14949_v39  ;;  %v14967_v32 = vld [vmem:[#allocation138_spill] sm:$0xff]  ;;  %v14968_v39 = vld [vmem:[#allocation139_spill] sm:$0xff] }
 0x5ae   :  { %4822 = vmatprep.subr.bf16.mxu0 %v14950_v26  ;;  %4863 = vmatprep.subr.bf16.mxu1 %v14951_v34 }
 0x5b1   :  { %v8696_v35 = vpop.eup %8695  ;;  %4823 = vmatpush1.bf16.msra.mxu0 %v14953_v5  ;;  %4864 = vmatpush1.bf16.msra.mxu1 %v14954_v27  ;;  %v14971_v27 = vld [vmem:[#allocation142_spill] sm:$0xff] }
 0x5b2   :  { %v4045_v42 = vadd.f32 1.0, %v8696_v35  ;;  %4824 = vmatprep.subr.bf16.mxu0 %v14955_v61  ;;  %4865 = vmatprep.subr.bf16.mxu1 %v14956_v20  ;;  %v14969_v35 = vld [vmem:[#allocation140_spill] sm:$0xff] }
 0x5b3   :  { %v8698_v16 = vpop.eup %8697 }
 0x5b4   :  { %8701 = vrcp.f32 %v4045_v42  ;;  %v4046_v48 = vadd.f32 1.0, %v8698_v16 }
 0x5b5   :  { %8703 = vtanh.f32 %v4032_v2  ;;  %4825 = vmatpush1.bf16.msra.mxu0 %v14957_v45  ;;  %4866 = vmatpush1.bf16.msra.mxu1 %v14958_v0  ;;  %v8700_v8 = vpop.eup %8699  ;;  %v14970_v2 = vld [vmem:[#allocation141_spill] sm:$0xff] }
 0x5b6   :  { %8705 = vrcp.f32 %v4046_v48  ;;  %4826 = vmatprep.subr.bf16.mxu0 %v14959_v55  ;;  %4867 = vmatprep.subr.bf16.mxu1 %v14960_v29  ;;  %v4047_v5 = vadd.f32 1.0, %v8700_v8  ;;  %v11495_v48 = vld [vmem:[#allocation12 + $0x164] ss:$16 sps:$4 sm:$0xff]   ;;  %v11498_v45 = vld [vmem:[#allocation12 + $0x16c] ss:$16 sps:$4 sm:$0xff]  }
 0x5b7   :  { %v11501_v29 = vld [vmem:[#allocation12 + $0x160] ss:$16 sps:$4 sm:$0xff]   ;;  %v11526_v8 = vld [vmem:[#allocation12 + $0x12c] ss:$16 sps:$4 sm:$0xff]  }
 0x5b8   :  { %8707 = vrcp.f32 %v4047_v5  ;;  %14972 = vst [vmem:[#allocation79_spill] sm:$0xff] %v11526_v8  ;;  %v11538_v5 = vld [vmem:[#allocation12 + $0x10c] ss:$16 sps:$4 sm:$0xff]  }
 0x5b9   :  { %4827 = vmatpush1.bf16.msra.mxu0 %v14961_v25  ;;  %4868 = vmatpush1.bf16.msra.mxu1 %v14962_v54  ;;  %v11504_v25 = vld [vmem:[#allocation12 + $0x168] ss:$16 sps:$4 sm:$0xff]  }
 0x5ba   :  { %4828 = vmatprep.subr.bf16.mxu0 %v14963_v6  ;;  %4869 = vmatprep.subr.bf16.mxu1 %v14964_v21  ;;  %v11507_v6 = vld [vmem:[#allocation12 + $0x144] ss:$16 sps:$4 sm:$0xff]   ;;  %v11510_v21 = vld [vmem:[#allocation12 + $0x14c] ss:$16 sps:$4 sm:$0xff]  }
 0x5bd   :  { %4829 = vmatpush1.bf16.msra.mxu0 %v14965_v13  ;;  %4870 = vmatpush1.bf16.msra.mxu1 %v14966_v19  ;;  %v11515_v19 = vld [vmem:[#allocation12 + $0x140] ss:$16 sps:$4 sm:$0xff]  }
 0x5be   :  { %4830 = vmatprep.subr.bf16.mxu0 %v14967_v32  ;;  %4871 = vmatprep.subr.bf16.mxu1 %v14968_v39  ;;  %v11518_v32 = vld [vmem:[#allocation12 + $0x148] ss:$16 sps:$4 sm:$0xff]   ;;  %v11523_v39 = vld [vmem:[#allocation12 + $0x124] ss:$16 sps:$4 sm:$0xff]  }
 0x5c1   :  { %v8702_v26 = vpop.eup %8701  ;;  %4831 = vmatpush1.bf16.msra.mxu0 %v14969_v35  ;;  %4872 = vmatpush1.bf16.msra.mxu1 %v14970_v2 }
 0x5c2   :  { %v8704_v34 = vpop.eup %8703  ;;  %4832 = vmatprep.subr.bf16.mxu0 %v14971_v27  ;;  %4873 = vmatprep.subr.bf16.mxu1 %v11035_v47  ;;  %v11471_v47 = vld [vmem:[#allocation12 + $0x1a4] ss:$16 sps:$4 sm:$0xff]  }
 0x5c3   :  { %v8706_v42 = vpop.eup %8705  ;;  %v4056_v61 = vmul.f32 %v8704_v34, %v8702_v26  ;;  %v11529_v26 = vld [vmem:[#allocation12 + $0x120] ss:$16 sps:$4 sm:$0xff]   ;;  %v11532_v34 = vld [vmem:[#allocation12 + $0x128] ss:$16 sps:$4 sm:$0xff]  }
 0x5c4   :  { %v4055_v16 = vmul.f32 %v8706_v42, %v11039_v7  ;;  %v11474_v7 = vld [vmem:[#allocation12 + $0x1ac] ss:$16 sps:$4 sm:$0xff]   ;;  %14973 = vst [vmem:[#allocation80_spill] sm:$0xff] %v11529_v26  ;;  %14974 = vst [vmem:[#allocation81_spill] sm:$0xff] %v11532_v34  ;;  %v11535_v42 = vld [vmem:[#allocation12 + $0x104] ss:$16 sps:$4 sm:$0xff]  }
 0x5c5   :  { %4833 = vmatpush2.bf16.msra.mxu0 %v11041_v40  ;;  %4874 = vmatpush2.bf16.msra.mxu1 %v11044_v36  ;;  %v11477_v36 = vld [vmem:[#allocation12 + $0x1a0] ss:$16 sps:$4 sm:$0xff]   ;;  %v11480_v40 = vld [vmem:[#allocation12 + $0x1a8] ss:$16 sps:$4 sm:$0xff]   ;;  %v8708_v0 = vpop.eup %8707  ;;  %14975 = vst [vmem:[#allocation82_spill] sm:$0xff] %v11535_v42 }
 0x5c6   :  { %v11462_v20 = vadd.f32 %v4056_v61, %v4055_v16  ;;  %4834 = vmatprep.subr.bf16.mxu0 %v11047_v63  ;;  %4875 = vmatprep.subr.bf16.mxu1 %v11050_v62  ;;  %v11483_v62 = vld [vmem:[#allocation12 + $0x184] ss:$16 sps:$4 sm:$0xff]   ;;  %v11486_v63 = vld [vmem:[#allocation12 + $0x18c] ss:$16 sps:$4 sm:$0xff]  }
 0x5c8   :  { %8709 = vtanh.f32 %v11462_v20 }
 0x5c9   :  { %4835 = vmatpush2.bf16.msra.mxu0 %v11054_v22  ;;  %4876 = vmatpush2.bf16.msra.mxu1 %v11057_v15  ;;  %v11489_v22 = vld [vmem:[#allocation12 + $0x180] ss:$16 sps:$4 sm:$0xff]   ;;  %v11492_v15 = vld [vmem:[#allocation12 + $0x188] ss:$16 sps:$4 sm:$0xff]  }
 0x5ca   :  { %4836 = vmatprep.subr.bf16.mxu0 %v11471_v47  ;;  %4877 = vmatprep.subr.bf16.mxu1 %v11474_v7 }
 0x5cd   :  { %4837 = vmatpush2.bf16.msra.mxu0 %v11477_v36  ;;  %4878 = vmatpush2.bf16.msra.mxu1 %v11480_v40 }
 0x5ce   :  { %4838 = vmatprep.subr.bf16.mxu0 %v11483_v62  ;;  %4879 = vmatprep.subr.bf16.mxu1 %v11486_v63 }
 0x5d1   :  { %4839 = vmatpush2.bf16.msra.mxu0 %v11489_v22  ;;  %4880 = vmatpush2.bf16.msra.mxu1 %v11492_v15 }
 0x5d2   :  { %4840 = vmatprep.subr.bf16.mxu0 %v11495_v48  ;;  %4881 = vmatprep.subr.bf16.mxu1 %v11498_v45 }
 0x5d5   :  { %v8710_v55 = vpop.eup %8709  ;;  %4841 = vmatpush2.bf16.msra.mxu0 %v11501_v29  ;;  %4882 = vmatpush2.bf16.msra.mxu1 %v11504_v25 }
 0x5d6   :  { %v4059_v54 = vmul.f32 %v8710_v55, %v8708_v0  ;;  %4842 = vmatprep.subr.bf16.mxu0 %v11507_v6  ;;  %4883 = vmatprep.subr.bf16.mxu1 %v11510_v21 }
 0x5d8   :  { %v11513_v13 = vpack.c.bf16 %v4059_v54, %v4059_v54  ;;  %v11543_v54 = vld [vmem:[#allocation12 + $0x100] ss:$16 sps:$4 sm:$0xff]  }
 0x5d9   :  { %4843 = vmatpush2.bf16.msra.mxu0 %v11515_v19  ;;  %4884 = vmatpush2.bf16.msra.mxu1 %v11518_v32  ;;  %14976 = vst [vmem:[#allocation83_spill] sm:$0xff] %v11543_v54 }
 0x5da   :  { %4848 = vmatprep.mubr.bf16.mxu0 %v11513_v13  ;;  %4889 = vmatprep.mubr.bf16.mxu1 %v11513_v13 }
 0x5db   :  { %4844 = vmatprep.subr.bf16.mxu0 %v11523_v39  ;;  %4885 = vmatprep.subr.bf16.mxu1 %v11526_v8  ;;  %v11549_v8 = vld [vmem:[#allocation13 + $0xe4] ss:$16 sps:$4 sm:$0xff]  }
 0x5dd   :  { %4845 = vmatpush2.bf16.msra.mxu0 %v11529_v26  ;;  %4886 = vmatpush2.bf16.msra.mxu1 %v11532_v34  ;;  %v11546_v34 = vld [vmem:[#allocation12 + $0x108] ss:$16 sps:$4 sm:$0xff]  }
 0x5de   :  { %4846 = vmatprep.subr.bf16.mxu0 %v11535_v42  ;;  %4887 = vmatprep.subr.bf16.mxu1 %v11538_v5  ;;  %14977 = vst [vmem:[#allocation84_spill] sm:$0xff] %v11546_v34 }
 0x5df   :  { %v4095_v35 = vpop.f32.mrf.mxu0  ;;  %v4136_v2 = vpop.f32.mrf.mxu1 }
 0x5e0   :  { %v4096_v27 = vadd.f32 %v4095_v35, %v11084_v11  ;;  %v11552_v35 = vld [vmem:[#allocation13 + $0xec] ss:$16 sps:$4 sm:$0xff]  }
 0x5e1   :  { %v4097_v16 = vpop.f32.mrf.mxu0  ;;  %v4138_v61 = vpop.f32.mrf.mxu1  ;;  %4847 = vmatpush2.bf16.msra.mxu0 %v11543_v54  ;;  %4888 = vmatpush2.bf16.msra.mxu1 %v11546_v34  ;;  %v11557_v34 = vld [vmem:[#allocation13 + $0xe0] ss:$16 sps:$4 sm:$0xff]  }
 0x5e2   :  { %v7697_v0 = vmul.f32 -1.442695, %v4096_v27  ;;  %v4098_v55 = vadd.f32 %v4097_v16, %v11089_v46  ;;  %4923 = vmatprep.subr.bf16.mxu0 %v11549_v8  ;;  %4964 = vmatprep.subr.bf16.mxu1 %v11552_v35  ;;  %14978 = vst [vmem:[#allocation85_spill] sm:$0xff] %v11557_v34 }
 0x5e3   :  { %v4099_v42 = vpop.f32.mrf.mxu0  ;;  %v4140_v26 = vpop.f32.mrf.mxu1 }
 0x5e4   :  { %8711 = vpow2.f32 %v7697_v0  ;;  %v7698_v27 = vmul.f32 -1.442695, %v4098_v55  ;;  %4849 = vmatmul.mubr.bf16.vlgmr.msra.gmra.mxu0 %v11423_v31  ;;  %4890 = vmatmul.mubr.bf16.vlgmr.msra.gmra.mxu1 %v11423_v31  ;;  %v11560_v26 = vld [vmem:[#allocation13 + $0xe8] ss:$16 sps:$4 sm:$0xff]   ;;  %v11563_v42 = vld [vmem:[#allocation13 + $0xc4] ss:$16 sps:$4 sm:$0xff]  }
 0x5e5   :  { %v4100_v16 = vpop.f32.mrf.mxu0  ;;  %v4141_v54 = vpop.f32.mrf.mxu1  ;;  %4924 = vmatpush1.bf16.msra.mxu0 %v11557_v34  ;;  %14979 = vst [vmem:[#allocation86_spill] sm:$0xff] %v11560_v26  ;;  %4965 = vmatpush1.bf16.msra.mxu1 %v11560_v26  ;;  %14980 = vst [vmem:[#allocation87_spill] sm:$0xff] %v11563_v42  ;;  %v11566_v0 = vld [vmem:[#allocation13 + $0xcc] ss:$16 sps:$4 sm:$0xff]   ;;  %v11569_v31 = vld [vmem:[#allocation13 + $0xc0] ss:$16 sps:$4 sm:$0xff]  }
 0x5e6   :  { %8713 = vpow2.f32 %v7698_v27  ;;  %4925 = vmatprep.subr.bf16.mxu0 %v11563_v42  ;;  %14981 = vst [vmem:[#allocation88_spill] sm:$0xff] %v11566_v0  ;;  %4966 = vmatprep.subr.bf16.mxu1 %v11566_v0  ;;  %14982 = vst [vmem:[#allocation89_spill] sm:$0xff] %v11569_v31  ;;  %v11572_v55 = vld [vmem:[#allocation13 + $0xc8] ss:$16 sps:$4 sm:$0xff]   ;;  %v4137_v54 = vadd.f32 %v4136_v2, %v11106_v10  ;;  %v11576_v27 = vld [vmem:[#allocation13 + $0xa4] ss:$16 sps:$4 sm:$0xff]  }
 0x5e7   :  { %14983 = vst [vmem:[#allocation90_spill] sm:$0xff] %v11572_v55  ;;  %14984 = vst [vmem:[#allocation91_spill] sm:$0xff] %v11576_v27  ;;  %v11579_v16 = vld [vmem:[#allocation13 + $0xac] ss:$16 sps:$4 sm:$0xff]   ;;  %v11582_v42 = vld [vmem:[#allocation13 + $0xa0] ss:$16 sps:$4 sm:$0xff]  }
 0x5e8   :  { %14985 = vst [vmem:[#allocation92_spill] sm:$0xff] %v11579_v16  ;;  %14986 = vst [vmem:[#allocation93_spill] sm:$0xff] %v11582_v42  ;;  %v11585_v0 = vld [vmem:[#allocation13 + $0xa8] ss:$16 sps:$4 sm:$0xff]   ;;  %v11591_v2 = vld [vmem:[#allocation13 + $0x8c] ss:$16 sps:$4 sm:$0xff]  }
 0x5e9   :  { %4926 = vmatpush1.bf16.msra.mxu0 %v11569_v31  ;;  %4967 = vmatpush1.bf16.msra.mxu1 %v11572_v55  ;;  %14987 = vst [vmem:[#allocation94_spill] sm:$0xff] %v11585_v0  ;;  %v7699_v31 = vmul.f32 -1.442695, %v4137_v54  ;;  %v11588_v55 = vld [vmem:[#allocation13 + $0x84] ss:$16 sps:$4 sm:$0xff]   ;;  %14989 = vst [vmem:[#allocation96_spill] sm:$0xff] %v11591_v2 }
 0x5ea   :  { %4927 = vmatprep.subr.bf16.mxu0 %v11576_v27  ;;  %4968 = vmatprep.subr.bf16.mxu1 %v11579_v16  ;;  %14988 = vst [vmem:[#allocation95_spill] sm:$0xff] %v11588_v55  ;;  %v4139_v16 = vadd.f32 %v4138_v61, %v11116_v9  ;;  %v11595_v26 = vld [vmem:[#allocation13 + $0x80] ss:$16 sps:$4 sm:$0xff]  }
 0x5eb   :  { %14990 = vst [vmem:[#allocation97_spill] sm:$0xff] %v11595_v26  ;;  %8715 = vpow2.f32 %v7699_v31  ;;  %v11613_v31 = vld [vmem:[#allocation13 + $0x44] ss:$16 sps:$4 sm:$0xff]  }
 0x5ec   :  { %14996 = vst [vmem:[#allocation103_spill] sm:$0xff] %v11613_v31 }
 0x5ed   :  { %4928 = vmatpush1.bf16.msra.mxu0 %v11582_v42  ;;  %4969 = vmatpush1.bf16.msra.mxu1 %v11585_v0  ;;  %v11598_v42 = vld [vmem:[#allocation13 + $0x88] ss:$16 sps:$4 sm:$0xff]   ;;  %v11601_v0 = vld [vmem:[#allocation13 + $0x64] ss:$16 sps:$4 sm:$0xff]  }
 0x5ee   :  { %4929 = vmatprep.subr.bf16.mxu0 %v11588_v55  ;;  %4970 = vmatprep.subr.bf16.mxu1 %v11591_v2  ;;  %14991 = vst [vmem:[#allocation98_spill] sm:$0xff] %v11598_v42  ;;  %14992 = vst [vmem:[#allocation99_spill] sm:$0xff] %v11601_v0  ;;  %v11604_v55 = vld [vmem:[#allocation13 + $0x6c] ss:$16 sps:$4 sm:$0xff]  }
 0x5ef   :  { %14993 = vst [vmem:[#allocation100_spill] sm:$0xff] %v11604_v55 }
 0x5f1   :  { %v8712_v27 = vpop.eup %8711  ;;  %4930 = vmatpush1.bf16.msra.mxu0 %v11595_v26  ;;  %4971 = vmatpush1.bf16.msra.mxu1 %v11598_v42  ;;  %v11610_v26 = vld [vmem:[#allocation13 + $0x68] ss:$16 sps:$4 sm:$0xff]   ;;  %v11649_v42 = vld [vmem:[#allocation13 + $0x1e4] ss:$16 sps:$4 sm:$0xff]  }
 0x5f2   :  { %v4152_v10 = vadd.f32 1.0, %v8712_v27  ;;  %4931 = vmatprep.subr.bf16.mxu0 %v11601_v0  ;;  %4972 = vmatprep.subr.bf16.mxu1 %v11604_v55  ;;  %v11607_v27 = vld [vmem:[#allocation13 + $0x60] ss:$16 sps:$4 sm:$0xff]   ;;  %14995 = vst [vmem:[#allocation102_spill] sm:$0xff] %v11610_v26  ;;  %v11616_v0 = vld [vmem:[#allocation13 + $0x4c] ss:$16 sps:$4 sm:$0xff]  }
 0x5f3   :  { %v8714_v54 = vpop.eup %8713  ;;  %14994 = vst [vmem:[#allocation101_spill] sm:$0xff] %v11607_v27  ;;  %14997 = vst [vmem:[#allocation104_spill] sm:$0xff] %v11616_v0 }
 0x5f4   :  { %8717 = vrcp.f32 %v4152_v10  ;;  %v4153_v61 = vadd.f32 1.0, %v8714_v54  ;;  %v11619_v10 = vld [vmem:[#allocation13 + $0x40] ss:$16 sps:$4 sm:$0xff]   ;;  %v11625_v54 = vld [vmem:[#allocation13 + $0x24] ss:$16 sps:$4 sm:$0xff]   ;;  %15008 = vst [vmem:[#allocation115_spill] sm:$0xff] %v11649_v42 }
 0x5f5   :  { %8719 = vtanh.f32 %v4139_v16  ;;  %4932 = vmatpush1.bf16.msra.mxu0 %v11607_v27  ;;  %4973 = vmatpush1.bf16.msra.mxu1 %v11610_v26  ;;  %14998 = vst [vmem:[#allocation105_spill] sm:$0xff] %v11619_v10  ;;  %v11622_v16 = vld [vmem:[#allocation13 + $0x48] ss:$16 sps:$4 sm:$0xff]   ;;  %15000 = vst [vmem:[#allocation107_spill] sm:$0xff] %v11625_v54 }
 0x5f6   :  { %8721 = vrcp.f32 %v4153_v61  ;;  %4933 = vmatprep.subr.bf16.mxu0 %v11613_v31  ;;  %4974 = vmatprep.subr.bf16.mxu1 %v11616_v0  ;;  %14999 = vst [vmem:[#allocation106_spill] sm:$0xff] %v11622_v16  ;;  %v11628_v61 = vld [vmem:[#allocation13 + $0x2c] ss:$16 sps:$4 sm:$0xff]   ;;  %v11631_v31 = vld [vmem:[#allocation13 + $0x20] ss:$16 sps:$4 sm:$0xff]  }
 0x5f7   :  { %15001 = vst [vmem:[#allocation108_spill] sm:$0xff] %v11628_v61  ;;  %15002 = vst [vmem:[#allocation109_spill] sm:$0xff] %v11631_v31  ;;  %v11634_v0 = vld [vmem:[#allocation13 + $0x28] ss:$16 sps:$4 sm:$0xff]  }
 0x5f8   :  { %15003 = vst [vmem:[#allocation110_spill] sm:$0xff] %v11634_v0 }
 0x5f9   :  { %4934 = vmatpush1.bf16.msra.mxu0 %v11619_v10  ;;  %4975 = vmatpush1.bf16.msra.mxu1 %v11622_v16  ;;  %v11637_v10 = vld [vmem:[#allocation13 + $0x4] ss:$16 sps:$4 sm:$0xff]   ;;  %v11640_v16 = vld [vmem:[#allocation13 + $0xc] ss:$16 sps:$4 sm:$0xff]  }
 0x5fa   :  { %4935 = vmatprep.subr.bf16.mxu0 %v11625_v54  ;;  %4976 = vmatprep.subr.bf16.mxu1 %v11628_v61  ;;  %15004 = vst [vmem:[#allocation111_spill] sm:$0xff] %v11637_v10  ;;  %15005 = vst [vmem:[#allocation112_spill] sm:$0xff] %v11640_v16  ;;  %v8716_v54 = vpop.eup %8715  ;;  %v11643_v61 = vld [vmem:[#allocation13] ss:$16 sps:$4 sm:$0xff]  }
 0x5fb   :  { %15006 = vst [vmem:[#allocation113_spill] sm:$0xff] %v11643_v61  ;;  %v4154_v55 = vadd.f32 1.0, %v8716_v54  ;;  %v11664_v54 = vld [vmem:[#allocation13 + $0x1c4] ss:$16 sps:$4 sm:$0xff]  }
 0x5fc   :  { %15013 = vst [vmem:[#allocation120_spill] sm:$0xff] %v11664_v54 }
 0x5fd   :  { %4936 = vmatpush1.bf16.msra.mxu0 %v11631_v31  ;;  %4977 = vmatpush1.bf16.msra.mxu1 %v11634_v0  ;;  %v11646_v31 = vld [vmem:[#allocation13 + $0x8] ss:$16 sps:$4 sm:$0xff]   ;;  %8723 = vrcp.f32 %v4154_v55  ;;  %v11683_v55 = vld [vmem:[#allocation13 + $0x1a0] ss:$16 sps:$4 sm:$0xff]  }
 0x5fe   :  { %4937 = vmatprep.subr.bf16.mxu0 %v11637_v10  ;;  %4978 = vmatprep.subr.bf16.mxu1 %v11640_v16  ;;  %15007 = vst [vmem:[#allocation114_spill] sm:$0xff] %v11646_v31  ;;  %v11652_v10 = vld [vmem:[#allocation13 + $0x1ec] ss:$16 sps:$4 sm:$0xff]   ;;  %15019 = vst [vmem:[#allocation126_spill] sm:$0xff] %v11683_v55 }
 0x5ff   :  { %15009 = vst [vmem:[#allocation116_spill] sm:$0xff] %v11652_v10 }
 0x601   :  { %v8718_v26 = vpop.eup %8717  ;;  %4938 = vmatpush1.bf16.msra.mxu0 %v11643_v61  ;;  %4979 = vmatpush1.bf16.msra.mxu1 %v11646_v31  ;;  %v11658_v61 = vld [vmem:[#allocation13 + $0x1e0] ss:$16 sps:$4 sm:$0xff]   ;;  %v11661_v31 = vld [vmem:[#allocation13 + $0x1e8] ss:$16 sps:$4 sm:$0xff]  }
 0x602   :  { %v8720_v27 = vpop.eup %8719  ;;  %4939 = vmatprep.subr.bf16.mxu0 %v11649_v42  ;;  %4980 = vmatprep.subr.bf16.mxu1 %v11652_v10  ;;  %15011 = vst [vmem:[#allocation118_spill] sm:$0xff] %v11658_v61  ;;  %15012 = vst [vmem:[#allocation119_spill] sm:$0xff] %v11661_v31  ;;  %v11667_v42 = vld [vmem:[#allocation13 + $0x1cc] ss:$16 sps:$4 sm:$0xff]   ;;  %v11758_v10 = vld [vmem:[#allocation13 + $0x100] ss:$16 sps:$4 sm:$0xff]  }
 0x603   :  { %v8722_v0 = vpop.eup %8721  ;;  %v4163_v9 = vmul.f32 %v8720_v27, %v8718_v26  ;;  %15014 = vst [vmem:[#allocation121_spill] sm:$0xff] %v11667_v42  ;;  %v11677_v26 = vld [vmem:[#allocation13 + $0x1a4] ss:$16 sps:$4 sm:$0xff]   ;;  %v11686_v27 = vld [vmem:[#allocation13 + $0x1a8] ss:$16 sps:$4 sm:$0xff]  }
 0x604   :  { %v4162_v16 = vmul.f32 %v8722_v0, %v11143_v49  ;;  %v11674_v49 = vld [vmem:[#allocation13 + $0x1c8] ss:$16 sps:$4 sm:$0xff]   ;;  %15017 = vst [vmem:[#allocation124_spill] sm:$0xff] %v11677_v26  ;;  %v11680_v0 = vld [vmem:[#allocation13 + $0x1ac] ss:$16 sps:$4 sm:$0xff]   ;;  %15020 = vst [vmem:[#allocation127_spill] sm:$0xff] %v11686_v27 }
 0x605   :  { %4940 = vmatpush2.bf16.msra.mxu0 %v11658_v61  ;;  %4981 = vmatpush2.bf16.msra.mxu1 %v11661_v31  ;;  %15016 = vst [vmem:[#allocation123_spill] sm:$0xff] %v11674_v49  ;;  %15018 = vst [vmem:[#allocation125_spill] sm:$0xff] %v11680_v0  ;;  %v11750_v31 = vld [vmem:[#allocation13 + $0x104] ss:$16 sps:$4 sm:$0xff]  }
 0x606   :  { %v11656_v2 = vadd.f32 %v4163_v9, %v4162_v16  ;;  %4941 = vmatprep.subr.bf16.mxu0 %v11664_v54  ;;  %4982 = vmatprep.subr.bf16.mxu1 %v11667_v42  ;;  %v11671_v9 = vld [vmem:[#allocation13 + $0x1c0] ss:$16 sps:$4 sm:$0xff]   ;;  %v11689_v16 = vld [vmem:[#allocation13 + $0x184] ss:$16 sps:$4 sm:$0xff]   ;;  %v4232_v54 = vld [vmem:[%s14022_s9] sm:$0xf] }
 0x607   :  { %15015 = vst [vmem:[#allocation122_spill] sm:$0xff] %v11671_v9  ;;  %15021 = vst [vmem:[#allocation128_spill] sm:$0xff] %v11689_v16  ;;  %v11707_v42 = vld [vmem:[#allocation13 + $0x160] ss:$16 sps:$4 sm:$0xff]   ;;  %s9968_s9 = smov [#allocation19]  }
 0x608   :  { %15010 = vst [vmem:[#allocation117_spill] sm:$0xff] %v11656_v2  ;;  %8725 = vtanh.f32 %v11656_v2  ;;  %15027 = vst [vmem:[#allocation134_spill] sm:$0xff] %v11707_v42  ;;  %s7252_s6 = sshll.u32 %s9968_s9, 4  ;;  %s7253_s6 = int_to_ptr.vmem [resolvable:$true] %s7252_s6 }
 0x609   :  { %4942 = vmatpush2.bf16.msra.mxu0 %v11671_v9  ;;  %4983 = vmatpush2.bf16.msra.mxu1 %v11674_v49  ;;  %v11692_v49 = vld [vmem:[#allocation13 + $0x18c] ss:$16 sps:$4 sm:$0xff]   ;;  %15039 = vst [vmem:[#allocation149_spill] sm:$0xff] %v11750_v31  ;;  %s9919_s30 = scalar_lea.vmem %s7253_s6, 16  ;;  %s9923_s13 = scalar_lea.vmem %s7253_s6, 32 }
 0x60a   :  { %4943 = vmatprep.subr.bf16.mxu0 %v11677_v26  ;;  %4984 = vmatprep.subr.bf16.mxu1 %v11680_v0  ;;  %15022 = vst [vmem:[#allocation129_spill] sm:$0xff] %v11692_v49  ;;  %v11695_v26 = vld [vmem:[#allocation13 + $0x180] ss:$16 sps:$4 sm:$0xff]   ;;  %v11698_v0 = vld [vmem:[#allocation13 + $0x188] ss:$16 sps:$4 sm:$0xff]   ;;  %p9920_p3 = scmp.ne.s32.totalorder %s7253_s6, %s9919_s30  ;;  %p9924_p4 = scmp.lt.s32.totalorder %s7253_s6, %s7253_s6 }
 0x60b   :  { %15023 = vst [vmem:[#allocation130_spill] sm:$0xff] %v11695_v26  ;;  %15024 = vst [vmem:[#allocation131_spill] sm:$0xff] %v11698_v0  ;;  %p9925_p5 = scmp.lt.s32.totalorder %s9923_s13, %s9919_s30 }
 0x60d   :  { %4944 = vmatpush2.bf16.msra.mxu0 %v11683_v55  ;;  %4985 = vmatpush2.bf16.msra.mxu1 %v11686_v27  ;;  %v11701_v55 = vld [vmem:[#allocation13 + $0x164] ss:$16 sps:$4 sm:$0xff]   ;;  %v11704_v27 = vld [vmem:[#allocation13 + $0x16c] ss:$16 sps:$4 sm:$0xff]   ;;  %p9926_p6 = por %p9925_p5, %p9924_p4 }
 0x60e   :  { %4945 = vmatprep.subr.bf16.mxu0 %v11689_v16  ;;  %4986 = vmatprep.subr.bf16.mxu1 %v11692_v49  ;;  %15025 = vst [vmem:[#allocation132_spill] sm:$0xff] %v11701_v55  ;;  %15026 = vst [vmem:[#allocation133_spill] sm:$0xff] %v11704_v27  ;;  %v8724_v16 = vpop.eup %8723  ;;  %v11710_v49 = vld [vmem:[#allocation13 + $0x168] ss:$16 sps:$4 sm:$0xff]  }
 0x60f   :  { %15028 = vst [vmem:[#allocation135_spill] sm:$0xff] %v11710_v49  ;;  %p9927_p7 = pnand %p9926_p6, %p9920_p3 }
 0x611   :  { %4946 = vmatpush2.bf16.msra.mxu0 %v11695_v26  ;;  %4987 = vmatpush2.bf16.msra.mxu1 %v11698_v0  ;;  %v11713_v0 = vld [vmem:[#allocation13 + $0x144] ss:$16 sps:$4 sm:$0xff]  }
 0x612   :  { %4947 = vmatprep.subr.bf16.mxu0 %v11701_v55  ;;  %4988 = vmatprep.subr.bf16.mxu1 %v11704_v27  ;;  %15029 = vst [vmem:[#allocation136_spill] sm:$0xff] %v11713_v0  ;;  %v11716_v55 = vld [vmem:[#allocation13 + $0x14c] ss:$16 sps:$4 sm:$0xff]  }
 0x613   :  { %15030 = vst [vmem:[#allocation137_spill] sm:$0xff] %v11716_v55 }
 0x615   :  { %v8726_v9 = vpop.eup %8725  ;;  %4948 = vmatpush2.bf16.msra.mxu0 %v11707_v42  ;;  %4989 = vmatpush2.bf16.msra.mxu1 %v11710_v49  ;;  %v11724_v42 = vld [vmem:[#allocation13 + $0x140] ss:$16 sps:$4 sm:$0xff]   ;;  %v11727_v49 = vld [vmem:[#allocation13 + $0x148] ss:$16 sps:$4 sm:$0xff]  }
 0x616   :  { %v4166_v26 = vmul.f32 %v8726_v9, %v8724_v16  ;;  %4949 = vmatprep.subr.bf16.mxu0 %v11713_v0  ;;  %4990 = vmatprep.subr.bf16.mxu1 %v11716_v55  ;;  %15031 = vst [vmem:[#allocation138_spill] sm:$0xff] %v11724_v42  ;;  %15032 = vst [vmem:[#allocation139_spill] sm:$0xff] %v11727_v49  ;;  %v11733_v9 = vrot.slane %v4232_v54, %v10252_v12  ;;  %v11738_v16 = vld [vmem:[#allocation13 + $0x12c] ss:$16 sps:$4 sm:$0xff]   ;;  %v11744_v55 = vld [vmem:[#allocation13 + $0x120] ss:$16 sps:$4 sm:$0xff]  }
 0x617   :  { %15035 = vst [vmem:[#allocation142_spill] sm:$0xff] %v11738_v16  ;;  %15037 = vst [vmem:[#allocation147_spill] sm:$0xff] %v11744_v55 }
 0x618   :  { %v11719_v27 = vpack.c.bf16 %v4166_v26, %v4166_v26  ;;  %15033 = vst [vmem:[#allocation140_spill] sm:$0xff] %v11733_v9  ;;  %v11735_v26 = vld [vmem:[#allocation13 + $0x124] ss:$16 sps:$4 sm:$0xff]  }
 0x619   :  { %4950 = vmatpush2.bf16.msra.mxu0 %v11724_v42  ;;  %4991 = vmatpush2.bf16.msra.mxu1 %v11727_v49  ;;  %15034 = vst [vmem:[#allocation141_spill] sm:$0xff] %v11735_v26  ;;  %v11742_v42 = vrot.slane %v4232_v54, %v10255_v14  ;;  %v11747_v49 = vld [vmem:[#allocation13 + $0x128] ss:$16 sps:$4 sm:$0xff]  }
 0x61a   :  { %4955 = vmatprep.mubr.bf16.mxu0 %v11719_v27  ;;  %4996 = vmatprep.mubr.bf16.mxu1 %v11719_v27  ;;  %15038 = vst [vmem:[#allocation148_spill] sm:$0xff] %v11747_v49 }
 0x61b   :  { %4951 = vmatprep.subr.bf16.mxu0 %v11735_v26  ;;  %4992 = vmatprep.subr.bf16.mxu1 %v11738_v16  ;;  %15036 = vst [vmem:[#allocation146_spill] sm:$0xff] %v11742_v42  ;;  %v11753_v26 = vld [vmem:[#allocation13 + $0x10c] ss:$16 sps:$4 sm:$0xff]  }
 0x61d   :  { %4952 = vmatpush2.bf16.msra.mxu0 %v11744_v55  ;;  %4993 = vmatpush2.bf16.msra.mxu1 %v11747_v49  ;;  %v11761_v49 = vld [vmem:[#allocation13 + $0x108] ss:$16 sps:$4 sm:$0xff]  }
 0x61e   :  { %4953 = vmatprep.subr.bf16.mxu0 %v11750_v31  ;;  %4994 = vmatprep.subr.bf16.mxu1 %v11753_v26 }
 0x61f   :  { %v4608_v12 = vpop.f32.mrf.mxu0  ;;  %v4649_v0 = vpop.f32.mrf.mxu1 }
 0x620   :  { %v4609_v14 = vadd.f32 %v4608_v12, %v11733_v9 }
 0x621   :  { %v4610_v16 = vpop.f32.mrf.mxu0  ;;  %v4651_v61 = vpop.f32.mrf.mxu1  ;;  %4954 = vmatpush2.bf16.msra.mxu0 %v11758_v10  ;;  %4995 = vmatpush2.bf16.msra.mxu1 %v11761_v49 }
 0x622   :  { %v7764_v2 = vmul.f32 -1.442695, %v4609_v14  ;;  %v4611_v55 = vadd.f32 %v4610_v16, %v11742_v42  ;;  %5030 = vmatprep.subr.bf16.mxu0 %v11178_v53  ;;  %5071 = vmatprep.subr.bf16.mxu1 %v11180_v51  ;;  %v11781_v51 = vrot.slane %v4232_v54, %v14810_v41  ;;  %v15042_v41 = vld [vmem:[#allocation28_spill] sm:$0xff] }
 0x623   :  { %v4612_v31 = vpop.f32.mrf.mxu0  ;;  %v4653_v34 = vpop.f32.mrf.mxu1 }
 0x624   :  { %8727 = vpow2.f32 %v7764_v2  ;;  %v7765_v12 = vmul.f32 -1.442695, %v4611_v55  ;;  %4956 = vmatmul.mubr.bf16.vlgmr.msra.gmra.mxu0 %v11513_v13  ;;  %4997 = vmatmul.mubr.bf16.vlgmr.msra.gmra.mxu1 %v11513_v13  ;;  %v11771_v31 = vrot.slane %v4232_v54, %v10280_v17  ;;  %15041 = vst [vmem:[#allocation151_spill] sm:$0xff] %v11781_v51  ;;  %v15053_v13 = vld [vmem:[#allocation39_spill] sm:$0xff]  ;;  %v15054_v34 = vld [vmem:[#allocation40_spill] sm:$0xff]  ;;  %v15056_v55 = vld [vmem:[#allocation42_spill] sm:$0xff] }
 0x625   :  { %v4613_v16 = vpop.f32.mrf.mxu0  ;;  %v4654_v14 = vpop.f32.mrf.mxu1  ;;  %5031 = vmatpush1.bf16.msra.mxu0 %v11184_v56  ;;  %5072 = vmatpush1.bf16.msra.mxu1 %v11186_v57  ;;  %v4652_v57 = vadd.f32 %v4651_v61, %v11781_v51 }
 0x626   :  { %8729 = vpow2.f32 %v7765_v12  ;;  %15040 = vst [vmem:[#allocation150_spill] sm:$0xff] %v11771_v31  ;;  %5032 = vmatprep.subr.bf16.mxu0 %v11190_v58  ;;  %5073 = vmatprep.subr.bf16.mxu1 %v11192_v59  ;;  %v4650_v53 = vadd.f32 %v4649_v0, %v11771_v31  ;;  %v15055_v0 = vld [vmem:[#allocation41_spill] sm:$0xff]  ;;  %v15057_v14 = vld [vmem:[#allocation43_spill] sm:$0xff] }
 0x628   :  { %v7766_v17 = vmul.f32 -1.442695, %v4650_v53  ;;  %v15058_v53 = vld [vmem:[#allocation44_spill] sm:$0xff] }
 0x629   :  { %5033 = vmatpush1.bf16.msra.mxu0 %v11198_v60  ;;  %5074 = vmatpush1.bf16.msra.mxu1 %v11200_v33  ;;  %v15043_v33 = vld [vmem:[#allocation29_spill] sm:$0xff] }
 0x62a   :  { %5034 = vmatprep.subr.bf16.mxu0 %v11204_v30  ;;  %5075 = vmatprep.subr.bf16.mxu1 %v11206_v44  ;;  %8731 = vpow2.f32 %v7766_v17  ;;  %v15044_v30 = vld [vmem:[#allocation30_spill] sm:$0xff]  ;;  %v15045_v44 = vld [vmem:[#allocation31_spill] sm:$0xff] }
 0x62d   :  { %5035 = vmatpush1.bf16.msra.mxu0 %v11212_v43  ;;  %5076 = vmatpush1.bf16.msra.mxu1 %v11214_v1  ;;  %v15046_v43 = vld [vmem:[#allocation32_spill] sm:$0xff]  ;;  %v15047_v1 = vld [vmem:[#allocation33_spill] sm:$0xff] }
 0x62e   :  { %5036 = vmatprep.subr.bf16.mxu0 %v11218_v18  ;;  %5077 = vmatprep.subr.bf16.mxu1 %v11220_v37  ;;  %v15048_v18 = vld [vmem:[#allocation34_spill] sm:$0xff]  ;;  %v15049_v37 = vld [vmem:[#allocation35_spill] sm:$0xff] }
 0x631   :  { %v8728_v56 = vpop.eup %8727  ;;  %5037 = vmatpush1.bf16.msra.mxu0 %v11224_v38  ;;  %5078 = vmatpush1.bf16.msra.mxu1 %v11226_v50  ;;  %v15050_v38 = vld [vmem:[#allocation36_spill] sm:$0xff]  ;;  %v15051_v50 = vld [vmem:[#allocation37_spill] sm:$0xff] }
 0x632   :  { %v4665_v58 = vadd.f32 1.0, %v8728_v56  ;;  %5038 = vmatprep.subr.bf16.mxu0 %v11230_v23  ;;  %5079 = vmatprep.subr.bf16.mxu1 %v15042_v41  ;;  %v15052_v23 = vld [vmem:[#allocation38_spill] sm:$0xff]  ;;  %v15061_v41 = vld [vmem:[#allocation47_spill] sm:$0xff] }
 0x633   :  { %v8730_v59 = vpop.eup %8729 }
 0x634   :  { %8733 = vrcp.f32 %v4665_v58  ;;  %v4666_v60 = vadd.f32 1.0, %v8730_v59  ;;  %v15059_v58 = vld [vmem:[#allocation45_spill] sm:$0xff]  ;;  %v15060_v59 = vld [vmem:[#allocation46_spill] sm:$0xff] }
 0x635   :  { %8735 = vtanh.f32 %v4652_v57  ;;  %5039 = vmatpush1.bf16.msra.mxu0 %v15043_v33  ;;  %5080 = vmatpush1.bf16.msra.mxu1 %v15044_v30  ;;  %v15063_v33 = vld [vmem:[#allocation49_spill] sm:$0xff]  ;;  %v15064_v30 = vld [vmem:[#allocation50_spill] sm:$0xff] }
 0x636   :  { %8737 = vrcp.f32 %v4666_v60  ;;  %5040 = vmatprep.subr.bf16.mxu0 %v15045_v44  ;;  %5081 = vmatprep.subr.bf16.mxu1 %v15046_v43  ;;  %v15062_v60 = vld [vmem:[#allocation48_spill] sm:$0xff]  ;;  %v15065_v44 = vld [vmem:[#allocation51_spill] sm:$0xff] }
 0x637   :  { %v8732_v2 = vpop.eup %8731  ;;  %v15066_v43 = vld [vmem:[#allocation52_spill] sm:$0xff] }
 0x638   :  { %v4667_v16 = vadd.f32 1.0, %v8732_v2 }
 0x639   :  { %5041 = vmatpush1.bf16.msra.mxu0 %v15047_v1  ;;  %5082 = vmatpush1.bf16.msra.mxu1 %v15048_v18  ;;  %v15067_v1 = vld [vmem:[#allocation53_spill] sm:$0xff]  ;;  %v15068_v18 = vld [vmem:[#allocation54_spill] sm:$0xff] }
 0x63a   :  { %5042 = vmatprep.subr.bf16.mxu0 %v15049_v37  ;;  %5083 = vmatprep.subr.bf16.mxu1 %v15050_v38  ;;  %8739 = vrcp.f32 %v4667_v16  ;;  %v15069_v37 = vld [vmem:[#allocation55_spill] sm:$0xff]  ;;  %v15070_v38 = vld [vmem:[#allocation56_spill] sm:$0xff] }
 0x63b   :  { %v15078_v16 = vld [vmem:[#allocation64_spill] sm:$0xff] }
 0x63d   :  { %5043 = vmatpush1.bf16.msra.mxu0 %v15051_v50  ;;  %5084 = vmatpush1.bf16.msra.mxu1 %v15052_v23  ;;  %v15071_v50 = vld [vmem:[#allocation57_spill] sm:$0xff]  ;;  %v15072_v23 = vld [vmem:[#allocation58_spill] sm:$0xff] }
 0x63e   :  { %5044 = vmatprep.subr.bf16.mxu0 %v15053_v13  ;;  %5085 = vmatprep.subr.bf16.mxu1 %v15054_v34  ;;  %v15073_v13 = vld [vmem:[#allocation59_spill] sm:$0xff]  ;;  %v15074_v34 = vld [vmem:[#allocation60_spill] sm:$0xff] }
 0x641   :  { %v8734_v61 = vpop.eup %8733  ;;  %5045 = vmatpush1.bf16.msra.mxu0 %v15055_v0  ;;  %5086 = vmatpush1.bf16.msra.mxu1 %v15056_v55  ;;  %v15076_v0 = vld [vmem:[#allocation62_spill] sm:$0xff] }
 0x642   :  { %v8736_v54 = vpop.eup %8735  ;;  %5046 = vmatprep.subr.bf16.mxu0 %v15057_v14  ;;  %5087 = vmatprep.subr.bf16.mxu1 %v15058_v53  ;;  %v15079_v53 = vld [vmem:[#allocation65_spill] sm:$0xff] }
 0x643   :  { %v8738_v12 = vpop.eup %8737  ;;  %v4676_v56 = vmul.f32 %v8736_v54, %v8734_v61  ;;  %v15075_v54 = vld [vmem:[#allocation61_spill] sm:$0xff] }
 0x644   :  { %v4675_v17 = vmul.f32 0.0, %v8738_v12  ;;  %v15077_v12 = vld [vmem:[#allocation63_spill] sm:$0xff] }
 0x645   :  { %5047 = vmatpush2.bf16.msra.mxu0 %v15059_v58  ;;  %5088 = vmatpush2.bf16.msra.mxu1 %v15060_v59  ;;  %v15082_v58 = vld [vmem:[#allocation72_spill] sm:$0xff]  ;;  %v15083_v59 = vld [vmem:[#allocation73_spill] sm:$0xff] }
 0x646   :  { %v11808_v57 = vadd.f32 %v4676_v56, %v4675_v17  ;;  %5048 = vmatprep.subr.bf16.mxu0 %v15061_v41  ;;  %5089 = vmatprep.subr.bf16.mxu1 %v15062_v60  ;;  %v15080_v17 = vld [vmem:[#allocation66_spill] sm:$0xff]  ;;  %v15081_v56 = vld [vmem:[#allocation67_spill] sm:$0xff] }
 0x647   :  { %v8740_v2 = vpop.eup %8739  ;;  %v15084_v41 = vld [vmem:[#allocation74_spill] sm:$0xff]  ;;  %v15085_v60 = vld [vmem:[#allocation75_spill] sm:$0xff] }
 0x648   :  { %8741 = vtanh.f32 %v11808_v57 }
 0x649   :  { %5049 = vmatpush2.bf16.msra.mxu0 %v15063_v33  ;;  %5090 = vmatpush2.bf16.msra.mxu1 %v15064_v30  ;;  %v15086_v33 = vld [vmem:[#allocation76_spill] sm:$0xff]  ;;  %v15087_v30 = vld [vmem:[#allocation77_spill] sm:$0xff] }
 0x64a   :  { %5050 = vmatprep.subr.bf16.mxu0 %v15065_v44  ;;  %5091 = vmatprep.subr.bf16.mxu1 %v15066_v43  ;;  %v15088_v44 = vld [vmem:[#allocation78_spill] sm:$0xff]  ;;  %v11841_v43 = vld [vmem:[#allocation9 + $0xe4] ss:$16 sps:$4 sm:$0xff]  }
 0x64d   :  { %5051 = vmatpush2.bf16.msra.mxu0 %v15067_v1  ;;  %5092 = vmatpush2.bf16.msra.mxu1 %v15068_v18  ;;  %v11844_v1 = vld [vmem:[#allocation9 + $0xec] ss:$16 sps:$4 sm:$0xff]  }
 0x64e   :  { %5052 = vmatprep.subr.bf16.mxu0 %v15069_v37  ;;  %5093 = vmatprep.subr.bf16.mxu1 %v15070_v38  ;;  %v11849_v38 = vld [vmem:[#allocation9 + $0xe0] ss:$16 sps:$4 sm:$0xff]  }
 0x651   :  { %5053 = vmatpush2.bf16.msra.mxu0 %v15071_v50  ;;  %5094 = vmatpush2.bf16.msra.mxu1 %v15072_v23  ;;  %v11852_v50 = vld [vmem:[#allocation9 + $0xe8] ss:$16 sps:$4 sm:$0xff]  }
 0x652   :  { %5054 = vmatprep.subr.bf16.mxu0 %v15073_v13  ;;  %5095 = vmatprep.subr.bf16.mxu1 %v15074_v34  ;;  %v11855_v34 = vld [vmem:[#allocation9 + $0xc4] ss:$16 sps:$4 sm:$0xff]  }
 0x655   :  { %v8742_v61 = vpop.eup %8741  ;;  %5055 = vmatpush2.bf16.msra.mxu0 %v15075_v54  ;;  %5096 = vmatpush2.bf16.msra.mxu1 %v15076_v0  ;;  %v15089_v54 = vmov 0  }
 0x656   :  { %v4679_v55 = vmul.f32 %v8742_v61, %v8740_v2  ;;  %5056 = vmatprep.subr.bf16.mxu0 %v15077_v12  ;;  %5097 = vmatprep.subr.bf16.mxu1 %v15078_v16  ;;  %v11858_v2 = vld [vmem:[#allocation9 + $0xcc] ss:$16 sps:$4 sm:$0xff]   ;;  %v15090_v12 = vld [vmem:[#allocation27_spill] sm:$0xff] }
 0x658   :  { %v4680_v14 = vpack.c.bf16 %v4679_v55, %v4679_v55 }
 0x659   :  { %5057 = vmatpush2.bf16.msra.mxu0 %v15079_v53  ;;  %5098 = vmatpush2.bf16.msra.mxu1 %v15080_v17  ;;  %v11865_v53 = vld [vmem:[#allocation9 + $0xc0] ss:$16 sps:$4 sm:$0xff]   ;;  %v11868_v17 = vld [vmem:[#allocation9 + $0xc8] ss:$16 sps:$4 sm:$0xff]  }
 0x65a   :  { %5062 = vmatprep.mubr.bf16.mxu0 %v4680_v14  ;;  %5103 = vmatprep.mubr.bf16.mxu1 %v4680_v14 }
 0x65b   :  { %5058 = vmatprep.subr.bf16.mxu0 %v15081_v56  ;;  %5099 = vmatprep.subr.bf16.mxu1 %v15082_v58 }
 0x65d   :  { %5059 = vmatpush2.bf16.msra.mxu0 %v15083_v59  ;;  %5100 = vmatpush2.bf16.msra.mxu1 %v15084_v41  ;;  %v11871_v59 = vld [vmem:[#allocation9 + $0xa4] ss:$16 sps:$4 sm:$0xff]   ;;  %v11874_v41 = vld [vmem:[#allocation9 + $0xac] ss:$16 sps:$4 sm:$0xff]  }
 0x65e   :  { %5060 = vmatprep.subr.bf16.mxu0 %v15085_v60  ;;  %5101 = vmatprep.subr.bf16.mxu1 %v15086_v33  ;;  %15091 = vst [vmem:[#allocation28_spill] sm:$0xff] %v11871_v59  ;;  %15092 = vst [vmem:[#allocation29_spill] sm:$0xff] %v11874_v41 }
 0x661   :  { %5061 = vmatpush2.bf16.msra.mxu0 %v15087_v30  ;;  %5102 = vmatpush2.bf16.msra.mxu1 %v15088_v44  ;;  %v11878_v30 = vld [vmem:[#allocation9 + $0xa0] ss:$16 sps:$4 sm:$0xff]   ;;  %v11881_v44 = vld [vmem:[#allocation9 + $0xa8] ss:$16 sps:$4 sm:$0xff]  }
 0x662   :  { %5139 = vmatprep.subr.bf16.mxu0 %v11841_v43  ;;  %5180 = vmatprep.subr.bf16.mxu1 %v11844_v1  ;;  %15093 = vst [vmem:[#allocation30_spill] sm:$0xff] %v11878_v30  ;;  %15094 = vst [vmem:[#allocation31_spill] sm:$0xff] %v11881_v44 }
 0x664   :  { %5063 = vmatmul.mubr.bf16.vlgmr.msra.gmra.mxu0 %v11719_v27  ;;  %5104 = vmatmul.mubr.bf16.vlgmr.msra.gmra.mxu1 %v11719_v27  ;;  %v4717_v18 = vpop.f32.mrf.mxu0  ;;  %v4758_v37 = vpop.f32.mrf.mxu1 }
 0x665   :  { %5140 = vmatpush1.bf16.msra.mxu0 %v11849_v38  ;;  %5181 = vmatpush1.bf16.msra.mxu1 %v11852_v50 }
 0x666   :  { %v4719_v23 = vpop.f32.mrf.mxu0  ;;  %v4760_v13 = vpop.f32.mrf.mxu1  ;;  %5141 = vmatprep.subr.bf16.mxu0 %v11855_v34  ;;  %5182 = vmatprep.subr.bf16.mxu1 %v11858_v2 }
 0x667   :  { %v4769_v27 = vcombine.low %v4717_v18, %v4719_v23  ;;  %v4770_v61 = vcombine.low %v4758_v37, %v4760_v13  ;;  %5171 = vmatprep.mubr.bf16.mxu0 %v15089_v54  ;;  %5212 = vmatprep.mubr.bf16.mxu1 %v15089_v54  ;;  %v4682_v18 = vld [vmem:[#allocation3 + $0x4] ss:$8 sm:$0xf] }
 0x668   :  { %v4721_v0 = vpop.f32.mrf.mxu0  ;;  %v4762_v55 = vpop.f32.mrf.mxu1  ;;  %v11884_v37 = vld [vmem:[#allocation9 + $0x84] ss:$16 sps:$4 sm:$0xff]   ;;  %v11887_v23 = vld [vmem:[#allocation9 + $0x8c] ss:$16 sps:$4 sm:$0xff]  }
 0x669   :  { %v4777_v16 = vrot.slane %v4769_v27, %v15090_v12  ;;  %v4784_v14 = vrot.slane %v4770_v61, %v15090_v12  ;;  %5142 = vmatpush1.bf16.msra.mxu0 %v11865_v53  ;;  %5183 = vmatpush1.bf16.msra.mxu1 %v11868_v17  ;;  %15095 = vst [vmem:[#allocation32_spill] sm:$0xff] %v11884_v37  ;;  %15096 = vst [vmem:[#allocation33_spill] sm:$0xff] %v11887_v23  ;;  %v11890_v61 = vld [vmem:[#allocation9 + $0x80] ss:$16 sps:$4 sm:$0xff]   ;;  %v11893_v0 = vld [vmem:[#allocation9 + $0x88] ss:$16 sps:$4 sm:$0xff]  }
 0x66a   :  { %v4722_v56 = vpop.f32.mrf.mxu0  ;;  %v4763_v58 = vpop.f32.mrf.mxu1  ;;  %5143 = vmatprep.subr.bf16.mxu0 %v11871_v59  ;;  %5184 = vmatprep.subr.bf16.mxu1 %v11874_v41  ;;  %15097 = vst [vmem:[#allocation34_spill] sm:$0xff] %v11890_v61  ;;  %15098 = vst [vmem:[#allocation35_spill] sm:$0xff] %v11893_v0  ;;  %v11896_v55 = vld [vmem:[#allocation9 + $0x64] ss:$16 sps:$4 sm:$0xff]  }
 0x66b   :  { %v4785_v60 = vcombine.low %v4777_v16, %v4784_v14  ;;  %15099 = vst [vmem:[#allocation36_spill] sm:$0xff] %v11896_v55  ;;  %v11899_v16 = vld [vmem:[#allocation9 + $0x6c] ss:$16 sps:$4 sm:$0xff]   ;;  %v11902_v14 = vld [vmem:[#allocation9 + $0x60] ss:$16 sps:$4 sm:$0xff]  }
 0x66c   :  { %15100 = vst [vmem:[#allocation37_spill] sm:$0xff] %v11899_v16  ;;  %15101 = vst [vmem:[#allocation38_spill] sm:$0xff] %v11902_v14  ;;  %v11905_v56 = vld [vmem:[#allocation9 + $0x68] ss:$16 sps:$4 sm:$0xff]   ;;  %v11908_v58 = vld [vmem:[#allocation9 + $0x44] ss:$16 sps:$4 sm:$0xff]  }
 0x66d   :  { %v4792_v33 = vrot.slane %v4785_v60, %v15090_v12  ;;  %5144 = vmatpush1.bf16.msra.mxu0 %v11878_v30  ;;  %5185 = vmatpush1.bf16.msra.mxu1 %v11881_v44  ;;  %15102 = vst [vmem:[#allocation39_spill] sm:$0xff] %v11905_v56  ;;  %15103 = vst [vmem:[#allocation40_spill] sm:$0xff] %v11908_v58  ;;  %v11911_v60 = vld [vmem:[#allocation9 + $0x4c] ss:$16 sps:$4 sm:$0xff]  }
 0x66e   :  { %5145 = vmatprep.subr.bf16.mxu0 %v11884_v37  ;;  %5186 = vmatprep.subr.bf16.mxu1 %v11887_v23  ;;  %15104 = vst [vmem:[#allocation41_spill] sm:$0xff] %v11911_v60 }
 0x66f   :  { %v4794_v13 = vadd.f32 %v4792_v33, %v4682_v18  ;;  %v11914_v33 = vld [vmem:[#allocation9 + $0x40] ss:$16 sps:$4 sm:$0xff]   ;;  %v11917_v18 = vld [vmem:[#allocation9 + $0x48] ss:$16 sps:$4 sm:$0xff]  }
 0x670   :  { %15105 = vst [vmem:[#allocation42_spill] sm:$0xff] %v11914_v33  ;;  %15106 = vst [vmem:[#allocation43_spill] sm:$0xff] %v11917_v18 }
 0x671   :  { %v7767_v27 = vmul.f32 -1.442695, %v4794_v13  ;;  %5146 = vmatpush1.bf16.msra.mxu0 %v11890_v61  ;;  %5187 = vmatpush1.bf16.msra.mxu1 %v11893_v0 }
 0x672   :  { %5147 = vmatprep.subr.bf16.mxu0 %v11896_v55  ;;  %5188 = vmatprep.subr.bf16.mxu1 %v11899_v16  ;;  %v4802_v16 = vrot.slane %v4794_v13, 3 }
 0x673   :  { %8743 = vpow2.f32 %v7767_v27  ;;  %v11920_v27 = vld [vmem:[#allocation9 + $0x24] ss:$16 sps:$4 sm:$0xff]  }
 0x674   :  { %15107 = vst [vmem:[#allocation44_spill] sm:$0xff] %v11920_v27 }
 0x675   :  { %5148 = vmatpush1.bf16.msra.mxu0 %v11902_v14  ;;  %5189 = vmatpush1.bf16.msra.mxu1 %v11905_v56  ;;  %v11923_v56 = vld [vmem:[#allocation9 + $0x2c] ss:$16 sps:$4 sm:$0xff]  }
 0x676   :  { %5149 = vmatprep.subr.bf16.mxu0 %v11908_v58  ;;  %5190 = vmatprep.subr.bf16.mxu1 %v11911_v60  ;;  %15108 = vst [vmem:[#allocation45_spill] sm:$0xff] %v11923_v56  ;;  %v11926_v58 = vld [vmem:[#allocation9 + $0x20] ss:$16 sps:$4 sm:$0xff]   ;;  %v11929_v60 = vld [vmem:[#allocation9 + $0x28] ss:$16 sps:$4 sm:$0xff]  }
 0x677   :  { %15109 = vst [vmem:[#allocation46_spill] sm:$0xff] %v11926_v58  ;;  %15110 = vst [vmem:[#allocation47_spill] sm:$0xff] %v11929_v60 }
 0x679   :  { %5150 = vmatpush1.bf16.msra.mxu0 %v11914_v33  ;;  %5191 = vmatpush1.bf16.msra.mxu1 %v11917_v18  ;;  %v11932_v33 = vld [vmem:[#allocation9 + $0x4] ss:$16 sps:$4 sm:$0xff]   ;;  %v11935_v18 = vld [vmem:[#allocation9 + $0xc] ss:$16 sps:$4 sm:$0xff]  }
 0x67a   :  { %5151 = vmatprep.subr.bf16.mxu0 %v11920_v27  ;;  %5192 = vmatprep.subr.bf16.mxu1 %v11923_v56  ;;  %15111 = vst [vmem:[#allocation48_spill] sm:$0xff] %v11932_v33  ;;  %15112 = vst [vmem:[#allocation49_spill] sm:$0xff] %v11935_v18  ;;  %v11938_v56 = vld [vmem:[#allocation9] ss:$16 sps:$4 sm:$0xff]  }
 0x67b   :  { %15113 = vst [vmem:[#allocation50_spill] sm:$0xff] %v11938_v56 }
 0x67d   :  { %5152 = vmatpush1.bf16.msra.mxu0 %v11926_v58  ;;  %5193 = vmatpush1.bf16.msra.mxu1 %v11929_v60  ;;  %v11941_v58 = vld [vmem:[#allocation9 + $0x8] ss:$16 sps:$4 sm:$0xff]  }
 0x67e   :  { %5153 = vmatprep.subr.bf16.mxu0 %v11932_v33  ;;  %5194 = vmatprep.subr.bf16.mxu1 %v11935_v18  ;;  %15114 = vst [vmem:[#allocation51_spill] sm:$0xff] %v11941_v58  ;;  %v11944_v60 = vld [vmem:[#allocation12 + $0xe4] ss:$16 sps:$4 sm:$0xff]   ;;  %v11947_v33 = vld [vmem:[#allocation12 + $0xec] ss:$16 sps:$4 sm:$0xff]  }
 0x67f   :  { %15115 = vst [vmem:[#allocation52_spill] sm:$0xff] %v11944_v60  ;;  %15116 = vst [vmem:[#allocation53_spill] sm:$0xff] %v11947_v33 }
 0x680   :  { %v8744_v27 = vpop.eup %8743 }
 0x681   :  { %v4798_v14 = vadd.f32 1.0, %v8744_v27  ;;  %5154 = vmatpush1.bf16.msra.mxu0 %v11938_v56  ;;  %5195 = vmatpush1.bf16.msra.mxu1 %v11941_v58 }
 0x682   :  { %5272 = vmatprep.subr.bf16.mxu0 %v11944_v60  ;;  %5313 = vmatprep.subr.bf16.mxu1 %v11947_v33 }
 0x683   :  { %8745 = vrcp.f32 %v4798_v14 }
 0x684   :  { %8747 = vtanh.f32 %v4802_v16 }
 0x690   :  { %v8746_v27 = vpop.eup %8745 }
 0x691   :  { %v4806_v13 = vrot.slane %v8746_v27, 1  ;;  %v8748_v18 = vpop.eup %8747  ;;  %v4812_v58 = vrot.slane %v8746_v27, 2 }
 0x692   :  { %v4809_v55 = vmul.f32 %v8748_v18, %v8746_v27  ;;  %v11982_v27 = vld [vmem:[#allocation12 + $0xac] ss:$16 sps:$4 sm:$0xff]  }
 0x693   :  { %v4808_v56 = vmul.f32 %v4806_v13, %v11418_v52  ;;  %15118 = vst [vmem:[#allocation55_spill] sm:$0xff] %v11982_v27  ;;  %v11985_v13 = vld [vmem:[#allocation12 + $0xa0] ss:$16 sps:$4 sm:$0xff]  }
 0x694   :  { %15119 = vst [vmem:[#allocation56_spill] sm:$0xff] %v11985_v13 }
 0x695   :  { %v11951_v0 = vadd.f32 %v4809_v55, %v4808_v56 }
 0x697   :  { %8749 = vtanh.f32 %v11951_v0 }
 0x6a4   :  { %v8750_v61 = vpop.eup %8749  ;;  %v4850_v23 = vpop.f32.mrf.mxu0 }
 0x6a5   :  { %v4891_v60 = vpop.f32.mrf.mxu1  ;;  %v4851_v37 = vadd.f32 %v4850_v23, %v10537_v3  ;;  %v4814_v44 = vmul.f32 %v8750_v61, %v4812_v58  ;;  %v11960_v23 = vld [vmem:[#allocation12 + $0xe0] ss:$16 sps:$4 sm:$0xff]   ;;  %v11975_v61 = vld [vmem:[#allocation12 + $0xc8] ss:$16 sps:$4 sm:$0xff]  }
 0x6a6   :  { %v4852_v33 = vpop.f32.mrf.mxu0  ;;  %v4892_v58 = vadd.f32 %v4891_v60, %v10551_v24  ;;  %v11994_v60 = vld [vmem:[#allocation12 + $0x8c] ss:$16 sps:$4 sm:$0xff]  }
 0x6a7   :  { %v4893_v14 = vpop.f32.mrf.mxu1  ;;  %v7768_v16 = vmul.f32 -1.442695, %v4851_v37  ;;  %v4853_v30 = vadd.f32 %v4852_v33, %v10540_v4  ;;  %v11956_v59 = vpack.c.bf16 %v4814_v44, %v4814_v44  ;;  %v11963_v37 = vld [vmem:[#allocation12 + $0xe8] ss:$16 sps:$4 sm:$0xff]   ;;  %v11972_v44 = vld [vmem:[#allocation12 + $0xc0] ss:$16 sps:$4 sm:$0xff]  }
 0x6a8   :  { %v4854_v41 = vpop.f32.mrf.mxu0  ;;  %v11979_v33 = vld [vmem:[#allocation12 + $0xa4] ss:$16 sps:$4 sm:$0xff]   ;;  %15122 = vst [vmem:[#allocation59_spill] sm:$0xff] %v11994_v60 }
 0x6a9   :  { %v4895_v18 = vpop.f32.mrf.mxu1  ;;  %8751 = vpow2.f32 %v7768_v16  ;;  %v7769_v52 = vmul.f32 -1.442695, %v4853_v30  ;;  %5172 = vmatmul.mubr.bf16.vlgmr.msra.gmra.mxu0 %v11956_v59  ;;  %5213 = vmatmul.mubr.bf16.vlgmr.msra.gmra.mxu1 %v11956_v59  ;;  %v11966_v41 = vld [vmem:[#allocation12 + $0xc4] ss:$16 sps:$4 sm:$0xff]   ;;  %v11969_v30 = vld [vmem:[#allocation12 + $0xcc] ss:$16 sps:$4 sm:$0xff]  }
 0x6aa   :  { %v4855_v55 = vpop.f32.mrf.mxu0  ;;  %5273 = vmatpush1.bf16.msra.mxu0 %v11960_v23  ;;  %5314 = vmatpush1.bf16.msra.mxu1 %v11963_v37  ;;  %15117 = vst [vmem:[#allocation54_spill] sm:$0xff] %v11979_v33  ;;  %v11988_v16 = vld [vmem:[#allocation12 + $0xa8] ss:$16 sps:$4 sm:$0xff]   ;;  %v7770_v18 = vmul.f32 -1.442695, %v4892_v58 }
 0x6ab   :  { %v4896_v56 = vpop.f32.mrf.mxu1  ;;  %8753 = vpow2.f32 %v7769_v52  ;;  %5274 = vmatprep.subr.bf16.mxu0 %v11966_v41  ;;  %5315 = vmatprep.subr.bf16.mxu1 %v11969_v30  ;;  %15120 = vst [vmem:[#allocation57_spill] sm:$0xff] %v11988_v16  ;;  %v11991_v52 = vld [vmem:[#allocation12 + $0x84] ss:$16 sps:$4 sm:$0xff]  }
 0x6ac   :  { %15121 = vst [vmem:[#allocation58_spill] sm:$0xff] %v11991_v52  ;;  %v4894_v56 = vadd.f32 %v4893_v14, %v14952_v28  ;;  %8755 = vpow2.f32 %v7770_v18  ;;  %v12016_v18 = vld [vmem:[#allocation12 + $0x44] ss:$16 sps:$4 sm:$0xff]  }
 0x6ad   :  { %15129 = vst [vmem:[#allocation66_spill] sm:$0xff] %v12016_v18 }
 0x6ae   :  { %5275 = vmatpush1.bf16.msra.mxu0 %v11972_v44  ;;  %5316 = vmatpush1.bf16.msra.mxu1 %v11975_v61 }
 0x6af   :  { %5276 = vmatprep.subr.bf16.mxu0 %v11979_v33  ;;  %5317 = vmatprep.subr.bf16.mxu1 %v11982_v27  ;;  %v11998_v33 = vld [vmem:[#allocation12 + $0x80] ss:$16 sps:$4 sm:$0xff]  }
 0x6b0   :  { %15123 = vst [vmem:[#allocation60_spill] sm:$0xff] %v11998_v33 }
 0x6b2   :  { %5277 = vmatpush1.bf16.msra.mxu0 %v11985_v13  ;;  %5318 = vmatpush1.bf16.msra.mxu1 %v11988_v16  ;;  %v12001_v13 = vld [vmem:[#allocation12 + $0x88] ss:$16 sps:$4 sm:$0xff]   ;;  %v12004_v16 = vld [vmem:[#allocation12 + $0x64] ss:$16 sps:$4 sm:$0xff]  }
 0x6b3   :  { %5278 = vmatprep.subr.bf16.mxu0 %v11991_v52  ;;  %5319 = vmatprep.subr.bf16.mxu1 %v11994_v60  ;;  %15124 = vst [vmem:[#allocation61_spill] sm:$0xff] %v12001_v13  ;;  %15125 = vst [vmem:[#allocation62_spill] sm:$0xff] %v12004_v16  ;;  %v12007_v52 = vld [vmem:[#allocation12 + $0x6c] ss:$16 sps:$4 sm:$0xff]  }
 0x6b4   :  { %15126 = vst [vmem:[#allocation63_spill] sm:$0xff] %v12007_v52 }
 0x6b6   :  { %v8752_v55 = vpop.eup %8751  ;;  %5279 = vmatpush1.bf16.msra.mxu0 %v11998_v33  ;;  %5320 = vmatpush1.bf16.msra.mxu1 %v12001_v13  ;;  %v12013_v33 = vld [vmem:[#allocation12 + $0x68] ss:$16 sps:$4 sm:$0xff]   ;;  %v12052_v13 = vld [vmem:[#allocation12 + $0x1e4] ss:$16 sps:$4 sm:$0xff]  }
 0x6b7   :  { %v4907_v27 = vadd.f32 1.0, %v8752_v55  ;;  %5280 = vmatprep.subr.bf16.mxu0 %v12004_v16  ;;  %5321 = vmatprep.subr.bf16.mxu1 %v12007_v52  ;;  %v12010_v55 = vld [vmem:[#allocation12 + $0x60] ss:$16 sps:$4 sm:$0xff]   ;;  %15128 = vst [vmem:[#allocation65_spill] sm:$0xff] %v12013_v33  ;;  %v12019_v16 = vld [vmem:[#allocation12 + $0x4c] ss:$16 sps:$4 sm:$0xff]  }
 0x6b8   :  { %v8754_v58 = vpop.eup %8753  ;;  %15127 = vst [vmem:[#allocation64_spill] sm:$0xff] %v12010_v55  ;;  %15130 = vst [vmem:[#allocation67_spill] sm:$0xff] %v12019_v16 }
 0x6b9   :  { %8757 = vrcp.f32 %v4907_v27  ;;  %v4908_v14 = vadd.f32 1.0, %v8754_v58  ;;  %v12022_v27 = vld [vmem:[#allocation12 + $0x40] ss:$16 sps:$4 sm:$0xff]   ;;  %v12028_v58 = vld [vmem:[#allocation12 + $0x24] ss:$16 sps:$4 sm:$0xff]   ;;  %15141 = vst [vmem:[#allocation155_spill] sm:$0xff] %v12052_v13 }
 0x6ba   :  { %8759 = vtanh.f32 %v4894_v56  ;;  %5281 = vmatpush1.bf16.msra.mxu0 %v12010_v55  ;;  %5322 = vmatpush1.bf16.msra.mxu1 %v12013_v33  ;;  %15131 = vst [vmem:[#allocation72_spill] sm:$0xff] %v12022_v27  ;;  %v12025_v56 = vld [vmem:[#allocation12 + $0x48] ss:$16 sps:$4 sm:$0xff]   ;;  %15133 = vst [vmem:[#allocation74_spill] sm:$0xff] %v12028_v58 }
 0x6bb   :  { %8761 = vrcp.f32 %v4908_v14  ;;  %5282 = vmatprep.subr.bf16.mxu0 %v12016_v18  ;;  %5323 = vmatprep.subr.bf16.mxu1 %v12019_v16  ;;  %15132 = vst [vmem:[#allocation73_spill] sm:$0xff] %v12025_v56  ;;  %v12031_v14 = vld [vmem:[#allocation12 + $0x2c] ss:$16 sps:$4 sm:$0xff]   ;;  %v12034_v18 = vld [vmem:[#allocation12 + $0x20] ss:$16 sps:$4 sm:$0xff]  }
 0x6bc   :  { %15134 = vst [vmem:[#allocation75_spill] sm:$0xff] %v12031_v14  ;;  %15135 = vst [vmem:[#allocation76_spill] sm:$0xff] %v12034_v18  ;;  %v12037_v16 = vld [vmem:[#allocation12 + $0x28] ss:$16 sps:$4 sm:$0xff]  }
 0x6bd   :  { %15136 = vst [vmem:[#allocation77_spill] sm:$0xff] %v12037_v16 }
 0x6be   :  { %5283 = vmatpush1.bf16.msra.mxu0 %v12022_v27  ;;  %5324 = vmatpush1.bf16.msra.mxu1 %v12025_v56  ;;  %v12040_v27 = vld [vmem:[#allocation12 + $0x4] ss:$16 sps:$4 sm:$0xff]   ;;  %v12043_v56 = vld [vmem:[#allocation12 + $0xc] ss:$16 sps:$4 sm:$0xff]  }
 0x6bf   :  { %5284 = vmatprep.subr.bf16.mxu0 %v12028_v58  ;;  %5325 = vmatprep.subr.bf16.mxu1 %v12031_v14  ;;  %15137 = vst [vmem:[#allocation78_spill] sm:$0xff] %v12040_v27  ;;  %15138 = vst [vmem:[#allocation152_spill] sm:$0xff] %v12043_v56  ;;  %v8756_v58 = vpop.eup %8755  ;;  %v12046_v14 = vld [vmem:[#allocation12] ss:$16 sps:$4 sm:$0xff]  }
 0x6c0   :  { %15139 = vst [vmem:[#allocation153_spill] sm:$0xff] %v12046_v14  ;;  %v4909_v52 = vadd.f32 1.0, %v8756_v58  ;;  %v12067_v58 = vld [vmem:[#allocation12 + $0x1c4] ss:$16 sps:$4 sm:$0xff]  }
 0x6c2   :  { %5285 = vmatpush1.bf16.msra.mxu0 %v12034_v18  ;;  %5326 = vmatpush1.bf16.msra.mxu1 %v12037_v16  ;;  %v12049_v18 = vld [vmem:[#allocation12 + $0x8] ss:$16 sps:$4 sm:$0xff]   ;;  %8763 = vrcp.f32 %v4909_v52 }
 0x6c3   :  { %5286 = vmatprep.subr.bf16.mxu0 %v12040_v27  ;;  %5327 = vmatprep.subr.bf16.mxu1 %v12043_v56  ;;  %15140 = vst [vmem:[#allocation154_spill] sm:$0xff] %v12049_v18  ;;  %v12055_v27 = vld [vmem:[#allocation12 + $0x1ec] ss:$16 sps:$4 sm:$0xff]  }
 0x6c6   :  { %v8758_v33 = vpop.eup %8757  ;;  %5287 = vmatpush1.bf16.msra.mxu0 %v12046_v14  ;;  %5328 = vmatpush1.bf16.msra.mxu1 %v12049_v18  ;;  %v12061_v14 = vld [vmem:[#allocation12 + $0x1e0] ss:$16 sps:$4 sm:$0xff]   ;;  %v12064_v18 = vld [vmem:[#allocation12 + $0x1e8] ss:$16 sps:$4 sm:$0xff]  }
 0x6c7   :  { %v8760_v55 = vpop.eup %8759  ;;  %5288 = vmatprep.subr.bf16.mxu0 %v12052_v13  ;;  %5329 = vmatprep.subr.bf16.mxu1 %v12055_v27  ;;  %v12070_v13 = vld [vmem:[#allocation12 + $0x1cc] ss:$16 sps:$4 sm:$0xff]  }
 0x6c8   :  { %v8762_v16 = vpop.eup %8761  ;;  %v4918_v28 = vmul.f32 %v8760_v55, %v8758_v33 }
 0x6c9   :  { %v4917_v56 = vmul.f32 %v8762_v16, %v11462_v20  ;;  %v12077_v20 = vld [vmem:[#allocation12 + $0x1c8] ss:$16 sps:$4 sm:$0xff]  }
 0x6ca   :  { %5289 = vmatpush2.bf16.msra.mxu0 %v12061_v14  ;;  %5330 = vmatpush2.bf16.msra.mxu1 %v12064_v18 }
 0x6cb   :  { %v12059_v60 = vadd.f32 %v4918_v28, %v4917_v56  ;;  %5290 = vmatprep.subr.bf16.mxu0 %v12067_v58  ;;  %5331 = vmatprep.subr.bf16.mxu1 %v12070_v13  ;;  %v12074_v28 = vld [vmem:[#allocation12 + $0x1c0] ss:$16 sps:$4 sm:$0xff]  }
 0x6cc   :  { %v15148_v56 = vld [vmem:[#allocation85_spill] sm:$0xff] }
 0x6cd   :  { %8765 = vtanh.f32 %v12059_v60 }
 0x6ce   :  { %5291 = vmatpush2.bf16.msra.mxu0 %v12074_v28  ;;  %5332 = vmatpush2.bf16.msra.mxu1 %v12077_v20 }
 0x6cf   :  { %5292 = vmatprep.subr.bf16.mxu0 %v11471_v47  ;;  %5333 = vmatprep.subr.bf16.mxu1 %v11474_v7  ;;  %v8764_v33 = vpop.eup %8763 }
 0x6d2   :  { %5293 = vmatpush2.bf16.msra.mxu0 %v11477_v36  ;;  %5334 = vmatpush2.bf16.msra.mxu1 %v11480_v40  ;;  %v15142_v40 = vld [vmem:[#allocation79_spill] sm:$0xff] }
 0x6d3   :  { %5294 = vmatprep.subr.bf16.mxu0 %v11483_v62  ;;  %5335 = vmatprep.subr.bf16.mxu1 %v11486_v63  ;;  %v15143_v62 = vld [vmem:[#allocation80_spill] sm:$0xff]  ;;  %v15144_v63 = vld [vmem:[#allocation81_spill] sm:$0xff] }
 0x6d6   :  { %5295 = vmatpush2.bf16.msra.mxu0 %v11489_v22  ;;  %5336 = vmatpush2.bf16.msra.mxu1 %v11492_v15 }
 0x6d7   :  { %5296 = vmatprep.subr.bf16.mxu0 %v11495_v48  ;;  %5337 = vmatprep.subr.bf16.mxu1 %v11498_v45  ;;  %v15145_v48 = vld [vmem:[#allocation82_spill] sm:$0xff] }
 0x6da   :  { %v8766_v47 = vpop.eup %8765  ;;  %5297 = vmatpush2.bf16.msra.mxu0 %v11501_v29  ;;  %5338 = vmatpush2.bf16.msra.mxu1 %v11504_v25 }
 0x6db   :  { %v4921_v7 = vmul.f32 %v8766_v47, %v8764_v33  ;;  %5298 = vmatprep.subr.bf16.mxu0 %v11507_v6  ;;  %5339 = vmatprep.subr.bf16.mxu1 %v11510_v21  ;;  %v15149_v33 = vld [vmem:[#allocation86_spill] sm:$0xff]  ;;  %v15150_v47 = vld [vmem:[#allocation87_spill] sm:$0xff] }
 0x6dd   :  { %v12094_v36 = vpack.c.bf16 %v4921_v7, %v4921_v7  ;;  %v15151_v7 = vld [vmem:[#allocation88_spill] sm:$0xff] }
 0x6de   :  { %5299 = vmatpush2.bf16.msra.mxu0 %v11515_v19  ;;  %5340 = vmatpush2.bf16.msra.mxu1 %v11518_v32  ;;  %v15146_v19 = vld [vmem:[#allocation83_spill] sm:$0xff]  ;;  %v15147_v32 = vld [vmem:[#allocation84_spill] sm:$0xff] }
 0x6df   :  { %5304 = vmatprep.mubr.bf16.mxu0 %v12094_v36  ;;  %5345 = vmatprep.mubr.bf16.mxu1 %v12094_v36 }
 0x6e0   :  { %5300 = vmatprep.subr.bf16.mxu0 %v11523_v39  ;;  %5341 = vmatprep.subr.bf16.mxu1 %v15142_v40  ;;  %v15154_v40 = vld [vmem:[#allocation145_spill] sm:$0xff] }
 0x6e2   :  { %5301 = vmatpush2.bf16.msra.mxu0 %v15143_v62  ;;  %5342 = vmatpush2.bf16.msra.mxu1 %v15144_v63  ;;  %v15155_v63 = vld [vmem:[#allocation91_spill] sm:$0xff] }
 0x6e3   :  { %5302 = vmatprep.subr.bf16.mxu0 %v15145_v48  ;;  %5343 = vmatprep.subr.bf16.mxu1 %v11538_v5  ;;  %v15158_v48 = vld [vmem:[#allocation94_spill] sm:$0xff] }
 0x6e4   :  { %v4957_v22 = vpop.f32.mrf.mxu0  ;;  %v4998_v15 = vpop.f32.mrf.mxu1 }
 0x6e5   :  { %v4958_v45 = vadd.f32 %v4957_v22, %v11084_v11  ;;  %v4999_v62 = vadd.f32 %v4998_v15, %v15154_v40  ;;  %v15157_v22 = vld [vmem:[#allocation93_spill] sm:$0xff]  ;;  %v15163_v15 = vld [vmem:[#allocation98_spill] sm:$0xff] }
 0x6e6   :  { %v4959_v29 = vpop.f32.mrf.mxu0  ;;  %v5000_v25 = vpop.f32.mrf.mxu1  ;;  %5303 = vmatpush2.bf16.msra.mxu0 %v15146_v19  ;;  %5344 = vmatpush2.bf16.msra.mxu1 %v15147_v32  ;;  %v15161_v19 = vld [vmem:[#allocation26_spill] sm:$0xff] }
 0x6e7   :  { %v7771_v6 = vmul.f32 -1.442695, %v4958_v45  ;;  %v4960_v21 = vadd.f32 %v4959_v29, %v11089_v46  ;;  %5379 = vmatprep.subr.bf16.mxu0 %v11549_v8  ;;  %5420 = vmatprep.subr.bf16.mxu1 %v11552_v35  ;;  %v15152_v8 = vld [vmem:[#allocation89_spill] sm:$0xff]  ;;  %v15153_v35 = vld [vmem:[#allocation90_spill] sm:$0xff]  ;;  %v7773_v45 = vmul.f32 -1.442695, %v4999_v62  ;;  %v5001_v32 = vadd.f32 %v5000_v25, %v15161_v19 }
 0x6e8   :  { %v4961_v39 = vpop.f32.mrf.mxu0  ;;  %v5002_v16 = vpop.f32.mrf.mxu1  ;;  %v15159_v29 = vld [vmem:[#allocation95_spill] sm:$0xff] }
 0x6e9   :  { %8767 = vpow2.f32 %v7771_v6  ;;  %v7772_v52 = vmul.f32 -1.442695, %v4960_v21  ;;  %5305 = vmatmul.mubr.bf16.vlgmr.msra.gmra.mxu0 %v11956_v59  ;;  %5346 = vmatmul.mubr.bf16.vlgmr.msra.gmra.mxu1 %v11956_v59  ;;  %v15156_v59 = vld [vmem:[#allocation92_spill] sm:$0xff]  ;;  %v15162_v16 = vld [vmem:[#allocation97_spill] sm:$0xff]  ;;  %v15168_v25 = vld [vmem:[#allocation103_spill] sm:$0xff] }
 0x6ea   :  { %v4962_v5 = vpop.f32.mrf.mxu0  ;;  %v5003_v55 = vpop.f32.mrf.mxu1  ;;  %5380 = vmatpush1.bf16.msra.mxu0 %v15148_v56  ;;  %5421 = vmatpush1.bf16.msra.mxu1 %v15149_v33  ;;  %v15160_v6 = vld [vmem:[#allocation96_spill] sm:$0xff]  ;;  %v15166_v33 = vld [vmem:[#allocation101_spill] sm:$0xff]  ;;  %v15172_v62 = vld [vmem:[#allocation107_spill] sm:$0xff] }
 0x6eb   :  { %8769 = vpow2.f32 %v7772_v52  ;;  %5381 = vmatprep.subr.bf16.mxu0 %v15150_v47  ;;  %5422 = vmatprep.subr.bf16.mxu1 %v15151_v7  ;;  %v15164_v5 = vld [vmem:[#allocation99_spill] sm:$0xff]  ;;  %v15165_v55 = vld [vmem:[#allocation100_spill] sm:$0xff]  ;;  %v15167_v47 = vld [vmem:[#allocation102_spill] sm:$0xff] }
 0x6ec   :  { %8771 = vpow2.f32 %v7773_v45  ;;  %v15169_v7 = vld [vmem:[#allocation104_spill] sm:$0xff] }
 0x6ed   :  { %v15177_v45 = vld [vmem:[#allocation112_spill] sm:$0xff] }
 0x6ee   :  { %5382 = vmatpush1.bf16.msra.mxu0 %v15152_v8  ;;  %5423 = vmatpush1.bf16.msra.mxu1 %v15153_v35  ;;  %v15170_v8 = vld [vmem:[#allocation105_spill] sm:$0xff]  ;;  %v15171_v35 = vld [vmem:[#allocation106_spill] sm:$0xff] }
 0x6ef   :  { %5383 = vmatprep.subr.bf16.mxu0 %v15155_v63  ;;  %5424 = vmatprep.subr.bf16.mxu1 %v15156_v59  ;;  %v15173_v63 = vld [vmem:[#allocation108_spill] sm:$0xff]  ;;  %v15174_v59 = vld [vmem:[#allocation109_spill] sm:$0xff] }
 0x6f2   :  { %5384 = vmatpush1.bf16.msra.mxu0 %v15157_v22  ;;  %5425 = vmatpush1.bf16.msra.mxu1 %v15158_v48  ;;  %v15175_v22 = vld [vmem:[#allocation110_spill] sm:$0xff]  ;;  %v15176_v48 = vld [vmem:[#allocation111_spill] sm:$0xff] }
 0x6f3   :  { %5385 = vmatprep.subr.bf16.mxu0 %v15159_v29  ;;  %5426 = vmatprep.subr.bf16.mxu1 %v15160_v6 }
 0x6f6   :  { %v8768_v21 = vpop.eup %8767  ;;  %5386 = vmatpush1.bf16.msra.mxu0 %v15162_v16  ;;  %5427 = vmatpush1.bf16.msra.mxu1 %v15163_v15 }
 0x6f7   :  { %v5014_v39 = vadd.f32 1.0, %v8768_v21  ;;  %5387 = vmatprep.subr.bf16.mxu0 %v15164_v5  ;;  %5428 = vmatprep.subr.bf16.mxu1 %v15165_v55  ;;  %v15181_v5 = vld [vmem:[#allocation116_spill] sm:$0xff]  ;;  %v15182_v55 = vld [vmem:[#allocation117_spill] sm:$0xff] }
 0x6f8   :  { %v8770_v52 = vpop.eup %8769 }
 0x6f9   :  { %8773 = vrcp.f32 %v5014_v39  ;;  %v5015_v56 = vadd.f32 1.0, %v8770_v52  ;;  %v8772_v29 = vpop.eup %8771  ;;  %v15179_v39 = vld [vmem:[#allocation114_spill] sm:$0xff]  ;;  %v15180_v52 = vld [vmem:[#allocation115_spill] sm:$0xff] }
 0x6fa   :  { %8775 = vtanh.f32 %v5001_v32  ;;  %5388 = vmatpush1.bf16.msra.mxu0 %v15166_v33  ;;  %5429 = vmatpush1.bf16.msra.mxu1 %v15167_v47  ;;  %v15178_v32 = vld [vmem:[#allocation113_spill] sm:$0xff]  ;;  %v5016_v15 = vadd.f32 1.0, %v8772_v29  ;;  %v15193_v29 = vld [vmem:[#allocation128_spill] sm:$0xff] }
 0x6fb   :  { %8777 = vrcp.f32 %v5015_v56  ;;  %5389 = vmatprep.subr.bf16.mxu0 %v15168_v25  ;;  %5430 = vmatprep.subr.bf16.mxu1 %v15169_v7  ;;  %v15183_v25 = vld [vmem:[#allocation118_spill] sm:$0xff]  ;;  %v15184_v7 = vld [vmem:[#allocation119_spill] sm:$0xff] }
 0x6fc   :  { %8779 = vrcp.f32 %v5016_v15 }
 0x6fe   :  { %5390 = vmatpush1.bf16.msra.mxu0 %v15170_v8  ;;  %5431 = vmatpush1.bf16.msra.mxu1 %v15171_v35  ;;  %v15185_v8 = vld [vmem:[#allocation120_spill] sm:$0xff]  ;;  %v15186_v35 = vld [vmem:[#allocation121_spill] sm:$0xff] }
 0x6ff   :  { %5391 = vmatprep.subr.bf16.mxu0 %v15172_v62  ;;  %5432 = vmatprep.subr.bf16.mxu1 %v15173_v63  ;;  %v15187_v62 = vld [vmem:[#allocation122_spill] sm:$0xff]  ;;  %v15188_v63 = vld [vmem:[#allocation123_spill] sm:$0xff] }
 0x702   :  { %5392 = vmatpush1.bf16.msra.mxu0 %v15174_v59  ;;  %5433 = vmatpush1.bf16.msra.mxu1 %v15175_v22  ;;  %v15189_v59 = vld [vmem:[#allocation124_spill] sm:$0xff]  ;;  %v15190_v22 = vld [vmem:[#allocation125_spill] sm:$0xff] }
 0x703   :  { %5393 = vmatprep.subr.bf16.mxu0 %v15176_v48  ;;  %5434 = vmatprep.subr.bf16.mxu1 %v15177_v45  ;;  %v15191_v48 = vld [vmem:[#allocation126_spill] sm:$0xff]  ;;  %v15192_v45 = vld [vmem:[#allocation127_spill] sm:$0xff] }
 0x706   :  { %v8774_v6 = vpop.eup %8773  ;;  %5394 = vmatpush1.bf16.msra.mxu0 %v15178_v32  ;;  %5435 = vmatpush1.bf16.msra.mxu1 %v15179_v39  ;;  %v15196_v32 = vld [vmem:[#allocation131_spill] sm:$0xff]  ;;  %v15197_v39 = vld [vmem:[#allocation132_spill] sm:$0xff] }
 0x707   :  { %v8776_v21 = vpop.eup %8775  ;;  %5395 = vmatprep.subr.bf16.mxu0 %v15180_v52  ;;  %5436 = vmatprep.subr.bf16.mxu1 %v15181_v5  ;;  %v15199_v5 = vld [vmem:[#allocation134_spill] sm:$0xff] }
 0x708   :  { %v8778_v16 = vpop.eup %8777  ;;  %v5025_v33 = vmul.f32 %v8776_v21, %v8774_v6  ;;  %v15194_v6 = vld [vmem:[#allocation129_spill] sm:$0xff]  ;;  %v15195_v21 = vld [vmem:[#allocation130_spill] sm:$0xff] }
 0x709   :  { %v5024_v56 = vmul.f32 %v8778_v16, %v15182_v55  ;;  %v15198_v16 = vld [vmem:[#allocation133_spill] sm:$0xff]  ;;  %v8780_v15 = vpop.eup %8779  ;;  %v15200_v55 = vld [vmem:[#allocation135_spill] sm:$0xff] }
 0x70a   :  { %5396 = vmatpush2.bf16.msra.mxu0 %v15183_v25  ;;  %5437 = vmatpush2.bf16.msra.mxu1 %v15184_v7  ;;  %v15202_v25 = vld [vmem:[#allocation137_spill] sm:$0xff] }
 0x70b   :  { %v12149_v47 = vadd.f32 %v5025_v33, %v5024_v56  ;;  %5397 = vmatprep.subr.bf16.mxu0 %v15185_v8  ;;  %5438 = vmatprep.subr.bf16.mxu1 %v15186_v35  ;;  %v15201_v33 = vld [vmem:[#allocation136_spill] sm:$0xff]  ;;  %v15203_v8 = vld [vmem:[#allocation138_spill] sm:$0xff]  ;;  %v15204_v35 = vld [vmem:[#allocation139_spill] sm:$0xff] }
 0x70d   :  { %8781 = vtanh.f32 %v12149_v47 }
 0x70e   :  { %5398 = vmatpush2.bf16.msra.mxu0 %v15187_v62  ;;  %5439 = vmatpush2.bf16.msra.mxu1 %v15188_v63  ;;  %v15205_v62 = vld [vmem:[#allocation141_spill] sm:$0xff]  ;;  %v15206_v63 = vld [vmem:[#allocation142_spill] sm:$0xff] }
 0x70f   :  { %5399 = vmatprep.subr.bf16.mxu0 %v15189_v59  ;;  %5440 = vmatprep.subr.bf16.mxu1 %v15190_v22  ;;  %v15207_v59 = vld [vmem:[#allocation147_spill] sm:$0xff]  ;;  %v15208_v22 = vld [vmem:[#allocation148_spill] sm:$0xff] }
 0x712   :  { %5400 = vmatpush2.bf16.msra.mxu0 %v15191_v48  ;;  %5441 = vmatpush2.bf16.msra.mxu1 %v15192_v45 }
 0x713   :  { %5401 = vmatprep.subr.bf16.mxu0 %v15193_v29  ;;  %5442 = vmatprep.subr.bf16.mxu1 %v15194_v6  ;;  %v15209_v29 = vld [vmem:[#allocation149_spill] sm:$0xff] }
 0x716   :  { %5402 = vmatpush2.bf16.msra.mxu0 %v15195_v21  ;;  %5443 = vmatpush2.bf16.msra.mxu1 %v15196_v32 }
 0x717   :  { %5403 = vmatprep.subr.bf16.mxu0 %v15197_v39  ;;  %5444 = vmatprep.subr.bf16.mxu1 %v15198_v16 }
 0x71a   :  { %v8782_v52 = vpop.eup %8781  ;;  %5404 = vmatpush2.bf16.msra.mxu0 %v15199_v5  ;;  %5445 = vmatpush2.bf16.msra.mxu1 %v15200_v55  ;;  %v12188_v5 = vld [vmem:[#allocation15 + $0xe4] ss:$16 sps:$4 sm:$0xff]   ;;  %v12191_v55 = vld [vmem:[#allocation15 + $0xec] ss:$16 sps:$4 sm:$0xff]  }
 0x71b   :  { %v5028_v56 = vmul.f32 %v8782_v52, %v8780_v15  ;;  %5405 = vmatprep.subr.bf16.mxu0 %v15201_v33  ;;  %5446 = vmatprep.subr.bf16.mxu1 %v15202_v25  ;;  %v12199_v33 = vld [vmem:[#allocation15 + $0xe8] ss:$16 sps:$4 sm:$0xff]   ;;  %v12202_v25 = vld [vmem:[#allocation15 + $0xc4] ss:$16 sps:$4 sm:$0xff]  }
 0x71d   :  { %v12172_v7 = vpack.c.bf16 %v5028_v56, %v5028_v56 }
 0x71e   :  { %5406 = vmatpush2.bf16.msra.mxu0 %v15203_v8  ;;  %5447 = vmatpush2.bf16.msra.mxu1 %v15204_v35  ;;  %v12205_v8 = vld [vmem:[#allocation15 + $0xcc] ss:$16 sps:$4 sm:$0xff]   ;;  %v12211_v35 = vld [vmem:[#allocation15 + $0xc8] ss:$16 sps:$4 sm:$0xff]  }
 0x71f   :  { %5411 = vmatprep.mubr.bf16.mxu0 %v12172_v7  ;;  %5452 = vmatprep.mubr.bf16.mxu1 %v12172_v7 }
 0x720   :  { %5407 = vmatprep.subr.bf16.mxu0 %v15205_v62  ;;  %5448 = vmatprep.subr.bf16.mxu1 %v15206_v63  ;;  %v12215_v63 = vld [vmem:[#allocation15 + $0xa4] ss:$16 sps:$4 sm:$0xff]  }
 0x722   :  { %5408 = vmatpush2.bf16.msra.mxu0 %v15207_v59  ;;  %5449 = vmatpush2.bf16.msra.mxu1 %v15208_v22  ;;  %v12218_v59 = vld [vmem:[#allocation15 + $0xac] ss:$16 sps:$4 sm:$0xff]   ;;  %v12221_v22 = vld [vmem:[#allocation15 + $0xa0] ss:$16 sps:$4 sm:$0xff]  }
 0x723   :  { %5409 = vmatprep.subr.bf16.mxu0 %v15209_v29  ;;  %5450 = vmatprep.subr.bf16.mxu1 %v11753_v26 }
 0x724   :  { %v5064_v48 = vpop.f32.mrf.mxu0  ;;  %v5105_v45 = vpop.f32.mrf.mxu1 }
 0x725   :  { %v5065_v6 = vadd.f32 %v5064_v48, %v11733_v9  ;;  %v5106_v62 = vadd.f32 %v5105_v45, %v11771_v31  ;;  %v12224_v48 = vld [vmem:[#allocation15 + $0xa8] ss:$16 sps:$4 sm:$0xff]   ;;  %v12230_v45 = vld [vmem:[#allocation15 + $0x8c] ss:$16 sps:$4 sm:$0xff]  }
 0x726   :  { %v5066_v21 = vpop.f32.mrf.mxu0  ;;  %v5107_v32 = vpop.f32.mrf.mxu1  ;;  %5410 = vmatpush2.bf16.msra.mxu0 %v11758_v10  ;;  %5451 = vmatpush2.bf16.msra.mxu1 %v11761_v49  ;;  %v12196_v49 = vld [vmem:[#allocation15 + $0xe0] ss:$16 sps:$4 sm:$0xff]  }
 0x727   :  { %v7774_v39 = vmul.f32 -1.442695, %v5065_v6  ;;  %v5067_v16 = vadd.f32 %v5066_v21, %v11742_v42  ;;  %5486 = vmatprep.subr.bf16.mxu0 %v12188_v5  ;;  %5527 = vmatprep.subr.bf16.mxu1 %v12191_v55  ;;  %v7776_v29 = vmul.f32 -1.442695, %v5106_v62  ;;  %v12227_v6 = vld [vmem:[#allocation15 + $0x84] ss:$16 sps:$4 sm:$0xff]  }
 0x728   :  { %v5068_v15 = vpop.f32.mrf.mxu0  ;;  %v5109_v52 = vpop.f32.mrf.mxu1  ;;  %v12246_v62 = vld [vmem:[#allocation15 + $0x60] ss:$16 sps:$4 sm:$0xff]  }
 0x729   :  { %8783 = vpow2.f32 %v7774_v39  ;;  %v7775_v26 = vmul.f32 -1.442695, %v5067_v16  ;;  %5412 = vmatmul.mubr.bf16.vlgmr.msra.gmra.mxu0 %v12094_v36  ;;  %5453 = vmatmul.mubr.bf16.vlgmr.msra.gmra.mxu1 %v12094_v36  ;;  %v12208_v36 = vld [vmem:[#allocation15 + $0xc0] ss:$16 sps:$4 sm:$0xff]   ;;  %v5108_v39 = vadd.f32 %v5107_v32, %v11781_v51  ;;  %v12237_v52 = vld [vmem:[#allocation15 + $0x88] ss:$16 sps:$4 sm:$0xff]  }
 0x72a   :  { %v5069_v56 = vpop.f32.mrf.mxu0  ;;  %v5110_v10 = vpop.f32.mrf.mxu1  ;;  %5487 = vmatpush1.bf16.msra.mxu0 %v12196_v49  ;;  %5528 = vmatpush1.bf16.msra.mxu1 %v12199_v33  ;;  %v12234_v15 = vld [vmem:[#allocation15 + $0x80] ss:$16 sps:$4 sm:$0xff]   ;;  %15211 = vst [vmem:[#allocation80_spill] sm:$0xff] %v12237_v52  ;;  %15214 = vst [vmem:[#allocation83_spill] sm:$0xff] %v12246_v62 }
 0x72b   :  { %8785 = vpow2.f32 %v7775_v26  ;;  %5488 = vmatprep.subr.bf16.mxu0 %v12202_v25  ;;  %5529 = vmatprep.subr.bf16.mxu1 %v12205_v8  ;;  %15210 = vst [vmem:[#allocation79_spill] sm:$0xff] %v12234_v15  ;;  %v12240_v56 = vld [vmem:[#allocation15 + $0x64] ss:$16 sps:$4 sm:$0xff]   ;;  %v12243_v10 = vld [vmem:[#allocation15 + $0x6c] ss:$16 sps:$4 sm:$0xff]  }
 0x72c   :  { %8787 = vpow2.f32 %v7776_v29  ;;  %15212 = vst [vmem:[#allocation81_spill] sm:$0xff] %v12240_v56  ;;  %15213 = vst [vmem:[#allocation82_spill] sm:$0xff] %v12243_v10  ;;  %v12252_v29 = vld [vmem:[#allocation15 + $0x44] ss:$16 sps:$4 sm:$0xff]  }
 0x72d   :  { %15216 = vst [vmem:[#allocation85_spill] sm:$0xff] %v12252_v29 }
 0x72e   :  { %5489 = vmatpush1.bf16.msra.mxu0 %v12208_v36  ;;  %5530 = vmatpush1.bf16.msra.mxu1 %v12211_v35 }
 0x72f   :  { %5490 = vmatprep.subr.bf16.mxu0 %v12215_v63  ;;  %5531 = vmatprep.subr.bf16.mxu1 %v12218_v59 }
 0x732   :  { %5491 = vmatpush1.bf16.msra.mxu0 %v12221_v22  ;;  %5532 = vmatpush1.bf16.msra.mxu1 %v12224_v48 }
 0x733   :  { %5492 = vmatprep.subr.bf16.mxu0 %v12227_v6  ;;  %5533 = vmatprep.subr.bf16.mxu1 %v12230_v45 }
 0x736   :  { %v8784_v21 = vpop.eup %8783  ;;  %5493 = vmatpush1.bf16.msra.mxu0 %v12234_v15  ;;  %5534 = vmatpush1.bf16.msra.mxu1 %v12237_v52  ;;  %v12288_v52 = vld [vmem:[#allocation15 + $0x1e4] ss:$16 sps:$4 sm:$0xff]  }
 0x737   :  { %v5121_v16 = vadd.f32 1.0, %v8784_v21  ;;  %5494 = vmatprep.subr.bf16.mxu0 %v12240_v56  ;;  %5535 = vmatprep.subr.bf16.mxu1 %v12243_v10  ;;  %v12249_v21 = vld [vmem:[#allocation15 + $0x68] ss:$16 sps:$4 sm:$0xff]   ;;  %v12255_v56 = vld [vmem:[#allocation15 + $0x4c] ss:$16 sps:$4 sm:$0xff]   ;;  %15228 = vst [vmem:[#allocation97_spill] sm:$0xff] %v12288_v52 }
 0x738   :  { %v8786_v26 = vpop.eup %8785  ;;  %15215 = vst [vmem:[#allocation84_spill] sm:$0xff] %v12249_v21  ;;  %15217 = vst [vmem:[#allocation86_spill] sm:$0xff] %v12255_v56 }
 0x739   :  { %8789 = vrcp.f32 %v5121_v16  ;;  %v5122_v32 = vadd.f32 1.0, %v8786_v26  ;;  %v12258_v16 = vld [vmem:[#allocation15 + $0x40] ss:$16 sps:$4 sm:$0xff]   ;;  %v12264_v26 = vld [vmem:[#allocation15 + $0x24] ss:$16 sps:$4 sm:$0xff]  }
 0x73a   :  { %8791 = vtanh.f32 %v5108_v39  ;;  %5495 = vmatpush1.bf16.msra.mxu0 %v12246_v62  ;;  %5536 = vmatpush1.bf16.msra.mxu1 %v12249_v21  ;;  %15218 = vst [vmem:[#allocation87_spill] sm:$0xff] %v12258_v16  ;;  %v12261_v39 = vld [vmem:[#allocation15 + $0x48] ss:$16 sps:$4 sm:$0xff]   ;;  %15220 = vst [vmem:[#allocation89_spill] sm:$0xff] %v12264_v26 }
 0x73b   :  { %8793 = vrcp.f32 %v5122_v32  ;;  %5496 = vmatprep.subr.bf16.mxu0 %v12252_v29  ;;  %5537 = vmatprep.subr.bf16.mxu1 %v12255_v56  ;;  %15219 = vst [vmem:[#allocation88_spill] sm:$0xff] %v12261_v39  ;;  %v12267_v32 = vld [vmem:[#allocation15 + $0x2c] ss:$16 sps:$4 sm:$0xff]   ;;  %v12270_v29 = vld [vmem:[#allocation15 + $0x20] ss:$16 sps:$4 sm:$0xff]  }
 0x73c   :  { %15221 = vst [vmem:[#allocation90_spill] sm:$0xff] %v12267_v32  ;;  %15222 = vst [vmem:[#allocation91_spill] sm:$0xff] %v12270_v29  ;;  %v12273_v56 = vld [vmem:[#allocation15 + $0x28] ss:$16 sps:$4 sm:$0xff]  }
 0x73d   :  { %15223 = vst [vmem:[#allocation92_spill] sm:$0xff] %v12273_v56 }
 0x73e   :  { %5497 = vmatpush1.bf16.msra.mxu0 %v12258_v16  ;;  %5538 = vmatpush1.bf16.msra.mxu1 %v12261_v39  ;;  %v12276_v16 = vld [vmem:[#allocation15 + $0x4] ss:$16 sps:$4 sm:$0xff]   ;;  %v12279_v39 = vld [vmem:[#allocation15 + $0xc] ss:$16 sps:$4 sm:$0xff]  }
 0x73f   :  { %5498 = vmatprep.subr.bf16.mxu0 %v12264_v26  ;;  %5539 = vmatprep.subr.bf16.mxu1 %v12267_v32  ;;  %15224 = vst [vmem:[#allocation93_spill] sm:$0xff] %v12276_v16  ;;  %15225 = vst [vmem:[#allocation94_spill] sm:$0xff] %v12279_v39  ;;  %v8788_v26 = vpop.eup %8787  ;;  %v12282_v32 = vld [vmem:[#allocation15] ss:$16 sps:$4 sm:$0xff]  }
 0x740   :  { %15226 = vst [vmem:[#allocation95_spill] sm:$0xff] %v12282_v32  ;;  %v5123_v10 = vadd.f32 1.0, %v8788_v26  ;;  %v12303_v26 = vld [vmem:[#allocation15 + $0x1c4] ss:$16 sps:$4 sm:$0xff]  }
 0x741   :  { %15230 = vst [vmem:[#allocation99_spill] sm:$0xff] %v12303_v26 }
 0x742   :  { %5499 = vmatpush1.bf16.msra.mxu0 %v12270_v29  ;;  %5540 = vmatpush1.bf16.msra.mxu1 %v12273_v56  ;;  %v12285_v29 = vld [vmem:[#allocation15 + $0x8] ss:$16 sps:$4 sm:$0xff]   ;;  %8795 = vrcp.f32 %v5123_v10  ;;  %v12319_v10 = vld [vmem:[#allocation15 + $0x1ac] ss:$16 sps:$4 sm:$0xff]  }
 0x743   :  { %5500 = vmatprep.subr.bf16.mxu0 %v12276_v16  ;;  %5541 = vmatprep.subr.bf16.mxu1 %v12279_v39  ;;  %15227 = vst [vmem:[#allocation96_spill] sm:$0xff] %v12285_v29  ;;  %v12291_v16 = vld [vmem:[#allocation15 + $0x1ec] ss:$16 sps:$4 sm:$0xff]   ;;  %15235 = vst [vmem:[#allocation104_spill] sm:$0xff] %v12319_v10 }
 0x746   :  { %v8790_v21 = vpop.eup %8789  ;;  %5501 = vmatpush1.bf16.msra.mxu0 %v12282_v32  ;;  %5542 = vmatpush1.bf16.msra.mxu1 %v12285_v29  ;;  %v12297_v32 = vld [vmem:[#allocation15 + $0x1e0] ss:$16 sps:$4 sm:$0xff]   ;;  %v12300_v29 = vld [vmem:[#allocation15 + $0x1e8] ss:$16 sps:$4 sm:$0xff]  }
 0x747   :  { %v8792_v62 = vpop.eup %8791  ;;  %5502 = vmatprep.subr.bf16.mxu0 %v12288_v52  ;;  %5543 = vmatprep.subr.bf16.mxu1 %v12291_v16  ;;  %15229 = vst [vmem:[#allocation98_spill] sm:$0xff] %v12300_v29  ;;  %v12306_v52 = vld [vmem:[#allocation15 + $0x1cc] ss:$16 sps:$4 sm:$0xff]  }
 0x748   :  { %v8794_v56 = vpop.eup %8793  ;;  %v5132_v15 = vmul.f32 %v8792_v62, %v8790_v21  ;;  %15231 = vst [vmem:[#allocation100_spill] sm:$0xff] %v12306_v52  ;;  %v12322_v62 = vld [vmem:[#allocation15 + $0x1a0] ss:$16 sps:$4 sm:$0xff]   ;;  %v12325_v21 = vld [vmem:[#allocation15 + $0x1a8] ss:$16 sps:$4 sm:$0xff]  }
 0x749   :  { %v5131_v39 = vmul.f32 %v8794_v56, %v11808_v57  ;;  %v12310_v57 = vld [vmem:[#allocation15 + $0x1c0] ss:$16 sps:$4 sm:$0xff]   ;;  %v12316_v56 = vld [vmem:[#allocation15 + $0x1a4] ss:$16 sps:$4 sm:$0xff]   ;;  %15236 = vst [vmem:[#allocation105_spill] sm:$0xff] %v12322_v62  ;;  %15237 = vst [vmem:[#allocation106_spill] sm:$0xff] %v12325_v21 }
 0x74a   :  { %5503 = vmatpush2.bf16.msra.mxu0 %v12297_v32  ;;  %5544 = vmatpush2.bf16.msra.mxu1 %v12300_v29  ;;  %15232 = vst [vmem:[#allocation101_spill] sm:$0xff] %v12310_v57  ;;  %15234 = vst [vmem:[#allocation103_spill] sm:$0xff] %v12316_v56  ;;  %v12361_v29 = vld [vmem:[#allocation15 + $0x148] ss:$16 sps:$4 sm:$0xff]  }
 0x74b   :  { %v12295_v51 = vadd.f32 %v5132_v15, %v5131_v39  ;;  %5504 = vmatprep.subr.bf16.mxu0 %v12303_v26  ;;  %5545 = vmatprep.subr.bf16.mxu1 %v12306_v52  ;;  %v12313_v15 = vld [vmem:[#allocation15 + $0x1c8] ss:$16 sps:$4 sm:$0xff]   ;;  %v12328_v39 = vld [vmem:[#allocation15 + $0x184] ss:$16 sps:$4 sm:$0xff]   ;;  %v12346_v52 = vld [vmem:[#allocation15 + $0x160] ss:$16 sps:$4 sm:$0xff]  }
 0x74c   :  { %15233 = vst [vmem:[#allocation102_spill] sm:$0xff] %v12313_v15  ;;  %15238 = vst [vmem:[#allocation107_spill] sm:$0xff] %v12328_v39  ;;  %v12358_v26 = vld [vmem:[#allocation15 + $0x140] ss:$16 sps:$4 sm:$0xff]  }
 0x74d   :  { %8797 = vtanh.f32 %v12295_v51  ;;  %15245 = vst [vmem:[#allocation114_spill] sm:$0xff] %v12358_v26  ;;  %15246 = vst [vmem:[#allocation115_spill] sm:$0xff] %v12361_v29 }
 0x74e   :  { %5505 = vmatpush2.bf16.msra.mxu0 %v12310_v57  ;;  %5546 = vmatpush2.bf16.msra.mxu1 %v12313_v15  ;;  %v12331_v15 = vld [vmem:[#allocation15 + $0x18c] ss:$16 sps:$4 sm:$0xff]  }
 0x74f   :  { %5506 = vmatprep.subr.bf16.mxu0 %v12316_v56  ;;  %5547 = vmatprep.subr.bf16.mxu1 %v12319_v10  ;;  %15239 = vst [vmem:[#allocation108_spill] sm:$0xff] %v12331_v15  ;;  %v12334_v56 = vld [vmem:[#allocation15 + $0x180] ss:$16 sps:$4 sm:$0xff]   ;;  %v12337_v10 = vld [vmem:[#allocation15 + $0x188] ss:$16 sps:$4 sm:$0xff]  }
 0x750   :  { %15240 = vst [vmem:[#allocation109_spill] sm:$0xff] %v12334_v56  ;;  %15241 = vst [vmem:[#allocation110_spill] sm:$0xff] %v12337_v10 }
 0x752   :  { %5507 = vmatpush2.bf16.msra.mxu0 %v12322_v62  ;;  %5548 = vmatpush2.bf16.msra.mxu1 %v12325_v21  ;;  %v12340_v62 = vld [vmem:[#allocation15 + $0x164] ss:$16 sps:$4 sm:$0xff]   ;;  %v12343_v21 = vld [vmem:[#allocation15 + $0x16c] ss:$16 sps:$4 sm:$0xff]  }
 0x753   :  { %5508 = vmatprep.subr.bf16.mxu0 %v12328_v39  ;;  %5549 = vmatprep.subr.bf16.mxu1 %v12331_v15  ;;  %15242 = vst [vmem:[#allocation111_spill] sm:$0xff] %v12340_v62  ;;  %15243 = vst [vmem:[#allocation112_spill] sm:$0xff] %v12343_v21  ;;  %v8796_v39 = vpop.eup %8795  ;;  %v12349_v15 = vld [vmem:[#allocation15 + $0x168] ss:$16 sps:$4 sm:$0xff]  }
 0x756   :  { %5509 = vmatpush2.bf16.msra.mxu0 %v12334_v56  ;;  %5550 = vmatpush2.bf16.msra.mxu1 %v12337_v10  ;;  %v12352_v10 = vld [vmem:[#allocation15 + $0x144] ss:$16 sps:$4 sm:$0xff]  }
 0x757   :  { %5510 = vmatprep.subr.bf16.mxu0 %v12340_v62  ;;  %5551 = vmatprep.subr.bf16.mxu1 %v12343_v21  ;;  %v12355_v62 = vld [vmem:[#allocation15 + $0x14c] ss:$16 sps:$4 sm:$0xff]  }
 0x758   :  { %15244 = vst [vmem:[#allocation113_spill] sm:$0xff] %v12355_v62 }
 0x75a   :  { %v8798_v57 = vpop.eup %8797  ;;  %5511 = vmatpush2.bf16.msra.mxu0 %v12346_v52  ;;  %5552 = vmatpush2.bf16.msra.mxu1 %v12349_v15 }
 0x75b   :  { %v5135_v56 = vmul.f32 %v8798_v57, %v8796_v39  ;;  %5512 = vmatprep.subr.bf16.mxu0 %v12352_v10  ;;  %5553 = vmatprep.subr.bf16.mxu1 %v12355_v62  ;;  %v12364_v57 = vld [vmem:[#allocation15 + $0x124] ss:$16 sps:$4 sm:$0xff]   ;;  %v12367_v39 = vld [vmem:[#allocation15 + $0x12c] ss:$16 sps:$4 sm:$0xff]   ;;  %v12370_v62 = vld [vmem:[#allocation15 + $0x120] ss:$16 sps:$4 sm:$0xff]  }
 0x75c   :  { %15247 = vst [vmem:[#allocation116_spill] sm:$0xff] %v12364_v57  ;;  %15248 = vst [vmem:[#allocation117_spill] sm:$0xff] %v12367_v39 }
 0x75d   :  { %v5136_v21 = vpack.c.bf16 %v5135_v56, %v5135_v56  ;;  %15249 = vst [vmem:[#allocation118_spill] sm:$0xff] %v12370_v62  ;;  %v12373_v56 = vld [vmem:[#allocation15 + $0x128] ss:$16 sps:$4 sm:$0xff]  }
 0x75e   :  { %5513 = vmatpush2.bf16.msra.mxu0 %v12358_v26  ;;  %5554 = vmatpush2.bf16.msra.mxu1 %v12361_v29  ;;  %15250 = vst [vmem:[#allocation119_spill] sm:$0xff] %v12373_v56  ;;  %v12376_v26 = vld [vmem:[#allocation15 + $0x104] ss:$16 sps:$4 sm:$0xff]  }
 0x75f   :  { %5518 = vmatprep.mubr.bf16.mxu0 %v5136_v21  ;;  %5559 = vmatprep.mubr.bf16.mxu1 %v5136_v21  ;;  %15251 = vst [vmem:[#allocation120_spill] sm:$0xff] %v12376_v26  ;;  %v12379_v21 = vld [vmem:[#allocation15 + $0x10c] ss:$16 sps:$4 sm:$0xff]   ;;  %v15255_v29 = vld [vmem:[#allocation28_spill] sm:$0xff] }
 0x760   :  { %5514 = vmatprep.subr.bf16.mxu0 %v12364_v57  ;;  %5555 = vmatprep.subr.bf16.mxu1 %v12367_v39  ;;  %15252 = vst [vmem:[#allocation121_spill] sm:$0xff] %v12379_v21  ;;  %v12382_v57 = vld [vmem:[#allocation15 + $0x100] ss:$16 sps:$4 sm:$0xff]   ;;  %v12385_v39 = vld [vmem:[#allocation15 + $0x108] ss:$16 sps:$4 sm:$0xff]  }
 0x761   :  { %15253 = vst [vmem:[#allocation122_spill] sm:$0xff] %v12382_v57  ;;  %15254 = vst [vmem:[#allocation123_spill] sm:$0xff] %v12385_v39 }
 0x762   :  { %5515 = vmatpush2.bf16.msra.mxu0 %v12370_v62  ;;  %5556 = vmatpush2.bf16.msra.mxu1 %v12373_v56 }
 0x763   :  { %5516 = vmatprep.subr.bf16.mxu0 %v12376_v26  ;;  %5557 = vmatprep.subr.bf16.mxu1 %v12379_v21 }
 0x766   :  { %5517 = vmatpush2.bf16.msra.mxu0 %v12382_v57  ;;  %5558 = vmatpush2.bf16.msra.mxu1 %v12385_v39 }
 0x767   :  { %5595 = vmatprep.subr.bf16.mxu0 %v11841_v43  ;;  %5636 = vmatprep.subr.bf16.mxu1 %v11844_v1 }
 0x769   :  { %5519 = vmatmul.mubr.bf16.vlgmr.msra.gmra.mxu0 %v12172_v7  ;;  %5560 = vmatmul.mubr.bf16.vlgmr.msra.gmra.mxu1 %v12172_v7  ;;  %v5173_v26 = vpop.f32.mrf.mxu0  ;;  %v5214_v56 = vpop.f32.mrf.mxu1 }
 0x76a   :  { %5596 = vmatpush1.bf16.msra.mxu0 %v11849_v38  ;;  %5637 = vmatpush1.bf16.msra.mxu1 %v11852_v50 }
 0x76b   :  { %v5175_v21 = vpop.f32.mrf.mxu0  ;;  %v5216_v57 = vpop.f32.mrf.mxu1  ;;  %5597 = vmatprep.subr.bf16.mxu0 %v11855_v34  ;;  %5638 = vmatprep.subr.bf16.mxu1 %v11858_v2  ;;  %v15256_v2 = vld [vmem:[#allocation29_spill] sm:$0xff] }
 0x76c   :  { %v5225_v39 = vcombine.low %v5173_v26, %v5175_v21  ;;  %v5226_v43 = vcombine.low %v5214_v56, %v5216_v57  ;;  %5627 = vmatprep.mubr.bf16.mxu0 %v15089_v54  ;;  %5668 = vmatprep.mubr.bf16.mxu1 %v15089_v54  ;;  %v15257_v56 = vld [vmem:[#allocation30_spill] sm:$0xff]  ;;  %v15258_v21 = vld [vmem:[#allocation31_spill] sm:$0xff] }
 0x76d   :  { %v5177_v1 = vpop.f32.mrf.mxu0  ;;  %v5218_v7 = vpop.f32.mrf.mxu1 }
 0x76e   :  { %v5233_v62 = vrot.slane %v5225_v39, %v15090_v12  ;;  %v5240_v38 = vrot.slane %v5226_v43, %v15090_v12  ;;  %5598 = vmatpush1.bf16.msra.mxu0 %v11865_v53  ;;  %5639 = vmatpush1.bf16.msra.mxu1 %v11868_v17  ;;  %v5138_v39 = vld [vmem:[#allocation3 + $0x5] ss:$8 sm:$0xf] }
 0x76f   :  { %v5178_v50 = vpop.f32.mrf.mxu0  ;;  %v5219_v34 = vpop.f32.mrf.mxu1  ;;  %5599 = vmatprep.subr.bf16.mxu0 %v15255_v29  ;;  %5640 = vmatprep.subr.bf16.mxu1 %v15256_v2  ;;  %v15259_v1 = vld [vmem:[#allocation32_spill] sm:$0xff]  ;;  %v15260_v43 = vld [vmem:[#allocation33_spill] sm:$0xff]  ;;  %v15261_v7 = vld [vmem:[#allocation34_spill] sm:$0xff] }
 0x770   :  { %v5241_v26 = vcombine.low %v5233_v62, %v5240_v38  ;;  %v15262_v50 = vld [vmem:[#allocation35_spill] sm:$0xff]  ;;  %v15263_v29 = vld [vmem:[#allocation36_spill] sm:$0xff]  ;;  %v15264_v62 = vld [vmem:[#allocation37_spill] sm:$0xff] }
 0x771   :  { %v15265_v38 = vld [vmem:[#allocation38_spill] sm:$0xff]  ;;  %v15266_v34 = vld [vmem:[#allocation39_spill] sm:$0xff]  ;;  %v15267_v2 = vld [vmem:[#allocation40_spill] sm:$0xff] }
 0x772   :  { %v5248_v57 = vrot.slane %v5241_v26, %v15090_v12  ;;  %5600 = vmatpush1.bf16.msra.mxu0 %v15257_v56  ;;  %5641 = vmatpush1.bf16.msra.mxu1 %v15258_v21  ;;  %v15268_v26 = vld [vmem:[#allocation41_spill] sm:$0xff]  ;;  %v15269_v56 = vld [vmem:[#allocation42_spill] sm:$0xff]  ;;  %v15271_v21 = vld [vmem:[#allocation44_spill] sm:$0xff] }
 0x773   :  { %5601 = vmatprep.subr.bf16.mxu0 %v15259_v1  ;;  %5642 = vmatprep.subr.bf16.mxu1 %v15260_v43  ;;  %v15273_v1 = vld [vmem:[#allocation46_spill] sm:$0xff]  ;;  %v15274_v43 = vld [vmem:[#allocation47_spill] sm:$0xff] }
 0x774   :  { %v5250_v53 = vadd.f32 %v5248_v57, %v5138_v39  ;;  %v15270_v57 = vld [vmem:[#allocation43_spill] sm:$0xff]  ;;  %v15272_v39 = vld [vmem:[#allocation45_spill] sm:$0xff] }
 0x776   :  { %v7777_v17 = vmul.f32 -1.442695, %v5250_v53  ;;  %5602 = vmatpush1.bf16.msra.mxu0 %v15261_v7  ;;  %5643 = vmatpush1.bf16.msra.mxu1 %v15262_v50  ;;  %v15276_v7 = vld [vmem:[#allocation49_spill] sm:$0xff] }
 0x777   :  { %5603 = vmatprep.subr.bf16.mxu0 %v15263_v29  ;;  %5644 = vmatprep.subr.bf16.mxu1 %v15264_v62  ;;  %v5258_v62 = vrot.slane %v5250_v53, 3 }
 0x778   :  { %8799 = vpow2.f32 %v7777_v17  ;;  %v15275_v17 = vld [vmem:[#allocation48_spill] sm:$0xff] }
 0x77a   :  { %5604 = vmatpush1.bf16.msra.mxu0 %v15265_v38  ;;  %5645 = vmatpush1.bf16.msra.mxu1 %v15266_v34  ;;  %v15277_v38 = vld [vmem:[#allocation50_spill] sm:$0xff]  ;;  %v15278_v34 = vld [vmem:[#allocation51_spill] sm:$0xff] }
 0x77b   :  { %5605 = vmatprep.subr.bf16.mxu0 %v15267_v2  ;;  %5646 = vmatprep.subr.bf16.mxu1 %v15268_v26  ;;  %v15279_v2 = vld [vmem:[#allocation52_spill] sm:$0xff]  ;;  %v15280_v26 = vld [vmem:[#allocation53_spill] sm:$0xff] }
 0x77e   :  { %5606 = vmatpush1.bf16.msra.mxu0 %v15269_v56  ;;  %5647 = vmatpush1.bf16.msra.mxu1 %v15270_v57 }
 0x77f   :  { %5607 = vmatprep.subr.bf16.mxu0 %v15271_v21  ;;  %5648 = vmatprep.subr.bf16.mxu1 %v15272_v39 }
 0x782   :  { %5608 = vmatpush1.bf16.msra.mxu0 %v15273_v1  ;;  %5649 = vmatpush1.bf16.msra.mxu1 %v15274_v43 }
 0x783   :  { %5609 = vmatprep.subr.bf16.mxu0 %v15275_v17  ;;  %5650 = vmatprep.subr.bf16.mxu1 %v15276_v7 }
 0x785   :  { %v8800_v50 = vpop.eup %8799 }
 0x786   :  { %v5254_v29 = vadd.f32 1.0, %v8800_v50  ;;  %5610 = vmatpush1.bf16.msra.mxu0 %v15277_v38  ;;  %5651 = vmatpush1.bf16.msra.mxu1 %v15278_v34 }
 0x787   :  { %5728 = vmatprep.subr.bf16.mxu0 %v15279_v2  ;;  %5769 = vmatprep.subr.bf16.mxu1 %v15280_v26 }
 0x788   :  { %8801 = vrcp.f32 %v5254_v29 }
 0x789   :  { %8803 = vtanh.f32 %v5258_v62 }
 0x795   :  { %v8802_v56 = vpop.eup %8801 }
 0x796   :  { %v5262_v57 = vrot.slane %v8802_v56, 1  ;;  %v8804_v21 = vpop.eup %8803  ;;  %v5268_v53 = vrot.slane %v8802_v56, 2 }
 0x797   :  { %v5265_v39 = vmul.f32 %v8804_v21, %v8802_v56  ;;  %v15281_v56 = vld [vmem:[#allocation54_spill] sm:$0xff] }
 0x798   :  { %v5264_v1 = vmul.f32 %v5262_v57, %v11951_v0 }
 0x79a   :  { %v12430_v43 = vadd.f32 %v5265_v39, %v5264_v1  ;;  %v15282_v1 = vld [vmem:[#allocation55_spill] sm:$0xff] }
 0x79c   :  { %8805 = vtanh.f32 %v12430_v43 }
 0x7a9   :  { %v8806_v17 = vpop.eup %8805  ;;  %v5306_v7 = vpop.f32.mrf.mxu0 }
 0x7aa   :  { %v5347_v50 = vpop.f32.mrf.mxu1  ;;  %v5307_v38 = vadd.f32 %v5306_v7, %v10537_v3  ;;  %v5270_v34 = vmul.f32 %v8806_v17, %v5268_v53  ;;  %v15283_v53 = vld [vmem:[#allocation56_spill] sm:$0xff]  ;;  %v15284_v17 = vld [vmem:[#allocation57_spill] sm:$0xff]  ;;  %v15287_v7 = vld [vmem:[#allocation71_spill] sm:$0xff] }
 0x7ab   :  { %v5308_v2 = vpop.f32.mrf.mxu0 }
 0x7ac   :  { %v5349_v29 = vpop.f32.mrf.mxu1  ;;  %v7778_v62 = vmul.f32 -1.442695, %v5307_v38  ;;  %v5309_v26 = vadd.f32 %v5308_v2, %v10540_v4  ;;  %v12435_v54 = vpack.c.bf16 %v5270_v34, %v5270_v34  ;;  %v15290_v2 = vld [vmem:[#allocation62_spill] sm:$0xff] }
 0x7ad   :  { %v5310_v12 = vpop.f32.mrf.mxu0 }
 0x7ae   :  { %v5351_v21 = vpop.f32.mrf.mxu1  ;;  %8807 = vpow2.f32 %v7778_v62  ;;  %v7779_v0 = vmul.f32 -1.442695, %v5309_v26  ;;  %5628 = vmatmul.mubr.bf16.vlgmr.msra.gmra.mxu0 %v12435_v54  ;;  %5669 = vmatmul.mubr.bf16.vlgmr.msra.gmra.mxu1 %v12435_v54  ;;  %v5348_v12 = vadd.f32 %v5347_v50, %v10551_v24  ;;  %v15289_v50 = vld [vmem:[#allocation61_spill] sm:$0xff]  ;;  %v15291_v62 = vld [vmem:[#allocation63_spill] sm:$0xff] }
 0x7af   :  { %v5311_v57 = vpop.f32.mrf.mxu0  ;;  %5729 = vmatpush1.bf16.msra.mxu0 %v11960_v23  ;;  %5770 = vmatpush1.bf16.msra.mxu1 %v11963_v37  ;;  %v15285_v37 = vld [vmem:[#allocation58_spill] sm:$0xff]  ;;  %v15292_v21 = vld [vmem:[#allocation64_spill] sm:$0xff] }
 0x7b0   :  { %v5352_v39 = vpop.f32.mrf.mxu1  ;;  %8809 = vpow2.f32 %v7779_v0  ;;  %5730 = vmatprep.subr.bf16.mxu0 %v11966_v41  ;;  %5771 = vmatprep.subr.bf16.mxu1 %v11969_v30  ;;  %v7780_v23 = vmul.f32 -1.442695, %v5348_v12  ;;  %v15286_v41 = vld [vmem:[#allocation59_spill] sm:$0xff]  ;;  %v15293_v0 = vld [vmem:[#allocation65_spill] sm:$0xff] }
 0x7b1   :  { %v15295_v57 = vld [vmem:[#allocation67_spill] sm:$0xff]  ;;  %v15296_v39 = vld [vmem:[#allocation72_spill] sm:$0xff]  ;;  %v15297_v12 = vld [vmem:[#allocation73_spill] sm:$0xff] }
 0x7b2   :  { %8811 = vpow2.f32 %v7780_v23  ;;  %v15302_v23 = vld [vmem:[#allocation78_spill] sm:$0xff] }
 0x7b3   :  { %5731 = vmatpush1.bf16.msra.mxu0 %v11972_v44  ;;  %5772 = vmatpush1.bf16.msra.mxu1 %v11975_v61  ;;  %v5350_v44 = vadd.f32 %v5349_v29, %v15287_v7  ;;  %v15288_v61 = vld [vmem:[#allocation60_spill] sm:$0xff]  ;;  %v15294_v29 = vld [vmem:[#allocation66_spill] sm:$0xff] }
 0x7b4   :  { %5732 = vmatprep.subr.bf16.mxu0 %v15281_v56  ;;  %5773 = vmatprep.subr.bf16.mxu1 %v15282_v1  ;;  %v15298_v56 = vld [vmem:[#allocation74_spill] sm:$0xff]  ;;  %v15299_v1 = vld [vmem:[#allocation75_spill] sm:$0xff] }
 0x7b7   :  { %5733 = vmatpush1.bf16.msra.mxu0 %v15283_v53  ;;  %5774 = vmatpush1.bf16.msra.mxu1 %v15284_v17  ;;  %v15300_v53 = vld [vmem:[#allocation76_spill] sm:$0xff]  ;;  %v15301_v17 = vld [vmem:[#allocation77_spill] sm:$0xff] }
 0x7b8   :  { %5734 = vmatprep.subr.bf16.mxu0 %v15285_v37  ;;  %5775 = vmatprep.subr.bf16.mxu1 %v15286_v41  ;;  %v15303_v37 = vld [vmem:[#allocation152_spill] sm:$0xff] }
 0x7bb   :  { %v8808_v30 = vpop.eup %8807  ;;  %5735 = vmatpush1.bf16.msra.mxu0 %v15288_v61  ;;  %5776 = vmatpush1.bf16.msra.mxu1 %v15289_v50  ;;  %v15305_v61 = vld [vmem:[#allocation154_spill] sm:$0xff] }
 0x7bc   :  { %v5363_v38 = vadd.f32 1.0, %v8808_v30  ;;  %5736 = vmatprep.subr.bf16.mxu0 %v15290_v2  ;;  %5777 = vmatprep.subr.bf16.mxu1 %v15291_v62  ;;  %v15306_v2 = vld [vmem:[#allocation155_spill] sm:$0xff] }
 0x7bd   :  { %v8810_v34 = vpop.eup %8809 }
 0x7be   :  { %8813 = vrcp.f32 %v5363_v38  ;;  %v5364_v26 = vadd.f32 1.0, %v8810_v34  ;;  %v15304_v38 = vld [vmem:[#allocation153_spill] sm:$0xff] }
 0x7bf   :  { %8815 = vtanh.f32 %v5350_v44  ;;  %5737 = vmatpush1.bf16.msra.mxu0 %v15292_v21  ;;  %5778 = vmatpush1.bf16.msra.mxu1 %v15293_v0  ;;  %v8812_v41 = vpop.eup %8811  ;;  %v12507_v0 = vld [vmem:[#allocation12 + $0x164] ss:$16 sps:$4 sm:$0xff]  }
 0x7c0   :  { %8817 = vrcp.f32 %v5364_v26  ;;  %5738 = vmatprep.subr.bf16.mxu0 %v15294_v29  ;;  %5779 = vmatprep.subr.bf16.mxu1 %v15295_v57  ;;  %v5365_v34 = vadd.f32 1.0, %v8812_v41  ;;  %v12510_v29 = vld [vmem:[#allocation12 + $0x16c] ss:$16 sps:$4 sm:$0xff]   ;;  %v12530_v41 = vld [vmem:[#allocation12 + $0x148] ss:$16 sps:$4 sm:$0xff]  }
 0x7c1   :  { %15307 = vst [vmem:[#allocation124_spill] sm:$0xff] %v12530_v41 }
 0x7c2   :  { %8819 = vrcp.f32 %v5365_v34 }
 0x7c3   :  { %5739 = vmatpush1.bf16.msra.mxu0 %v15296_v39  ;;  %5780 = vmatpush1.bf16.msra.mxu1 %v15297_v12  ;;  %v12513_v12 = vld [vmem:[#allocation12 + $0x160] ss:$16 sps:$4 sm:$0xff]  }
 0x7c4   :  { %5740 = vmatprep.subr.bf16.mxu0 %v15298_v56  ;;  %5781 = vmatprep.subr.bf16.mxu1 %v15299_v1  ;;  %v12516_v56 = vld [vmem:[#allocation12 + $0x168] ss:$16 sps:$4 sm:$0xff]  }
 0x7c7   :  { %5741 = vmatpush1.bf16.msra.mxu0 %v15300_v53  ;;  %5782 = vmatpush1.bf16.msra.mxu1 %v15301_v17  ;;  %v12519_v53 = vld [vmem:[#allocation12 + $0x144] ss:$16 sps:$4 sm:$0xff]   ;;  %v12522_v17 = vld [vmem:[#allocation12 + $0x14c] ss:$16 sps:$4 sm:$0xff]  }
 0x7c8   :  { %5742 = vmatprep.subr.bf16.mxu0 %v15302_v23  ;;  %5783 = vmatprep.subr.bf16.mxu1 %v15303_v37  ;;  %v12527_v37 = vld [vmem:[#allocation12 + $0x140] ss:$16 sps:$4 sm:$0xff]  }
 0x7cb   :  { %v8814_v30 = vpop.eup %8813  ;;  %5743 = vmatpush1.bf16.msra.mxu0 %v15304_v38  ;;  %5784 = vmatpush1.bf16.msra.mxu1 %v15305_v61  ;;  %v12541_v38 = vld [vmem:[#allocation12 + $0x120] ss:$16 sps:$4 sm:$0xff]   ;;  %v12544_v61 = vld [vmem:[#allocation12 + $0x128] ss:$16 sps:$4 sm:$0xff]  }
 0x7cc   :  { %v8816_v44 = vpop.eup %8815  ;;  %5744 = vmatprep.subr.bf16.mxu0 %v15306_v2  ;;  %5785 = vmatprep.subr.bf16.mxu1 %v12055_v27  ;;  %v12483_v27 = vld [vmem:[#allocation12 + $0x1a4] ss:$16 sps:$4 sm:$0xff]   ;;  %15310 = vst [vmem:[#allocation127_spill] sm:$0xff] %v12541_v38  ;;  %15311 = vst [vmem:[#allocation128_spill] sm:$0xff] %v12544_v61 }
 0x7cd   :  { %v8818_v50 = vpop.eup %8817  ;;  %v5374_v26 = vmul.f32 %v8816_v44, %v8814_v30  ;;  %v12535_v30 = vld [vmem:[#allocation12 + $0x124] ss:$16 sps:$4 sm:$0xff]   ;;  %v12538_v44 = vld [vmem:[#allocation12 + $0x12c] ss:$16 sps:$4 sm:$0xff]  }
 0x7ce   :  { %v5373_v62 = vmul.f32 %v8818_v50, %v12059_v60  ;;  %v12486_v60 = vld [vmem:[#allocation12 + $0x1ac] ss:$16 sps:$4 sm:$0xff]   ;;  %15308 = vst [vmem:[#allocation125_spill] sm:$0xff] %v12535_v30  ;;  %15309 = vst [vmem:[#allocation126_spill] sm:$0xff] %v12538_v44  ;;  %v12547_v2 = vld [vmem:[#allocation12 + $0x104] ss:$16 sps:$4 sm:$0xff]  }
 0x7cf   :  { %5745 = vmatpush2.bf16.msra.mxu0 %v12061_v14  ;;  %5786 = vmatpush2.bf16.msra.mxu1 %v12064_v18  ;;  %v12489_v18 = vld [vmem:[#allocation12 + $0x1a0] ss:$16 sps:$4 sm:$0xff]   ;;  %v12492_v14 = vld [vmem:[#allocation12 + $0x1a8] ss:$16 sps:$4 sm:$0xff]   ;;  %v8820_v57 = vpop.eup %8819  ;;  %15312 = vst [vmem:[#allocation129_spill] sm:$0xff] %v12547_v2 }
 0x7d0   :  { %v12474_v21 = vadd.f32 %v5374_v26, %v5373_v62  ;;  %5746 = vmatprep.subr.bf16.mxu0 %v12067_v58  ;;  %5787 = vmatprep.subr.bf16.mxu1 %v12070_v13  ;;  %v12495_v13 = vld [vmem:[#allocation12 + $0x184] ss:$16 sps:$4 sm:$0xff]   ;;  %v12498_v58 = vld [vmem:[#allocation12 + $0x18c] ss:$16 sps:$4 sm:$0xff]  }
 0x7d1   :  { %v12550_v62 = vld [vmem:[#allocation12 + $0x10c] ss:$16 sps:$4 sm:$0xff]  }
 0x7d2   :  { %8821 = vtanh.f32 %v12474_v21 }
 0x7d3   :  { %5747 = vmatpush2.bf16.msra.mxu0 %v12074_v28  ;;  %5788 = vmatpush2.bf16.msra.mxu1 %v12077_v20  ;;  %v12501_v28 = vld [vmem:[#allocation12 + $0x180] ss:$16 sps:$4 sm:$0xff]   ;;  %v12504_v20 = vld [vmem:[#allocation12 + $0x188] ss:$16 sps:$4 sm:$0xff]  }
 0x7d4   :  { %5748 = vmatprep.subr.bf16.mxu0 %v12483_v27  ;;  %5789 = vmatprep.subr.bf16.mxu1 %v12486_v60 }
 0x7d7   :  { %5749 = vmatpush2.bf16.msra.mxu0 %v12489_v18  ;;  %5790 = vmatpush2.bf16.msra.mxu1 %v12492_v14 }
 0x7d8   :  { %5750 = vmatprep.subr.bf16.mxu0 %v12495_v13  ;;  %5791 = vmatprep.subr.bf16.mxu1 %v12498_v58 }
 0x7db   :  { %5751 = vmatpush2.bf16.msra.mxu0 %v12501_v28  ;;  %5792 = vmatpush2.bf16.msra.mxu1 %v12504_v20 }
 0x7dc   :  { %5752 = vmatprep.subr.bf16.mxu0 %v12507_v0  ;;  %5793 = vmatprep.subr.bf16.mxu1 %v12510_v29 }
 0x7df   :  { %v8822_v39 = vpop.eup %8821  ;;  %5753 = vmatpush2.bf16.msra.mxu0 %v12513_v12  ;;  %5794 = vmatpush2.bf16.msra.mxu1 %v12516_v56 }
 0x7e0   :  { %v5377_v1 = vmul.f32 %v8822_v39, %v8820_v57  ;;  %5754 = vmatprep.subr.bf16.mxu0 %v12519_v53  ;;  %5795 = vmatprep.subr.bf16.mxu1 %v12522_v17 }
 0x7e2   :  { %v12525_v23 = vpack.c.bf16 %v5377_v1, %v5377_v1 }
 0x7e3   :  { %5755 = vmatpush2.bf16.msra.mxu0 %v12527_v37  ;;  %5796 = vmatpush2.bf16.msra.mxu1 %v12530_v41  ;;  %v12561_v41 = vld [vmem:[#allocation13 + $0xe4] ss:$16 sps:$4 sm:$0xff]  }
 0x7e4   :  { %5760 = vmatprep.mubr.bf16.mxu0 %v12525_v23  ;;  %5801 = vmatprep.mubr.bf16.mxu1 %v12525_v23 }
 0x7e5   :  { %5756 = vmatprep.subr.bf16.mxu0 %v12535_v30  ;;  %5797 = vmatprep.subr.bf16.mxu1 %v12538_v44  ;;  %v12555_v44 = vld [vmem:[#allocation12 + $0x100] ss:$16 sps:$4 sm:$0xff]  }
 0x7e6   :  { %15313 = vst [vmem:[#allocation130_spill] sm:$0xff] %v12555_v44 }
 0x7e7   :  { %5757 = vmatpush2.bf16.msra.mxu0 %v12541_v38  ;;  %5798 = vmatpush2.bf16.msra.mxu1 %v12544_v61  ;;  %v12558_v61 = vld [vmem:[#allocation12 + $0x108] ss:$16 sps:$4 sm:$0xff]  }
 0x7e8   :  { %5758 = vmatprep.subr.bf16.mxu0 %v12547_v2  ;;  %5799 = vmatprep.subr.bf16.mxu1 %v12550_v62  ;;  %15314 = vst [vmem:[#allocation131_spill] sm:$0xff] %v12558_v61 }
 0x7e9   :  { %v5413_v50 = vpop.f32.mrf.mxu0  ;;  %v5454_v34 = vpop.f32.mrf.mxu1 }
 0x7ea   :  { %v5414_v26 = vadd.f32 %v5413_v50, %v11084_v11  ;;  %v12564_v50 = vld [vmem:[#allocation13 + $0xec] ss:$16 sps:$4 sm:$0xff]  }
 0x7eb   :  { %v5415_v57 = vpop.f32.mrf.mxu0  ;;  %v5456_v39 = vpop.f32.mrf.mxu1  ;;  %5759 = vmatpush2.bf16.msra.mxu0 %v12555_v44  ;;  %5800 = vmatpush2.bf16.msra.mxu1 %v12558_v61  ;;  %v12569_v61 = vld [vmem:[#allocation13 + $0xe0] ss:$16 sps:$4 sm:$0xff]  }
 0x7ec   :  { %v7781_v1 = vmul.f32 -1.442695, %v5414_v26  ;;  %v5416_v38 = vadd.f32 %v5415_v57, %v11089_v46  ;;  %5835 = vmatprep.subr.bf16.mxu0 %v12561_v41  ;;  %5876 = vmatprep.subr.bf16.mxu1 %v12564_v50 }
 0x7ed   :  { %v5417_v2 = vpop.f32.mrf.mxu0  ;;  %v5458_v30 = vpop.f32.mrf.mxu1 }
 0x7ee   :  { %8823 = vpow2.f32 %v7781_v1  ;;  %v7782_v26 = vmul.f32 -1.442695, %v5416_v38  ;;  %5761 = vmatmul.mubr.bf16.vlgmr.msra.gmra.mxu0 %v12435_v54  ;;  %5802 = vmatmul.mubr.bf16.vlgmr.msra.gmra.mxu1 %v12435_v54  ;;  %v12572_v30 = vld [vmem:[#allocation13 + $0xe8] ss:$16 sps:$4 sm:$0xff]   ;;  %v12575_v2 = vld [vmem:[#allocation13 + $0xc4] ss:$16 sps:$4 sm:$0xff]   ;;  %v5455_v1 = vadd.f32 %v5454_v34, %v15154_v40 }
 0x7ef   :  { %v5418_v57 = vpop.f32.mrf.mxu0  ;;  %v5459_v44 = vpop.f32.mrf.mxu1  ;;  %5836 = vmatpush1.bf16.msra.mxu0 %v12569_v61  ;;  %15315 = vst [vmem:[#allocation132_spill] sm:$0xff] %v12572_v30  ;;  %5877 = vmatpush1.bf16.msra.mxu1 %v12572_v30  ;;  %15316 = vst [vmem:[#allocation133_spill] sm:$0xff] %v12575_v2  ;;  %v12578_v38 = vld [vmem:[#allocation13 + $0xcc] ss:$16 sps:$4 sm:$0xff]   ;;  %v12581_v54 = vld [vmem:[#allocation13 + $0xc0] ss:$16 sps:$4 sm:$0xff]  }
 0x7f0   :  { %8825 = vpow2.f32 %v7782_v26  ;;  %5837 = vmatprep.subr.bf16.mxu0 %v12575_v2  ;;  %15317 = vst [vmem:[#allocation134_spill] sm:$0xff] %v12578_v38  ;;  %5878 = vmatprep.subr.bf16.mxu1 %v12578_v38  ;;  %15318 = vst [vmem:[#allocation135_spill] sm:$0xff] %v12581_v54  ;;  %v12584_v44 = vld [vmem:[#allocation13 + $0xc8] ss:$16 sps:$4 sm:$0xff]   ;;  %v12588_v26 = vld [vmem:[#allocation13 + $0xa4] ss:$16 sps:$4 sm:$0xff]  }
 0x7f1   :  { %15319 = vst [vmem:[#allocation136_spill] sm:$0xff] %v12584_v44  ;;  %15320 = vst [vmem:[#allocation137_spill] sm:$0xff] %v12588_v26  ;;  %v12591_v57 = vld [vmem:[#allocation13 + $0xac] ss:$16 sps:$4 sm:$0xff]   ;;  %v12594_v2 = vld [vmem:[#allocation13 + $0xa0] ss:$16 sps:$4 sm:$0xff]  }
 0x7f2   :  { %15321 = vst [vmem:[#allocation138_spill] sm:$0xff] %v12591_v57  ;;  %15322 = vst [vmem:[#allocation139_spill] sm:$0xff] %v12594_v2  ;;  %v12597_v38 = vld [vmem:[#allocation13 + $0xa8] ss:$16 sps:$4 sm:$0xff]   ;;  %v12603_v34 = vld [vmem:[#allocation13 + $0x8c] ss:$16 sps:$4 sm:$0xff]  }
 0x7f3   :  { %5838 = vmatpush1.bf16.msra.mxu0 %v12581_v54  ;;  %5879 = vmatpush1.bf16.msra.mxu1 %v12584_v44  ;;  %15323 = vst [vmem:[#allocation141_spill] sm:$0xff] %v12597_v38  ;;  %v7783_v54 = vmul.f32 -1.442695, %v5455_v1  ;;  %v12600_v44 = vld [vmem:[#allocation13 + $0x84] ss:$16 sps:$4 sm:$0xff]   ;;  %15325 = vst [vmem:[#allocation147_spill] sm:$0xff] %v12603_v34 }
 0x7f4   :  { %5839 = vmatprep.subr.bf16.mxu0 %v12588_v26  ;;  %5880 = vmatprep.subr.bf16.mxu1 %v12591_v57  ;;  %15324 = vst [vmem:[#allocation142_spill] sm:$0xff] %v12600_v44  ;;  %v5457_v57 = vadd.f32 %v5456_v39, %v15161_v19  ;;  %v12607_v30 = vld [vmem:[#allocation13 + $0x80] ss:$16 sps:$4 sm:$0xff]  }
 0x7f5   :  { %15326 = vst [vmem:[#allocation148_spill] sm:$0xff] %v12607_v30  ;;  %8827 = vpow2.f32 %v7783_v54  ;;  %v12625_v54 = vld [vmem:[#allocation13 + $0x44] ss:$16 sps:$4 sm:$0xff]  }
 0x7f6   :  { %15332 = vst [vmem:[#allocation32_spill] sm:$0xff] %v12625_v54 }
 0x7f7   :  { %5840 = vmatpush1.bf16.msra.mxu0 %v12594_v2  ;;  %5881 = vmatpush1.bf16.msra.mxu1 %v12597_v38  ;;  %v12610_v2 = vld [vmem:[#allocation13 + $0x88] ss:$16 sps:$4 sm:$0xff]   ;;  %v12613_v38 = vld [vmem:[#allocation13 + $0x64] ss:$16 sps:$4 sm:$0xff]  }
 0x7f8   :  { %5841 = vmatprep.subr.bf16.mxu0 %v12600_v44  ;;  %5882 = vmatprep.subr.bf16.mxu1 %v12603_v34  ;;  %15327 = vst [vmem:[#allocation149_spill] sm:$0xff] %v12610_v2  ;;  %15328 = vst [vmem:[#allocation28_spill] sm:$0xff] %v12613_v38  ;;  %v12616_v44 = vld [vmem:[#allocation13 + $0x6c] ss:$16 sps:$4 sm:$0xff]  }
 0x7f9   :  { %15329 = vst [vmem:[#allocation29_spill] sm:$0xff] %v12616_v44 }
 0x7fb   :  { %v8824_v26 = vpop.eup %8823  ;;  %5842 = vmatpush1.bf16.msra.mxu0 %v12607_v30  ;;  %5883 = vmatpush1.bf16.msra.mxu1 %v12610_v2  ;;  %v12622_v30 = vld [vmem:[#allocation13 + $0x68] ss:$16 sps:$4 sm:$0xff]   ;;  %v12661_v2 = vld [vmem:[#allocation13 + $0x1e4] ss:$16 sps:$4 sm:$0xff]  }
 0x7fc   :  { %v5470_v40 = vadd.f32 1.0, %v8824_v26  ;;  %5843 = vmatprep.subr.bf16.mxu0 %v12613_v38  ;;  %5884 = vmatprep.subr.bf16.mxu1 %v12616_v44  ;;  %v12619_v26 = vld [vmem:[#allocation13 + $0x60] ss:$16 sps:$4 sm:$0xff]   ;;  %15331 = vst [vmem:[#allocation31_spill] sm:$0xff] %v12622_v30  ;;  %v12628_v38 = vld [vmem:[#allocation13 + $0x4c] ss:$16 sps:$4 sm:$0xff]  }
 0x7fd   :  { %v8826_v1 = vpop.eup %8825  ;;  %15330 = vst [vmem:[#allocation30_spill] sm:$0xff] %v12619_v26  ;;  %15333 = vst [vmem:[#allocation33_spill] sm:$0xff] %v12628_v38 }
 0x7fe   :  { %8829 = vrcp.f32 %v5470_v40  ;;  %v5471_v39 = vadd.f32 1.0, %v8826_v1  ;;  %v12631_v40 = vld [vmem:[#allocation13 + $0x40] ss:$16 sps:$4 sm:$0xff]   ;;  %v12637_v1 = vld [vmem:[#allocation13 + $0x24] ss:$16 sps:$4 sm:$0xff]   ;;  %15344 = vst [vmem:[#allocation44_spill] sm:$0xff] %v12661_v2 }
 0x7ff   :  { %8831 = vtanh.f32 %v5457_v57  ;;  %5844 = vmatpush1.bf16.msra.mxu0 %v12619_v26  ;;  %5885 = vmatpush1.bf16.msra.mxu1 %v12622_v30  ;;  %15334 = vst [vmem:[#allocation34_spill] sm:$0xff] %v12631_v40  ;;  %v12634_v57 = vld [vmem:[#allocation13 + $0x48] ss:$16 sps:$4 sm:$0xff]   ;;  %15336 = vst [vmem:[#allocation36_spill] sm:$0xff] %v12637_v1 }
 0x800   :  { %8833 = vrcp.f32 %v5471_v39  ;;  %5845 = vmatprep.subr.bf16.mxu0 %v12625_v54  ;;  %5886 = vmatprep.subr.bf16.mxu1 %v12628_v38  ;;  %15335 = vst [vmem:[#allocation35_spill] sm:$0xff] %v12634_v57  ;;  %v12640_v39 = vld [vmem:[#allocation13 + $0x2c] ss:$16 sps:$4 sm:$0xff]   ;;  %v12643_v54 = vld [vmem:[#allocation13 + $0x20] ss:$16 sps:$4 sm:$0xff]  }
 0x801   :  { %15337 = vst [vmem:[#allocation37_spill] sm:$0xff] %v12640_v39  ;;  %15338 = vst [vmem:[#allocation38_spill] sm:$0xff] %v12643_v54  ;;  %v12646_v38 = vld [vmem:[#allocation13 + $0x28] ss:$16 sps:$4 sm:$0xff]  }
 0x802   :  { %15339 = vst [vmem:[#allocation39_spill] sm:$0xff] %v12646_v38 }
 0x803   :  { %5846 = vmatpush1.bf16.msra.mxu0 %v12631_v40  ;;  %5887 = vmatpush1.bf16.msra.mxu1 %v12634_v57  ;;  %v12649_v40 = vld [vmem:[#allocation13 + $0x4] ss:$16 sps:$4 sm:$0xff]   ;;  %v12652_v57 = vld [vmem:[#allocation13 + $0xc] ss:$16 sps:$4 sm:$0xff]  }
 0x804   :  { %5847 = vmatprep.subr.bf16.mxu0 %v12637_v1  ;;  %5888 = vmatprep.subr.bf16.mxu1 %v12640_v39  ;;  %15340 = vst [vmem:[#allocation40_spill] sm:$0xff] %v12649_v40  ;;  %15341 = vst [vmem:[#allocation41_spill] sm:$0xff] %v12652_v57  ;;  %v8828_v1 = vpop.eup %8827  ;;  %v12655_v39 = vld [vmem:[#allocation13] ss:$16 sps:$4 sm:$0xff]  }
 0x805   :  { %15342 = vst [vmem:[#allocation42_spill] sm:$0xff] %v12655_v39  ;;  %v5472_v44 = vadd.f32 1.0, %v8828_v1  ;;  %v12676_v1 = vld [vmem:[#allocation13 + $0x1c4] ss:$16 sps:$4 sm:$0xff]  }
 0x806   :  { %15349 = vst [vmem:[#allocation49_spill] sm:$0xff] %v12676_v1 }
 0x807   :  { %5848 = vmatpush1.bf16.msra.mxu0 %v12643_v54  ;;  %5889 = vmatpush1.bf16.msra.mxu1 %v12646_v38  ;;  %v12658_v54 = vld [vmem:[#allocation13 + $0x8] ss:$16 sps:$4 sm:$0xff]   ;;  %8835 = vrcp.f32 %v5472_v44  ;;  %v12695_v44 = vld [vmem:[#allocation13 + $0x1a0] ss:$16 sps:$4 sm:$0xff]  }
 0x808   :  { %5849 = vmatprep.subr.bf16.mxu0 %v12649_v40  ;;  %5890 = vmatprep.subr.bf16.mxu1 %v12652_v57  ;;  %15343 = vst [vmem:[#allocation43_spill] sm:$0xff] %v12658_v54  ;;  %v12664_v40 = vld [vmem:[#allocation13 + $0x1ec] ss:$16 sps:$4 sm:$0xff]   ;;  %15355 = vst [vmem:[#allocation55_spill] sm:$0xff] %v12695_v44 }
 0x809   :  { %15345 = vst [vmem:[#allocation45_spill] sm:$0xff] %v12664_v40 }
 0x80b   :  { %v8830_v30 = vpop.eup %8829  ;;  %5850 = vmatpush1.bf16.msra.mxu0 %v12655_v39  ;;  %5891 = vmatpush1.bf16.msra.mxu1 %v12658_v54  ;;  %v12670_v39 = vld [vmem:[#allocation13 + $0x1e0] ss:$16 sps:$4 sm:$0xff]   ;;  %v12673_v54 = vld [vmem:[#allocation13 + $0x1e8] ss:$16 sps:$4 sm:$0xff]  }
 0x80c   :  { %v8832_v26 = vpop.eup %8831  ;;  %5851 = vmatprep.subr.bf16.mxu0 %v12661_v2  ;;  %5892 = vmatprep.subr.bf16.mxu1 %v12664_v40  ;;  %15347 = vst [vmem:[#allocation47_spill] sm:$0xff] %v12670_v39  ;;  %15348 = vst [vmem:[#allocation48_spill] sm:$0xff] %v12673_v54  ;;  %v12679_v2 = vld [vmem:[#allocation13 + $0x1cc] ss:$16 sps:$4 sm:$0xff]  }
 0x80d   :  { %v8834_v38 = vpop.eup %8833  ;;  %v5481_v19 = vmul.f32 %v8832_v26, %v8830_v30  ;;  %15350 = vst [vmem:[#allocation50_spill] sm:$0xff] %v12679_v2  ;;  %v12689_v30 = vld [vmem:[#allocation13 + $0x1a4] ss:$16 sps:$4 sm:$0xff]   ;;  %v12698_v26 = vld [vmem:[#allocation13 + $0x1a8] ss:$16 sps:$4 sm:$0xff]  }
 0x80e   :  { %v5480_v57 = vmul.f32 %v8834_v38, %v12149_v47  ;;  %v12686_v47 = vld [vmem:[#allocation13 + $0x1c8] ss:$16 sps:$4 sm:$0xff]   ;;  %15353 = vst [vmem:[#allocation53_spill] sm:$0xff] %v12689_v30  ;;  %v12692_v38 = vld [vmem:[#allocation13 + $0x1ac] ss:$16 sps:$4 sm:$0xff]   ;;  %15356 = vst [vmem:[#allocation56_spill] sm:$0xff] %v12698_v26 }
 0x80f   :  { %5852 = vmatpush2.bf16.msra.mxu0 %v12670_v39  ;;  %5893 = vmatpush2.bf16.msra.mxu1 %v12673_v54  ;;  %15352 = vst [vmem:[#allocation52_spill] sm:$0xff] %v12686_v47  ;;  %15354 = vst [vmem:[#allocation54_spill] sm:$0xff] %v12692_v38 }
 0x810   :  { %v12668_v34 = vadd.f32 %v5481_v19, %v5480_v57  ;;  %5853 = vmatprep.subr.bf16.mxu0 %v12676_v1  ;;  %5894 = vmatprep.subr.bf16.mxu1 %v12679_v2  ;;  %v12683_v19 = vld [vmem:[#allocation13 + $0x1c0] ss:$16 sps:$4 sm:$0xff]   ;;  %v12701_v57 = vld [vmem:[#allocation13 + $0x184] ss:$16 sps:$4 sm:$0xff]  }
 0x811   :  { %15351 = vst [vmem:[#allocation51_spill] sm:$0xff] %v12683_v19  ;;  %15357 = vst [vmem:[#allocation57_spill] sm:$0xff] %v12701_v57  ;;  %v12719_v2 = vld [vmem:[#allocation13 + $0x160] ss:$16 sps:$4 sm:$0xff]  }
 0x812   :  { %15346 = vst [vmem:[#allocation46_spill] sm:$0xff] %v12668_v34  ;;  %8837 = vtanh.f32 %v12668_v34  ;;  %15363 = vst [vmem:[#allocation63_spill] sm:$0xff] %v12719_v2  ;;  %v12733_v1 = vld [vmem:[#allocation13 + $0x140] ss:$16 sps:$4 sm:$0xff]  }
 0x813   :  { %5854 = vmatpush2.bf16.msra.mxu0 %v12683_v19  ;;  %5895 = vmatpush2.bf16.msra.mxu1 %v12686_v47  ;;  %v12704_v47 = vld [vmem:[#allocation13 + $0x18c] ss:$16 sps:$4 sm:$0xff]   ;;  %15367 = vst [vmem:[#allocation67_spill] sm:$0xff] %v12733_v1  ;;  %v12761_v34 = vld [vmem:[#allocation13 + $0x100] ss:$16 sps:$4 sm:$0xff]  }
 0x814   :  { %5855 = vmatprep.subr.bf16.mxu0 %v12689_v30  ;;  %5896 = vmatprep.subr.bf16.mxu1 %v12692_v38  ;;  %15358 = vst [vmem:[#allocation58_spill] sm:$0xff] %v12704_v47  ;;  %v12707_v30 = vld [vmem:[#allocation13 + $0x180] ss:$16 sps:$4 sm:$0xff]   ;;  %v12710_v38 = vld [vmem:[#allocation13 + $0x188] ss:$16 sps:$4 sm:$0xff]  }
 0x815   :  { %15359 = vst [vmem:[#allocation59_spill] sm:$0xff] %v12707_v30  ;;  %15360 = vst [vmem:[#allocation60_spill] sm:$0xff] %v12710_v38 }
 0x817   :  { %5856 = vmatpush2.bf16.msra.mxu0 %v12695_v44  ;;  %5897 = vmatpush2.bf16.msra.mxu1 %v12698_v26  ;;  %v12713_v44 = vld [vmem:[#allocation13 + $0x164] ss:$16 sps:$4 sm:$0xff]   ;;  %v12716_v26 = vld [vmem:[#allocation13 + $0x16c] ss:$16 sps:$4 sm:$0xff]  }
 0x818   :  { %5857 = vmatprep.subr.bf16.mxu0 %v12701_v57  ;;  %5898 = vmatprep.subr.bf16.mxu1 %v12704_v47  ;;  %15361 = vst [vmem:[#allocation61_spill] sm:$0xff] %v12713_v44  ;;  %15362 = vst [vmem:[#allocation62_spill] sm:$0xff] %v12716_v26  ;;  %v8836_v57 = vpop.eup %8835  ;;  %v12722_v47 = vld [vmem:[#allocation13 + $0x168] ss:$16 sps:$4 sm:$0xff]  }
 0x819   :  { %15364 = vst [vmem:[#allocation64_spill] sm:$0xff] %v12722_v47 }
 0x81b   :  { %5858 = vmatpush2.bf16.msra.mxu0 %v12707_v30  ;;  %5899 = vmatpush2.bf16.msra.mxu1 %v12710_v38  ;;  %v12725_v38 = vld [vmem:[#allocation13 + $0x144] ss:$16 sps:$4 sm:$0xff]  }
 0x81c   :  { %5859 = vmatprep.subr.bf16.mxu0 %v12713_v44  ;;  %5900 = vmatprep.subr.bf16.mxu1 %v12716_v26  ;;  %15365 = vst [vmem:[#allocation65_spill] sm:$0xff] %v12725_v38  ;;  %v12728_v44 = vld [vmem:[#allocation13 + $0x14c] ss:$16 sps:$4 sm:$0xff]  }
 0x81d   :  { %15366 = vst [vmem:[#allocation66_spill] sm:$0xff] %v12728_v44 }
 0x81f   :  { %v8838_v19 = vpop.eup %8837  ;;  %5860 = vmatpush2.bf16.msra.mxu0 %v12719_v2  ;;  %5901 = vmatpush2.bf16.msra.mxu1 %v12722_v47  ;;  %v12736_v2 = vld [vmem:[#allocation13 + $0x148] ss:$16 sps:$4 sm:$0xff]   ;;  %v12756_v47 = vld [vmem:[#allocation13 + $0x10c] ss:$16 sps:$4 sm:$0xff]  }
 0x820   :  { %v5484_v30 = vmul.f32 %v8838_v19, %v8836_v57  ;;  %5861 = vmatprep.subr.bf16.mxu0 %v12725_v38  ;;  %5902 = vmatprep.subr.bf16.mxu1 %v12728_v44  ;;  %15368 = vst [vmem:[#allocation72_spill] sm:$0xff] %v12736_v2  ;;  %v12741_v19 = vld [vmem:[#allocation13 + $0x124] ss:$16 sps:$4 sm:$0xff]   ;;  %v12744_v57 = vld [vmem:[#allocation13 + $0x12c] ss:$16 sps:$4 sm:$0xff]  }
 0x821   :  { %15369 = vst [vmem:[#allocation73_spill] sm:$0xff] %v12741_v19  ;;  %15370 = vst [vmem:[#allocation74_spill] sm:$0xff] %v12744_v57  ;;  %v12753_v38 = vld [vmem:[#allocation13 + $0x104] ss:$16 sps:$4 sm:$0xff]  }
 0x822   :  { %v12731_v26 = vpack.c.bf16 %v5484_v30, %v5484_v30  ;;  %v12747_v30 = vld [vmem:[#allocation13 + $0x120] ss:$16 sps:$4 sm:$0xff]   ;;  %15373 = vst [vmem:[#allocation77_spill] sm:$0xff] %v12753_v38 }
 0x823   :  { %5862 = vmatpush2.bf16.msra.mxu0 %v12733_v1  ;;  %5903 = vmatpush2.bf16.msra.mxu1 %v12736_v2  ;;  %15371 = vst [vmem:[#allocation75_spill] sm:$0xff] %v12747_v30  ;;  %v12750_v1 = vld [vmem:[#allocation13 + $0x128] ss:$16 sps:$4 sm:$0xff]  }
 0x824   :  { %5867 = vmatprep.mubr.bf16.mxu0 %v12731_v26  ;;  %5908 = vmatprep.mubr.bf16.mxu1 %v12731_v26  ;;  %15372 = vst [vmem:[#allocation76_spill] sm:$0xff] %v12750_v1 }
 0x825   :  { %5863 = vmatprep.subr.bf16.mxu0 %v12741_v19  ;;  %5904 = vmatprep.subr.bf16.mxu1 %v12744_v57 }
 0x827   :  { %5864 = vmatpush2.bf16.msra.mxu0 %v12747_v30  ;;  %5905 = vmatpush2.bf16.msra.mxu1 %v12750_v1  ;;  %v12764_v1 = vld [vmem:[#allocation13 + $0x108] ss:$16 sps:$4 sm:$0xff]  }
 0x828   :  { %5865 = vmatprep.subr.bf16.mxu0 %v12753_v38  ;;  %5906 = vmatprep.subr.bf16.mxu1 %v12756_v47 }
 0x829   :  { %v5520_v2 = vpop.f32.mrf.mxu0  ;;  %v5561_v44 = vpop.f32.mrf.mxu1 }
 0x82a   :  { %v5521_v57 = vadd.f32 %v5520_v2, %v11733_v9 }
 0x82b   :  { %v5522_v19 = vpop.f32.mrf.mxu0  ;;  %v5563_v54 = vpop.f32.mrf.mxu1  ;;  %5866 = vmatpush2.bf16.msra.mxu0 %v12761_v34  ;;  %5907 = vmatpush2.bf16.msra.mxu1 %v12764_v1 }
 0x82c   :  { %v7784_v39 = vmul.f32 -1.442695, %v5521_v57  ;;  %v5523_v30 = vadd.f32 %v5522_v19, %v11742_v42  ;;  %5942 = vmatprep.subr.bf16.mxu0 %v12188_v5  ;;  %5983 = vmatprep.subr.bf16.mxu1 %v12191_v55  ;;  %v5562_v5 = vadd.f32 %v5561_v44, %v11771_v31  ;;  %v15386_v44 = vld [vmem:[#allocation90_spill] sm:$0xff] }
 0x82d   :  { %v5524_v38 = vpop.f32.mrf.mxu0  ;;  %v5565_v40 = vpop.f32.mrf.mxu1 }
 0x82e   :  { %8839 = vpow2.f32 %v7784_v39  ;;  %v7785_v2 = vmul.f32 -1.442695, %v5523_v30  ;;  %5868 = vmatmul.mubr.bf16.vlgmr.msra.gmra.mxu0 %v12525_v23  ;;  %5909 = vmatmul.mubr.bf16.vlgmr.msra.gmra.mxu1 %v12525_v23  ;;  %v7786_v55 = vmul.f32 -1.442695, %v5562_v5  ;;  %v15381_v23 = vld [vmem:[#allocation85_spill] sm:$0xff]  ;;  %v15383_v40 = vld [vmem:[#allocation87_spill] sm:$0xff] }
 0x82f   :  { %v5525_v19 = vpop.f32.mrf.mxu0  ;;  %v5566_v57 = vpop.f32.mrf.mxu1  ;;  %5943 = vmatpush1.bf16.msra.mxu0 %v12196_v49  ;;  %5984 = vmatpush1.bf16.msra.mxu1 %v12199_v33  ;;  %v15374_v33 = vld [vmem:[#allocation151_spill] sm:$0xff]  ;;  %v15384_v39 = vld [vmem:[#allocation88_spill] sm:$0xff]  ;;  %v15385_v38 = vld [vmem:[#allocation89_spill] sm:$0xff] }
 0x830   :  { %8841 = vpow2.f32 %v7785_v2  ;;  %5944 = vmatprep.subr.bf16.mxu0 %v12202_v25  ;;  %5985 = vmatprep.subr.bf16.mxu1 %v12205_v8  ;;  %v5564_v25 = vadd.f32 %v5563_v54, %v15374_v33  ;;  %v15382_v54 = vld [vmem:[#allocation86_spill] sm:$0xff]  ;;  %v15387_v30 = vld [vmem:[#allocation91_spill] sm:$0xff]  ;;  %v15388_v2 = vld [vmem:[#allocation92_spill] sm:$0xff] }
 0x831   :  { %8843 = vpow2.f32 %v7786_v55  ;;  %v15389_v19 = vld [vmem:[#allocation93_spill] sm:$0xff]  ;;  %v15390_v57 = vld [vmem:[#allocation94_spill] sm:$0xff] }
 0x833   :  { %5945 = vmatpush1.bf16.msra.mxu0 %v12208_v36  ;;  %5986 = vmatpush1.bf16.msra.mxu1 %v12211_v35  ;;  %v15375_v36 = vld [vmem:[#allocation79_spill] sm:$0xff]  ;;  %v15376_v35 = vld [vmem:[#allocation80_spill] sm:$0xff] }
 0x834   :  { %5946 = vmatprep.subr.bf16.mxu0 %v12215_v63  ;;  %5987 = vmatprep.subr.bf16.mxu1 %v12218_v59  ;;  %v15377_v59 = vld [vmem:[#allocation81_spill] sm:$0xff] }
 0x837   :  { %5947 = vmatpush1.bf16.msra.mxu0 %v12221_v22  ;;  %5988 = vmatpush1.bf16.msra.mxu1 %v12224_v48  ;;  %v15378_v22 = vld [vmem:[#allocation82_spill] sm:$0xff] }
 0x838   :  { %5948 = vmatprep.subr.bf16.mxu0 %v12227_v6  ;;  %5989 = vmatprep.subr.bf16.mxu1 %v12230_v45  ;;  %v15379_v6 = vld [vmem:[#allocation83_spill] sm:$0xff]  ;;  %v15380_v45 = vld [vmem:[#allocation84_spill] sm:$0xff] }
 0x83b   :  { %v8840_v49 = vpop.eup %8839  ;;  %5949 = vmatpush1.bf16.msra.mxu0 %v15375_v36  ;;  %5990 = vmatpush1.bf16.msra.mxu1 %v15376_v35 }
 0x83c   :  { %v5577_v8 = vadd.f32 1.0, %v8840_v49  ;;  %5950 = vmatprep.subr.bf16.mxu0 %v15377_v59  ;;  %5991 = vmatprep.subr.bf16.mxu1 %v15378_v22 }
 0x83d   :  { %v8842_v63 = vpop.eup %8841 }
 0x83e   :  { %8845 = vrcp.f32 %v5577_v8  ;;  %v5578_v48 = vadd.f32 1.0, %v8842_v63  ;;  %v8844_v5 = vpop.eup %8843  ;;  %v15392_v8 = vld [vmem:[#allocation96_spill] sm:$0xff]  ;;  %v15393_v63 = vld [vmem:[#allocation97_spill] sm:$0xff] }
 0x83f   :  { %8847 = vtanh.f32 %v5564_v25  ;;  %5951 = vmatpush1.bf16.msra.mxu0 %v15379_v6  ;;  %5992 = vmatpush1.bf16.msra.mxu1 %v15380_v45  ;;  %v15391_v25 = vld [vmem:[#allocation95_spill] sm:$0xff]  ;;  %v5579_v35 = vadd.f32 1.0, %v8844_v5  ;;  %v15394_v6 = vld [vmem:[#allocation98_spill] sm:$0xff] }
 0x840   :  { %8849 = vrcp.f32 %v5578_v48  ;;  %5952 = vmatprep.subr.bf16.mxu0 %v15381_v23  ;;  %5993 = vmatprep.subr.bf16.mxu1 %v15382_v54  ;;  %v15395_v45 = vld [vmem:[#allocation99_spill] sm:$0xff]  ;;  %v15396_v23 = vld [vmem:[#allocation100_spill] sm:$0xff]  ;;  %v15397_v54 = vld [vmem:[#allocation101_spill] sm:$0xff] }
 0x841   :  { %8851 = vrcp.f32 %v5579_v35  ;;  %v15411_v35 = vld [vmem:[#allocation115_spill] sm:$0xff] }
 0x843   :  { %5953 = vmatpush1.bf16.msra.mxu0 %v15383_v40  ;;  %5994 = vmatpush1.bf16.msra.mxu1 %v15384_v39  ;;  %v15398_v40 = vld [vmem:[#allocation102_spill] sm:$0xff]  ;;  %v15401_v39 = vld [vmem:[#allocation105_spill] sm:$0xff] }
 0x844   :  { %5954 = vmatprep.subr.bf16.mxu0 %v15385_v38  ;;  %5995 = vmatprep.subr.bf16.mxu1 %v15386_v44  ;;  %v15403_v38 = vld [vmem:[#allocation107_spill] sm:$0xff]  ;;  %v15404_v44 = vld [vmem:[#allocation108_spill] sm:$0xff] }
 0x847   :  { %5955 = vmatpush1.bf16.msra.mxu0 %v15387_v30  ;;  %5996 = vmatpush1.bf16.msra.mxu1 %v15388_v2  ;;  %v15405_v30 = vld [vmem:[#allocation109_spill] sm:$0xff]  ;;  %v15406_v2 = vld [vmem:[#allocation110_spill] sm:$0xff] }
 0x848   :  { %5956 = vmatprep.subr.bf16.mxu0 %v15389_v19  ;;  %5997 = vmatprep.subr.bf16.mxu1 %v15390_v57  ;;  %v15407_v19 = vld [vmem:[#allocation111_spill] sm:$0xff]  ;;  %v15408_v57 = vld [vmem:[#allocation112_spill] sm:$0xff] }
 0x84b   :  { %v8846_v55 = vpop.eup %8845  ;;  %5957 = vmatpush1.bf16.msra.mxu0 %v15391_v25  ;;  %5998 = vmatpush1.bf16.msra.mxu1 %v15392_v8  ;;  %v15409_v25 = vld [vmem:[#allocation113_spill] sm:$0xff] }
 0x84c   :  { %v8848_v49 = vpop.eup %8847  ;;  %5958 = vmatprep.subr.bf16.mxu0 %v15393_v63  ;;  %5999 = vmatprep.subr.bf16.mxu1 %v12291_v16  ;;  %v15399_v16 = vld [vmem:[#allocation103_spill] sm:$0xff]  ;;  %v15412_v63 = vld [vmem:[#allocation116_spill] sm:$0xff] }
 0x84d   :  { %v8850_v36 = vpop.eup %8849  ;;  %v5588_v22 = vmul.f32 %v8848_v49, %v8846_v55 }
 0x84e   :  { %v5587_v59 = vmul.f32 %v8850_v36, %v12295_v51  ;;  %v15400_v51 = vld [vmem:[#allocation104_spill] sm:$0xff]  ;;  %v8852_v5 = vpop.eup %8851  ;;  %v15410_v36 = vld [vmem:[#allocation114_spill] sm:$0xff] }
 0x84f   :  { %5959 = vmatpush2.bf16.msra.mxu0 %v12297_v32  ;;  %6000 = vmatpush2.bf16.msra.mxu1 %v15394_v6  ;;  %v15402_v32 = vld [vmem:[#allocation106_spill] sm:$0xff] }
 0x850   :  { %v12806_v48 = vadd.f32 %v5588_v22, %v5587_v59  ;;  %5960 = vmatprep.subr.bf16.mxu0 %v15395_v45  ;;  %6001 = vmatprep.subr.bf16.mxu1 %v15396_v23  ;;  %v15413_v59 = vld [vmem:[#allocation117_spill] sm:$0xff]  ;;  %v15414_v22 = vld [vmem:[#allocation118_spill] sm:$0xff]  ;;  %v15419_v45 = vld [vmem:[#allocation123_spill] sm:$0xff] }
 0x851   :  { %v15418_v6 = vld [vmem:[#allocation122_spill] sm:$0xff]  ;;  %v9451_v23 = vld [vmem:[#allocation9 + $0xe4] ss:$16 sps:$4 sm:$0xff]  }
 0x852   :  { %8853 = vtanh.f32 %v12806_v48 }
 0x853   :  { %5961 = vmatpush2.bf16.msra.mxu0 %v15397_v54  ;;  %6002 = vmatpush2.bf16.msra.mxu1 %v15398_v40  ;;  %v9452_v54 = vld [vmem:[#allocation9 + $0xec] ss:$16 sps:$4 sm:$0xff]  }
 0x854   :  { %5962 = vmatprep.subr.bf16.mxu0 %v15399_v16  ;;  %6003 = vmatprep.subr.bf16.mxu1 %v15400_v51  ;;  %v9453_v51 = vld [vmem:[#allocation9 + $0xe0] ss:$16 sps:$4 sm:$0xff]  }
 0x857   :  { %5963 = vmatpush2.bf16.msra.mxu0 %v15401_v39  ;;  %6004 = vmatpush2.bf16.msra.mxu1 %v15402_v32  ;;  %v9454_v39 = vld [vmem:[#allocation9 + $0xe8] ss:$16 sps:$4 sm:$0xff]  }
 0x858   :  { %5964 = vmatprep.subr.bf16.mxu0 %v15403_v38  ;;  %6005 = vmatprep.subr.bf16.mxu1 %v15404_v44  ;;  %v9455_v44 = vld [vmem:[#allocation9 + $0xc4] ss:$16 sps:$4 sm:$0xff]  }
 0x85b   :  { %5965 = vmatpush2.bf16.msra.mxu0 %v15405_v30  ;;  %6006 = vmatpush2.bf16.msra.mxu1 %v15406_v2  ;;  %v9456_v30 = vld [vmem:[#allocation9 + $0xcc] ss:$16 sps:$4 sm:$0xff]  }
 0x85c   :  { %5966 = vmatprep.subr.bf16.mxu0 %v15407_v19  ;;  %6007 = vmatprep.subr.bf16.mxu1 %v15408_v57  ;;  %v15420_v57 = vmov 0  }
 0x85f   :  { %v8854_v55 = vpop.eup %8853  ;;  %5967 = vmatpush2.bf16.msra.mxu0 %v12346_v52  ;;  %6008 = vmatpush2.bf16.msra.mxu1 %v12349_v15  ;;  %v15415_v52 = vld [vmem:[#allocation119_spill] sm:$0xff]  ;;  %v15416_v15 = vld [vmem:[#allocation120_spill] sm:$0xff] }
 0x860   :  { %v5591_v49 = vmul.f32 %v8854_v55, %v8852_v5  ;;  %5968 = vmatprep.subr.bf16.mxu0 %v12352_v10  ;;  %6009 = vmatprep.subr.bf16.mxu1 %v15409_v25  ;;  %v15417_v10 = vld [vmem:[#allocation121_spill] sm:$0xff]  ;;  %v15421_v55 = vld [vmem:[#allocation27_spill] sm:$0xff] }
 0x862   :  { %v5592_v8 = vpack.c.bf16 %v5591_v49, %v5591_v49 }
 0x863   :  { %5969 = vmatpush2.bf16.msra.mxu0 %v15410_v36  ;;  %6010 = vmatpush2.bf16.msra.mxu1 %v15411_v35  ;;  %v9458_v36 = vld [vmem:[#allocation9 + $0xc8] ss:$16 sps:$4 sm:$0xff]  }
 0x864   :  { %5974 = vmatprep.mubr.bf16.mxu0 %v5592_v8  ;;  %6015 = vmatprep.mubr.bf16.mxu1 %v5592_v8  ;;  %v9457_v8 = vld [vmem:[#allocation9 + $0xc0] ss:$16 sps:$4 sm:$0xff]  }
 0x865   :  { %5970 = vmatprep.subr.bf16.mxu0 %v15412_v63  ;;  %6011 = vmatprep.subr.bf16.mxu1 %v15413_v59  ;;  %v9459_v59 = vld [vmem:[#allocation9 + $0xa4] ss:$16 sps:$4 sm:$0xff]  }
 0x867   :  { %5971 = vmatpush2.bf16.msra.mxu0 %v15414_v22  ;;  %6012 = vmatpush2.bf16.msra.mxu1 %v15415_v52  ;;  %v9460_v22 = vld [vmem:[#allocation9 + $0xac] ss:$16 sps:$4 sm:$0xff]  }
 0x868   :  { %5972 = vmatprep.subr.bf16.mxu0 %v15416_v15  ;;  %6013 = vmatprep.subr.bf16.mxu1 %v15417_v10  ;;  %v9461_v10 = vld [vmem:[#allocation9 + $0xa0] ss:$16 sps:$4 sm:$0xff]  }
 0x86b   :  { %5973 = vmatpush2.bf16.msra.mxu0 %v15418_v6  ;;  %6014 = vmatpush2.bf16.msra.mxu1 %v15419_v45  ;;  %v9462_v6 = vld [vmem:[#allocation9 + $0xa8] ss:$16 sps:$4 sm:$0xff]   ;;  %v5594_v45 = vld [vmem:[#allocation3 + $0x6] ss:$8 sm:$0xf] }
 0x86c   :  { %6051 = vmatprep.subr.bf16.mxu0 %v9451_v23  ;;  %6092 = vmatprep.subr.bf16.mxu1 %v9452_v54  ;;  %v9463_v23 = vld [vmem:[#allocation9 + $0x84] ss:$16 sps:$4 sm:$0xff]   ;;  %v9464_v54 = vld [vmem:[#allocation9 + $0x8c] ss:$16 sps:$4 sm:$0xff]  }
 0x86e   :  { %5975 = vmatmul.mubr.bf16.vlgmr.msra.gmra.mxu0 %v12731_v26  ;;  %6016 = vmatmul.mubr.bf16.vlgmr.msra.gmra.mxu1 %v12731_v26  ;;  %v5629_v40 = vpop.f32.mrf.mxu0  ;;  %v5670_v16 = vpop.f32.mrf.mxu1 }
 0x86f   :  { %6052 = vmatpush1.bf16.msra.mxu0 %v9453_v51  ;;  %6093 = vmatpush1.bf16.msra.mxu1 %v9454_v39  ;;  %v9465_v51 = vld [vmem:[#allocation9 + $0x80] ss:$16 sps:$4 sm:$0xff]   ;;  %v9466_v39 = vld [vmem:[#allocation9 + $0x88] ss:$16 sps:$4 sm:$0xff]  }
 0x870   :  { %v5631_v32 = vpop.f32.mrf.mxu0  ;;  %v5672_v38 = vpop.f32.mrf.mxu1  ;;  %6053 = vmatprep.subr.bf16.mxu0 %v9455_v44  ;;  %6094 = vmatprep.subr.bf16.mxu1 %v9456_v30  ;;  %v9469_v44 = vld [vmem:[#allocation9 + $0x60] ss:$16 sps:$4 sm:$0xff]   ;;  %v9470_v30 = vld [vmem:[#allocation9 + $0x68] ss:$16 sps:$4 sm:$0xff]  }
 0x871   :  { %v5681_v2 = vcombine.low %v5629_v40, %v5631_v32  ;;  %v5682_v19 = vcombine.low %v5670_v16, %v5672_v38  ;;  %6083 = vmatprep.mubr.bf16.mxu0 %v15420_v57  ;;  %6124 = vmatprep.mubr.bf16.mxu1 %v15420_v57  ;;  %v9467_v32 = vld [vmem:[#allocation9 + $0x64] ss:$16 sps:$4 sm:$0xff]   ;;  %v9468_v38 = vld [vmem:[#allocation9 + $0x6c] ss:$16 sps:$4 sm:$0xff]   ;;  %v9473_v57 = vld [vmem:[#allocation9 + $0x40] ss:$16 sps:$4 sm:$0xff]  }
 0x872   :  { %v5633_v5 = vpop.f32.mrf.mxu0  ;;  %v5674_v26 = vpop.f32.mrf.mxu1 }
 0x873   :  { %v5689_v49 = vrot.slane %v5681_v2, %v15421_v55  ;;  %v5696_v25 = vrot.slane %v5682_v19, %v15421_v55  ;;  %6054 = vmatpush1.bf16.msra.mxu0 %v9457_v8  ;;  %6095 = vmatpush1.bf16.msra.mxu1 %v9458_v36  ;;  %v9471_v2 = vld [vmem:[#allocation9 + $0x44] ss:$16 sps:$4 sm:$0xff]   ;;  %v9472_v19 = vld [vmem:[#allocation9 + $0x4c] ss:$16 sps:$4 sm:$0xff]   ;;  %v9474_v5 = vld [vmem:[#allocation9 + $0x48] ss:$16 sps:$4 sm:$0xff]  }
 0x874   :  { %v5634_v35 = vpop.f32.mrf.mxu0  ;;  %v5675_v63 = vpop.f32.mrf.mxu1  ;;  %6055 = vmatprep.subr.bf16.mxu0 %v9459_v59  ;;  %6096 = vmatprep.subr.bf16.mxu1 %v9460_v22  ;;  %v9475_v26 = vld [vmem:[#allocation9 + $0x24] ss:$16 sps:$4 sm:$0xff]   ;;  %v9478_v8 = vld [vmem:[#allocation9 + $0x28] ss:$16 sps:$4 sm:$0xff]  }
 0x875   :  { %v5697_v52 = vcombine.low %v5689_v49, %v5696_v25  ;;  %v9476_v49 = vld [vmem:[#allocation9 + $0x2c] ss:$16 sps:$4 sm:$0xff]   ;;  %v9477_v25 = vld [vmem:[#allocation9 + $0x20] ss:$16 sps:$4 sm:$0xff]   ;;  %v9479_v36 = vld [vmem:[#allocation9 + $0x4] ss:$16 sps:$4 sm:$0xff]  }
 0x876   :  { %v9480_v35 = vld [vmem:[#allocation9 + $0xc] ss:$16 sps:$4 sm:$0xff]  }
 0x877   :  { %v5704_v15 = vrot.slane %v5697_v52, %v15421_v55  ;;  %6056 = vmatpush1.bf16.msra.mxu0 %v9461_v10  ;;  %6097 = vmatpush1.bf16.msra.mxu1 %v9462_v6  ;;  %v9481_v52 = vld [vmem:[#allocation9] ss:$16 sps:$4 sm:$0xff]   ;;  %v12846_v10 = vld [vmem:[#allocation12 + $0xe4] ss:$16 sps:$4 sm:$0xff]  }
 0x878   :  { %6057 = vmatprep.subr.bf16.mxu0 %v9463_v23  ;;  %6098 = vmatprep.subr.bf16.mxu1 %v9464_v54  ;;  %v12849_v6 = vld [vmem:[#allocation12 + $0xec] ss:$16 sps:$4 sm:$0xff]  }
 0x879   :  { %v5706_v40 = vadd.f32 %v5704_v15, %v5594_v45  ;;  %v9482_v15 = vld [vmem:[#allocation9 + $0x8] ss:$16 sps:$4 sm:$0xff]  }
 0x87b   :  { %v7787_v16 = vmul.f32 -1.442695, %v5706_v40  ;;  %6058 = vmatpush1.bf16.msra.mxu0 %v9465_v51  ;;  %6099 = vmatpush1.bf16.msra.mxu1 %v9466_v39  ;;  %v5714_v22 = vrot.slane %v5706_v40, 3 }
 0x87c   :  { %6059 = vmatprep.subr.bf16.mxu0 %v9467_v32  ;;  %6100 = vmatprep.subr.bf16.mxu1 %v9468_v38 }
 0x87d   :  { %8855 = vpow2.f32 %v7787_v16 }
 0x87f   :  { %6060 = vmatpush1.bf16.msra.mxu0 %v9469_v44  ;;  %6101 = vmatpush1.bf16.msra.mxu1 %v9470_v30 }
 0x880   :  { %6061 = vmatprep.subr.bf16.mxu0 %v9471_v2  ;;  %6102 = vmatprep.subr.bf16.mxu1 %v9472_v19 }
 0x883   :  { %6062 = vmatpush1.bf16.msra.mxu0 %v9473_v57  ;;  %6103 = vmatpush1.bf16.msra.mxu1 %v9474_v5 }
 0x884   :  { %6063 = vmatprep.subr.bf16.mxu0 %v9475_v26  ;;  %6104 = vmatprep.subr.bf16.mxu1 %v9476_v49 }
 0x887   :  { %6064 = vmatpush1.bf16.msra.mxu0 %v9477_v25  ;;  %6105 = vmatpush1.bf16.msra.mxu1 %v9478_v8 }
 0x888   :  { %6065 = vmatprep.subr.bf16.mxu0 %v9479_v36  ;;  %6106 = vmatprep.subr.bf16.mxu1 %v9480_v35 }
 0x88a   :  { %v8856_v63 = vpop.eup %8855 }
 0x88b   :  { %v5710_v59 = vadd.f32 1.0, %v8856_v63  ;;  %6066 = vmatpush1.bf16.msra.mxu0 %v9481_v52  ;;  %6107 = vmatpush1.bf16.msra.mxu1 %v9482_v15  ;;  %v12862_v63 = vld [vmem:[#allocation12 + $0xe0] ss:$16 sps:$4 sm:$0xff]   ;;  %v12871_v52 = vld [vmem:[#allocation12 + $0xcc] ss:$16 sps:$4 sm:$0xff]  }
 0x88c   :  { %6184 = vmatprep.subr.bf16.mxu0 %v12846_v10  ;;  %6225 = vmatprep.subr.bf16.mxu1 %v12849_v6  ;;  %v12874_v15 = vld [vmem:[#allocation12 + $0xc0] ss:$16 sps:$4 sm:$0xff]  }
 0x88d   :  { %8857 = vrcp.f32 %v5710_v59  ;;  %v12865_v59 = vld [vmem:[#allocation12 + $0xe8] ss:$16 sps:$4 sm:$0xff]  }
 0x88e   :  { %8859 = vtanh.f32 %v5714_v22  ;;  %v12868_v22 = vld [vmem:[#allocation12 + $0xc4] ss:$16 sps:$4 sm:$0xff]  }
 0x89a   :  { %v8858_v45 = vpop.eup %8857 }
 0x89b   :  { %v5718_v23 = vrot.slane %v8858_v45, 1  ;;  %v8860_v54 = vpop.eup %8859  ;;  %v5724_v39 = vrot.slane %v8858_v45, 2 }
 0x89c   :  { %v5721_v16 = vmul.f32 %v8860_v54, %v8858_v45  ;;  %v12877_v45 = vld [vmem:[#allocation12 + $0xc8] ss:$16 sps:$4 sm:$0xff]   ;;  %v12881_v54 = vld [vmem:[#allocation12 + $0xa4] ss:$16 sps:$4 sm:$0xff]  }
 0x89d   :  { %v5720_v40 = vmul.f32 %v5718_v23, %v12430_v43 }
 0x89f   :  { %v12853_v51 = vadd.f32 %v5721_v16, %v5720_v40  ;;  %v12884_v16 = vld [vmem:[#allocation12 + $0xac] ss:$16 sps:$4 sm:$0xff]   ;;  %v12887_v40 = vld [vmem:[#allocation12 + $0xa0] ss:$16 sps:$4 sm:$0xff]  }
 0x8a1   :  { %15422 = vst [vmem:[#allocation78_spill] sm:$0xff] %v12853_v51  ;;  %8861 = vtanh.f32 %v12853_v51  ;;  %v12939_v51 = vld [vmem:[#allocation12 + $0x28] ss:$16 sps:$4 sm:$0xff]  }
 0x8a2   :  { %15429 = vst [vmem:[#allocation81_spill] sm:$0xff] %v12939_v51 }
 0x8ae   :  { %v8862_v32 = vpop.eup %8861  ;;  %v5762_v38 = vpop.f32.mrf.mxu0 }
 0x8af   :  { %v5803_v44 = vpop.f32.mrf.mxu1  ;;  %v5763_v30 = vadd.f32 %v5762_v38, %v10537_v3  ;;  %v5726_v2 = vmul.f32 %v8862_v32, %v5724_v39  ;;  %v12890_v39 = vld [vmem:[#allocation12 + $0xa8] ss:$16 sps:$4 sm:$0xff]   ;;  %v12893_v38 = vld [vmem:[#allocation12 + $0x84] ss:$16 sps:$4 sm:$0xff]  }
 0x8b0   :  { %v5764_v19 = vpop.f32.mrf.mxu0  ;;  %v5804_v23 = vadd.f32 %v5803_v44, %v10551_v24  ;;  %v12896_v44 = vld [vmem:[#allocation12 + $0x8c] ss:$16 sps:$4 sm:$0xff]  }
 0x8b1   :  { %v5805_v57 = vpop.f32.mrf.mxu1  ;;  %v7788_v5 = vmul.f32 -1.442695, %v5763_v30  ;;  %v5765_v26 = vadd.f32 %v5764_v19, %v10540_v4  ;;  %v12858_v8 = vpack.c.bf16 %v5726_v2, %v5726_v2  ;;  %v12945_v24 = vld [vmem:[#allocation12 + $0xc] ss:$16 sps:$4 sm:$0xff]  }
 0x8b2   :  { %v5766_v49 = vpop.f32.mrf.mxu0  ;;  %v7790_v32 = vmul.f32 -1.442695, %v5804_v23  ;;  %v5806_v2 = vadd.f32 %v5805_v57, %v15287_v7  ;;  %v12918_v23 = vld [vmem:[#allocation12 + $0x44] ss:$16 sps:$4 sm:$0xff]   ;;  %15431 = vst [vmem:[#allocation83_spill] sm:$0xff] %v12945_v24 }
 0x8b3   :  { %v5807_v25 = vpop.f32.mrf.mxu1  ;;  %8863 = vpow2.f32 %v7788_v5  ;;  %v7789_v43 = vmul.f32 -1.442695, %v5765_v26  ;;  %6084 = vmatmul.mubr.bf16.vlgmr.msra.gmra.mxu0 %v12858_v8  ;;  %6125 = vmatmul.mubr.bf16.vlgmr.msra.gmra.mxu1 %v12858_v8  ;;  %v12900_v5 = vld [vmem:[#allocation12 + $0x80] ss:$16 sps:$4 sm:$0xff]   ;;  %v12903_v26 = vld [vmem:[#allocation12 + $0x88] ss:$16 sps:$4 sm:$0xff]  }
 0x8b4   :  { %v5767_v36 = vpop.f32.mrf.mxu0  ;;  %6185 = vmatpush1.bf16.msra.mxu0 %v12862_v63  ;;  %6226 = vmatpush1.bf16.msra.mxu1 %v12865_v59  ;;  %v12906_v25 = vld [vmem:[#allocation12 + $0x64] ss:$16 sps:$4 sm:$0xff]  }
 0x8b5   :  { %v5808_v35 = vpop.f32.mrf.mxu1  ;;  %8865 = vpow2.f32 %v7789_v43  ;;  %6186 = vmatprep.subr.bf16.mxu0 %v12868_v22  ;;  %6227 = vmatprep.subr.bf16.mxu1 %v12871_v52  ;;  %v12909_v43 = vld [vmem:[#allocation12 + $0x6c] ss:$16 sps:$4 sm:$0xff]   ;;  %v12912_v36 = vld [vmem:[#allocation12 + $0x60] ss:$16 sps:$4 sm:$0xff]   ;;  %v12942_v7 = vld [vmem:[#allocation12 + $0x4] ss:$16 sps:$4 sm:$0xff]  }
 0x8b6   :  { %8867 = vpow2.f32 %v7790_v32  ;;  %v12915_v35 = vld [vmem:[#allocation12 + $0x68] ss:$16 sps:$4 sm:$0xff]   ;;  %v12921_v32 = vld [vmem:[#allocation12 + $0x4c] ss:$16 sps:$4 sm:$0xff]   ;;  %15430 = vst [vmem:[#allocation82_spill] sm:$0xff] %v12942_v7 }
 0x8b7   :  { %15423 = vst [vmem:[#allocation152_spill] sm:$0xff] %v12921_v32 }
 0x8b8   :  { %6187 = vmatpush1.bf16.msra.mxu0 %v12874_v15  ;;  %6228 = vmatpush1.bf16.msra.mxu1 %v12877_v45 }
 0x8b9   :  { %6188 = vmatprep.subr.bf16.mxu0 %v12881_v54  ;;  %6229 = vmatprep.subr.bf16.mxu1 %v12884_v16 }
 0x8bc   :  { %6189 = vmatpush1.bf16.msra.mxu0 %v12887_v40  ;;  %6230 = vmatpush1.bf16.msra.mxu1 %v12890_v39 }
 0x8bd   :  { %6190 = vmatprep.subr.bf16.mxu0 %v12893_v38  ;;  %6231 = vmatprep.subr.bf16.mxu1 %v12896_v44 }
 0x8c0   :  { %v8864_v30 = vpop.eup %8863  ;;  %6191 = vmatpush1.bf16.msra.mxu0 %v12900_v5  ;;  %6232 = vmatpush1.bf16.msra.mxu1 %v12903_v26 }
 0x8c1   :  { %v5819_v19 = vadd.f32 1.0, %v8864_v30  ;;  %6192 = vmatprep.subr.bf16.mxu0 %v12906_v25  ;;  %6233 = vmatprep.subr.bf16.mxu1 %v12909_v43  ;;  %v12924_v30 = vld [vmem:[#allocation12 + $0x40] ss:$16 sps:$4 sm:$0xff]  }
 0x8c2   :  { %v8866_v49 = vpop.eup %8865  ;;  %15424 = vst [vmem:[#allocation153_spill] sm:$0xff] %v12924_v30 }
 0x8c3   :  { %8869 = vrcp.f32 %v5819_v19  ;;  %v5820_v57 = vadd.f32 1.0, %v8866_v49  ;;  %v12930_v19 = vld [vmem:[#allocation12 + $0x24] ss:$16 sps:$4 sm:$0xff]   ;;  %v12933_v49 = vld [vmem:[#allocation12 + $0x2c] ss:$16 sps:$4 sm:$0xff]   ;;  %v8868_v4 = vpop.eup %8867 }
 0x8c4   :  { %8871 = vtanh.f32 %v5806_v2  ;;  %6193 = vmatpush1.bf16.msra.mxu0 %v12912_v36  ;;  %6234 = vmatpush1.bf16.msra.mxu1 %v12915_v35  ;;  %v12927_v2 = vld [vmem:[#allocation12 + $0x48] ss:$16 sps:$4 sm:$0xff]   ;;  %15426 = vst [vmem:[#allocation155_spill] sm:$0xff] %v12930_v19  ;;  %15427 = vst [vmem:[#allocation79_spill] sm:$0xff] %v12933_v49 }
 0x8c5   :  { %8873 = vrcp.f32 %v5820_v57  ;;  %6194 = vmatprep.subr.bf16.mxu0 %v12918_v23  ;;  %6235 = vmatprep.subr.bf16.mxu1 %v12921_v32  ;;  %15425 = vst [vmem:[#allocation154_spill] sm:$0xff] %v12927_v2  ;;  %v12936_v57 = vld [vmem:[#allocation12 + $0x20] ss:$16 sps:$4 sm:$0xff]  }
 0x8c6   :  { %15428 = vst [vmem:[#allocation80_spill] sm:$0xff] %v12936_v57 }
 0x8c8   :  { %6195 = vmatpush1.bf16.msra.mxu0 %v12924_v30  ;;  %6236 = vmatpush1.bf16.msra.mxu1 %v12927_v2  ;;  %v12954_v2 = vld [vmem:[#allocation12 + $0x1e4] ss:$16 sps:$4 sm:$0xff]  }
 0x8c9   :  { %6196 = vmatprep.subr.bf16.mxu0 %v12930_v19  ;;  %6237 = vmatprep.subr.bf16.mxu1 %v12933_v49  ;;  %v12948_v49 = vld [vmem:[#allocation12] ss:$16 sps:$4 sm:$0xff]   ;;  %v5821_v19 = vadd.f32 1.0, %v8868_v4  ;;  %15434 = vst [vmem:[#allocation86_spill] sm:$0xff] %v12954_v2  ;;  %v12969_v4 = vld [vmem:[#allocation12 + $0x1c4] ss:$16 sps:$4 sm:$0xff]  }
 0x8ca   :  { %15432 = vst [vmem:[#allocation84_spill] sm:$0xff] %v12948_v49 }
 0x8cb   :  { %8875 = vrcp.f32 %v5821_v19 }
 0x8cc   :  { %6197 = vmatpush1.bf16.msra.mxu0 %v12936_v57  ;;  %6238 = vmatpush1.bf16.msra.mxu1 %v12939_v51  ;;  %v12951_v57 = vld [vmem:[#allocation12 + $0x8] ss:$16 sps:$4 sm:$0xff]  }
 0x8cd   :  { %6198 = vmatprep.subr.bf16.mxu0 %v12942_v7  ;;  %6239 = vmatprep.subr.bf16.mxu1 %v12945_v24  ;;  %15433 = vst [vmem:[#allocation85_spill] sm:$0xff] %v12951_v57  ;;  %v12957_v7 = vld [vmem:[#allocation12 + $0x1ec] ss:$16 sps:$4 sm:$0xff]  }
 0x8d0   :  { %v8870_v3 = vpop.eup %8869  ;;  %6199 = vmatpush1.bf16.msra.mxu0 %v12948_v49  ;;  %6240 = vmatpush1.bf16.msra.mxu1 %v12951_v57  ;;  %v12963_v49 = vld [vmem:[#allocation12 + $0x1e0] ss:$16 sps:$4 sm:$0xff]   ;;  %v12966_v57 = vld [vmem:[#allocation12 + $0x1e8] ss:$16 sps:$4 sm:$0xff]  }
 0x8d1   :  { %v8872_v55 = vpop.eup %8871  ;;  %6200 = vmatprep.subr.bf16.mxu0 %v12954_v2  ;;  %6241 = vmatprep.subr.bf16.mxu1 %v12957_v7  ;;  %v12972_v2 = vld [vmem:[#allocation12 + $0x1cc] ss:$16 sps:$4 sm:$0xff]  }
 0x8d2   :  { %v8874_v51 = vpop.eup %8873  ;;  %v5830_v30 = vmul.f32 %v8872_v55, %v8870_v3  ;;  %v12976_v3 = vld [vmem:[#allocation12 + $0x1c0] ss:$16 sps:$4 sm:$0xff]  }
 0x8d3   :  { %v5829_v24 = vmul.f32 %v8874_v51, %v12474_v21  ;;  %v15441_v51 = vld [vmem:[#allocation130_spill] sm:$0xff] }
 0x8d4   :  { %6201 = vmatpush2.bf16.msra.mxu0 %v12963_v49  ;;  %6242 = vmatpush2.bf16.msra.mxu1 %v12966_v57 }
 0x8d5   :  { %v12961_v32 = vadd.f32 %v5830_v30, %v5829_v24  ;;  %6202 = vmatprep.subr.bf16.mxu0 %v12969_v4  ;;  %6243 = vmatprep.subr.bf16.mxu1 %v12972_v2  ;;  %v12979_v24 = vld [vmem:[#allocation12 + $0x1c8] ss:$16 sps:$4 sm:$0xff]   ;;  %v15442_v30 = vld [vmem:[#allocation131_spill] sm:$0xff] }
 0x8d7   :  { %8877 = vtanh.f32 %v12961_v32 }
 0x8d8   :  { %6203 = vmatpush2.bf16.msra.mxu0 %v12976_v3  ;;  %6244 = vmatpush2.bf16.msra.mxu1 %v12979_v24  ;;  %v8876_v21 = vpop.eup %8875 }
 0x8d9   :  { %6204 = vmatprep.subr.bf16.mxu0 %v12483_v27  ;;  %6245 = vmatprep.subr.bf16.mxu1 %v12486_v60 }
 0x8dc   :  { %6205 = vmatpush2.bf16.msra.mxu0 %v12489_v18  ;;  %6246 = vmatpush2.bf16.msra.mxu1 %v12492_v14  ;;  %v15435_v14 = vld [vmem:[#allocation124_spill] sm:$0xff] }
 0x8dd   :  { %6206 = vmatprep.subr.bf16.mxu0 %v12495_v13  ;;  %6247 = vmatprep.subr.bf16.mxu1 %v12498_v58  ;;  %v15436_v13 = vld [vmem:[#allocation125_spill] sm:$0xff]  ;;  %v15437_v58 = vld [vmem:[#allocation126_spill] sm:$0xff] }
 0x8e0   :  { %6207 = vmatpush2.bf16.msra.mxu0 %v12501_v28  ;;  %6248 = vmatpush2.bf16.msra.mxu1 %v12504_v20  ;;  %v15438_v28 = vld [vmem:[#allocation127_spill] sm:$0xff]  ;;  %v15439_v20 = vld [vmem:[#allocation128_spill] sm:$0xff] }
 0x8e1   :  { %6208 = vmatprep.subr.bf16.mxu0 %v12507_v0  ;;  %6249 = vmatprep.subr.bf16.mxu1 %v12510_v29 }
 0x8e4   :  { %v8878_v27 = vpop.eup %8877  ;;  %6209 = vmatpush2.bf16.msra.mxu0 %v12513_v12  ;;  %6250 = vmatpush2.bf16.msra.mxu1 %v12516_v56  ;;  %v15440_v12 = vld [vmem:[#allocation129_spill] sm:$0xff] }
 0x8e5   :  { %v5833_v60 = vmul.f32 %v8878_v27, %v8876_v21  ;;  %6210 = vmatprep.subr.bf16.mxu0 %v12519_v53  ;;  %6251 = vmatprep.subr.bf16.mxu1 %v12522_v17 }
 0x8e7   :  { %v12996_v18 = vpack.c.bf16 %v5833_v60, %v5833_v60 }
 0x8e8   :  { %6211 = vmatpush2.bf16.msra.mxu0 %v12527_v37  ;;  %6252 = vmatpush2.bf16.msra.mxu1 %v15435_v14  ;;  %v15443_v14 = vld [vmem:[#allocation132_spill] sm:$0xff] }
 0x8e9   :  { %6216 = vmatprep.mubr.bf16.mxu0 %v12996_v18  ;;  %6257 = vmatprep.mubr.bf16.mxu1 %v12996_v18 }
 0x8ea   :  { %6212 = vmatprep.subr.bf16.mxu0 %v15436_v13  ;;  %6253 = vmatprep.subr.bf16.mxu1 %v15437_v58  ;;  %v15444_v13 = vld [vmem:[#allocation133_spill] sm:$0xff]  ;;  %v15445_v58 = vld [vmem:[#allocation134_spill] sm:$0xff] }
 0x8ec   :  { %6213 = vmatpush2.bf16.msra.mxu0 %v15438_v28  ;;  %6254 = vmatpush2.bf16.msra.mxu1 %v15439_v20  ;;  %v15448_v28 = vld [vmem:[#allocation145_spill] sm:$0xff] }
 0x8ed   :  { %6214 = vmatprep.subr.bf16.mxu0 %v15440_v12  ;;  %6255 = vmatprep.subr.bf16.mxu1 %v12550_v62  ;;  %v15451_v12 = vld [vmem:[#allocation139_spill] sm:$0xff] }
 0x8ee   :  { %v5869_v0 = vpop.f32.mrf.mxu0  ;;  %v5910_v29 = vpop.f32.mrf.mxu1 }
 0x8ef   :  { %v5870_v56 = vadd.f32 %v5869_v0, %v11084_v11  ;;  %v5911_v20 = vadd.f32 %v5910_v29, %v15448_v28  ;;  %v15449_v0 = vld [vmem:[#allocation137_spill] sm:$0xff] }
 0x8f0   :  { %v5871_v53 = vpop.f32.mrf.mxu0  ;;  %v5912_v17 = vpop.f32.mrf.mxu1  ;;  %6215 = vmatpush2.bf16.msra.mxu0 %v15441_v51  ;;  %6256 = vmatpush2.bf16.msra.mxu1 %v15442_v30  ;;  %v15455_v51 = vld [vmem:[#allocation26_spill] sm:$0xff]  ;;  %v15457_v29 = vld [vmem:[#allocation149_spill] sm:$0xff] }
 0x8f1   :  { %v7791_v37 = vmul.f32 -1.442695, %v5870_v56  ;;  %v5872_v55 = vadd.f32 %v5871_v53, %v11089_v46  ;;  %6291 = vmatprep.subr.bf16.mxu0 %v12561_v41  ;;  %6332 = vmatprep.subr.bf16.mxu1 %v12564_v50  ;;  %v15446_v41 = vld [vmem:[#allocation135_spill] sm:$0xff]  ;;  %v15447_v50 = vld [vmem:[#allocation136_spill] sm:$0xff]  ;;  %v15452_v56 = vld [vmem:[#allocation141_spill] sm:$0xff]  ;;  %v5913_v30 = vadd.f32 %v5912_v17, %v15455_v51 }
 0x8f2   :  { %v5873_v19 = vpop.f32.mrf.mxu0  ;;  %v5914_v21 = vpop.f32.mrf.mxu1  ;;  %v15453_v53 = vld [vmem:[#allocation142_spill] sm:$0xff]  ;;  %v15462_v17 = vld [vmem:[#allocation32_spill] sm:$0xff] }
 0x8f3   :  { %8879 = vpow2.f32 %v7791_v37  ;;  %v7792_v27 = vmul.f32 -1.442695, %v5872_v55  ;;  %6217 = vmatmul.mubr.bf16.vlgmr.msra.gmra.mxu0 %v12858_v8  ;;  %6258 = vmatmul.mubr.bf16.vlgmr.msra.gmra.mxu1 %v12858_v8  ;;  %v15450_v8 = vld [vmem:[#allocation138_spill] sm:$0xff]  ;;  %v15454_v37 = vld [vmem:[#allocation147_spill] sm:$0xff]  ;;  %v15456_v21 = vld [vmem:[#allocation148_spill] sm:$0xff] }
 0x8f4   :  { %v5874_v62 = vpop.f32.mrf.mxu0  ;;  %v5915_v60 = vpop.f32.mrf.mxu1  ;;  %6292 = vmatpush1.bf16.msra.mxu0 %v12569_v61  ;;  %6333 = vmatpush1.bf16.msra.mxu1 %v15443_v14  ;;  %v7793_v61 = vmul.f32 -1.442695, %v5911_v20  ;;  %v15465_v20 = vld [vmem:[#allocation35_spill] sm:$0xff] }
 0x8f5   :  { %8881 = vpow2.f32 %v7792_v27  ;;  %6293 = vmatprep.subr.bf16.mxu0 %v15444_v13  ;;  %6334 = vmatprep.subr.bf16.mxu1 %v15445_v58  ;;  %v15458_v62 = vld [vmem:[#allocation28_spill] sm:$0xff]  ;;  %v15459_v60 = vld [vmem:[#allocation29_spill] sm:$0xff]  ;;  %v15460_v13 = vld [vmem:[#allocation30_spill] sm:$0xff] }
 0x8f6   :  { %8883 = vpow2.f32 %v7793_v61  ;;  %v15461_v58 = vld [vmem:[#allocation31_spill] sm:$0xff]  ;;  %v15470_v61 = vld [vmem:[#allocation40_spill] sm:$0xff] }
 0x8f8   :  { %6294 = vmatpush1.bf16.msra.mxu0 %v15446_v41  ;;  %6335 = vmatpush1.bf16.msra.mxu1 %v15447_v50  ;;  %v15463_v41 = vld [vmem:[#allocation33_spill] sm:$0xff]  ;;  %v15464_v50 = vld [vmem:[#allocation34_spill] sm:$0xff] }
 0x8f9   :  { %6295 = vmatprep.subr.bf16.mxu0 %v15449_v0  ;;  %6336 = vmatprep.subr.bf16.mxu1 %v15450_v8  ;;  %v15466_v0 = vld [vmem:[#allocation36_spill] sm:$0xff]  ;;  %v15467_v8 = vld [vmem:[#allocation37_spill] sm:$0xff] }
 0x8fc   :  { %6296 = vmatpush1.bf16.msra.mxu0 %v15451_v12  ;;  %6337 = vmatpush1.bf16.msra.mxu1 %v15452_v56  ;;  %v15468_v12 = vld [vmem:[#allocation38_spill] sm:$0xff]  ;;  %v15469_v56 = vld [vmem:[#allocation39_spill] sm:$0xff] }
 0x8fd   :  { %6297 = vmatprep.subr.bf16.mxu0 %v15453_v53  ;;  %6338 = vmatprep.subr.bf16.mxu1 %v15454_v37  ;;  %v15471_v53 = vld [vmem:[#allocation41_spill] sm:$0xff] }
 0x900   :  { %v8880_v55 = vpop.eup %8879  ;;  %6298 = vmatpush1.bf16.msra.mxu0 %v15456_v21  ;;  %6339 = vmatpush1.bf16.msra.mxu1 %v15457_v29  ;;  %v15473_v21 = vld [vmem:[#allocation43_spill] sm:$0xff] }
 0x901   :  { %v5926_v19 = vadd.f32 1.0, %v8880_v55  ;;  %6299 = vmatprep.subr.bf16.mxu0 %v15458_v62  ;;  %6340 = vmatprep.subr.bf16.mxu1 %v15459_v60  ;;  %v15474_v62 = vld [vmem:[#allocation44_spill] sm:$0xff]  ;;  %v15475_v60 = vld [vmem:[#allocation45_spill] sm:$0xff] }
 0x902   :  { %v8882_v27 = vpop.eup %8881 }
 0x903   :  { %8885 = vrcp.f32 %v5926_v19  ;;  %v5927_v14 = vadd.f32 1.0, %v8882_v27  ;;  %v8884_v37 = vpop.eup %8883  ;;  %v15472_v19 = vld [vmem:[#allocation42_spill] sm:$0xff] }
 0x904   :  { %8887 = vtanh.f32 %v5913_v30  ;;  %6300 = vmatpush1.bf16.msra.mxu0 %v15460_v13  ;;  %6341 = vmatpush1.bf16.msra.mxu1 %v15461_v58  ;;  %v5928_v27 = vadd.f32 1.0, %v8884_v37  ;;  %v15486_v37 = vld [vmem:[#allocation56_spill] sm:$0xff] }
 0x905   :  { %8889 = vrcp.f32 %v5927_v14  ;;  %6301 = vmatprep.subr.bf16.mxu0 %v15462_v17  ;;  %6342 = vmatprep.subr.bf16.mxu1 %v15463_v41  ;;  %v15476_v14 = vld [vmem:[#allocation46_spill] sm:$0xff]  ;;  %v15477_v41 = vld [vmem:[#allocation47_spill] sm:$0xff] }
 0x906   :  { %8891 = vrcp.f32 %v5928_v27  ;;  %v15492_v27 = vld [vmem:[#allocation62_spill] sm:$0xff] }
 0x908   :  { %6302 = vmatpush1.bf16.msra.mxu0 %v15464_v50  ;;  %6343 = vmatpush1.bf16.msra.mxu1 %v15465_v20  ;;  %v15478_v50 = vld [vmem:[#allocation48_spill] sm:$0xff]  ;;  %v15479_v20 = vld [vmem:[#allocation49_spill] sm:$0xff] }
 0x909   :  { %6303 = vmatprep.subr.bf16.mxu0 %v15466_v0  ;;  %6344 = vmatprep.subr.bf16.mxu1 %v15467_v8  ;;  %v15480_v0 = vld [vmem:[#allocation50_spill] sm:$0xff]  ;;  %v15481_v8 = vld [vmem:[#allocation51_spill] sm:$0xff] }
 0x90c   :  { %6304 = vmatpush1.bf16.msra.mxu0 %v15468_v12  ;;  %6345 = vmatpush1.bf16.msra.mxu1 %v15469_v56  ;;  %v15482_v12 = vld [vmem:[#allocation52_spill] sm:$0xff]  ;;  %v15483_v56 = vld [vmem:[#allocation53_spill] sm:$0xff] }
 0x90d   :  { %6305 = vmatprep.subr.bf16.mxu0 %v15470_v61  ;;  %6346 = vmatprep.subr.bf16.mxu1 %v15471_v53  ;;  %v15484_v61 = vld [vmem:[#allocation54_spill] sm:$0xff]  ;;  %v15485_v53 = vld [vmem:[#allocation55_spill] sm:$0xff] }
 0x910   :  { %v8886_v55 = vpop.eup %8885  ;;  %6306 = vmatpush1.bf16.msra.mxu0 %v15472_v19  ;;  %6347 = vmatpush1.bf16.msra.mxu1 %v15473_v21  ;;  %v15489_v19 = vld [vmem:[#allocation59_spill] sm:$0xff]  ;;  %v15490_v21 = vld [vmem:[#allocation60_spill] sm:$0xff] }
 0x911   :  { %v8888_v30 = vpop.eup %8887  ;;  %6307 = vmatprep.subr.bf16.mxu0 %v15474_v62  ;;  %6348 = vmatprep.subr.bf16.mxu1 %v15475_v60 }
 0x912   :  { %v8890_v29 = vpop.eup %8889  ;;  %v5937_v58 = vmul.f32 %v8888_v30, %v8886_v55  ;;  %v15487_v55 = vld [vmem:[#allocation57_spill] sm:$0xff]  ;;  %v15488_v30 = vld [vmem:[#allocation58_spill] sm:$0xff] }
 0x913   :  { %v5936_v13 = vmul.f32 %v8890_v29, %v15476_v14  ;;  %v15491_v29 = vld [vmem:[#allocation61_spill] sm:$0xff]  ;;  %v8892_v62 = vpop.eup %8891  ;;  %v15493_v14 = vld [vmem:[#allocation63_spill] sm:$0xff] }
 0x914   :  { %6308 = vmatpush2.bf16.msra.mxu0 %v15477_v41  ;;  %6349 = vmatpush2.bf16.msra.mxu1 %v15478_v50  ;;  %v15495_v41 = vld [vmem:[#allocation65_spill] sm:$0xff]  ;;  %v15496_v50 = vld [vmem:[#allocation66_spill] sm:$0xff] }
 0x915   :  { %v13051_v17 = vadd.f32 %v5937_v58, %v5936_v13  ;;  %6309 = vmatprep.subr.bf16.mxu0 %v15479_v20  ;;  %6350 = vmatprep.subr.bf16.mxu1 %v15480_v0  ;;  %v15494_v13 = vld [vmem:[#allocation64_spill] sm:$0xff]  ;;  %v15497_v0 = vld [vmem:[#allocation67_spill] sm:$0xff] }
 0x917   :  { %8893 = vtanh.f32 %v13051_v17 }
 0x918   :  { %6310 = vmatpush2.bf16.msra.mxu0 %v15481_v8  ;;  %6351 = vmatpush2.bf16.msra.mxu1 %v15482_v12  ;;  %v15498_v8 = vld [vmem:[#allocation72_spill] sm:$0xff]  ;;  %v15499_v12 = vld [vmem:[#allocation73_spill] sm:$0xff] }
 0x919   :  { %6311 = vmatprep.subr.bf16.mxu0 %v15483_v56  ;;  %6352 = vmatprep.subr.bf16.mxu1 %v15484_v61  ;;  %v15500_v56 = vld [vmem:[#allocation74_spill] sm:$0xff]  ;;  %v15501_v61 = vld [vmem:[#allocation75_spill] sm:$0xff] }
 0x91c   :  { %6312 = vmatpush2.bf16.msra.mxu0 %v15485_v53  ;;  %6353 = vmatpush2.bf16.msra.mxu1 %v15486_v37  ;;  %v15502_v53 = vld [vmem:[#allocation76_spill] sm:$0xff] }
 0x91d   :  { %6313 = vmatprep.subr.bf16.mxu0 %v15487_v55  ;;  %6354 = vmatprep.subr.bf16.mxu1 %v15488_v30  ;;  %v15503_v30 = vld [vmem:[#allocation77_spill] sm:$0xff] }
 0x920   :  { %6314 = vmatpush2.bf16.msra.mxu0 %v15489_v19  ;;  %6355 = vmatpush2.bf16.msra.mxu1 %v15490_v21 }
 0x921   :  { %6315 = vmatprep.subr.bf16.mxu0 %v15491_v29  ;;  %6356 = vmatprep.subr.bf16.mxu1 %v15492_v27 }
 0x924   :  { %v8894_v60 = vpop.eup %8893  ;;  %6316 = vmatpush2.bf16.msra.mxu0 %v15493_v14  ;;  %6357 = vmatpush2.bf16.msra.mxu1 %v15494_v13  ;;  %v13090_v13 = vld [vmem:[#allocation15 + $0xe4] ss:$16 sps:$4 sm:$0xff]  }
 0x925   :  { %v5940_v58 = vmul.f32 %v8894_v60, %v8892_v62  ;;  %6317 = vmatprep.subr.bf16.mxu0 %v15495_v41  ;;  %6358 = vmatprep.subr.bf16.mxu1 %v15496_v50  ;;  %v13101_v50 = vld [vmem:[#allocation15 + $0xe8] ss:$16 sps:$4 sm:$0xff]  }
 0x927   :  { %v13074_v20 = vpack.c.bf16 %v5940_v58, %v5940_v58  ;;  %v13093_v58 = vld [vmem:[#allocation15 + $0xec] ss:$16 sps:$4 sm:$0xff]  }
 0x928   :  { %6318 = vmatpush2.bf16.msra.mxu0 %v15497_v0  ;;  %6359 = vmatpush2.bf16.msra.mxu1 %v15498_v8  ;;  %v13104_v0 = vld [vmem:[#allocation15 + $0xc4] ss:$16 sps:$4 sm:$0xff]   ;;  %v13107_v8 = vld [vmem:[#allocation15 + $0xcc] ss:$16 sps:$4 sm:$0xff]  }
 0x929   :  { %6323 = vmatprep.mubr.bf16.mxu0 %v13074_v20  ;;  %6364 = vmatprep.mubr.bf16.mxu1 %v13074_v20 }
 0x92a   :  { %6319 = vmatprep.subr.bf16.mxu0 %v15499_v12  ;;  %6360 = vmatprep.subr.bf16.mxu1 %v15500_v56  ;;  %v13113_v12 = vld [vmem:[#allocation15 + $0xc8] ss:$16 sps:$4 sm:$0xff]  }
 0x92c   :  { %6320 = vmatpush2.bf16.msra.mxu0 %v15501_v61  ;;  %6361 = vmatpush2.bf16.msra.mxu1 %v15502_v53  ;;  %v13117_v61 = vld [vmem:[#allocation15 + $0xa4] ss:$16 sps:$4 sm:$0xff]   ;;  %v13120_v53 = vld [vmem:[#allocation15 + $0xac] ss:$16 sps:$4 sm:$0xff]  }
 0x92d   :  { %6321 = vmatprep.subr.bf16.mxu0 %v15503_v30  ;;  %6362 = vmatprep.subr.bf16.mxu1 %v12756_v47  ;;  %v13126_v30 = vld [vmem:[#allocation15 + $0xa8] ss:$16 sps:$4 sm:$0xff]  }
 0x92e   :  { %v5976_v37 = vpop.f32.mrf.mxu0  ;;  %v6017_v55 = vpop.f32.mrf.mxu1 }
 0x92f   :  { %v5977_v19 = vadd.f32 %v5976_v37, %v11733_v9  ;;  %v6018_v56 = vadd.f32 %v6017_v55, %v11771_v31  ;;  %v13123_v37 = vld [vmem:[#allocation15 + $0xa0] ss:$16 sps:$4 sm:$0xff]   ;;  %v13132_v55 = vld [vmem:[#allocation15 + $0x8c] ss:$16 sps:$4 sm:$0xff]  }
 0x930   :  { %v5978_v21 = vpop.f32.mrf.mxu0  ;;  %v6019_v29 = vpop.f32.mrf.mxu1  ;;  %6322 = vmatpush2.bf16.msra.mxu0 %v12761_v34  ;;  %6363 = vmatpush2.bf16.msra.mxu1 %v12764_v1  ;;  %v13098_v1 = vld [vmem:[#allocation15 + $0xe0] ss:$16 sps:$4 sm:$0xff]   ;;  %v13157_v31 = vld [vmem:[#allocation15 + $0x4c] ss:$16 sps:$4 sm:$0xff]  }
 0x931   :  { %v7794_v27 = vmul.f32 -1.442695, %v5977_v19  ;;  %v5979_v62 = vadd.f32 %v5978_v21, %v11742_v42  ;;  %6398 = vmatprep.subr.bf16.mxu0 %v13090_v13  ;;  %6439 = vmatprep.subr.bf16.mxu1 %v13093_v58  ;;  %v7796_v19 = vmul.f32 -1.442695, %v6018_v56  ;;  %v13129_v21 = vld [vmem:[#allocation15 + $0x84] ss:$16 sps:$4 sm:$0xff]  }
 0x932   :  { %v5980_v60 = vpop.f32.mrf.mxu0  ;;  %v6021_v14 = vpop.f32.mrf.mxu1  ;;  %v13145_v56 = vld [vmem:[#allocation15 + $0x6c] ss:$16 sps:$4 sm:$0xff]   ;;  %15511 = vst [vmem:[#allocation94_spill] sm:$0xff] %v13157_v31 }
 0x933   :  { %8895 = vpow2.f32 %v7794_v27  ;;  %v7795_v47 = vmul.f32 -1.442695, %v5979_v62  ;;  %6324 = vmatmul.mubr.bf16.vlgmr.msra.gmra.mxu0 %v12996_v18  ;;  %6365 = vmatmul.mubr.bf16.vlgmr.msra.gmra.mxu1 %v12996_v18  ;;  %v13110_v18 = vld [vmem:[#allocation15 + $0xc0] ss:$16 sps:$4 sm:$0xff]   ;;  %v6020_v62 = vadd.f32 %v6019_v29, %v15374_v33  ;;  %15507 = vst [vmem:[#allocation90_spill] sm:$0xff] %v13145_v56 }
 0x934   :  { %v5981_v41 = vpop.f32.mrf.mxu0  ;;  %v6022_v34 = vpop.f32.mrf.mxu1  ;;  %6399 = vmatpush1.bf16.msra.mxu0 %v13098_v1  ;;  %6440 = vmatpush1.bf16.msra.mxu1 %v13101_v50  ;;  %v13136_v14 = vld [vmem:[#allocation15 + $0x80] ss:$16 sps:$4 sm:$0xff]   ;;  %v13151_v33 = vld [vmem:[#allocation15 + $0x68] ss:$16 sps:$4 sm:$0xff]  }
 0x935   :  { %8897 = vpow2.f32 %v7795_v47  ;;  %6400 = vmatprep.subr.bf16.mxu0 %v13104_v0  ;;  %6441 = vmatprep.subr.bf16.mxu1 %v13107_v8  ;;  %15504 = vst [vmem:[#allocation87_spill] sm:$0xff] %v13136_v14  ;;  %v13139_v47 = vld [vmem:[#allocation15 + $0x88] ss:$16 sps:$4 sm:$0xff]   ;;  %v13142_v34 = vld [vmem:[#allocation15 + $0x64] ss:$16 sps:$4 sm:$0xff]   ;;  %15509 = vst [vmem:[#allocation92_spill] sm:$0xff] %v13151_v33 }
 0x936   :  { %15505 = vst [vmem:[#allocation88_spill] sm:$0xff] %v13139_v47  ;;  %8899 = vpow2.f32 %v7796_v19  ;;  %15506 = vst [vmem:[#allocation89_spill] sm:$0xff] %v13142_v34  ;;  %v13154_v19 = vld [vmem:[#allocation15 + $0x44] ss:$16 sps:$4 sm:$0xff]  }
 0x937   :  { %15510 = vst [vmem:[#allocation93_spill] sm:$0xff] %v13154_v19 }
 0x938   :  { %6401 = vmatpush1.bf16.msra.mxu0 %v13110_v18  ;;  %6442 = vmatpush1.bf16.msra.mxu1 %v13113_v12 }
 0x939   :  { %6402 = vmatprep.subr.bf16.mxu0 %v13117_v61  ;;  %6443 = vmatprep.subr.bf16.mxu1 %v13120_v53 }
 0x93c   :  { %6403 = vmatpush1.bf16.msra.mxu0 %v13123_v37  ;;  %6444 = vmatpush1.bf16.msra.mxu1 %v13126_v30 }
 0x93d   :  { %6404 = vmatprep.subr.bf16.mxu0 %v13129_v21  ;;  %6445 = vmatprep.subr.bf16.mxu1 %v13132_v55 }
 0x940   :  { %v8896_v27 = vpop.eup %8895  ;;  %6405 = vmatpush1.bf16.msra.mxu0 %v13136_v14  ;;  %6446 = vmatpush1.bf16.msra.mxu1 %v13139_v47 }
 0x941   :  { %v6033_v60 = vadd.f32 1.0, %v8896_v27  ;;  %6406 = vmatprep.subr.bf16.mxu0 %v13142_v34  ;;  %6447 = vmatprep.subr.bf16.mxu1 %v13145_v56  ;;  %v13148_v27 = vld [vmem:[#allocation15 + $0x60] ss:$16 sps:$4 sm:$0xff]   ;;  %v13190_v34 = vld [vmem:[#allocation15 + $0x1e4] ss:$16 sps:$4 sm:$0xff]  }
 0x942   :  { %v8898_v41 = vpop.eup %8897  ;;  %15508 = vst [vmem:[#allocation91_spill] sm:$0xff] %v13148_v27  ;;  %15522 = vst [vmem:[#allocation105_spill] sm:$0xff] %v13190_v34 }
 0x943   :  { %8901 = vrcp.f32 %v6033_v60  ;;  %v6034_v29 = vadd.f32 1.0, %v8898_v41  ;;  %v13160_v60 = vld [vmem:[#allocation15 + $0x40] ss:$16 sps:$4 sm:$0xff]   ;;  %v13166_v41 = vld [vmem:[#allocation15 + $0x24] ss:$16 sps:$4 sm:$0xff]  }
 0x944   :  { %8903 = vtanh.f32 %v6020_v62  ;;  %6407 = vmatpush1.bf16.msra.mxu0 %v13148_v27  ;;  %6448 = vmatpush1.bf16.msra.mxu1 %v13151_v33  ;;  %15512 = vst [vmem:[#allocation95_spill] sm:$0xff] %v13160_v60  ;;  %v13163_v62 = vld [vmem:[#allocation15 + $0x48] ss:$16 sps:$4 sm:$0xff]   ;;  %15514 = vst [vmem:[#allocation97_spill] sm:$0xff] %v13166_v41 }
 0x945   :  { %8905 = vrcp.f32 %v6034_v29  ;;  %6408 = vmatprep.subr.bf16.mxu0 %v13154_v19  ;;  %6449 = vmatprep.subr.bf16.mxu1 %v13157_v31  ;;  %15513 = vst [vmem:[#allocation96_spill] sm:$0xff] %v13163_v62  ;;  %v13169_v29 = vld [vmem:[#allocation15 + $0x2c] ss:$16 sps:$4 sm:$0xff]   ;;  %v13172_v19 = vld [vmem:[#allocation15 + $0x20] ss:$16 sps:$4 sm:$0xff]  }
 0x946   :  { %15515 = vst [vmem:[#allocation98_spill] sm:$0xff] %v13169_v29  ;;  %15516 = vst [vmem:[#allocation99_spill] sm:$0xff] %v13172_v19  ;;  %v13175_v31 = vld [vmem:[#allocation15 + $0x28] ss:$16 sps:$4 sm:$0xff]  }
 0x947   :  { %15517 = vst [vmem:[#allocation100_spill] sm:$0xff] %v13175_v31 }
 0x948   :  { %6409 = vmatpush1.bf16.msra.mxu0 %v13160_v60  ;;  %6450 = vmatpush1.bf16.msra.mxu1 %v13163_v62  ;;  %v13178_v60 = vld [vmem:[#allocation15 + $0x4] ss:$16 sps:$4 sm:$0xff]   ;;  %v13181_v62 = vld [vmem:[#allocation15 + $0xc] ss:$16 sps:$4 sm:$0xff]  }
 0x949   :  { %6410 = vmatprep.subr.bf16.mxu0 %v13166_v41  ;;  %6451 = vmatprep.subr.bf16.mxu1 %v13169_v29  ;;  %15518 = vst [vmem:[#allocation101_spill] sm:$0xff] %v13178_v60  ;;  %15519 = vst [vmem:[#allocation102_spill] sm:$0xff] %v13181_v62  ;;  %v8900_v41 = vpop.eup %8899  ;;  %v13184_v29 = vld [vmem:[#allocation15] ss:$16 sps:$4 sm:$0xff]  }
 0x94a   :  { %15520 = vst [vmem:[#allocation103_spill] sm:$0xff] %v13184_v29  ;;  %v6035_v56 = vadd.f32 1.0, %v8900_v41  ;;  %v13205_v41 = vld [vmem:[#allocation15 + $0x1c4] ss:$16 sps:$4 sm:$0xff]  }
 0x94b   :  { %15524 = vst [vmem:[#allocation107_spill] sm:$0xff] %v13205_v41 }
 0x94c   :  { %6411 = vmatpush1.bf16.msra.mxu0 %v13172_v19  ;;  %6452 = vmatpush1.bf16.msra.mxu1 %v13175_v31  ;;  %v13187_v19 = vld [vmem:[#allocation15 + $0x8] ss:$16 sps:$4 sm:$0xff]   ;;  %8907 = vrcp.f32 %v6035_v56  ;;  %v13224_v56 = vld [vmem:[#allocation15 + $0x1a0] ss:$16 sps:$4 sm:$0xff]  }
 0x94d   :  { %6412 = vmatprep.subr.bf16.mxu0 %v13178_v60  ;;  %6453 = vmatprep.subr.bf16.mxu1 %v13181_v62  ;;  %15521 = vst [vmem:[#allocation104_spill] sm:$0xff] %v13187_v19  ;;  %v13193_v60 = vld [vmem:[#allocation15 + $0x1ec] ss:$16 sps:$4 sm:$0xff]   ;;  %15530 = vst [vmem:[#allocation113_spill] sm:$0xff] %v13224_v56 }
 0x950   :  { %v8902_v33 = vpop.eup %8901  ;;  %6413 = vmatpush1.bf16.msra.mxu0 %v13184_v29  ;;  %6454 = vmatpush1.bf16.msra.mxu1 %v13187_v19  ;;  %v13199_v29 = vld [vmem:[#allocation15 + $0x1e0] ss:$16 sps:$4 sm:$0xff]   ;;  %v13202_v19 = vld [vmem:[#allocation15 + $0x1e8] ss:$16 sps:$4 sm:$0xff]  }
 0x951   :  { %v8904_v27 = vpop.eup %8903  ;;  %6414 = vmatprep.subr.bf16.mxu0 %v13190_v34  ;;  %6455 = vmatprep.subr.bf16.mxu1 %v13193_v60  ;;  %v13208_v34 = vld [vmem:[#allocation15 + $0x1cc] ss:$16 sps:$4 sm:$0xff]  }
 0x952   :  { %v8906_v31 = vpop.eup %8905  ;;  %v6044_v47 = vmul.f32 %v8904_v27, %v8902_v33  ;;  %15525 = vst [vmem:[#allocation108_spill] sm:$0xff] %v13208_v34  ;;  %v13215_v33 = vld [vmem:[#allocation15 + $0x1c8] ss:$16 sps:$4 sm:$0xff]  }
 0x953   :  { %v6043_v62 = vmul.f32 %v8906_v31, %v12806_v48  ;;  %v13212_v31 = vld [vmem:[#allocation15 + $0x1c0] ss:$16 sps:$4 sm:$0xff]   ;;  %15527 = vst [vmem:[#allocation110_spill] sm:$0xff] %v13215_v33  ;;  %v13218_v48 = vld [vmem:[#allocation15 + $0x1a4] ss:$16 sps:$4 sm:$0xff]  }
 0x954   :  { %6415 = vmatpush2.bf16.msra.mxu0 %v13199_v29  ;;  %6456 = vmatpush2.bf16.msra.mxu1 %v13202_v19  ;;  %15526 = vst [vmem:[#allocation109_spill] sm:$0xff] %v13212_v31  ;;  %15528 = vst [vmem:[#allocation111_spill] sm:$0xff] %v13218_v48  ;;  %v13227_v27 = vld [vmem:[#allocation15 + $0x1a8] ss:$16 sps:$4 sm:$0xff]  }
 0x955   :  { %v13197_v14 = vadd.f32 %v6044_v47, %v6043_v62  ;;  %6416 = vmatprep.subr.bf16.mxu0 %v13205_v41  ;;  %6457 = vmatprep.subr.bf16.mxu1 %v13208_v34  ;;  %v13221_v47 = vld [vmem:[#allocation15 + $0x1ac] ss:$16 sps:$4 sm:$0xff]   ;;  %15531 = vst [vmem:[#allocation114_spill] sm:$0xff] %v13227_v27  ;;  %v13230_v62 = vld [vmem:[#allocation15 + $0x184] ss:$16 sps:$4 sm:$0xff]  }
 0x956   :  { %15529 = vst [vmem:[#allocation112_spill] sm:$0xff] %v13221_v47  ;;  %15532 = vst [vmem:[#allocation115_spill] sm:$0xff] %v13230_v62  ;;  %v13260_v34 = vld [vmem:[#allocation15 + $0x140] ss:$16 sps:$4 sm:$0xff]   ;;  %v13263_v41 = vld [vmem:[#allocation15 + $0x148] ss:$16 sps:$4 sm:$0xff]  }
 0x957   :  { %15523 = vst [vmem:[#allocation106_spill] sm:$0xff] %v13197_v14  ;;  %8909 = vtanh.f32 %v13197_v14  ;;  %v13233_v14 = vld [vmem:[#allocation15 + $0x18c] ss:$16 sps:$4 sm:$0xff]   ;;  %15539 = vst [vmem:[#allocation122_spill] sm:$0xff] %v13260_v34 }
 0x958   :  { %6417 = vmatpush2.bf16.msra.mxu0 %v13212_v31  ;;  %6458 = vmatpush2.bf16.msra.mxu1 %v13215_v33  ;;  %15533 = vst [vmem:[#allocation116_spill] sm:$0xff] %v13233_v14  ;;  %v13248_v31 = vld [vmem:[#allocation15 + $0x160] ss:$16 sps:$4 sm:$0xff]  }
 0x959   :  { %6418 = vmatprep.subr.bf16.mxu0 %v13218_v48  ;;  %6459 = vmatprep.subr.bf16.mxu1 %v13221_v47  ;;  %v13236_v48 = vld [vmem:[#allocation15 + $0x180] ss:$16 sps:$4 sm:$0xff]   ;;  %v13239_v47 = vld [vmem:[#allocation15 + $0x188] ss:$16 sps:$4 sm:$0xff]  }
 0x95a   :  { %15534 = vst [vmem:[#allocation117_spill] sm:$0xff] %v13236_v48  ;;  %15535 = vst [vmem:[#allocation118_spill] sm:$0xff] %v13239_v47 }
 0x95c   :  { %6419 = vmatpush2.bf16.msra.mxu0 %v13224_v56  ;;  %6460 = vmatpush2.bf16.msra.mxu1 %v13227_v27  ;;  %v13242_v56 = vld [vmem:[#allocation15 + $0x164] ss:$16 sps:$4 sm:$0xff]   ;;  %v13245_v27 = vld [vmem:[#allocation15 + $0x16c] ss:$16 sps:$4 sm:$0xff]  }
 0x95d   :  { %6420 = vmatprep.subr.bf16.mxu0 %v13230_v62  ;;  %6461 = vmatprep.subr.bf16.mxu1 %v13233_v14  ;;  %15536 = vst [vmem:[#allocation119_spill] sm:$0xff] %v13242_v56  ;;  %15537 = vst [vmem:[#allocation120_spill] sm:$0xff] %v13245_v27  ;;  %v8908_v62 = vpop.eup %8907  ;;  %v13251_v14 = vld [vmem:[#allocation15 + $0x168] ss:$16 sps:$4 sm:$0xff]  }
 0x960   :  { %6421 = vmatpush2.bf16.msra.mxu0 %v13236_v48  ;;  %6462 = vmatpush2.bf16.msra.mxu1 %v13239_v47  ;;  %v13254_v47 = vld [vmem:[#allocation15 + $0x144] ss:$16 sps:$4 sm:$0xff]  }
 0x961   :  { %6422 = vmatprep.subr.bf16.mxu0 %v13242_v56  ;;  %6463 = vmatprep.subr.bf16.mxu1 %v13245_v27  ;;  %v13257_v56 = vld [vmem:[#allocation15 + $0x14c] ss:$16 sps:$4 sm:$0xff]  }
 0x962   :  { %15538 = vst [vmem:[#allocation121_spill] sm:$0xff] %v13257_v56 }
 0x964   :  { %v8910_v33 = vpop.eup %8909  ;;  %6423 = vmatpush2.bf16.msra.mxu0 %v13248_v31  ;;  %6464 = vmatpush2.bf16.msra.mxu1 %v13251_v14 }
 0x965   :  { %v6047_v48 = vmul.f32 %v8910_v33, %v8908_v62  ;;  %6424 = vmatprep.subr.bf16.mxu0 %v13254_v47  ;;  %6465 = vmatprep.subr.bf16.mxu1 %v13257_v56  ;;  %v13266_v33 = vld [vmem:[#allocation15 + $0x124] ss:$16 sps:$4 sm:$0xff]   ;;  %v13269_v62 = vld [vmem:[#allocation15 + $0x12c] ss:$16 sps:$4 sm:$0xff]   ;;  %v13272_v56 = vld [vmem:[#allocation15 + $0x120] ss:$16 sps:$4 sm:$0xff]  }
 0x966   :  { %15540 = vst [vmem:[#allocation123_spill] sm:$0xff] %v13266_v33  ;;  %15541 = vst [vmem:[#allocation124_spill] sm:$0xff] %v13269_v62 }
 0x967   :  { %v6048_v27 = vpack.c.bf16 %v6047_v48, %v6047_v48  ;;  %v13275_v48 = vld [vmem:[#allocation15 + $0x128] ss:$16 sps:$4 sm:$0xff]  }
 0x968   :  { %6425 = vmatpush2.bf16.msra.mxu0 %v13260_v34  ;;  %6466 = vmatpush2.bf16.msra.mxu1 %v13263_v41  ;;  %15542 = vst [vmem:[#allocation125_spill] sm:$0xff] %v13275_v48  ;;  %v13278_v34 = vld [vmem:[#allocation15 + $0x104] ss:$16 sps:$4 sm:$0xff]  }
 0x969   :  { %6430 = vmatprep.mubr.bf16.mxu0 %v6048_v27  ;;  %6471 = vmatprep.mubr.bf16.mxu1 %v6048_v27  ;;  %15543 = vst [vmem:[#allocation126_spill] sm:$0xff] %v13278_v34  ;;  %v13281_v27 = vld [vmem:[#allocation15 + $0x10c] ss:$16 sps:$4 sm:$0xff]  }
 0x96a   :  { %6426 = vmatprep.subr.bf16.mxu0 %v13266_v33  ;;  %6467 = vmatprep.subr.bf16.mxu1 %v13269_v62  ;;  %15544 = vst [vmem:[#allocation127_spill] sm:$0xff] %v13281_v27  ;;  %v13284_v33 = vld [vmem:[#allocation15 + $0x100] ss:$16 sps:$4 sm:$0xff]   ;;  %v13287_v62 = vld [vmem:[#allocation15 + $0x108] ss:$16 sps:$4 sm:$0xff]  }
 0x96b   :  { %15545 = vst [vmem:[#allocation128_spill] sm:$0xff] %v13284_v33  ;;  %15546 = vst [vmem:[#allocation129_spill] sm:$0xff] %v13287_v62 }
 0x96c   :  { %6427 = vmatpush2.bf16.msra.mxu0 %v13272_v56  ;;  %6468 = vmatpush2.bf16.msra.mxu1 %v13275_v48 }
 0x96d   :  { %6428 = vmatprep.subr.bf16.mxu0 %v13278_v34  ;;  %6469 = vmatprep.subr.bf16.mxu1 %v13281_v27 }
 0x970   :  { %6429 = vmatpush2.bf16.msra.mxu0 %v13284_v33  ;;  %6470 = vmatpush2.bf16.msra.mxu1 %v13287_v62 }
 0x971   :  { %6505 = vmatprep.subr.bf16.mxu0 %v12846_v10  ;;  %6546 = vmatprep.subr.bf16.mxu1 %v12849_v6 }
 0x973   :  { %6431 = vmatmul.mubr.bf16.vlgmr.msra.gmra.mxu0 %v13074_v20  ;;  %6472 = vmatmul.mubr.bf16.vlgmr.msra.gmra.mxu1 %v13074_v20  ;;  %v6085_v34 = vpop.f32.mrf.mxu0  ;;  %v6126_v48 = vpop.f32.mrf.mxu1 }
 0x974   :  { %6506 = vmatpush1.bf16.msra.mxu0 %v12862_v63  ;;  %6547 = vmatpush1.bf16.msra.mxu1 %v12865_v59  ;;  %v15547_v63 = vld [vmem:[#allocation152_spill] sm:$0xff]  ;;  %v15548_v59 = vld [vmem:[#allocation153_spill] sm:$0xff] }
 0x975   :  { %v6087_v27 = vpop.f32.mrf.mxu0  ;;  %v6128_v33 = vpop.f32.mrf.mxu1  ;;  %6507 = vmatprep.subr.bf16.mxu0 %v12868_v22  ;;  %6548 = vmatprep.subr.bf16.mxu1 %v12871_v52  ;;  %v15549_v22 = vld [vmem:[#allocation154_spill] sm:$0xff]  ;;  %v15550_v52 = vld [vmem:[#allocation155_spill] sm:$0xff] }
 0x977   :  { %v6089_v62 = vpop.f32.mrf.mxu0  ;;  %v6130_v10 = vpop.f32.mrf.mxu1 }
 0x978   :  { %6508 = vmatpush1.bf16.msra.mxu0 %v12874_v15  ;;  %6549 = vmatpush1.bf16.msra.mxu1 %v12877_v45  ;;  %v15551_v15 = vld [vmem:[#allocation79_spill] sm:$0xff]  ;;  %v15552_v45 = vld [vmem:[#allocation80_spill] sm:$0xff] }
 0x979   :  { %v6090_v6 = vpop.f32.mrf.mxu0  ;;  %v6131_v20 = vpop.f32.mrf.mxu1  ;;  %6509 = vmatprep.subr.bf16.mxu0 %v12881_v54  ;;  %6550 = vmatprep.subr.bf16.mxu1 %v12884_v16  ;;  %v15553_v54 = vld [vmem:[#allocation81_spill] sm:$0xff]  ;;  %v15554_v16 = vld [vmem:[#allocation82_spill] sm:$0xff] }
 0x97a   :  { %v9593_v62 = vld [vmem:[#allocation12 + $0x180] ss:$16 sps:$4 sm:$0xff]   ;;  %v9598_v6 = vld [vmem:[#allocation12 + $0x168] ss:$16 sps:$4 sm:$0xff]  }
 0x97b   :  { %v9597_v10 = vld [vmem:[#allocation12 + $0x160] ss:$16 sps:$4 sm:$0xff]  }
 0x97c   :  { %6510 = vmatpush1.bf16.msra.mxu0 %v12887_v40  ;;  %6551 = vmatpush1.bf16.msra.mxu1 %v12890_v39  ;;  %v15555_v40 = vld [vmem:[#allocation83_spill] sm:$0xff]  ;;  %v15556_v39 = vld [vmem:[#allocation84_spill] sm:$0xff] }
 0x97d   :  { %6511 = vmatprep.subr.bf16.mxu0 %v12893_v38  ;;  %6552 = vmatprep.subr.bf16.mxu1 %v12896_v44  ;;  %v15557_v38 = vld [vmem:[#allocation85_spill] sm:$0xff]  ;;  %v6137_v44 = vcombine.low %v6085_v34, %v6087_v27 }
 0x97e   :  { %v9596_v27 = vld [vmem:[#allocation12 + $0x16c] ss:$16 sps:$4 sm:$0xff]  }
 0x980   :  { %6512 = vmatpush1.bf16.msra.mxu0 %v12900_v5  ;;  %6553 = vmatpush1.bf16.msra.mxu1 %v12903_v26  ;;  %v6138_v5 = vcombine.low %v6126_v48, %v6128_v33  ;;  %v15558_v26 = vld [vmem:[#allocation86_spill] sm:$0xff] }
 0x981   :  { %6513 = vmatprep.subr.bf16.mxu0 %v12906_v25  ;;  %6554 = vmatprep.subr.bf16.mxu1 %v12909_v43  ;;  %v15559_v25 = vld [vmem:[#allocation27_spill] sm:$0xff]  ;;  %v9591_v33 = vld [vmem:[#allocation12 + $0x184] ss:$16 sps:$4 sm:$0xff]  }
 0x982   :  { %v6145_v43 = vrot.slane %v6137_v44, %v15559_v25  ;;  %v9595_v48 = vld [vmem:[#allocation12 + $0x164] ss:$16 sps:$4 sm:$0xff]   ;;  %v9610_v44 = vld [vmem:[#allocation12 + $0x108] ss:$16 sps:$4 sm:$0xff]  }
 0x984   :  { %6514 = vmatpush1.bf16.msra.mxu0 %v12912_v36  ;;  %6555 = vmatpush1.bf16.msra.mxu1 %v12915_v35  ;;  %v6152_v36 = vrot.slane %v6138_v5, %v15559_v25  ;;  %v13335_v5 = vld [vmem:[#allocation13 + $0xe4] ss:$16 sps:$4 sm:$0xff]  }
 0x985   :  { %6515 = vmatprep.subr.bf16.mxu0 %v12918_v23  ;;  %6556 = vmatprep.subr.bf16.mxu1 %v15547_v63  ;;  %v9587_v23 = vld [vmem:[#allocation12 + $0x1a4] ss:$16 sps:$4 sm:$0xff]  }
 0x986   :  { %v6153_v35 = vcombine.low %v6145_v43, %v6152_v36  ;;  %v9599_v63 = vld [vmem:[#allocation12 + $0x144] ss:$16 sps:$4 sm:$0xff]  }
 0x987   :  { %v15560_v36 = vld [vmem:[#allocation68_spill] sm:$0xff] }
 0x988   :  { %6516 = vmatpush1.bf16.msra.mxu0 %v15548_v59  ;;  %6557 = vmatpush1.bf16.msra.mxu1 %v15549_v22  ;;  %v6160_v34 = vrot.slane %v6153_v35, %v15559_v25  ;;  %v9600_v59 = vld [vmem:[#allocation12 + $0x14c] ss:$16 sps:$4 sm:$0xff]   ;;  %v9601_v22 = vld [vmem:[#allocation12 + $0x140] ss:$16 sps:$4 sm:$0xff]  }
 0x989   :  { %6517 = vmatprep.subr.bf16.mxu0 %v15550_v52  ;;  %6558 = vmatprep.subr.bf16.mxu1 %v15551_v15  ;;  %v9602_v52 = vld [vmem:[#allocation12 + $0x148] ss:$16 sps:$4 sm:$0xff]   ;;  %v9603_v15 = vld [vmem:[#allocation12 + $0x124] ss:$16 sps:$4 sm:$0xff]  }
 0x98c   :  { %6518 = vmatpush1.bf16.msra.mxu0 %v15552_v45  ;;  %6559 = vmatpush1.bf16.msra.mxu1 %v15553_v54  ;;  %v9604_v45 = vld [vmem:[#allocation12 + $0x12c] ss:$16 sps:$4 sm:$0xff]   ;;  %v9605_v54 = vld [vmem:[#allocation12 + $0x120] ss:$16 sps:$4 sm:$0xff]  }
 0x98d   :  { %6519 = vmatprep.subr.bf16.mxu0 %v15554_v16  ;;  %6560 = vmatprep.subr.bf16.mxu1 %v15555_v40  ;;  %v9606_v16 = vld [vmem:[#allocation12 + $0x128] ss:$16 sps:$4 sm:$0xff]   ;;  %v9607_v40 = vld [vmem:[#allocation12 + $0x104] ss:$16 sps:$4 sm:$0xff]  }
 0x990   :  { %6520 = vmatpush1.bf16.msra.mxu0 %v15556_v39  ;;  %6561 = vmatpush1.bf16.msra.mxu1 %v15557_v38  ;;  %v9608_v39 = vld [vmem:[#allocation12 + $0x10c] ss:$16 sps:$4 sm:$0xff]   ;;  %v9609_v38 = vld [vmem:[#allocation12 + $0x100] ss:$16 sps:$4 sm:$0xff]  }
 0x991   :  { %6521 = vmatprep.subr.bf16.mxu0 %v15558_v26  ;;  %6562 = vmatprep.subr.bf16.mxu1 %v12957_v7  ;;  %v9588_v7 = vld [vmem:[#allocation12 + $0x1ac] ss:$16 sps:$4 sm:$0xff]  }
 0x992   :  { %v13338_v26 = vld [vmem:[#allocation13 + $0xec] ss:$16 sps:$4 sm:$0xff]  }
 0x994   :  { %6522 = vmatpush2.bf16.msra.mxu0 %v12963_v49  ;;  %6563 = vmatpush2.bf16.msra.mxu1 %v12966_v57  ;;  %v9589_v49 = vld [vmem:[#allocation12 + $0x1a0] ss:$16 sps:$4 sm:$0xff]   ;;  %v9590_v57 = vld [vmem:[#allocation12 + $0x1a8] ss:$16 sps:$4 sm:$0xff]  }
 0x995   :  { %6523 = vmatprep.subr.bf16.mxu0 %v12969_v4  ;;  %6564 = vmatprep.subr.bf16.mxu1 %v12972_v2  ;;  %v9592_v4 = vld [vmem:[#allocation12 + $0x18c] ss:$16 sps:$4 sm:$0xff]   ;;  %v6050_v2 = vld [vmem:[#allocation3 + $0x7] ss:$8 sm:$0xf] }
 0x998   :  { %6524 = vmatpush2.bf16.msra.mxu0 %v12976_v3  ;;  %6565 = vmatpush2.bf16.msra.mxu1 %v12979_v24  ;;  %v9594_v3 = vld [vmem:[#allocation12 + $0x188] ss:$16 sps:$4 sm:$0xff]   ;;  %v6162_v24 = vadd.f32 %v6160_v34, %v6050_v2  ;;  %v15561_v34 = vld [vmem:[#allocation69_spill] sm:$0xff] }
 0x999   :  { %6525 = vmatprep.subr.bf16.mxu0 %v9587_v23  ;;  %6566 = vmatprep.subr.bf16.mxu1 %v9588_v7 }
 0x99a   :  { %v7797_v20 = vmul.f32 -1.442695, %v6162_v24 }
 0x99c   :  { %6526 = vmatpush2.bf16.msra.mxu0 %v9589_v49  ;;  %6567 = vmatpush2.bf16.msra.mxu1 %v9590_v57  ;;  %8911 = vpow2.f32 %v7797_v20  ;;  %v6170_v20 = vrot.slane %v6162_v24, 3 }
 0x99d   :  { %6527 = vmatprep.subr.bf16.mxu0 %v9591_v33  ;;  %6568 = vmatprep.subr.bf16.mxu1 %v9592_v4 }
 0x9a0   :  { %6528 = vmatpush2.bf16.msra.mxu0 %v9593_v62  ;;  %6569 = vmatpush2.bf16.msra.mxu1 %v9594_v3 }
 0x9a1   :  { %6529 = vmatprep.subr.bf16.mxu0 %v9595_v48  ;;  %6570 = vmatprep.subr.bf16.mxu1 %v9596_v27 }
 0x9a4   :  { %6530 = vmatpush2.bf16.msra.mxu0 %v9597_v10  ;;  %6571 = vmatpush2.bf16.msra.mxu1 %v9598_v6  ;;  %v15562_v10 = vld [vmem:[#allocation70_spill] sm:$0xff] }
 0x9a5   :  { %6531 = vmatprep.subr.bf16.mxu0 %v9599_v63  ;;  %6572 = vmatprep.subr.bf16.mxu1 %v9600_v59 }
 0x9a8   :  { %6532 = vmatpush2.bf16.msra.mxu0 %v9601_v22  ;;  %6573 = vmatpush2.bf16.msra.mxu1 %v9602_v52  ;;  %v15563_v22 = vld [vmem:[#allocation71_spill] sm:$0xff] }
 0x9a9   :  { %6533 = vmatprep.subr.bf16.mxu0 %v9603_v15  ;;  %6574 = vmatprep.subr.bf16.mxu1 %v9604_v45  ;;  %v8912_v49 = vpop.eup %8911 }
 0x9aa   :  { %v6166_v3 = vadd.f32 1.0, %v8912_v49 }
 0x9ac   :  { %6534 = vmatpush2.bf16.msra.mxu0 %v9605_v54  ;;  %6575 = vmatpush2.bf16.msra.mxu1 %v9606_v16 }
 0x9ad   :  { %6535 = vmatprep.subr.bf16.mxu0 %v9607_v40  ;;  %6576 = vmatprep.subr.bf16.mxu1 %v9608_v39  ;;  %v15564_v39 = vld [vmem:[#allocation78_spill] sm:$0xff] }
 0x9b0   :  { %6536 = vmatpush2.bf16.msra.mxu0 %v9609_v38  ;;  %6577 = vmatpush2.bf16.msra.mxu1 %v9610_v44 }
 0x9b1   :  { %6612 = vmatprep.subr.bf16.mxu0 %v13335_v5  ;;  %6653 = vmatprep.subr.bf16.mxu1 %v13338_v26 }
 0x9b3   :  { %v6218_v25 = vpop.f32.mrf.mxu0  ;;  %v6259_v43 = vpop.f32.mrf.mxu1 }
 0x9b4   :  { %v6219_v35 = vadd.f32 %v6218_v25, %v15560_v36  ;;  %v6260_v6 = vadd.f32 %v6259_v43, %v15562_v10  ;;  %v13433_v10 = vld [vmem:[#allocation13 + $0x28] ss:$16 sps:$4 sm:$0xff]   ;;  %v13463_v36 = vld [vmem:[#allocation13 + $0x1cc] ss:$16 sps:$4 sm:$0xff]  }
 0x9b5   :  { %v6220_v23 = vpop.f32.mrf.mxu0  ;;  %v6261_v7 = vpop.f32.mrf.mxu1  ;;  %15567 = vst [vmem:[#allocation132_spill] sm:$0xff] %v13433_v10  ;;  %15577 = vst [vmem:[#allocation147_spill] sm:$0xff] %v13463_v36 }
 0x9b6   :  { %v7798_v57 = vmul.f32 -1.442695, %v6219_v35  ;;  %v6221_v33 = vadd.f32 %v6220_v23, %v15561_v34  ;;  %v7800_v63 = vmul.f32 -1.442695, %v6260_v6  ;;  %v6262_v52 = vadd.f32 %v6261_v7, %v15563_v22  ;;  %v13430_v22 = vld [vmem:[#allocation13 + $0x20] ss:$16 sps:$4 sm:$0xff]  }
 0x9b7   :  { %v6222_v4 = vpop.f32.mrf.mxu0  ;;  %v6263_v2 = vpop.f32.mrf.mxu1  ;;  %15566 = vst [vmem:[#allocation131_spill] sm:$0xff] %v13430_v22  ;;  %v13460_v34 = vld [vmem:[#allocation13 + $0x1c4] ss:$16 sps:$4 sm:$0xff]  }
 0x9b8   :  { %8913 = vpow2.f32 %v7798_v57  ;;  %v7799_v62 = vmul.f32 -1.442695, %v6221_v33  ;;  %15576 = vst [vmem:[#allocation142_spill] sm:$0xff] %v13460_v34 }
 0x9b9   :  { %v6223_v48 = vpop.f32.mrf.mxu0  ;;  %v6264_v27 = vpop.f32.mrf.mxu1 }
 0x9ba   :  { %8915 = vpow2.f32 %v7799_v62 }
 0x9bb   :  { %8917 = vrcp.f32 %v6166_v3 }
 0x9bc   :  { %8919 = vtanh.f32 %v6170_v20 }
 0x9bd   :  { %8921 = vpow2.f32 %v7800_v63 }
 0x9c5   :  { %v8914_v59 = vpop.eup %8913 }
 0x9c6   :  { %v6275_v15 = vadd.f32 1.0, %v8914_v59  ;;  %v13357_v59 = vld [vmem:[#allocation13 + $0xe8] ss:$16 sps:$4 sm:$0xff]  }
 0x9c7   :  { %v8916_v45 = vpop.eup %8915 }
 0x9c8   :  { %8923 = vrcp.f32 %v6275_v15  ;;  %v6276_v54 = vadd.f32 1.0, %v8916_v45  ;;  %v8918_v16 = vpop.eup %8917  ;;  %v13363_v15 = vld [vmem:[#allocation13 + $0xcc] ss:$16 sps:$4 sm:$0xff]  }
 0x9c9   :  { %8925 = vtanh.f32 %v6262_v52  ;;  %v6174_v40 = vrot.slane %v8918_v16, 1  ;;  %v8920_v44 = vpop.eup %8919  ;;  %v6180_v62 = vrot.slane %v8918_v16, 2  ;;  %v13360_v52 = vld [vmem:[#allocation13 + $0xc4] ss:$16 sps:$4 sm:$0xff]  }
 0x9ca   :  { %8927 = vrcp.f32 %v6276_v54  ;;  %v6177_v25 = vmul.f32 %v8920_v44, %v8918_v16  ;;  %v8922_v43 = vpop.eup %8921 }
 0x9cb   :  { %v6176_v38 = vmul.f32 %v6174_v40, %v15564_v39  ;;  %v6277_v57 = vadd.f32 1.0, %v8922_v43  ;;  %v13367_v40 = vld [vmem:[#allocation13 + $0xc0] ss:$16 sps:$4 sm:$0xff]   ;;  %v13370_v39 = vld [vmem:[#allocation13 + $0xc8] ss:$16 sps:$4 sm:$0xff]  }
 0x9cc   :  { %v13376_v43 = vld [vmem:[#allocation13 + $0xac] ss:$16 sps:$4 sm:$0xff]  }
 0x9cd   :  { %v6178_v35 = vadd.f32 %v6177_v25, %v6176_v38  ;;  %v13373_v25 = vld [vmem:[#allocation13 + $0xa4] ss:$16 sps:$4 sm:$0xff]  }
 0x9cf   :  { %8929 = vtanh.f32 %v6178_v35 }
 0x9d0   :  { %8931 = vrcp.f32 %v6277_v57 }
 0x9d5   :  { %v8924_v24 = vpop.eup %8923 }
 0x9d6   :  { %v8926_v23 = vpop.eup %8925 }
 0x9d7   :  { %v8928_v49 = vpop.eup %8927  ;;  %v6286_v33 = vmul.f32 %v8926_v23, %v8924_v24 }
 0x9d8   :  { %v6285_v7 = vmul.f32 %v8928_v49, %v12961_v32  ;;  %v13354_v32 = vld [vmem:[#allocation13 + $0xe0] ss:$16 sps:$4 sm:$0xff]  }
 0x9da   :  { %v13347_v4 = vadd.f32 %v6286_v33, %v6285_v7  ;;  %v13380_v7 = vld [vmem:[#allocation13 + $0xa0] ss:$16 sps:$4 sm:$0xff]   ;;  %v13383_v33 = vld [vmem:[#allocation13 + $0xa8] ss:$16 sps:$4 sm:$0xff]  }
 0x9dc   :  { %15565 = vst [vmem:[#allocation130_spill] sm:$0xff] %v13347_v4  ;;  %8933 = vtanh.f32 %v13347_v4  ;;  %v8930_v2 = vpop.eup %8929 }
 0x9dd   :  { %v8932_v3 = vpop.eup %8931  ;;  %v6182_v27 = vmul.f32 %v8930_v2, %v6180_v62 }
 0x9df   :  { %v6183_v63 = vpack.c.bf16 %v6182_v27, %v6182_v27  ;;  %v13392_v27 = vld [vmem:[#allocation13 + $0x80] ss:$16 sps:$4 sm:$0xff]  }
 0x9e9   :  { %v8934_v48 = vpop.eup %8933 }
 0x9ea   :  { %v6289_v6 = vmul.f32 %v8934_v48, %v8932_v3  ;;  %v13386_v3 = vld [vmem:[#allocation13 + $0x84] ss:$16 sps:$4 sm:$0xff]   ;;  %v13389_v48 = vld [vmem:[#allocation13 + $0x8c] ss:$16 sps:$4 sm:$0xff]  }
 0x9ec   :  { %v13350_v20 = vpack.c.bf16 %v6289_v6, %v6289_v6  ;;  %v13395_v6 = vld [vmem:[#allocation13 + $0x88] ss:$16 sps:$4 sm:$0xff]  }
 0x9ee   :  { %6537 = vmatprep.mubr.bf16.mxu0 %v13350_v20  ;;  %6578 = vmatprep.mubr.bf16.mxu1 %v13350_v20 }
 0x9ef   :  { %6538 = vmatmul.mubr.bf16.vlgmr.msra.gmra.mxu0 %v6183_v63  ;;  %6579 = vmatmul.mubr.bf16.vlgmr.msra.gmra.mxu1 %v6183_v63  ;;  %v13398_v63 = vld [vmem:[#allocation13 + $0x64] ss:$16 sps:$4 sm:$0xff]  }
 0x9f0   :  { %6613 = vmatpush1.bf16.msra.mxu0 %v13354_v32  ;;  %6654 = vmatpush1.bf16.msra.mxu1 %v13357_v59 }
 0x9f1   :  { %6614 = vmatprep.subr.bf16.mxu0 %v13360_v52  ;;  %6655 = vmatprep.subr.bf16.mxu1 %v13363_v15 }
 0x9f3   :  { %v6325_v45 = vpop.f32.mrf.mxu0  ;;  %v6366_v54 = vpop.f32.mrf.mxu1 }
 0x9f4   :  { %v6326_v16 = vadd.f32 %v6325_v45, %v11084_v11  ;;  %6615 = vmatpush1.bf16.msra.mxu0 %v13367_v40  ;;  %6656 = vmatpush1.bf16.msra.mxu1 %v13370_v39  ;;  %v13401_v45 = vld [vmem:[#allocation13 + $0x6c] ss:$16 sps:$4 sm:$0xff]  }
 0x9f5   :  { %v6327_v38 = vpop.f32.mrf.mxu0  ;;  %v6368_v44 = vpop.f32.mrf.mxu1  ;;  %6616 = vmatprep.subr.bf16.mxu0 %v13373_v25  ;;  %6657 = vmatprep.subr.bf16.mxu1 %v13376_v43 }
 0x9f6   :  { %v7801_v24 = vmul.f32 -1.442695, %v6326_v16  ;;  %v6328_v35 = vadd.f32 %v6327_v38, %v11089_v46  ;;  %v6367_v16 = vadd.f32 %v6366_v54, %v15448_v28  ;;  %v13405_v38 = vld [vmem:[#allocation13 + $0x60] ss:$16 sps:$4 sm:$0xff]   ;;  %v13420_v54 = vld [vmem:[#allocation13 + $0x48] ss:$16 sps:$4 sm:$0xff]  }
 0x9f7   :  { %v6329_v23 = vpop.f32.mrf.mxu0  ;;  %v6370_v49 = vpop.f32.mrf.mxu1  ;;  %v13424_v28 = vld [vmem:[#allocation13 + $0x24] ss:$16 sps:$4 sm:$0xff]   ;;  %v13427_v46 = vld [vmem:[#allocation13 + $0x2c] ss:$16 sps:$4 sm:$0xff]  }
 0x9f8   :  { %8935 = vpow2.f32 %v7801_v24  ;;  %v7802_v57 = vmul.f32 -1.442695, %v6328_v35  ;;  %6617 = vmatpush1.bf16.msra.mxu0 %v13380_v7  ;;  %6658 = vmatpush1.bf16.msra.mxu1 %v13383_v33  ;;  %v13408_v24 = vld [vmem:[#allocation13 + $0x68] ss:$16 sps:$4 sm:$0xff]   ;;  %v13411_v35 = vld [vmem:[#allocation13 + $0x44] ss:$16 sps:$4 sm:$0xff]  }
 0x9f9   :  { %v6330_v2 = vpop.f32.mrf.mxu0  ;;  %v6371_v62 = vpop.f32.mrf.mxu1  ;;  %6618 = vmatprep.subr.bf16.mxu0 %v13386_v3  ;;  %6659 = vmatprep.subr.bf16.mxu1 %v13389_v48  ;;  %v13414_v23 = vld [vmem:[#allocation13 + $0x4c] ss:$16 sps:$4 sm:$0xff]   ;;  %v7803_v49 = vmul.f32 -1.442695, %v6367_v16 }
 0x9fa   :  { %8937 = vpow2.f32 %v7802_v57  ;;  %v13417_v57 = vld [vmem:[#allocation13 + $0x40] ss:$16 sps:$4 sm:$0xff]   ;;  %v6369_v62 = vadd.f32 %v6368_v44, %v15455_v51  ;;  %v13436_v44 = vld [vmem:[#allocation13 + $0x4] ss:$16 sps:$4 sm:$0xff]   ;;  %v13439_v51 = vld [vmem:[#allocation13 + $0xc] ss:$16 sps:$4 sm:$0xff]  }
 0x9fb   :  { %8939 = vpow2.f32 %v7803_v49  ;;  %15568 = vst [vmem:[#allocation133_spill] sm:$0xff] %v13436_v44  ;;  %15569 = vst [vmem:[#allocation134_spill] sm:$0xff] %v13439_v51  ;;  %v13442_v49 = vld [vmem:[#allocation13] ss:$16 sps:$4 sm:$0xff]  }
 0x9fc   :  { %6619 = vmatpush1.bf16.msra.mxu0 %v13392_v27  ;;  %6660 = vmatpush1.bf16.msra.mxu1 %v13395_v6  ;;  %15570 = vst [vmem:[#allocation135_spill] sm:$0xff] %v13442_v49 }
 0x9fd   :  { %6620 = vmatprep.subr.bf16.mxu0 %v13398_v63  ;;  %6661 = vmatprep.subr.bf16.mxu1 %v13401_v45 }
 0xa00   :  { %6621 = vmatpush1.bf16.msra.mxu0 %v13405_v38  ;;  %6662 = vmatpush1.bf16.msra.mxu1 %v13408_v24 }
 0xa01   :  { %6622 = vmatprep.subr.bf16.mxu0 %v13411_v35  ;;  %6663 = vmatprep.subr.bf16.mxu1 %v13414_v23 }
 0xa04   :  { %6623 = vmatpush1.bf16.msra.mxu0 %v13417_v57  ;;  %6664 = vmatpush1.bf16.msra.mxu1 %v13420_v54 }
 0xa05   :  { %v8936_v2 = vpop.eup %8935  ;;  %6624 = vmatprep.subr.bf16.mxu0 %v13424_v28  ;;  %6665 = vmatprep.subr.bf16.mxu1 %v13427_v46 }
 0xa06   :  { %v6382_v16 = vadd.f32 1.0, %v8936_v2  ;;  %v13448_v2 = vld [vmem:[#allocation13 + $0x1e4] ss:$16 sps:$4 sm:$0xff]  }
 0xa07   :  { %v8938_v11 = vpop.eup %8937  ;;  %15572 = vst [vmem:[#allocation137_spill] sm:$0xff] %v13448_v2 }
 0xa08   :  { %8941 = vrcp.f32 %v6382_v16  ;;  %v6383_v4 = vadd.f32 1.0, %v8938_v11  ;;  %6625 = vmatpush1.bf16.msra.mxu0 %v13430_v22  ;;  %6666 = vmatpush1.bf16.msra.mxu1 %v13433_v10  ;;  %v13445_v11 = vld [vmem:[#allocation13 + $0x8] ss:$16 sps:$4 sm:$0xff]   ;;  %v13454_v16 = vld [vmem:[#allocation13 + $0x1e0] ss:$16 sps:$4 sm:$0xff]  }
 0xa09   :  { %8943 = vtanh.f32 %v6369_v62  ;;  %6626 = vmatprep.subr.bf16.mxu0 %v13436_v44  ;;  %6667 = vmatprep.subr.bf16.mxu1 %v13439_v51  ;;  %15571 = vst [vmem:[#allocation136_spill] sm:$0xff] %v13445_v11  ;;  %v13451_v62 = vld [vmem:[#allocation13 + $0x1ec] ss:$16 sps:$4 sm:$0xff]   ;;  %15574 = vst [vmem:[#allocation139_spill] sm:$0xff] %v13454_v16  ;;  %v13485_v22 = vld [vmem:[#allocation13 + $0x184] ss:$16 sps:$4 sm:$0xff]  }
 0xa0a   :  { %8945 = vrcp.f32 %v6383_v4  ;;  %15573 = vst [vmem:[#allocation138_spill] sm:$0xff] %v13451_v62  ;;  %v13457_v4 = vld [vmem:[#allocation13 + $0x1e8] ss:$16 sps:$4 sm:$0xff]  }
 0xa0b   :  { %15575 = vst [vmem:[#allocation141_spill] sm:$0xff] %v13457_v4 }
 0xa0c   :  { %6627 = vmatpush1.bf16.msra.mxu0 %v13442_v49  ;;  %6668 = vmatpush1.bf16.msra.mxu1 %v13445_v11  ;;  %v13466_v11 = vld [vmem:[#allocation13 + $0x1c0] ss:$16 sps:$4 sm:$0xff]   ;;  %v13472_v49 = vld [vmem:[#allocation13 + $0x1a4] ss:$16 sps:$4 sm:$0xff]  }
 0xa0d   :  { %6628 = vmatprep.subr.bf16.mxu0 %v13448_v2  ;;  %6669 = vmatprep.subr.bf16.mxu1 %v13451_v62  ;;  %v8940_v2 = vpop.eup %8939  ;;  %15578 = vst [vmem:[#allocation148_spill] sm:$0xff] %v13466_v11  ;;  %v13469_v62 = vld [vmem:[#allocation13 + $0x1c8] ss:$16 sps:$4 sm:$0xff]   ;;  %15580 = vst [vmem:[#allocation28_spill] sm:$0xff] %v13472_v49 }
 0xa0e   :  { %15579 = vst [vmem:[#allocation149_spill] sm:$0xff] %v13469_v62  ;;  %v6384_v51 = vadd.f32 1.0, %v8940_v2 }
 0xa10   :  { %6629 = vmatpush2.bf16.msra.mxu0 %v13454_v16  ;;  %6670 = vmatpush2.bf16.msra.mxu1 %v13457_v4  ;;  %v13475_v4 = vld [vmem:[#allocation13 + $0x1ac] ss:$16 sps:$4 sm:$0xff]   ;;  %8947 = vrcp.f32 %v6384_v51  ;;  %v13509_v51 = vld [vmem:[#allocation13 + $0x168] ss:$16 sps:$4 sm:$0xff]  }
 0xa11   :  { %6630 = vmatprep.subr.bf16.mxu0 %v13460_v34  ;;  %6671 = vmatprep.subr.bf16.mxu1 %v13463_v36  ;;  %15588 = vst [vmem:[#allocation36_spill] sm:$0xff] %v13509_v51 }
 0xa14   :  { %6631 = vmatpush2.bf16.msra.mxu0 %v13466_v11  ;;  %6672 = vmatpush2.bf16.msra.mxu1 %v13469_v62  ;;  %v13479_v11 = vld [vmem:[#allocation13 + $0x1a0] ss:$16 sps:$4 sm:$0xff]   ;;  %v13482_v62 = vld [vmem:[#allocation13 + $0x1a8] ss:$16 sps:$4 sm:$0xff]  }
 0xa15   :  { %v8942_v16 = vpop.eup %8941  ;;  %6632 = vmatprep.subr.bf16.mxu0 %v13472_v49  ;;  %6673 = vmatprep.subr.bf16.mxu1 %v13475_v4  ;;  %v13488_v49 = vld [vmem:[#allocation13 + $0x18c] ss:$16 sps:$4 sm:$0xff]  }
 0xa16   :  { %v8944_v34 = vpop.eup %8943  ;;  %15581 = vst [vmem:[#allocation29_spill] sm:$0xff] %v13488_v49 }
 0xa17   :  { %v8946_v36 = vpop.eup %8945  ;;  %v6393_v10 = vmul.f32 %v8944_v34, %v8942_v16  ;;  %v13500_v34 = vld [vmem:[#allocation13 + $0x164] ss:$16 sps:$4 sm:$0xff]   ;;  %v13503_v16 = vld [vmem:[#allocation13 + $0x16c] ss:$16 sps:$4 sm:$0xff]  }
 0xa18   :  { %v6392_v44 = vmul.f32 %v8946_v36, %v13051_v17  ;;  %6633 = vmatpush2.bf16.msra.mxu0 %v13479_v11  ;;  %6674 = vmatpush2.bf16.msra.mxu1 %v13482_v62  ;;  %v13494_v17 = vld [vmem:[#allocation13 + $0x180] ss:$16 sps:$4 sm:$0xff]   ;;  %v13497_v36 = vld [vmem:[#allocation13 + $0x188] ss:$16 sps:$4 sm:$0xff]   ;;  %15585 = vst [vmem:[#allocation33_spill] sm:$0xff] %v13500_v34  ;;  %15586 = vst [vmem:[#allocation34_spill] sm:$0xff] %v13503_v16 }
 0xa19   :  { %6634 = vmatprep.subr.bf16.mxu0 %v13485_v22  ;;  %6675 = vmatprep.subr.bf16.mxu1 %v13488_v49  ;;  %15583 = vst [vmem:[#allocation31_spill] sm:$0xff] %v13494_v17  ;;  %15584 = vst [vmem:[#allocation32_spill] sm:$0xff] %v13497_v36  ;;  %v13545_v49 = vld [vmem:[#allocation13 + $0x108] ss:$16 sps:$4 sm:$0xff]  }
 0xa1a   :  { %v13491_v2 = vadd.f32 %v6393_v10, %v6392_v44  ;;  %v13506_v10 = vld [vmem:[#allocation13 + $0x160] ss:$16 sps:$4 sm:$0xff]   ;;  %v13512_v44 = vld [vmem:[#allocation13 + $0x144] ss:$16 sps:$4 sm:$0xff]  }
 0xa1b   :  { %15587 = vst [vmem:[#allocation35_spill] sm:$0xff] %v13506_v10  ;;  %15589 = vst [vmem:[#allocation37_spill] sm:$0xff] %v13512_v44 }
 0xa1c   :  { %15582 = vst [vmem:[#allocation30_spill] sm:$0xff] %v13491_v2  ;;  %8949 = vtanh.f32 %v13491_v2  ;;  %6635 = vmatpush2.bf16.msra.mxu0 %v13494_v17  ;;  %6676 = vmatpush2.bf16.msra.mxu1 %v13497_v36  ;;  %v13515_v2 = vld [vmem:[#allocation13 + $0x14c] ss:$16 sps:$4 sm:$0xff]   ;;  %v13530_v36 = vld [vmem:[#allocation13 + $0x120] ss:$16 sps:$4 sm:$0xff]  }
 0xa1d   :  { %6636 = vmatprep.subr.bf16.mxu0 %v13500_v34  ;;  %6677 = vmatprep.subr.bf16.mxu1 %v13503_v16  ;;  %15590 = vst [vmem:[#allocation38_spill] sm:$0xff] %v13515_v2  ;;  %v13518_v34 = vld [vmem:[#allocation13 + $0x140] ss:$16 sps:$4 sm:$0xff]   ;;  %v13521_v16 = vld [vmem:[#allocation13 + $0x148] ss:$16 sps:$4 sm:$0xff]   ;;  %15595 = vst [vmem:[#allocation43_spill] sm:$0xff] %v13530_v36 }
 0xa1e   :  { %15591 = vst [vmem:[#allocation39_spill] sm:$0xff] %v13518_v34  ;;  %15592 = vst [vmem:[#allocation40_spill] sm:$0xff] %v13521_v16  ;;  %v13536_v17 = vld [vmem:[#allocation13 + $0x104] ss:$16 sps:$4 sm:$0xff]  }
 0xa20   :  { %6637 = vmatpush2.bf16.msra.mxu0 %v13506_v10  ;;  %6678 = vmatpush2.bf16.msra.mxu1 %v13509_v51  ;;  %v13524_v10 = vld [vmem:[#allocation13 + $0x124] ss:$16 sps:$4 sm:$0xff]   ;;  %v13527_v51 = vld [vmem:[#allocation13 + $0x12c] ss:$16 sps:$4 sm:$0xff]  }
 0xa21   :  { %6638 = vmatprep.subr.bf16.mxu0 %v13512_v44  ;;  %6679 = vmatprep.subr.bf16.mxu1 %v13515_v2  ;;  %15593 = vst [vmem:[#allocation41_spill] sm:$0xff] %v13524_v10  ;;  %15594 = vst [vmem:[#allocation42_spill] sm:$0xff] %v13527_v51  ;;  %v8948_v44 = vpop.eup %8947  ;;  %v13533_v2 = vld [vmem:[#allocation13 + $0x128] ss:$16 sps:$4 sm:$0xff]  }
 0xa24   :  { %6639 = vmatpush2.bf16.msra.mxu0 %v13518_v34  ;;  %6680 = vmatpush2.bf16.msra.mxu1 %v13521_v16  ;;  %v13539_v16 = vld [vmem:[#allocation13 + $0x10c] ss:$16 sps:$4 sm:$0xff]  }
 0xa25   :  { %6640 = vmatprep.subr.bf16.mxu0 %v13524_v10  ;;  %6681 = vmatprep.subr.bf16.mxu1 %v13527_v51  ;;  %v13542_v51 = vld [vmem:[#allocation13 + $0x100] ss:$16 sps:$4 sm:$0xff]  }
 0xa28   :  { %6641 = vmatpush2.bf16.msra.mxu0 %v13530_v36  ;;  %6682 = vmatpush2.bf16.msra.mxu1 %v13533_v2 }
 0xa29   :  { %v8950_v34 = vpop.eup %8949  ;;  %6642 = vmatprep.subr.bf16.mxu0 %v13536_v17  ;;  %6683 = vmatprep.subr.bf16.mxu1 %v13539_v16 }
 0xa2a   :  { %v6396_v10 = vmul.f32 %v8950_v34, %v8948_v44 }
 0xa2c   :  { %6643 = vmatpush2.bf16.msra.mxu0 %v13542_v51  ;;  %6684 = vmatpush2.bf16.msra.mxu1 %v13545_v49  ;;  %v13548_v36 = vpack.c.bf16 %v6396_v10, %v6396_v10 }
 0xa2d   :  { %6719 = vmatprep.subr.bf16.mxu0 %v13090_v13  ;;  %6760 = vmatprep.subr.bf16.mxu1 %v13093_v58 }
 0xa2e   :  { %6644 = vmatprep.mubr.bf16.mxu0 %v13548_v36  ;;  %6685 = vmatprep.mubr.bf16.mxu1 %v13548_v36 }
 0xa2f   :  { %6645 = vmatmul.mubr.bf16.vlgmr.msra.gmra.mxu0 %v13350_v20  ;;  %6686 = vmatmul.mubr.bf16.vlgmr.msra.gmra.mxu1 %v13350_v20 }
 0xa30   :  { %6720 = vmatpush1.bf16.msra.mxu0 %v13098_v1  ;;  %6761 = vmatpush1.bf16.msra.mxu1 %v13101_v50 }
 0xa31   :  { %6721 = vmatprep.subr.bf16.mxu0 %v13104_v0  ;;  %6762 = vmatprep.subr.bf16.mxu1 %v13107_v8 }
 0xa33   :  { %v6432_v34 = vpop.f32.mrf.mxu0  ;;  %v6473_v13 = vpop.f32.mrf.mxu1 }
 0xa34   :  { %v6433_v58 = vadd.f32 %v6432_v34, %v11733_v9  ;;  %6722 = vmatpush1.bf16.msra.mxu0 %v13110_v18  ;;  %6763 = vmatpush1.bf16.msra.mxu1 %v13113_v12  ;;  %v15596_v12 = vld [vmem:[#allocation87_spill] sm:$0xff] }
 0xa35   :  { %v6434_v10 = vpop.f32.mrf.mxu0  ;;  %v6475_v44 = vpop.f32.mrf.mxu1  ;;  %6723 = vmatprep.subr.bf16.mxu0 %v13117_v61  ;;  %6764 = vmatprep.subr.bf16.mxu1 %v13120_v53  ;;  %v15597_v61 = vld [vmem:[#allocation88_spill] sm:$0xff]  ;;  %v15598_v53 = vld [vmem:[#allocation89_spill] sm:$0xff] }
 0xa36   :  { %v7804_v1 = vmul.f32 -1.442695, %v6433_v58  ;;  %v6435_v50 = vadd.f32 %v6434_v10, %v11742_v42  ;;  %v15599_v58 = vld [vmem:[#allocation90_spill] sm:$0xff] }
 0xa37   :  { %v6436_v0 = vpop.f32.mrf.mxu0  ;;  %v6477_v20 = vpop.f32.mrf.mxu1  ;;  %v15600_v10 = vld [vmem:[#allocation150_spill] sm:$0xff] }
 0xa38   :  { %8951 = vpow2.f32 %v7804_v1  ;;  %v7805_v8 = vmul.f32 -1.442695, %v6435_v50  ;;  %6724 = vmatpush1.bf16.msra.mxu0 %v13123_v37  ;;  %6765 = vmatpush1.bf16.msra.mxu1 %v13126_v30  ;;  %v6474_v1 = vadd.f32 %v6473_v13, %v15600_v10  ;;  %v15601_v37 = vld [vmem:[#allocation91_spill] sm:$0xff]  ;;  %v15602_v30 = vld [vmem:[#allocation92_spill] sm:$0xff]  ;;  %v15603_v50 = vld [vmem:[#allocation93_spill] sm:$0xff] }
 0xa39   :  { %v6437_v18 = vpop.f32.mrf.mxu0  ;;  %v6478_v34 = vpop.f32.mrf.mxu1  ;;  %6725 = vmatprep.subr.bf16.mxu0 %v13129_v21  ;;  %6766 = vmatprep.subr.bf16.mxu1 %v13132_v55  ;;  %v15604_v21 = vld [vmem:[#allocation94_spill] sm:$0xff]  ;;  %v15605_v0 = vld [vmem:[#allocation95_spill] sm:$0xff]  ;;  %v15606_v20 = vld [vmem:[#allocation96_spill] sm:$0xff] }
 0xa3a   :  { %8953 = vpow2.f32 %v7805_v8  ;;  %v7806_v55 = vmul.f32 -1.442695, %v6474_v1  ;;  %v15607_v18 = vld [vmem:[#allocation151_spill] sm:$0xff]  ;;  %v15612_v1 = vld [vmem:[#allocation101_spill] sm:$0xff] }
 0xa3b   :  { %v6476_v34 = vadd.f32 %v6475_v44, %v15607_v18  ;;  %v15614_v44 = vld [vmem:[#allocation103_spill] sm:$0xff] }
 0xa3c   :  { %6726 = vmatpush1.bf16.msra.mxu0 %v15596_v12  ;;  %6767 = vmatpush1.bf16.msra.mxu1 %v15597_v61  ;;  %v15608_v12 = vld [vmem:[#allocation97_spill] sm:$0xff]  ;;  %v15609_v61 = vld [vmem:[#allocation98_spill] sm:$0xff]  ;;  %8955 = vpow2.f32 %v7806_v55  ;;  %v15617_v55 = vld [vmem:[#allocation107_spill] sm:$0xff] }
 0xa3d   :  { %6727 = vmatprep.subr.bf16.mxu0 %v15598_v53  ;;  %6768 = vmatprep.subr.bf16.mxu1 %v15599_v58 }
 0xa40   :  { %6728 = vmatpush1.bf16.msra.mxu0 %v15601_v37  ;;  %6769 = vmatpush1.bf16.msra.mxu1 %v15602_v30  ;;  %v15610_v37 = vld [vmem:[#allocation99_spill] sm:$0xff]  ;;  %v15611_v30 = vld [vmem:[#allocation100_spill] sm:$0xff] }
 0xa41   :  { %6729 = vmatprep.subr.bf16.mxu0 %v15603_v50  ;;  %6770 = vmatprep.subr.bf16.mxu1 %v15604_v21  ;;  %v15613_v50 = vld [vmem:[#allocation102_spill] sm:$0xff]  ;;  %v15615_v21 = vld [vmem:[#allocation104_spill] sm:$0xff] }
 0xa44   :  { %6730 = vmatpush1.bf16.msra.mxu0 %v15605_v0  ;;  %6771 = vmatpush1.bf16.msra.mxu1 %v15606_v20  ;;  %v15616_v0 = vld [vmem:[#allocation105_spill] sm:$0xff]  ;;  %v15618_v20 = vld [vmem:[#allocation108_spill] sm:$0xff] }
 0xa45   :  { %v8952_v8 = vpop.eup %8951  ;;  %6731 = vmatprep.subr.bf16.mxu0 %v15608_v12  ;;  %6772 = vmatprep.subr.bf16.mxu1 %v15609_v61  ;;  %v15620_v12 = vld [vmem:[#allocation110_spill] sm:$0xff] }
 0xa46   :  { %v6489_v13 = vadd.f32 1.0, %v8952_v8 }
 0xa47   :  { %v8954_v53 = vpop.eup %8953 }
 0xa48   :  { %8957 = vrcp.f32 %v6489_v13  ;;  %v6490_v58 = vadd.f32 1.0, %v8954_v53  ;;  %6732 = vmatpush1.bf16.msra.mxu0 %v15610_v37  ;;  %6773 = vmatpush1.bf16.msra.mxu1 %v15611_v30  ;;  %v15621_v13 = vld [vmem:[#allocation111_spill] sm:$0xff]  ;;  %v15622_v53 = vld [vmem:[#allocation112_spill] sm:$0xff] }
 0xa49   :  { %8959 = vtanh.f32 %v6476_v34  ;;  %6733 = vmatprep.subr.bf16.mxu0 %v15612_v1  ;;  %6774 = vmatprep.subr.bf16.mxu1 %v15613_v50  ;;  %v8956_v8 = vpop.eup %8955  ;;  %v15619_v34 = vld [vmem:[#allocation109_spill] sm:$0xff]  ;;  %v15625_v50 = vld [vmem:[#allocation114_spill] sm:$0xff] }
 0xa4a   :  { %8961 = vrcp.f32 %v6490_v58  ;;  %v6491_v37 = vadd.f32 1.0, %v8956_v8  ;;  %v15624_v1 = vld [vmem:[#allocation113_spill] sm:$0xff]  ;;  %v15630_v8 = vld [vmem:[#allocation119_spill] sm:$0xff] }
 0xa4c   :  { %6734 = vmatpush1.bf16.msra.mxu0 %v15614_v44  ;;  %6775 = vmatpush1.bf16.msra.mxu1 %v15615_v21  ;;  %v15626_v44 = vld [vmem:[#allocation115_spill] sm:$0xff]  ;;  %v15627_v21 = vld [vmem:[#allocation116_spill] sm:$0xff]  ;;  %8963 = vrcp.f32 %v6491_v37  ;;  %v15637_v37 = vld [vmem:[#allocation126_spill] sm:$0xff] }
 0xa4d   :  { %6735 = vmatprep.subr.bf16.mxu0 %v15616_v0  ;;  %6776 = vmatprep.subr.bf16.mxu1 %v13193_v60 }
 0xa50   :  { %6736 = vmatpush2.bf16.msra.mxu0 %v13199_v29  ;;  %6777 = vmatpush2.bf16.msra.mxu1 %v13202_v19  ;;  %v15623_v29 = vld [vmem:[#allocation106_spill] sm:$0xff] }
 0xa51   :  { %6737 = vmatprep.subr.bf16.mxu0 %v15617_v55  ;;  %6778 = vmatprep.subr.bf16.mxu1 %v15618_v20  ;;  %v15628_v55 = vld [vmem:[#allocation117_spill] sm:$0xff]  ;;  %v15629_v20 = vld [vmem:[#allocation118_spill] sm:$0xff] }
 0xa54   :  { %6738 = vmatpush2.bf16.msra.mxu0 %v15619_v34  ;;  %6779 = vmatpush2.bf16.msra.mxu1 %v15620_v12  ;;  %v15631_v34 = vld [vmem:[#allocation120_spill] sm:$0xff]  ;;  %v15632_v12 = vld [vmem:[#allocation121_spill] sm:$0xff] }
 0xa55   :  { %v8958_v61 = vpop.eup %8957  ;;  %6739 = vmatprep.subr.bf16.mxu0 %v15621_v13  ;;  %6780 = vmatprep.subr.bf16.mxu1 %v15622_v53  ;;  %v15634_v13 = vld [vmem:[#allocation123_spill] sm:$0xff]  ;;  %v15635_v53 = vld [vmem:[#allocation124_spill] sm:$0xff] }
 0xa56   :  { %v8960_v58 = vpop.eup %8959 }
 0xa57   :  { %v8962_v60 = vpop.eup %8961  ;;  %v6500_v19 = vmul.f32 %v8960_v58, %v8958_v61  ;;  %v15633_v61 = vld [vmem:[#allocation122_spill] sm:$0xff] }
 0xa58   :  { %v6499_v30 = vmul.f32 %v8962_v60, %v15623_v29  ;;  %6740 = vmatpush2.bf16.msra.mxu0 %v15624_v1  ;;  %6781 = vmatpush2.bf16.msra.mxu1 %v15625_v50  ;;  %v15636_v60 = vld [vmem:[#allocation125_spill] sm:$0xff]  ;;  %v15639_v29 = vld [vmem:[#allocation128_spill] sm:$0xff] }
 0xa59   :  { %6741 = vmatprep.subr.bf16.mxu0 %v15626_v44  ;;  %6782 = vmatprep.subr.bf16.mxu1 %v15627_v21  ;;  %v8964_v58 = vpop.eup %8963  ;;  %v15670_v1 = vld [vmem:[#allocation68_spill] sm:$0xff] }
 0xa5a   :  { %v13605_v0 = vadd.f32 %v6500_v19, %v6499_v30  ;;  %v15640_v30 = vld [vmem:[#allocation129_spill] sm:$0xff] }
 0xa5c   :  { %6742 = vmatpush2.bf16.msra.mxu0 %v15628_v55  ;;  %6783 = vmatpush2.bf16.msra.mxu1 %v15629_v20  ;;  %8965 = vtanh.f32 %v13605_v0 }
 0xa5d   :  { %6743 = vmatprep.subr.bf16.mxu0 %v15630_v8  ;;  %6784 = vmatprep.subr.bf16.mxu1 %v15631_v34  ;;  %v15672_v34 = vld [vmem:[#allocation70_spill] sm:$0xff] }
 0xa60   :  { %6744 = vmatpush2.bf16.msra.mxu0 %v13248_v31  ;;  %6785 = vmatpush2.bf16.msra.mxu1 %v13251_v14  ;;  %v15638_v14 = vld [vmem:[#allocation127_spill] sm:$0xff] }
 0xa61   :  { %6745 = vmatprep.subr.bf16.mxu0 %v13254_v47  ;;  %6786 = vmatprep.subr.bf16.mxu1 %v15632_v12 }
 0xa64   :  { %6746 = vmatpush2.bf16.msra.mxu0 %v15633_v61  ;;  %6787 = vmatpush2.bf16.msra.mxu1 %v13263_v41 }
 0xa65   :  { %6747 = vmatprep.subr.bf16.mxu0 %v15634_v13  ;;  %6788 = vmatprep.subr.bf16.mxu1 %v15635_v53  ;;  %v15673_v13 = vld [vmem:[#allocation71_spill] sm:$0xff] }
 0xa68   :  { %6748 = vmatpush2.bf16.msra.mxu0 %v13272_v56  ;;  %6789 = vmatpush2.bf16.msra.mxu1 %v15636_v60  ;;  %v15641_v56 = vld [vmem:[#allocation131_spill] sm:$0xff] }
 0xa69   :  { %v8966_v31 = vpop.eup %8965  ;;  %6749 = vmatprep.subr.bf16.mxu0 %v15637_v37  ;;  %6790 = vmatprep.subr.bf16.mxu1 %v15638_v14 }
 0xa6a   :  { %v6503_v47 = vmul.f32 %v8966_v31, %v8964_v58 }
 0xa6c   :  { %6750 = vmatpush2.bf16.msra.mxu0 %v15639_v29  ;;  %6791 = vmatpush2.bf16.msra.mxu1 %v15640_v30  ;;  %v6504_v41 = vpack.c.bf16 %v6503_v47, %v6503_v47 }
 0xa6d   :  { %6826 = vmatprep.subr.bf16.mxu0 %v13335_v5  ;;  %6867 = vmatprep.subr.bf16.mxu1 %v13338_v26  ;;  %v15642_v5 = vld [vmem:[#allocation132_spill] sm:$0xff]  ;;  %v15643_v26 = vld [vmem:[#allocation133_spill] sm:$0xff] }
 0xa6e   :  { %6751 = vmatprep.mubr.bf16.mxu0 %v6504_v41  ;;  %6792 = vmatprep.mubr.bf16.mxu1 %v6504_v41 }
 0xa6f   :  { %6752 = vmatmul.mubr.bf16.vlgmr.msra.gmra.mxu0 %v13548_v36  ;;  %6793 = vmatmul.mubr.bf16.vlgmr.msra.gmra.mxu1 %v13548_v36 }
 0xa70   :  { %6827 = vmatpush1.bf16.msra.mxu0 %v13354_v32  ;;  %6868 = vmatpush1.bf16.msra.mxu1 %v13357_v59  ;;  %v15644_v32 = vld [vmem:[#allocation134_spill] sm:$0xff]  ;;  %v15645_v59 = vld [vmem:[#allocation135_spill] sm:$0xff] }
 0xa71   :  { %6828 = vmatprep.subr.bf16.mxu0 %v13360_v52  ;;  %6869 = vmatprep.subr.bf16.mxu1 %v13363_v15  ;;  %v15646_v52 = vld [vmem:[#allocation136_spill] sm:$0xff]  ;;  %v15647_v15 = vld [vmem:[#allocation137_spill] sm:$0xff] }
 0xa74   :  { %6829 = vmatpush1.bf16.msra.mxu0 %v13367_v40  ;;  %6870 = vmatpush1.bf16.msra.mxu1 %v13370_v39  ;;  %v15648_v40 = vld [vmem:[#allocation138_spill] sm:$0xff]  ;;  %v15649_v39 = vld [vmem:[#allocation139_spill] sm:$0xff] }
 0xa75   :  { %6830 = vmatprep.subr.bf16.mxu0 %v13373_v25  ;;  %6871 = vmatprep.subr.bf16.mxu1 %v13376_v43  ;;  %v15652_v25 = vld [vmem:[#allocation147_spill] sm:$0xff]  ;;  %v15653_v43 = vld [vmem:[#allocation148_spill] sm:$0xff] }
 0xa78   :  { %6831 = vmatpush1.bf16.msra.mxu0 %v13380_v7  ;;  %6872 = vmatpush1.bf16.msra.mxu1 %v13383_v33  ;;  %v15654_v7 = vld [vmem:[#allocation149_spill] sm:$0xff]  ;;  %v15655_v33 = vld [vmem:[#allocation28_spill] sm:$0xff] }
 0xa79   :  { %6832 = vmatprep.subr.bf16.mxu0 %v13386_v3  ;;  %6873 = vmatprep.subr.bf16.mxu1 %v13389_v48  ;;  %v15656_v3 = vld [vmem:[#allocation29_spill] sm:$0xff]  ;;  %v15657_v48 = vld [vmem:[#allocation31_spill] sm:$0xff] }
 0xa7c   :  { %6833 = vmatpush1.bf16.msra.mxu0 %v13392_v27  ;;  %6874 = vmatpush1.bf16.msra.mxu1 %v13395_v6  ;;  %v15658_v27 = vld [vmem:[#allocation32_spill] sm:$0xff]  ;;  %v15659_v6 = vld [vmem:[#allocation33_spill] sm:$0xff] }
 0xa7d   :  { %6834 = vmatprep.subr.bf16.mxu0 %v13398_v63  ;;  %6875 = vmatprep.subr.bf16.mxu1 %v13401_v45  ;;  %v15660_v63 = vld [vmem:[#allocation34_spill] sm:$0xff]  ;;  %v15661_v45 = vld [vmem:[#allocation35_spill] sm:$0xff] }
 0xa80   :  { %6835 = vmatpush1.bf16.msra.mxu0 %v13405_v38  ;;  %6876 = vmatpush1.bf16.msra.mxu1 %v13408_v24  ;;  %v15662_v38 = vld [vmem:[#allocation36_spill] sm:$0xff]  ;;  %v15663_v24 = vld [vmem:[#allocation37_spill] sm:$0xff] }
 0xa81   :  { %6836 = vmatprep.subr.bf16.mxu0 %v13411_v35  ;;  %6877 = vmatprep.subr.bf16.mxu1 %v13414_v23  ;;  %v15664_v35 = vld [vmem:[#allocation38_spill] sm:$0xff]  ;;  %v15665_v23 = vld [vmem:[#allocation39_spill] sm:$0xff] }
 0xa84   :  { %6837 = vmatpush1.bf16.msra.mxu0 %v13417_v57  ;;  %6878 = vmatpush1.bf16.msra.mxu1 %v13420_v54  ;;  %v15667_v57 = vld [vmem:[#allocation41_spill] sm:$0xff]  ;;  %v15668_v54 = vld [vmem:[#allocation42_spill] sm:$0xff] }
 0xa85   :  { %6838 = vmatprep.subr.bf16.mxu0 %v13424_v28  ;;  %6879 = vmatprep.subr.bf16.mxu1 %v13427_v46  ;;  %v15650_v28 = vld [vmem:[#allocation141_spill] sm:$0xff]  ;;  %v15651_v46 = vld [vmem:[#allocation142_spill] sm:$0xff] }
 0xa88   :  { %6839 = vmatpush1.bf16.msra.mxu0 %v15641_v56  ;;  %6880 = vmatpush1.bf16.msra.mxu1 %v15642_v5  ;;  %v15674_v5 = vld [vmem:[#allocation130_spill] sm:$0xff] }
 0xa89   :  { %6840 = vmatprep.subr.bf16.mxu0 %v15643_v26  ;;  %6881 = vmatprep.subr.bf16.mxu1 %v15644_v32 }
 0xa8c   :  { %6841 = vmatpush1.bf16.msra.mxu0 %v15645_v59  ;;  %6882 = vmatpush1.bf16.msra.mxu1 %v15646_v52 }
 0xa8d   :  { %6842 = vmatprep.subr.bf16.mxu0 %v15647_v15  ;;  %6883 = vmatprep.subr.bf16.mxu1 %v15648_v40 }
 0xa90   :  { %6843 = vmatpush2.bf16.msra.mxu0 %v15649_v39  ;;  %6884 = vmatpush2.bf16.msra.mxu1 %v15650_v28  ;;  %v15675_v28 = vld [vmem:[#allocation143_spill] sm:$0xff] }
 0xa91   :  { %6844 = vmatprep.subr.bf16.mxu0 %v15651_v46  ;;  %6885 = vmatprep.subr.bf16.mxu1 %v15652_v25 }
 0xa94   :  { %6845 = vmatpush2.bf16.msra.mxu0 %v15653_v43  ;;  %6886 = vmatpush2.bf16.msra.mxu1 %v15654_v7 }
 0xa95   :  { %6846 = vmatprep.subr.bf16.mxu0 %v15655_v33  ;;  %6887 = vmatprep.subr.bf16.mxu1 %v13475_v4  ;;  %v13695_v4 = vld [vmem:[#allocation15 + $0xec] ss:$16 sps:$4 sm:$0xff]   ;;  %v15676_v33 = vld [vmem:[#allocation144_spill] sm:$0xff] }
 0xa98   :  { %6847 = vmatpush2.bf16.msra.mxu0 %v13479_v11  ;;  %6888 = vmatpush2.bf16.msra.mxu1 %v13482_v62  ;;  %v15669_v11 = vld [vmem:[#allocation43_spill] sm:$0xff]  ;;  %v13692_v62 = vld [vmem:[#allocation15 + $0xe4] ss:$16 sps:$4 sm:$0xff]  }
 0xa99   :  { %6848 = vmatprep.subr.bf16.mxu0 %v13485_v22  ;;  %6889 = vmatprep.subr.bf16.mxu1 %v15656_v3  ;;  %v15666_v22 = vld [vmem:[#allocation40_spill] sm:$0xff] }
 0xa9c   :  { %6849 = vmatpush2.bf16.msra.mxu0 %v15657_v48  ;;  %6890 = vmatpush2.bf16.msra.mxu1 %v15658_v27 }
 0xa9d   :  { %6850 = vmatprep.subr.bf16.mxu0 %v15659_v6  ;;  %6891 = vmatprep.subr.bf16.mxu1 %v15660_v63 }
 0xaa0   :  { %6851 = vmatpush2.bf16.msra.mxu0 %v15661_v45  ;;  %6892 = vmatpush2.bf16.msra.mxu1 %v15662_v38  ;;  %v15677_v38 = vld [vmem:[#allocation145_spill] sm:$0xff] }
 0xaa1   :  { %6852 = vmatprep.subr.bf16.mxu0 %v15663_v24  ;;  %6893 = vmatprep.subr.bf16.mxu1 %v15664_v35 }
 0xaa4   :  { %6853 = vmatpush2.bf16.msra.mxu0 %v15665_v23  ;;  %6894 = vmatpush2.bf16.msra.mxu1 %v15666_v22  ;;  %v15678_v22 = vld [vmem:[#allocation26_spill] sm:$0xff] }
 0xaa5   :  { %6854 = vmatprep.subr.bf16.mxu0 %v15667_v57  ;;  %6895 = vmatprep.subr.bf16.mxu1 %v15668_v54 }
 0xaa8   :  { %6855 = vmatpush2.bf16.msra.mxu0 %v15669_v11  ;;  %6896 = vmatpush2.bf16.msra.mxu1 %v13533_v2 }
 0xaa9   :  { %6856 = vmatprep.subr.bf16.mxu0 %v13536_v17  ;;  %6897 = vmatprep.subr.bf16.mxu1 %v13539_v16  ;;  %v15671_v16 = vld [vmem:[#allocation69_spill] sm:$0xff] }
 0xaac   :  { %6857 = vmatpush2.bf16.msra.mxu0 %v13542_v51  ;;  %6898 = vmatpush2.bf16.msra.mxu1 %v13545_v49 }
 0xaad   :  { %6933 = vmatprep.subr.bf16.mxu0 %v13692_v62  ;;  %6974 = vmatprep.subr.bf16.mxu1 %v13695_v4 }
 0xaaf   :  { %v6539_v36 = vpop.f32.mrf.mxu0  ;;  %v6580_v19 = vpop.f32.mrf.mxu1 }
 0xab0   :  { %v6540_v2 = vadd.f32 %v6539_v36, %v15670_v1  ;;  %v6581_v12 = vadd.f32 %v6580_v19, %v15672_v34 }
 0xab1   :  { %v6541_v50 = vpop.f32.mrf.mxu0  ;;  %v6582_v17 = vpop.f32.mrf.mxu1 }
 0xab2   :  { %v7807_v44 = vmul.f32 -1.442695, %v6540_v2  ;;  %v6542_v21 = vadd.f32 %v6541_v50, %v15671_v16  ;;  %v7809_v61 = vmul.f32 -1.442695, %v6581_v12  ;;  %v6583_v53 = vadd.f32 %v6582_v17, %v15673_v13  ;;  %v13715_v12 = vld [vmem:[#allocation15 + $0xe0] ss:$16 sps:$4 sm:$0xff]  }
 0xab3   :  { %v6543_v51 = vpop.f32.mrf.mxu0  ;;  %v6584_v55 = vpop.f32.mrf.mxu1  ;;  %v13721_v13 = vld [vmem:[#allocation15 + $0xc4] ss:$16 sps:$4 sm:$0xff]  }
 0xab4   :  { %8967 = vpow2.f32 %v7807_v44  ;;  %v7808_v49 = vmul.f32 -1.442695, %v6542_v21  ;;  %v15679_v44 = vld [vmem:[#allocation30_spill] sm:$0xff] }
 0xab5   :  { %v6544_v20 = vpop.f32.mrf.mxu0  ;;  %v6585_v8 = vpop.f32.mrf.mxu1 }
 0xab6   :  { %8969 = vpow2.f32 %v7808_v49 }
 0xab7   :  { %8971 = vpow2.f32 %v7809_v61  ;;  %v13718_v61 = vld [vmem:[#allocation15 + $0xe8] ss:$16 sps:$4 sm:$0xff]  }
 0xab8   :  { %8973 = vtanh.f32 %v6583_v53  ;;  %v13724_v53 = vld [vmem:[#allocation15 + $0xcc] ss:$16 sps:$4 sm:$0xff]  }
 0xac1   :  { %v8968_v58 = vpop.eup %8967 }
 0xac2   :  { %v6596_v60 = vadd.f32 1.0, %v8968_v58 }
 0xac3   :  { %v8970_v31 = vpop.eup %8969 }
 0xac4   :  { %8975 = vrcp.f32 %v6596_v60  ;;  %v6597_v37 = vadd.f32 1.0, %v8970_v31  ;;  %v8972_v14 = vpop.eup %8971 }
 0xac5   :  { %v8974_v47 = vpop.eup %8973  ;;  %v6598_v56 = vadd.f32 1.0, %v8972_v14  ;;  %v13731_v14 = vld [vmem:[#allocation15 + $0xc8] ss:$16 sps:$4 sm:$0xff]  }
 0xac6   :  { %8977 = vrcp.f32 %v6597_v37  ;;  %v13728_v37 = vld [vmem:[#allocation15 + $0xc0] ss:$16 sps:$4 sm:$0xff]  }
 0xac7   :  { %8979 = vrcp.f32 %v6598_v56 }
 0xad1   :  { %v8976_v29 = vpop.eup %8975 }
 0xad2   :  { %v6607_v30 = vmul.f32 %v8976_v29, %v8974_v47 }
 0xad3   :  { %v8978_v41 = vpop.eup %8977 }
 0xad4   :  { %v6606_v26 = vmul.f32 %v8978_v41, %v15674_v5  ;;  %v8980_v59 = vpop.eup %8979  ;;  %v13737_v41 = vld [vmem:[#allocation15 + $0xac] ss:$16 sps:$4 sm:$0xff]  }
 0xad6   :  { %v6608_v32 = vadd.f32 %v6607_v30, %v6606_v26  ;;  %v13734_v30 = vld [vmem:[#allocation15 + $0xa4] ss:$16 sps:$4 sm:$0xff]  }
 0xad8   :  { %8981 = vtanh.f32 %v6608_v32 }
 0xae5   :  { %v8982_v52 = vpop.eup %8981 }
 0xae6   :  { %v6610_v15 = vmul.f32 %v8982_v52, %v8980_v59  ;;  %v13741_v52 = vld [vmem:[#allocation15 + $0xa0] ss:$16 sps:$4 sm:$0xff]  }
 0xae8   :  { %v6611_v34 = vpack.c.bf16 %v6610_v15, %v6610_v15  ;;  %v13744_v15 = vld [vmem:[#allocation15 + $0xa8] ss:$16 sps:$4 sm:$0xff]  }
 0xaef   :  { %v6646_v40 = vpop.f32.mrf.mxu0  ;;  %v6687_v39 = vpop.f32.mrf.mxu1 }
 0xaf0   :  { %v6647_v46 = vadd.f32 %v6646_v40, %v15675_v28  ;;  %v6688_v24 = vadd.f32 %v6687_v39, %v15677_v38  ;;  %v13894_v38 = vld [vmem:[#allocation15 + $0x128] ss:$16 sps:$4 sm:$0xff]   ;;  %v13897_v28 = vld [vmem:[#allocation15 + $0x104] ss:$16 sps:$4 sm:$0xff]  }
 0xaf1   :  { %v6648_v25 = vpop.f32.mrf.mxu0  ;;  %v6689_v43 = vpop.f32.mrf.mxu1 }
 0xaf2   :  { %v7810_v7 = vmul.f32 -1.442695, %v6647_v46  ;;  %v6649_v3 = vadd.f32 %v6648_v25, %v15676_v33  ;;  %v7812_v35 = vmul.f32 -1.442695, %v6688_v24  ;;  %v6690_v57 = vadd.f32 %v6689_v43, %v15678_v22  ;;  %v13747_v46 = vld [vmem:[#allocation15 + $0x84] ss:$16 sps:$4 sm:$0xff]  }
 0xaf3   :  { %v6650_v48 = vpop.f32.mrf.mxu0  ;;  %v6691_v27 = vpop.f32.mrf.mxu1  ;;  %v13750_v25 = vld [vmem:[#allocation15 + $0x8c] ss:$16 sps:$4 sm:$0xff]   ;;  %v13753_v43 = vld [vmem:[#allocation15 + $0x80] ss:$16 sps:$4 sm:$0xff]  }
 0xaf4   :  { %8983 = vpow2.f32 %v7810_v7  ;;  %v7811_v6 = vmul.f32 -1.442695, %v6649_v3  ;;  %v13756_v7 = vld [vmem:[#allocation15 + $0x88] ss:$16 sps:$4 sm:$0xff]   ;;  %v13759_v3 = vld [vmem:[#allocation15 + $0x64] ss:$16 sps:$4 sm:$0xff]  }
 0xaf5   :  { %v6651_v63 = vpop.f32.mrf.mxu0  ;;  %v6692_v45 = vpop.f32.mrf.mxu1  ;;  %v13762_v48 = vld [vmem:[#allocation15 + $0x6c] ss:$16 sps:$4 sm:$0xff]   ;;  %v13891_v22 = vld [vmem:[#allocation15 + $0x120] ss:$16 sps:$4 sm:$0xff]  }
 0xaf6   :  { %8985 = vpow2.f32 %v7811_v6  ;;  %v13766_v6 = vld [vmem:[#allocation15 + $0x60] ss:$16 sps:$4 sm:$0xff]   ;;  %v13769_v63 = vld [vmem:[#allocation15 + $0x68] ss:$16 sps:$4 sm:$0xff]   ;;  %v13772_v45 = vld [vmem:[#allocation15 + $0x44] ss:$16 sps:$4 sm:$0xff]  }
 0xaf7   :  { %8987 = vpow2.f32 %v7812_v35  ;;  %v13775_v24 = vld [vmem:[#allocation15 + $0x4c] ss:$16 sps:$4 sm:$0xff]   ;;  %15686 = vst [vmem:[#allocation50_spill] sm:$0xff] %v13891_v22 }
 0xb01   :  { %v8984_v23 = vpop.eup %8983 }
 0xb02   :  { %v6703_v54 = vadd.f32 1.0, %v8984_v23  ;;  %v13778_v23 = vld [vmem:[#allocation15 + $0x40] ss:$16 sps:$4 sm:$0xff]  }
 0xb03   :  { %v8986_v11 = vpop.eup %8985 }
 0xb04   :  { %8989 = vrcp.f32 %v6703_v54  ;;  %v6704_v36 = vadd.f32 1.0, %v8986_v11  ;;  %v8988_v19 = vpop.eup %8987 }
 0xb05   :  { %8991 = vtanh.f32 %v6690_v57  ;;  %v6705_v17 = vadd.f32 1.0, %v8988_v19  ;;  %v13781_v57 = vld [vmem:[#allocation15 + $0x48] ss:$16 sps:$4 sm:$0xff]   ;;  %v13788_v19 = vld [vmem:[#allocation15 + $0x2c] ss:$16 sps:$4 sm:$0xff]  }
 0xb06   :  { %8993 = vrcp.f32 %v6704_v36  ;;  %v13785_v36 = vld [vmem:[#allocation15 + $0x24] ss:$16 sps:$4 sm:$0xff]  }
 0xb07   :  { %8995 = vrcp.f32 %v6705_v17  ;;  %v13791_v17 = vld [vmem:[#allocation15 + $0x20] ss:$16 sps:$4 sm:$0xff]  }
 0xb11   :  { %v8990_v1 = vpop.eup %8989 }
 0xb12   :  { %v8992_v2 = vpop.eup %8991 }
 0xb13   :  { %v8994_v50 = vpop.eup %8993  ;;  %v6714_v21 = vmul.f32 %v8992_v2, %v8990_v1 }
 0xb14   :  { %v6713_v16 = vmul.f32 %v8994_v50, %v15679_v44  ;;  %v8996_v55 = vpop.eup %8995  ;;  %v13794_v44 = vld [vmem:[#allocation15 + $0x28] ss:$16 sps:$4 sm:$0xff]  }
 0xb16   :  { %v13708_v51 = vadd.f32 %v6714_v21, %v6713_v16  ;;  %v13797_v16 = vld [vmem:[#allocation15 + $0x4] ss:$16 sps:$4 sm:$0xff]   ;;  %v13800_v21 = vld [vmem:[#allocation15 + $0xc] ss:$16 sps:$4 sm:$0xff]  }
 0xb18   :  { %15680 = vst [vmem:[#allocation44_spill] sm:$0xff] %v13708_v51  ;;  %8997 = vtanh.f32 %v13708_v51 }
 0xb25   :  { %v8998_v49 = vpop.eup %8997 }
 0xb26   :  { %v6717_v20 = vmul.f32 %v8998_v49, %v8996_v55  ;;  %v13803_v55 = vld [vmem:[#allocation15] ss:$16 sps:$4 sm:$0xff]   ;;  %v13806_v49 = vld [vmem:[#allocation15 + $0x8] ss:$16 sps:$4 sm:$0xff]  }
 0xb28   :  { %v13711_v8 = vpack.c.bf16 %v6717_v20, %v6717_v20  ;;  %v13809_v20 = vld [vmem:[#allocation15 + $0x1e4] ss:$16 sps:$4 sm:$0xff]  }
 0xb2a   :  { %6858 = vmatprep.mubr.bf16.mxu0 %v13711_v8  ;;  %6899 = vmatprep.mubr.bf16.mxu1 %v13711_v8 }
 0xb2b   :  { %6859 = vmatmul.mubr.bf16.vlgmr.msra.gmra.mxu0 %v6611_v34  ;;  %6900 = vmatmul.mubr.bf16.vlgmr.msra.gmra.mxu1 %v6611_v34  ;;  %v13812_v34 = vld [vmem:[#allocation15 + $0x1ec] ss:$16 sps:$4 sm:$0xff]  }
 0xb2c   :  { %6934 = vmatpush1.bf16.msra.mxu0 %v13715_v12  ;;  %6975 = vmatpush1.bf16.msra.mxu1 %v13718_v61 }
 0xb2d   :  { %6935 = vmatprep.subr.bf16.mxu0 %v13721_v13  ;;  %6976 = vmatprep.subr.bf16.mxu1 %v13724_v53 }
 0xb2f   :  { %v6753_v58 = vpop.f32.mrf.mxu0  ;;  %v6794_v60 = vpop.f32.mrf.mxu1 }
 0xb30   :  { %v6754_v31 = vadd.f32 %v6753_v58, %v11733_v9  ;;  %6936 = vmatpush1.bf16.msra.mxu0 %v13728_v37  ;;  %6977 = vmatpush1.bf16.msra.mxu1 %v13731_v14  ;;  %v6795_v27 = vadd.f32 %v6794_v60, %v15600_v10  ;;  %v13815_v58 = vld [vmem:[#allocation15 + $0x1e0] ss:$16 sps:$4 sm:$0xff]   ;;  %v13818_v60 = vld [vmem:[#allocation15 + $0x1e8] ss:$16 sps:$4 sm:$0xff]   ;;  %v13888_v9 = vld [vmem:[#allocation15 + $0x12c] ss:$16 sps:$4 sm:$0xff]  }
 0xb31   :  { %v6755_v47 = vpop.f32.mrf.mxu0  ;;  %v6796_v29 = vpop.f32.mrf.mxu1  ;;  %6937 = vmatprep.subr.bf16.mxu0 %v13734_v30  ;;  %6978 = vmatprep.subr.bf16.mxu1 %v13737_v41  ;;  %v13882_v10 = vld [vmem:[#allocation15 + $0x148] ss:$16 sps:$4 sm:$0xff]   ;;  %15685 = vst [vmem:[#allocation49_spill] sm:$0xff] %v13888_v9 }
 0xb32   :  { %v7813_v56 = vmul.f32 -1.442695, %v6754_v31  ;;  %v6756_v5 = vadd.f32 %v6755_v47, %v11742_v42  ;;  %v7815_v35 = vmul.f32 -1.442695, %v6795_v27  ;;  %v6797_v11 = vadd.f32 %v6796_v29, %v15607_v18  ;;  %v13821_v31 = vld [vmem:[#allocation15 + $0x1c4] ss:$16 sps:$4 sm:$0xff]  }
 0xb33   :  { %v6757_v26 = vpop.f32.mrf.mxu0  ;;  %v6798_v32 = vpop.f32.mrf.mxu1  ;;  %v13824_v47 = vld [vmem:[#allocation15 + $0x1cc] ss:$16 sps:$4 sm:$0xff]   ;;  %v13879_v18 = vld [vmem:[#allocation15 + $0x140] ss:$16 sps:$4 sm:$0xff]   ;;  %15683 = vst [vmem:[#allocation47_spill] sm:$0xff] %v13882_v10 }
 0xb34   :  { %8999 = vpow2.f32 %v7813_v56  ;;  %v7814_v59 = vmul.f32 -1.442695, %v6756_v5  ;;  %6938 = vmatpush1.bf16.msra.mxu0 %v13741_v52  ;;  %6979 = vmatpush1.bf16.msra.mxu1 %v13744_v15  ;;  %v13827_v56 = vld [vmem:[#allocation15 + $0x1c0] ss:$16 sps:$4 sm:$0xff]   ;;  %v13830_v5 = vld [vmem:[#allocation15 + $0x1c8] ss:$16 sps:$4 sm:$0xff]  }
 0xb35   :  { %v6758_v40 = vpop.f32.mrf.mxu0  ;;  %v6799_v39 = vpop.f32.mrf.mxu1  ;;  %6939 = vmatprep.subr.bf16.mxu0 %v13747_v46  ;;  %6980 = vmatprep.subr.bf16.mxu1 %v13750_v25  ;;  %v13833_v32 = vld [vmem:[#allocation15 + $0x1a4] ss:$16 sps:$4 sm:$0xff]   ;;  %15682 = vst [vmem:[#allocation46_spill] sm:$0xff] %v13879_v18 }
 0xb36   :  { %9001 = vpow2.f32 %v7814_v59  ;;  %v13836_v59 = vld [vmem:[#allocation15 + $0x1ac] ss:$16 sps:$4 sm:$0xff]   ;;  %v13885_v42 = vld [vmem:[#allocation15 + $0x124] ss:$16 sps:$4 sm:$0xff]  }
 0xb37   :  { %9003 = vpow2.f32 %v7815_v35  ;;  %15684 = vst [vmem:[#allocation48_spill] sm:$0xff] %v13885_v42 }
 0xb38   :  { %6940 = vmatpush1.bf16.msra.mxu0 %v13753_v43  ;;  %6981 = vmatpush1.bf16.msra.mxu1 %v13756_v7 }
 0xb39   :  { %6941 = vmatprep.subr.bf16.mxu0 %v13759_v3  ;;  %6982 = vmatprep.subr.bf16.mxu1 %v13762_v48 }
 0xb3c   :  { %6942 = vmatpush1.bf16.msra.mxu0 %v13766_v6  ;;  %6983 = vmatpush1.bf16.msra.mxu1 %v13769_v63 }
 0xb3d   :  { %6943 = vmatprep.subr.bf16.mxu0 %v13772_v45  ;;  %6984 = vmatprep.subr.bf16.mxu1 %v13775_v24 }
 0xb40   :  { %6944 = vmatpush1.bf16.msra.mxu0 %v13778_v23  ;;  %6985 = vmatpush1.bf16.msra.mxu1 %v13781_v57 }
 0xb41   :  { %v9000_v54 = vpop.eup %8999  ;;  %6945 = vmatprep.subr.bf16.mxu0 %v13785_v36  ;;  %6986 = vmatprep.subr.bf16.mxu1 %v13788_v19 }
 0xb42   :  { %v6810_v1 = vadd.f32 1.0, %v9000_v54 }
 0xb43   :  { %v9002_v2 = vpop.eup %9001 }
 0xb44   :  { %9005 = vrcp.f32 %v6810_v1  ;;  %v6811_v50 = vadd.f32 1.0, %v9002_v2  ;;  %6946 = vmatpush1.bf16.msra.mxu0 %v13791_v17  ;;  %6987 = vmatpush1.bf16.msra.mxu1 %v13794_v44  ;;  %v9004_v29 = vpop.eup %9003  ;;  %v13843_v1 = vld [vmem:[#allocation15 + $0x1a8] ss:$16 sps:$4 sm:$0xff]   ;;  %v13846_v2 = vld [vmem:[#allocation15 + $0x184] ss:$16 sps:$4 sm:$0xff]  }
 0xb45   :  { %9007 = vtanh.f32 %v6797_v11  ;;  %6947 = vmatprep.subr.bf16.mxu0 %v13797_v16  ;;  %6988 = vmatprep.subr.bf16.mxu1 %v13800_v21  ;;  %v6812_v27 = vadd.f32 1.0, %v9004_v29  ;;  %v13840_v11 = vld [vmem:[#allocation15 + $0x1a0] ss:$16 sps:$4 sm:$0xff]  }
 0xb46   :  { %9009 = vrcp.f32 %v6811_v50  ;;  %v13849_v50 = vld [vmem:[#allocation15 + $0x18c] ss:$16 sps:$4 sm:$0xff]  }
 0xb47   :  { %9011 = vrcp.f32 %v6812_v27  ;;  %v13870_v27 = vld [vmem:[#allocation15 + $0x168] ss:$16 sps:$4 sm:$0xff]  }
 0xb48   :  { %6948 = vmatpush1.bf16.msra.mxu0 %v13803_v55  ;;  %6989 = vmatpush1.bf16.msra.mxu1 %v13806_v49 }
 0xb49   :  { %6949 = vmatprep.subr.bf16.mxu0 %v13809_v20  ;;  %6990 = vmatprep.subr.bf16.mxu1 %v13812_v34 }
 0xb4c   :  { %6950 = vmatpush2.bf16.msra.mxu0 %v13815_v58  ;;  %6991 = vmatpush2.bf16.msra.mxu1 %v13818_v60 }
 0xb4d   :  { %6951 = vmatprep.subr.bf16.mxu0 %v13821_v31  ;;  %6992 = vmatprep.subr.bf16.mxu1 %v13824_v47 }
 0xb50   :  { %6952 = vmatpush2.bf16.msra.mxu0 %v13827_v56  ;;  %6993 = vmatpush2.bf16.msra.mxu1 %v13830_v5 }
 0xb51   :  { %v9006_v26 = vpop.eup %9005  ;;  %6953 = vmatprep.subr.bf16.mxu0 %v13833_v32  ;;  %6994 = vmatprep.subr.bf16.mxu1 %v13836_v59 }
 0xb52   :  { %v9008_v40 = vpop.eup %9007 }
 0xb53   :  { %v9010_v39 = vpop.eup %9009  ;;  %v6821_v54 = vmul.f32 %v9008_v40, %v9006_v26  ;;  %v13857_v26 = vld [vmem:[#allocation15 + $0x188] ss:$16 sps:$4 sm:$0xff]   ;;  %v13861_v40 = vld [vmem:[#allocation15 + $0x164] ss:$16 sps:$4 sm:$0xff]  }
 0xb54   :  { %v6820_v35 = vmul.f32 %v9010_v39, %v13605_v0  ;;  %6954 = vmatpush2.bf16.msra.mxu0 %v13840_v11  ;;  %6995 = vmatpush2.bf16.msra.mxu1 %v13843_v1  ;;  %v13854_v0 = vld [vmem:[#allocation15 + $0x180] ss:$16 sps:$4 sm:$0xff]   ;;  %v13864_v39 = vld [vmem:[#allocation15 + $0x16c] ss:$16 sps:$4 sm:$0xff]   ;;  %v9012_v51 = vpop.eup %9011 }
 0xb55   :  { %6955 = vmatprep.subr.bf16.mxu0 %v13846_v2  ;;  %6996 = vmatprep.subr.bf16.mxu1 %v13849_v50 }
 0xb56   :  { %v13852_v29 = vadd.f32 %v6821_v54, %v6820_v35  ;;  %v13867_v35 = vld [vmem:[#allocation15 + $0x160] ss:$16 sps:$4 sm:$0xff]   ;;  %v13873_v54 = vld [vmem:[#allocation15 + $0x144] ss:$16 sps:$4 sm:$0xff]  }
 0xb58   :  { %15681 = vst [vmem:[#allocation45_spill] sm:$0xff] %v13852_v29  ;;  %6956 = vmatpush2.bf16.msra.mxu0 %v13854_v0  ;;  %6997 = vmatpush2.bf16.msra.mxu1 %v13857_v26  ;;  %9013 = vtanh.f32 %v13852_v29  ;;  %v13876_v29 = vld [vmem:[#allocation15 + $0x14c] ss:$16 sps:$4 sm:$0xff]  }
 0xb59   :  { %6957 = vmatprep.subr.bf16.mxu0 %v13861_v40  ;;  %6998 = vmatprep.subr.bf16.mxu1 %v13864_v39 }
 0xb5c   :  { %6958 = vmatpush2.bf16.msra.mxu0 %v13867_v35  ;;  %6999 = vmatpush2.bf16.msra.mxu1 %v13870_v27 }
 0xb5d   :  { %6959 = vmatprep.subr.bf16.mxu0 %v13873_v54  ;;  %7000 = vmatprep.subr.bf16.mxu1 %v13876_v29 }
 0xb60   :  { %6960 = vmatpush2.bf16.msra.mxu0 %v13879_v18  ;;  %7001 = vmatpush2.bf16.msra.mxu1 %v13882_v10  ;;  %v13900_v10 = vld [vmem:[#allocation15 + $0x10c] ss:$16 sps:$4 sm:$0xff]   ;;  %v13906_v18 = vld [vmem:[#allocation15 + $0x108] ss:$16 sps:$4 sm:$0xff]  }
 0xb61   :  { %6961 = vmatprep.subr.bf16.mxu0 %v13885_v42  ;;  %7002 = vmatprep.subr.bf16.mxu1 %v13888_v9  ;;  %v13903_v9 = vld [vmem:[#allocation15 + $0x100] ss:$16 sps:$4 sm:$0xff]  }
 0xb64   :  { %6962 = vmatpush2.bf16.msra.mxu0 %v13891_v22  ;;  %7003 = vmatpush2.bf16.msra.mxu1 %v13894_v38 }
 0xb65   :  { %v9014_v33 = vpop.eup %9013  ;;  %6963 = vmatprep.subr.bf16.mxu0 %v13897_v28  ;;  %7004 = vmatprep.subr.bf16.mxu1 %v13900_v10 }
 0xb66   :  { %v6824_v42 = vmul.f32 %v9014_v33, %v9012_v51  ;;  %v15690_v33 = vld [vmem:[#allocation49_spill] sm:$0xff]  ;;  %v15692_v51 = vmov 0.0  }
 0xb68   :  { %6964 = vmatpush2.bf16.msra.mxu0 %v13903_v9  ;;  %7005 = vmatpush2.bf16.msra.mxu1 %v13906_v18  ;;  %v6825_v22 = vpack.c.bf16 %v6824_v42, %v6824_v42  ;;  %v15687_v42 = vld [vmem:[#allocation46_spill] sm:$0xff] }
 0xb69   :  { %7040 = vmatprep.subr.bf16.mxu0 %v13692_v62  ;;  %7081 = vmatprep.subr.bf16.mxu1 %v13695_v4  ;;  %v15688_v62 = vld [vmem:[#allocation47_spill] sm:$0xff]  ;;  %v15689_v4 = vld [vmem:[#allocation48_spill] sm:$0xff] }
 0xb6a   :  { %6965 = vmatprep.mubr.bf16.mxu0 %v6825_v22  ;;  %7006 = vmatprep.mubr.bf16.mxu1 %v6825_v22  ;;  %v15691_v22 = vld [vmem:[#allocation50_spill] sm:$0xff] }
 0xb6b   :  { %6966 = vmatmul.mubr.bf16.vlgmr.msra.gmra.mxu0 %v13711_v8  ;;  %7007 = vmatmul.mubr.bf16.vlgmr.msra.gmra.mxu1 %v13711_v8 }
 0xb6c   :  { %7041 = vmatpush1.bf16.msra.mxu0 %v13715_v12  ;;  %7082 = vmatpush1.bf16.msra.mxu1 %v13718_v61  ;;  %v15693_v61 = vld [vmem:[#allocation143_spill] sm:$0xff] }
 0xb6d   :  { %7042 = vmatprep.subr.bf16.mxu0 %v13721_v13  ;;  %7083 = vmatprep.subr.bf16.mxu1 %v13724_v53 }
 0xb70   :  { %7043 = vmatpush1.bf16.msra.mxu0 %v13728_v37  ;;  %7084 = vmatpush1.bf16.msra.mxu1 %v13731_v14 }
 0xb71   :  { %7044 = vmatprep.subr.bf16.mxu0 %v13734_v30  ;;  %7085 = vmatprep.subr.bf16.mxu1 %v13737_v41  ;;  %v15694_v30 = vld [vmem:[#allocation144_spill] sm:$0xff] }
 0xb74   :  { %7045 = vmatpush1.bf16.msra.mxu0 %v13741_v52  ;;  %7086 = vmatpush1.bf16.msra.mxu1 %v13744_v15 }
 0xb75   :  { %7046 = vmatprep.subr.bf16.mxu0 %v13747_v46  ;;  %7087 = vmatprep.subr.bf16.mxu1 %v13750_v25  ;;  %v15696_v25 = vld [vmem:[#allocation26_spill] sm:$0xff] }
 0xb78   :  { %7047 = vmatpush1.bf16.msra.mxu0 %v13753_v43  ;;  %7088 = vmatpush1.bf16.msra.mxu1 %v13756_v7 }
 0xb79   :  { %7048 = vmatprep.subr.bf16.mxu0 %v13759_v3  ;;  %7089 = vmatprep.subr.bf16.mxu1 %v13762_v48 }
 0xb7c   :  { %7049 = vmatpush1.bf16.msra.mxu0 %v13766_v6  ;;  %7090 = vmatpush1.bf16.msra.mxu1 %v13769_v63 }
 0xb7d   :  { %7050 = vmatprep.subr.bf16.mxu0 %v13772_v45  ;;  %7091 = vmatprep.subr.bf16.mxu1 %v13775_v24 }
 0xb80   :  { %7051 = vmatpush1.bf16.msra.mxu0 %v13778_v23  ;;  %7092 = vmatpush1.bf16.msra.mxu1 %v13781_v57 }
 0xb81   :  { %7052 = vmatprep.subr.bf16.mxu0 %v13785_v36  ;;  %7093 = vmatprep.subr.bf16.mxu1 %v13788_v19  ;;  %v15697_v19 = vld [vmem:[#allocation44_spill] sm:$0xff] }
 0xb84   :  { %7053 = vmatpush1.bf16.msra.mxu0 %v13791_v17  ;;  %7094 = vmatpush1.bf16.msra.mxu1 %v13794_v44 }
 0xb85   :  { %7054 = vmatprep.subr.bf16.mxu0 %v13797_v16  ;;  %7095 = vmatprep.subr.bf16.mxu1 %v13800_v21 }
 0xb88   :  { %7055 = vmatpush1.bf16.msra.mxu0 %v13803_v55  ;;  %7096 = vmatpush1.bf16.msra.mxu1 %v13806_v49 }
 0xb89   :  { %7056 = vmatprep.subr.bf16.mxu0 %v13809_v20  ;;  %7097 = vmatprep.subr.bf16.mxu1 %v13812_v34  ;;  %v15698_v34 = vld [vmem:[#allocation140_spill] sm:$0xff] }
 0xb8c   :  { %7057 = vmatpush2.bf16.msra.mxu0 %v13815_v58  ;;  %7098 = vmatpush2.bf16.msra.mxu1 %v13818_v60 }
 0xb8d   :  { %7058 = vmatprep.subr.bf16.mxu0 %v13821_v31  ;;  %7099 = vmatprep.subr.bf16.mxu1 %v13824_v47 }
 0xb90   :  { %7059 = vmatpush2.bf16.msra.mxu0 %v13827_v56  ;;  %7100 = vmatpush2.bf16.msra.mxu1 %v13830_v5  ;;  %v15699_v56 = vld [vmem:[#allocation146_spill] sm:$0xff] }
 0xb91   :  { %7060 = vmatprep.subr.bf16.mxu0 %v13833_v32  ;;  %7101 = vmatprep.subr.bf16.mxu1 %v13836_v59 }
 0xb94   :  { %7061 = vmatpush2.bf16.msra.mxu0 %v13840_v11  ;;  %7102 = vmatpush2.bf16.msra.mxu1 %v13843_v1 }
 0xb95   :  { %7062 = vmatprep.subr.bf16.mxu0 %v13846_v2  ;;  %7103 = vmatprep.subr.bf16.mxu1 %v13849_v50  ;;  %v15700_v50 = vld [vmem:[#allocation150_spill] sm:$0xff] }
 0xb98   :  { %7063 = vmatpush2.bf16.msra.mxu0 %v13854_v0  ;;  %7104 = vmatpush2.bf16.msra.mxu1 %v13857_v26 }
 0xb99   :  { %7064 = vmatprep.subr.bf16.mxu0 %v13861_v40  ;;  %7105 = vmatprep.subr.bf16.mxu1 %v13864_v39  ;;  %v15701_v40 = vld [vmem:[#allocation151_spill] sm:$0xff] }
 0xb9c   :  { %7065 = vmatpush2.bf16.msra.mxu0 %v13867_v35  ;;  %7106 = vmatpush2.bf16.msra.mxu1 %v13870_v27 }
 0xb9d   :  { %7066 = vmatprep.subr.bf16.mxu0 %v13873_v54  ;;  %7107 = vmatprep.subr.bf16.mxu1 %v13876_v29 }
 0xba0   :  { %7067 = vmatpush2.bf16.msra.mxu0 %v15687_v42  ;;  %7108 = vmatpush2.bf16.msra.mxu1 %v15688_v62 }
 0xba1   :  { %7068 = vmatprep.subr.bf16.mxu0 %v15689_v4  ;;  %7109 = vmatprep.subr.bf16.mxu1 %v15690_v33 }
 0xba4   :  { %7069 = vmatpush2.bf16.msra.mxu0 %v15691_v22  ;;  %7110 = vmatpush2.bf16.msra.mxu1 %v13894_v38 }
 0xba5   :  { %7070 = vmatprep.subr.bf16.mxu0 %v13897_v28  ;;  %7111 = vmatprep.subr.bf16.mxu1 %v13900_v10 }
 0xba8   :  { %7071 = vmatpush2.bf16.msra.mxu0 %v13903_v9  ;;  %7112 = vmatpush2.bf16.msra.mxu1 %v13906_v18  ;;  %v15695_v9 = vld [vmem:[#allocation145_spill] sm:$0xff] }
 0xba9   :  { %7842 = vmatprep.subr.mxu0 %v15692_v51 }
 0xbeb   :  { %v6860_v8 = vpop.f32.mrf.mxu0  ;;  %v6901_v12 = vpop.f32.mrf.mxu1 }
 0xbec   :  { %v6861_v13 = vadd.f32 %v6860_v8, %v15693_v61  ;;  %v6902_v18 = vadd.f32 %v6901_v12, %v15695_v9  ;;  %v15702_v8 = vld [vmem:[#allocation45_spill] sm:$0xff]  ;;  %v7156_v9 = vld [vmem:[#allocation16 + $0x50] sm:$0xff] }
 0xbed   :  { %v6862_v53 = vpop.f32.mrf.mxu0  ;;  %v6903_v37 = vpop.f32.mrf.mxu1 }
 0xbee   :  { %v7816_v14 = vmul.f32 -1.442695, %v6861_v13  ;;  %v6863_v41 = vadd.f32 %v6862_v53, %v15694_v30  ;;  %v7818_v46 = vmul.f32 -1.442695, %v6902_v18  ;;  %v6904_v43 = vadd.f32 %v6903_v37, %v15696_v25  ;;  %v7155_v18 = vld [vmem:[#allocation16 + $0x48] sm:$0xff]  ;;  %v7153_v25 = vld [vmem:[#allocation16 + $0x38] sm:$0xff] }
 0xbef   :  { %v6864_v38 = vpop.f32.mrf.mxu0  ;;  %v6905_v52 = vpop.f32.mrf.mxu1 }
 0xbf0   :  { %9015 = vpow2.f32 %v7816_v14  ;;  %v7817_v28 = vmul.f32 -1.442695, %v6863_v41  ;;  %v7161_v38 = vld [vmem:[#allocation16 + $0x78] sm:$0xff]  ;;  %v7160_v52 = vld [vmem:[#allocation16 + $0x70] sm:$0xff] }
 0xbf1   :  { %v6865_v10 = vpop.f32.mrf.mxu0  ;;  %v6906_v15 = vpop.f32.mrf.mxu1 }
 0xbf2   :  { %9017 = vpow2.f32 %v7817_v28  ;;  %v7159_v28 = vld [vmem:[#allocation16 + $0x68] sm:$0xff]  ;;  %v7158_v10 = vld [vmem:[#allocation16 + $0x60] sm:$0xff]  ;;  %v7157_v15 = vld [vmem:[#allocation16 + $0x58] sm:$0xff] }
 0xbf3   :  { %9019 = vpow2.f32 %v7818_v46  ;;  %v7154_v46 = vld [vmem:[#allocation16 + $0x40] sm:$0xff] }
 0xbf4   :  { %9021 = vtanh.f32 %v6904_v43  ;;  %v7152_v43 = vld [vmem:[#allocation16 + $0x30] sm:$0xff] }
 0xbfd   :  { %v9016_v7 = vpop.eup %9015 }
 0xbfe   :  { %v6917_v3 = vadd.f32 1.0, %v9016_v7  ;;  %v7151_v7 = vld [vmem:[#allocation16 + $0x28] sm:$0xff] }
 0xbff   :  { %v9018_v48 = vpop.eup %9017 }
 0xc00   :  { %9023 = vrcp.f32 %v6917_v3  ;;  %v6918_v6 = vadd.f32 1.0, %v9018_v48  ;;  %v9020_v63 = vpop.eup %9019  ;;  %v7150_v3 = vld [vmem:[#allocation16 + $0x20] sm:$0xff]  ;;  %v7149_v48 = vld [vmem:[#allocation16 + $0x18] sm:$0xff] }
 0xc01   :  { %v9022_v45 = vpop.eup %9021  ;;  %v6919_v36 = vadd.f32 1.0, %v9020_v63  ;;  %v7147_v63 = vld [vmem:[#allocation16 + $0x8] sm:$0xff] }
 0xc02   :  { %9025 = vrcp.f32 %v6918_v6  ;;  %v7148_v6 = vld [vmem:[#allocation16 + $0x10] sm:$0xff] }
 0xc03   :  { %9027 = vrcp.f32 %v6919_v36 }
 0xc0d   :  { %v9024_v24 = vpop.eup %9023 }
 0xc0e   :  { %v6928_v23 = vmul.f32 %v9024_v24, %v9022_v45  ;;  %v7146_v45 = vld [vmem:[#allocation16] sm:$0xff] }
 0xc0f   :  { %v9026_v57 = vpop.eup %9025 }
 0xc10   :  { %v6927_v17 = vmul.f32 %v9026_v57, %v15697_v19  ;;  %v9028_v16 = vpop.eup %9027 }
 0xc12   :  { %v6929_v44 = vadd.f32 %v6928_v23, %v6927_v17 }
 0xc14   :  { %9029 = vtanh.f32 %v6929_v44 }
 0xc21   :  { %v9030_v21 = vpop.eup %9029 }
 0xc22   :  { %v6931_v55 = vmul.f32 %v9030_v21, %v9028_v16 }
 0xc24   :  { %v6932_v41 = vpack.c.bf16 %v6931_v55, %v6931_v55 }
 0xc2b   :  { %v6967_v49 = vpop.f32.mrf.mxu0  ;;  %v7008_v20 = vpop.f32.mrf.mxu1 }
 0xc2c   :  { %v6968_v58 = vadd.f32 %v6967_v49, %v15698_v34  ;;  %v7009_v29 = vadd.f32 %v7008_v20, %v15700_v50 }
 0xc2d   :  { %v6969_v60 = vpop.f32.mrf.mxu0  ;;  %v7010_v31 = vpop.f32.mrf.mxu1 }
 0xc2e   :  { %v7819_v47 = vmul.f32 -1.442695, %v6968_v58  ;;  %v6970_v5 = vadd.f32 %v6969_v60, %v15699_v56  ;;  %v7821_v0 = vmul.f32 -1.442695, %v7009_v29  ;;  %v7011_v39 = vadd.f32 %v7010_v31, %v15701_v40 }
 0xc2f   :  { %v6971_v32 = vpop.f32.mrf.mxu0  ;;  %v7012_v59 = vpop.f32.mrf.mxu1 }
 0xc30   :  { %9031 = vpow2.f32 %v7819_v47  ;;  %v7820_v11 = vmul.f32 -1.442695, %v6970_v5 }
 0xc31   :  { %v6972_v1 = vpop.f32.mrf.mxu0  ;;  %v7013_v2 = vpop.f32.mrf.mxu1 }
 0xc32   :  { %9033 = vpow2.f32 %v7820_v11 }
 0xc33   :  { %9035 = vpow2.f32 %v7821_v0 }
 0xc3d   :  { %v9032_v26 = vpop.eup %9031 }
 0xc3e   :  { %v7024_v35 = vadd.f32 1.0, %v9032_v26 }
 0xc3f   :  { %v9034_v27 = vpop.eup %9033 }
 0xc40   :  { %9037 = vrcp.f32 %v7024_v35  ;;  %v7025_v54 = vadd.f32 1.0, %v9034_v27  ;;  %v9036_v42 = vpop.eup %9035 }
 0xc41   :  { %9039 = vtanh.f32 %v7011_v39  ;;  %v7026_v22 = vadd.f32 1.0, %v9036_v42  ;;  %v7162_v39 = vld [vmem:[#allocation18] sm:$0x1] }
 0xc42   :  { %9041 = vrcp.f32 %v7025_v54 }
 0xc43   :  { %9043 = vrcp.f32 %v7026_v22 }
 0xc4d   :  { %v9038_v62 = vpop.eup %9037 }
 0xc4e   :  { %v9040_v4 = vpop.eup %9039 }
 0xc4f   :  { %v9042_v33 = vpop.eup %9041  ;;  %v7035_v61 = vmul.f32 %v9040_v4, %v9038_v62 }
 0xc50   :  { %v7034_v12 = vmul.f32 %v9042_v33, %v15702_v8  ;;  %v9044_v53 = vpop.eup %9043 }
 0xc52   :  { %v13986_v13 = vadd.f32 %v7035_v61, %v7034_v12 }
 0xc54   :  { %9045 = vtanh.f32 %v13986_v13 }
 0xc61   :  { %v9046_v37 = vpop.eup %9045 }
 0xc62   :  { %v7038_v14 = vmul.f32 %v9046_v37, %v9044_v53 }
 0xc64   :  { %v7039_v30 = vpack.c.bf16 %v7038_v14, %v7038_v14 }
 0xc66   :  { %7072 = vmatprep.mubr.bf16.mxu0 %v7039_v30  ;;  %7113 = vmatprep.mubr.bf16.mxu1 %v7039_v30 }
 0xc67   :  { %7073 = vmatmul.mubr.bf16.vlgmr.msra.gmra.mxu0 %v6932_v41  ;;  %7114 = vmatmul.mubr.bf16.vlgmr.msra.gmra.mxu1 %v6932_v41 }
 0xc68   :  { %7843 = vmatpush3.msra.mxu0 %v7161_v38  ;;  %7874 = vmatprep.mubr.msk.f32.mxu0 %vm9967_vm1, %v15692_v51 }
 0xc69   :  { %7844 = vmatprep.subr.mxu0 %v15692_v51 }
 0xc6a   :  { %7845 = vmatpush3.msra.mxu0 %v7160_v52 }
 0xc6b   :  { %7846 = vmatprep.subr.mxu0 %v15692_v51 }
 0xc6c   :  { %7847 = vmatpush3.msra.mxu0 %v7159_v28 }
 0xc6d   :  { %7848 = vmatprep.subr.mxu0 %v15692_v51 }
 0xc6e   :  { %7849 = vmatpush3.msra.mxu0 %v7158_v10 }
 0xc6f   :  { %7850 = vmatprep.subr.mxu0 %v15692_v51 }
 0xc70   :  { %7851 = vmatpush3.msra.mxu0 %v7157_v15 }
 0xc71   :  { %7852 = vmatprep.subr.mxu0 %v15692_v51 }
 0xc72   :  { %7853 = vmatpush3.msra.mxu0 %v7156_v9 }
 0xc73   :  { %7854 = vmatprep.subr.mxu0 %v15692_v51 }
 0xc74   :  { %7855 = vmatpush3.msra.mxu0 %v7155_v18 }
 0xc75   :  { %7856 = vmatprep.subr.mxu0 %v15692_v51 }
 0xc76   :  { %7857 = vmatpush3.msra.mxu0 %v7154_v46 }
 0xc77   :  { %7858 = vmatprep.subr.mxu0 %v15692_v51 }
 0xc78   :  { %7859 = vmatpush3.msra.mxu0 %v7153_v25 }
 0xc79   :  { %7860 = vmatprep.subr.mxu0 %v15692_v51 }
 0xc7a   :  { %7861 = vmatpush3.msra.mxu0 %v7152_v43 }
 0xc7b   :  { %7862 = vmatprep.subr.mxu0 %v15692_v51 }
 0xc7c   :  { %7863 = vmatpush3.msra.mxu0 %v7151_v7 }
 0xc7d   :  { %7864 = vmatprep.subr.mxu0 %v15692_v51 }
 0xc7e   :  { %7865 = vmatpush3.msra.mxu0 %v7150_v3 }
 0xc7f   :  { %7866 = vmatprep.subr.mxu0 %v15692_v51 }
 0xc80   :  { %7867 = vmatpush3.msra.mxu0 %v7149_v48 }
 0xc81   :  { %7868 = vmatprep.subr.mxu0 %v15692_v51 }
 0xc82   :  { %7869 = vmatpush3.msra.mxu0 %v7148_v6 }
 0xc83   :  { %7870 = vmatprep.subr.mxu0 %v15692_v51 }
 0xc84   :  { %7871 = vmatpush3.msra.mxu0 %v7147_v63 }
 0xc85   :  { %7872 = vmatprep.subr.mxu0 %v15692_v51 }
 0xc86   :  { %7873 = vmatpush3.msra.mxu0 %v7146_v45 }
 0xd27   :  { %v7074_v24 = vpop.f32.mrf.mxu0  ;;  %v7115_v23 = vpop.f32.mrf.mxu1 }
 0xd28   :  { %v7075_v57 = vadd.f32 %v7074_v24, %v15698_v34  ;;  %v7116_v58 = vadd.f32 %v7115_v23, %v15700_v50 }
 0xd29   :  { %v7076_v36 = vpop.f32.mrf.mxu0  ;;  %v7117_v19 = vpop.f32.mrf.mxu1 }
 0xd2a   :  { %v7822_v17 = vmul.f32 -1.442695, %v7075_v57  ;;  %v7077_v44 = vadd.f32 %v7076_v36, %v15699_v56  ;;  %v7824_v51 = vmul.f32 -1.442695, %v7116_v58  ;;  %v7118_v31 = vadd.f32 %v7117_v19, %v15701_v40 }
 0xd2b   :  { %v7078_v16 = vpop.f32.mrf.mxu0  ;;  %v7119_v21 = vpop.f32.mrf.mxu1 }
 0xd2c   :  { %9047 = vpow2.f32 %v7822_v17  ;;  %v7823_v55 = vmul.f32 -1.442695, %v7077_v44 }
 0xd2d   :  { %v7079_v49 = vpop.f32.mrf.mxu0  ;;  %v7120_v20 = vpop.f32.mrf.mxu1 }
 0xd2e   :  { %9049 = vpow2.f32 %v7823_v55 }
 0xd2f   :  { %9051 = vpow2.f32 %v7824_v51 }
 0xd39   :  { %v9048_v60 = vpop.eup %9047 }
 0xd3a   :  { %v7131_v47 = vadd.f32 1.0, %v9048_v60 }
 0xd3b   :  { %v9050_v34 = vpop.eup %9049 }
 0xd3c   :  { %9053 = vrcp.f32 %v7131_v47  ;;  %v7132_v5 = vadd.f32 1.0, %v9050_v34  ;;  %v9052_v56 = vpop.eup %9051 }
 0xd3d   :  { %9055 = vtanh.f32 %v7118_v31  ;;  %v7133_v1 = vadd.f32 1.0, %v9052_v56 }
 0xd3e   :  { %9057 = vrcp.f32 %v7132_v5 }
 0xd3f   :  { %9059 = vrcp.f32 %v7133_v1 }
 0xd49   :  { %v9054_v32 = vpop.eup %9053 }
 0xd4a   :  { %v9056_v59 = vpop.eup %9055 }
 0xd4b   :  { %v9058_v11 = vpop.eup %9057  ;;  %v7142_v29 = vmul.f32 %v9056_v59, %v9054_v32 }
 0xd4c   :  { %v7141_v2 = vmul.f32 %v9058_v11, %v13986_v13  ;;  %v9060_v0 = vpop.eup %9059 }
 0xd4e   :  { %v7143_v50 = vadd.f32 %v7142_v29, %v7141_v2 }
 0xd50   :  { %9061 = vtanh.f32 %v7143_v50 }
 0xd5d   :  { %v9062_v26 = vpop.eup %9061 }
 0xd5e   :  { %v7145_v40 = vmul.f32 %v9062_v26, %v9060_v0 }
 0xd60   :  { %7875 = vmatmul.mubr.f32.vlgmr.msra.gmra.mxu0 %v7145_v40 }
 0xe20   :  { %v7229_v35 = vpop.f32.mrf.mxu0 }
 0xe21   :  { %v7230_v27 = vadd.f32 %v7229_v35, %v7162_v39 }
 0xe22   :  { %v7876_v54 = vpop.f32.mrf.mxu0 }
 0xe23   :  { %v7234_v42 = vsel %vm7233_vm2, %v7230_v27, -inf }
 0xe24   :  { %7235 = vmax.xlane.f32.xlu0 %v7234_v42 }
 0xead   :  { %v7236_v62 = vpop.xlane.xlu0 %7235 }
 0xeae   :  { %v7237_v4 = vsub.f32 %v7230_v27, %v7236_v62 }
 0xeb0   :  { %v7238_v33 = vmul.f32 1.442695, %v7237_v4 }
 0xeb2   :  { %9063 = vpow2.f32 %v7238_v33 }
 0xebf   :  { %v9064_v22 = vpop.eup %9063 }
 0xec0   :  { %v7240_v8 = vsel %vm7233_vm2, %v9064_v22, 0.0 }
 0xec1   :  { %7241 = vadd.xlane.f32.xlu0 %v7240_v8 }
 0xf4a   :  { %v7242_v12 = vpop.xlane.xlu0 %7241 }
 0xf4b   :  { %9065 = vrcp.f32 %v7242_v12 }
 0xf58   :  { %v9066_v61 = vpop.eup %9065 }
 0xf59   :  { %v7244_v13 = vmul.f32 %v9066_v61, %v9064_v22 }
 0xf5b   :  { %7245 = vst [vmem:[#allocation19] sm:$0x1] %v7244_v13 }
 0xf5c   :  { %9930 = shalt.err (!%p9927_p7)
}
 0xf5d   :  { %7255 = dma.vmem_to_hbm [thread:$0]  %s7253_s6, 16, %s14025_s12, [#allocation6]  }
 0xf5e   :  { %9949 = dma.done.wait [#allocation6], 16  }
 0xf5f   :  { %9950 = vsyncadd [#allocation6], 4294967280 }
 0xf60   :  { %7259 = vsyncpa [#allocation5], 1 }
 0xf61   :  { %7260 = vsyncpa [#allocation8], 1 }
 0xf62   :  { %7261 = vsyncpa [#allocation11], 1 }
 0xf63   :  { %7262 = vsyncpa [#allocation14], 1 }
 0xf64   :  { %7263 = vsyncpa [#allocation17], 1 }
 0xf65   :  { %7264 = vsyncpa [#allocation6], 1 }

</bundles_post_ra>
